<compile_context>
chip_gen: v7x
topology: tpu7x:2x2x1
jax: 0.10.0
libtpu: 0.0.40
codegen_flags: <defaults>
</compile_context>

<pallas_src>
import functools

import jax
import jax.numpy as jnp
from jax.experimental import pallas as pl
from jax.experimental.pallas import tpu as pltpu

EPS = 1e-5
CFG = [(64, 3, 1), (128, 4, 2), (256, 6, 2), (512, 3, 2)]  # (channels, blocks, first stride)


def _ru(x, m):
    return (x + m - 1) // m * m


def _tile(dim, tile, align):
    """Return (padded_dim, tile_size) with padded_dim % tile_size == 0."""
    p = _ru(dim, align)
    if p <= tile:
        return p, p
    return _ru(dim, tile), tile


# ----------------------------- Pallas kernels -----------------------------

def _matmul_affine_kernel(a_ref, b_ref, scale_ref, shift_ref, *rest, relu, has_res):
    if has_res:
        res_ref, o_ref, acc_ref = rest
    else:
        o_ref, acc_ref = rest
    k = pl.program_id(2)

    @pl.when(k == 0)
    def _():
        acc_ref[...] = jnp.zeros_like(acc_ref)

    acc_ref[...] += jnp.dot(a_ref[...], b_ref[...], preferred_element_type=jnp.float32)

    @pl.when(k == pl.num_programs(2) - 1)
    def _():
        out = acc_ref[...] * scale_ref[...] + shift_ref[...]
        if has_res:
            out = out + res_ref[...]
        if relu:
            out = jnp.maximum(out, 0.0)
        o_ref[...] = out


def matmul_affine(a, b, scale, shift, relu, residual=None):
    """maybe_relu((a @ b) * scale + shift [+ residual]); scale/shift per output column.

    a: (M, K) f32, b: (K, N) f32 -- cast to bf16 for the MXU, f32 accumulation.
    residual: optional (M, N) f32 added in the epilogue (fused residual branch).
    """
    M, K = a.shape
    _, N = b.shape
    Mp, tm = _tile(M, 256, 8)
    Kp, tk = _tile(K, 256, 128)
    Np, tn = _tile(N, 256, 128)

    a_p = jnp.pad(a, ((0, Mp - M), (0, Kp - K))).astype(jnp.bfloat16)
    b_p = jnp.pad(b, ((0, Kp - K), (0, Np - N))).astype(jnp.bfloat16)
    s_p = jnp.pad(scale.reshape(1, N), ((0, 0), (0, Np - N))).astype(jnp.float32)
    t_p = jnp.pad(shift.reshape(1, N), ((0, 0), (0, Np - N))).astype(jnp.float32)

    in_specs = [
        pl.BlockSpec((tm, tk), lambda i, j, k: (i, k)),
        pl.BlockSpec((tk, tn), lambda i, j, k: (k, j)),
        pl.BlockSpec((1, tn), lambda i, j, k: (0, j)),
        pl.BlockSpec((1, tn), lambda i, j, k: (0, j)),
    ]
    inputs = [a_p, b_p, s_p, t_p]
    has_res = residual is not None
    if has_res:
        r_p = jnp.pad(residual.astype(jnp.float32), ((0, Mp - M), (0, Np - N)))
        in_specs.append(pl.BlockSpec((tm, tn), lambda i, j, k: (i, j)))
        inputs.append(r_p)

    grid = (Mp // tm, Np // tn, Kp // tk)  # reduction axis last
    out = pl.pallas_call(
        functools.partial(_matmul_affine_kernel, relu=relu, has_res=has_res),
        out_shape=jax.ShapeDtypeStruct((Mp, Np), jnp.float32),
        grid_spec=pltpu.PrefetchScalarGridSpec(
            num_scalar_prefetch=0,
            grid=grid,
            in_specs=in_specs,
            out_specs=pl.BlockSpec((tm, tn), lambda i, j, k: (i, j)),
            scratch_shapes=[pltpu.VMEM((tm, tn), jnp.float32)],
        ),
        compiler_params=pltpu.CompilerParams(
            dimension_semantics=("parallel", "parallel", "arbitrary"),
        ),
    )(*inputs)
    return out[:M, :N]


def _max_reduce_kernel(x_ref, o_ref):
    o_ref[...] = jnp.max(x_ref[...], axis=0)


def _max_reduce(stacked):  # (9, R, 128) -> (R, 128), lane-dense, row-tiled
    _, R, _ = stacked.shape
    Rp, tr = _tile(R, 512, 8)
    if Rp != R:
        stacked = jnp.pad(stacked, ((0, 0), (0, Rp - R), (0, 0)),
                          constant_values=-jnp.inf)
    out = pl.pallas_call(
        _max_reduce_kernel,
        out_shape=jax.ShapeDtypeStruct((Rp, 128), jnp.float32),
        grid=(Rp // tr,),
        in_specs=[pl.BlockSpec((9, tr, 128), lambda i: (0, i, 0))],
        out_specs=pl.BlockSpec((tr, 128), lambda i: (i, 0)),
        compiler_params=pltpu.CompilerParams(dimension_semantics=("parallel",)),
    )(stacked)
    return out[:R]


def _gap_kernel(x_ref, o_ref):
    o_ref[...] = jnp.mean(x_ref[...], axis=1)


def global_avg_pool(x_nhwc):  # adaptive_avg_pool2d(x, 1).reshape(bs, -1)
    B, H, W, C = x_nhwc.shape
    x3 = x_nhwc.reshape(B, H * W, C)
    return pl.pallas_call(
        _gap_kernel,
        out_shape=jax.ShapeDtypeStruct((B, C), jnp.float32),
        grid=(1,),
        in_specs=[pl.BlockSpec((B, H * W, C), lambda i: (0, 0, 0))],
        out_specs=pl.BlockSpec((B, C), lambda i: (0, 0)),
    )(x3)


# ----------------------------- JAX glue (im2col / pooling windows) -----------------------------

def _im2col(x, kh, kw, stride, pad):
    B, H, W, C = x.shape
    xp = jnp.pad(x, ((0, 0), (pad, pad), (pad, pad), (0, 0)))
    Ho = (H + 2 * pad - kh) // stride + 1
    Wo = (W + 2 * pad - kw) // stride + 1
    cols = []
    for dy in range(kh):
        for dx in range(kw):
            cols.append(xp[:, dy:dy + stride * Ho:stride, dx:dx + stride * Wo:stride, :])
    a = jnp.concatenate(cols, axis=-1)  # (B, Ho, Wo, kh*kw*C), order (dy, dx, cin)
    return a.reshape(B * Ho * Wo, kh * kw * C), Ho, Wo


def conv_bn(x, w, scale, shift, stride, pad, relu, residual=None):
    # w: (Cout, Cin, kh, kw) -- PyTorch conv weight layout.
    Cout, Cin, kh, kw = w.shape
    B = x.shape[0]
    a, Ho, Wo = _im2col(x, kh, kw, stride, pad)
    wm = jnp.transpose(w, (2, 3, 1, 0)).reshape(kh * kw * Cin, Cout)  # match im2col ordering
    res2d = None
    if residual is not None:
        res2d = residual.reshape(B * Ho * Wo, Cout)
    out = matmul_affine(a, wm, scale, shift, relu, residual=res2d)
    return out.reshape(B, Ho, Wo, Cout)


def maxpool_3x3_s2_p1(x):
    B, H, W, C = x.shape
    xp = jnp.pad(x, ((0, 0), (1, 1), (1, 1), (0, 0)), constant_values=-jnp.inf)
    Ho = (H + 2 - 3) // 2 + 1
    Wo = (W + 2 - 3) // 2 + 1
    wins = [xp[:, dy:dy + 2 * Ho:2, dx:dx + 2 * Wo:2, :]
            for dy in range(3) for dx in range(3)]
    # Lane-densify: flatten to 128-wide rows so the store path is unmasked.
    T = B * Ho * Wo * C
    Tp = _ru(T, 8 * 128)
    stacked = jnp.stack(wins, axis=0).reshape(9, T)
    stacked = jnp.pad(stacked, ((0, 0), (0, Tp - T)), constant_values=-jnp.inf)
    out = _max_reduce(stacked.reshape(9, Tp // 128, 128))
    return out.reshape(-1)[:T].reshape(B, Ho, Wo, C)


# ----------------------------- parameters (deterministic, synthetic) -----------------------------

def _fold_bn(gamma, beta, mean, var):
    scale = gamma / jnp.sqrt(var + EPS)
    shift = beta - mean * scale
    return scale, shift


def _init_conv(key, cout, cin, kh, kw):
    fan = cin * kh * kw
    return jax.random.normal(key, (cout, cin, kh, kw), jnp.float32) * jnp.sqrt(2.0 / fan)


def _init_bn(key, c):
    k1, k2, k3, k4 = jax.random.split(key, 4)
    gamma = 1.0 + 0.1 * jax.random.normal(k1, (c,), jnp.float32)
    beta = 0.1 * jax.random.normal(k2, (c,), jnp.float32)
    mean = 0.1 * jax.random.normal(k3, (c,), jnp.float32)
    var = 1.0 + 0.5 * jax.random.uniform(k4, (c,), jnp.float32)
    return _fold_bn(gamma, beta, mean, var)


def make_resnet34_params(key):
    params = {}
    key, k = jax.random.split(key)
    params["conv1_w"] = _init_conv(k, 64, 3, 7, 7)
    key, k = jax.random.split(key)
    params["bn1"] = _init_bn(k, 64)

    stages = []
    in_c = 64
    for (out_c, n_blocks, first_stride) in CFG:
        blocks = []
        for b in range(n_blocks):
            stride = first_stride if b == 0 else 1
            blk = {}
            key, k = jax.random.split(key)
            blk["conv1_w"] = _init_conv(k, out_c, in_c, 3, 3)
            key, k = jax.random.split(key)
            blk["bn1"] = _init_bn(k, out_c)
            key, k = jax.random.split(key)
            blk["conv2_w"] = _init_conv(k, out_c, out_c, 3, 3)
            key, k = jax.random.split(key)
            blk["bn2"] = _init_bn(k, out_c)
            if stride != 1 or in_c != out_c:
                key, k = jax.random.split(key)
                blk["down_w"] = _init_conv(k, out_c, in_c, 1, 1)
                key, k = jax.random.split(key)
                blk["down_bn"] = _init_bn(k, out_c)
            blocks.append(blk)
            in_c = out_c
        stages.append(blocks)
    params["stages"] = stages

    heads = {}
    for name, n_out in [("l0", 168), ("l1", 11), ("l2", 7)]:
        key, kw_, kb_ = jax.random.split(key, 3)
        bound = 1.0 / jnp.sqrt(512.0)
        heads[name + "_w"] = jax.random.uniform(kw_, (n_out, 512), jnp.float32, -bound, bound)
        heads[name + "_b"] = jax.random.uniform(kb_, (n_out,), jnp.float32, -bound, bound)
    params["heads"] = heads
    return params


# ----------------------------- forward -----------------------------

def basic_block(x, blk, stride):
    identity = x
    out = conv_bn(x, blk["conv1_w"], *blk["bn1"], stride=stride, pad=1, relu=True)
    if "down_w" in blk:
        identity = conv_bn(x, blk["down_w"], *blk["down_bn"], stride=stride, pad=0, relu=False)
    # Second conv: BN + residual add + ReLU fused into the matmul epilogue.
    out = conv_bn(out, blk["conv2_w"], *blk["bn2"], stride=1, pad=1, relu=True,
                  residual=identity)
    return out


def resnet34_forward(params, x_nchw):
    x = jnp.transpose(x_nchw, (0, 2, 3, 1)).astype(jnp.float32)  # NCHW -> NHWC
    # stem: conv7x7/s2 + bn + relu + maxpool3x3/s2
    x = conv_bn(x, params["conv1_w"], *params["bn1"], stride=2, pad=3, relu=True)
    x = maxpool_3x3_s2_p1(x)
    # 4 stages of BasicBlocks
    for s_idx, (out_c, n_blocks, first_stride) in enumerate(CFG):
        for b in range(n_blocks):
            stride = first_stride if b == 0 else 1
            x = basic_block(x, params["stages"][s_idx][b], stride)
    feat = global_avg_pool(x)  # (B, 512)
    # three linear heads merged into one matmul (bias via fused affine epilogue)
    heads = params["heads"]
    w_all = jnp.concatenate([heads["l0_w"], heads["l1_w"], heads["l2_w"]], axis=0)  # (186, 512)
    b_all = jnp.concatenate([heads["l0_b"], heads["l1_b"], heads["l2_b"]], axis=0)  # (186,)
    ones = jnp.ones((w_all.shape[0],), jnp.float32)
    logits = matmul_affine(feat, w_all.T, ones, b_all, relu=False)  # (B, 186)
    l0 = logits[:, :168]
    l1 = logits[:, 168:179]
    l2 = logits[:, 179:186]
    return (l0, l1, l2)


if __name__ == "__main__":
    key = jax.random.PRNGKey(0)
    pkey, xkey = jax.random.split(key)
    params = make_resnet34_params(pkey)
    x = jax.random.normal(xkey, (2, 3, 32, 32), jnp.float32)  # small NCHW input

    fwd = jax.jit(resnet34_forward)
    l0, l1, l2 = fwd(params, x)
    jax.block_until_ready((l0, l1, l2))

    assert l0.shape == (2, 168) and l0.dtype == jnp.float32
    assert l1.shape == (2, 11) and l1.dtype == jnp.float32
    assert l2.shape == (2, 7) and l2.dtype == jnp.float32
    print("KERNEL_OK")
</pallas_src>

<mosaic_0001>
module attributes {stable_mosaic.version = 11 : i64} {
  func.func @_matmul_affine_kernel(%arg0: i32, %arg1: i32, %arg2: i32, %arg3: memref<256x256xbf16, #tpu.memory_space<vmem>>, %arg4: memref<256x128xbf16, #tpu.memory_space<vmem>>, %arg5: memref<1x128xf32, #tpu.memory_space<vmem>>, %arg6: memref<1x128xf32, #tpu.memory_space<vmem>>, %arg7: memref<256x128xf32, #tpu.memory_space<vmem>>, %arg8: memref<256x128xf32, #tpu.memory_space<vmem>>) attributes {dimension_semantics = [#tpu.dimension_semantics<parallel>, #tpu.dimension_semantics<parallel>, #tpu.dimension_semantics<arbitrary>], iteration_bounds = array<i64: 2, 1, 1>, scalar_prefetch = 0 : i64, scratch_operands = 1 : i64, tpu.core_type = #tpu.core_type<tc>, window_params = [{transform_indices = @transform_0, window_bounds = array<i64: 256, 256>}, {transform_indices = @transform_1, window_bounds = array<i64: 256, 128>}, {transform_indices = @transform_2, window_bounds = array<i64: 1, 128>}, {transform_indices = @transform_3, window_bounds = array<i64: 1, 128>}, {transform_indices = @transform_4, window_bounds = array<i64: 256, 128>}]} {
    %c0_i32 = arith.constant 0 : i32
    %0 = arith.cmpi eq, %arg2, %c0_i32 : i32
    %1 = arith.extui %0 : i1 to i32
    %c0_i32_0 = arith.constant 0 : i32
    %2 = arith.cmpi ne, %1, %c0_i32_0 : i32
    scf.if %2 {
      %cst_10 = arith.constant 0.000000e+00 : f32
      %12 = vector.broadcast %cst_10 : f32 to vector<256x128xf32>
      %c0_11 = arith.constant 0 : index
      %c0_12 = arith.constant 0 : index
      %13 = vector.load %arg8[%c0_11, %c0_12] : memref<256x128xf32, #tpu.memory_space<vmem>>, vector<256x128xf32>
      tpu.vector_store %arg8[%c0_11, %c0_12], %12 {strides = array<i32>} : memref<256x128xf32, #tpu.memory_space<vmem>>, vector<256x128xf32>,
    } else {
    }
    %c0 = arith.constant 0 : index
    %c0_1 = arith.constant 0 : index
    %3 = vector.load %arg8[%c0, %c0_1] : memref<256x128xf32, #tpu.memory_space<vmem>>, vector<256x128xf32>
    %c0_2 = arith.constant 0 : index
    %c0_3 = arith.constant 0 : index
    %4 = vector.load %arg3[%c0_2, %c0_3] : memref<256x256xbf16, #tpu.memory_space<vmem>>, vector<256x256xbf16>
    %c0_4 = arith.constant 0 : index
    %c0_5 = arith.constant 0 : index
    %5 = vector.load %arg4[%c0_4, %c0_5] : memref<256x128xbf16, #tpu.memory_space<vmem>>, vector<256x128xbf16>
    %cst = arith.constant dense<0.000000e+00> : vector<256x128xf32>
    %6 = tpu.matmul %4, %5, %cst {dimension_numbers = #tpu.dot_dimension_numbers<[1], [0], [0], [1], [0, 0, 1, 1], [], []>} : vector<256x256xbf16>, vector<256x128xbf16>, vector<256x128xf32> -> vector<256x128xf32>
    %7 = arith.addf %3, %6 : vector<256x128xf32>
    %c0_6 = arith.constant 0 : index
    %c0_7 = arith.constant 0 : index
    %8 = vector.load %arg8[%c0_6, %c0_7] : memref<256x128xf32, #tpu.memory_space<vmem>>, vector<256x128xf32>
    tpu.vector_store %arg8[%c0_6, %c0_7], %7 {strides = array<i32>} : memref<256x128xf32, #tpu.memory_space<vmem>>, vector<256x128xf32>,
    %c0_i32_8 = arith.constant 0 : i32
    %9 = arith.cmpi eq, %arg2, %c0_i32_8 : i32
    %10 = arith.extui %9 : i1 to i32
    %c0_i32_9 = arith.constant 0 : i32
    %11 = arith.cmpi ne, %10, %c0_i32_9 : i32
    scf.if %11 {
      %c0_10 = arith.constant 0 : index
      %c0_11 = arith.constant 0 : index
      %12 = vector.load %arg8[%c0_10, %c0_11] : memref<256x128xf32, #tpu.memory_space<vmem>>, vector<256x128xf32>
      %c0_12 = arith.constant 0 : index
      %c0_13 = arith.constant 0 : index
      %13 = vector.load %arg5[%c0_12, %c0_13] : memref<1x128xf32, #tpu.memory_space<vmem>>, vector<1x128xf32>
      %14 = vector.broadcast %13 : vector<1x128xf32> to vector<256x128xf32>
      %15 = arith.mulf %12, %14 : vector<256x128xf32>
      %c0_14 = arith.constant 0 : index
      %c0_15 = arith.constant 0 : index
      %16 = vector.load %arg6[%c0_14, %c0_15] : memref<1x128xf32, #tpu.memory_space<vmem>>, vector<1x128xf32>
      %17 = vector.broadcast %16 : vector<1x128xf32> to vector<256x128xf32>
      %18 = arith.addf %15, %17 : vector<256x128xf32>
      %cst_16 = arith.constant 0.000000e+00 : f32
      %19 = vector.broadcast %cst_16 : f32 to vector<256x128xf32>
      %20 = arith.maximumf %18, %19 : vector<256x128xf32>
      %c0_17 = arith.constant 0 : index
      %c0_18 = arith.constant 0 : index
      %21 = vector.load %arg7[%c0_17, %c0_18] : memref<256x128xf32, #tpu.memory_space<vmem>>, vector<256x128xf32>
      tpu.vector_store %arg7[%c0_17, %c0_18], %20 {strides = array<i32>} : memref<256x128xf32, #tpu.memory_space<vmem>>, vector<256x128xf32>,
    } else {
    }
    return
  }
  func.func @transform_0(%arg0: i32, %arg1: i32, %arg2: i32) -> (i32, i32) {
    %c0_i32 = arith.constant 0 : i32
    return %arg0, %arg2 : i32, i32
  }
  func.func @transform_1(%arg0: i32, %arg1: i32, %arg2: i32) -> (i32, i32) {
    %c0_i32 = arith.constant 0 : i32
    return %arg2, %arg1 : i32, i32
  }
  func.func @transform_2(%arg0: i32, %arg1: i32, %arg2: i32) -> (i32, i32) {
    %c0_i32 = arith.constant 0 : i32
    %c0_i32_0 = arith.constant 0 : i32
    return %c0_i32, %arg1 : i32, i32
  }
  func.func @transform_3(%arg0: i32, %arg1: i32, %arg2: i32) -> (i32, i32) {
    %c0_i32 = arith.constant 0 : i32
    %c0_i32_0 = arith.constant 0 : i32
    return %c0_i32, %arg1 : i32, i32
  }
  func.func @transform_4(%arg0: i32, %arg1: i32, %arg2: i32) -> (i32, i32) {
    %c0_i32 = arith.constant 0 : i32
    return %arg0, %arg1 : i32, i32
  }
}

module attributes {stable_mosaic.version = 11 : i64} {
  func.func @_max_reduce_kernel(%arg0: i32, %arg1: memref<9x64x128xf32, #tpu.memory_space<vmem>>, %arg2: memref<64x128xf32, #tpu.memory_space<vmem>>) attributes {dimension_semantics = [#tpu.dimension_semantics<parallel>], iteration_bounds = array<i64: 1>, scalar_prefetch = 0 : i64, scratch_operands = 0 : i64, tpu.core_type = #tpu.core_type<tc>, window_params = [{transform_indices = @transform_0, window_bounds = array<i64: 9, 64, 128>}, {transform_indices = @transform_1, window_bounds = array<i64: 64, 128>}]} {
    %c0 = arith.constant 0 : index
    %c0_0 = arith.constant 0 : index
    %c0_1 = arith.constant 0 : index
    %0 = vector.load %arg1[%c0, %c0_0, %c0_1] : memref<9x64x128xf32, #tpu.memory_space<vmem>>, vector<9x64x128xf32>
    %cst = arith.constant dense<0xFF800000> : vector<64x128xf32>
    %1 = vector.multi_reduction <maximumf>, %0, %cst [0] : vector<9x64x128xf32> to vector<64x128xf32>
    %c0_2 = arith.constant 0 : index
    %c0_3 = arith.constant 0 : index
    %2 = vector.load %arg2[%c0_2, %c0_3] : memref<64x128xf32, #tpu.memory_space<vmem>>, vector<64x128xf32>
    tpu.vector_store %arg2[%c0_2, %c0_3], %1 {strides = array<i32>} : memref<64x128xf32, #tpu.memory_space<vmem>>, vector<64x128xf32>,
    return
  }
  func.func @transform_0(%arg0: i32) -> (i32, i32, i32) {
    %c0_i32 = arith.constant 0 : i32
    %c0_i32_0 = arith.constant 0 : i32
    %c0_i32_1 = arith.constant 0 : i32
    return %c0_i32, %arg0, %c0_i32_0 : i32, i32, i32
  }
  func.func @transform_1(%arg0: i32) -> (i32, i32) {
    %c0_i32 = arith.constant 0 : i32
    %c0_i32_0 = arith.constant 0 : i32
    return %arg0, %c0_i32 : i32, i32
  }
}

module attributes {stable_mosaic.version = 11 : i64} {
  func.func @_matmul_affine_kernel(%arg0: i32, %arg1: i32, %arg2: i32, %arg3: memref<128x256xbf16, #tpu.memory_space<vmem>>, %arg4: memref<256x128xbf16, #tpu.memory_space<vmem>>, %arg5: memref<1x128xf32, #tpu.memory_space<vmem>>, %arg6: memref<1x128xf32, #tpu.memory_space<vmem>>, %arg7: memref<128x128xf32, #tpu.memory_space<vmem>>, %arg8: memref<128x128xf32, #tpu.memory_space<vmem>>) attributes {dimension_semantics = [#tpu.dimension_semantics<parallel>, #tpu.dimension_semantics<parallel>, #tpu.dimension_semantics<arbitrary>], iteration_bounds = array<i64: 1, 1, 3>, scalar_prefetch = 0 : i64, scratch_operands = 1 : i64, tpu.core_type = #tpu.core_type<tc>, window_params = [{transform_indices = @transform_0, window_bounds = array<i64: 128, 256>}, {transform_indices = @transform_1, window_bounds = array<i64: 256, 128>}, {transform_indices = @transform_2, window_bounds = array<i64: 1, 128>}, {transform_indices = @transform_3, window_bounds = array<i64: 1, 128>}, {transform_indices = @transform_4, window_bounds = array<i64: 128, 128>}]} {
    %c0_i32 = arith.constant 0 : i32
    %0 = arith.cmpi eq, %arg2, %c0_i32 : i32
    %1 = arith.extui %0 : i1 to i32
    %c0_i32_0 = arith.constant 0 : i32
    %2 = arith.cmpi ne, %1, %c0_i32_0 : i32
    scf.if %2 {
      %cst_9 = arith.constant 0.000000e+00 : f32
      %12 = vector.broadcast %cst_9 : f32 to vector<128x128xf32>
      %c0_10 = arith.constant 0 : index
      %c0_11 = arith.constant 0 : index
      %13 = vector.load %arg8[%c0_10, %c0_11] : memref<128x128xf32, #tpu.memory_space<vmem>>, vector<128x128xf32>
      tpu.vector_store %arg8[%c0_10, %c0_11], %12 {strides = array<i32>} : memref<128x128xf32, #tpu.memory_space<vmem>>, vector<128x128xf32>,
    } else {
    }
    %c0 = arith.constant 0 : index
    %c0_1 = arith.constant 0 : index
    %3 = vector.load %arg8[%c0, %c0_1] : memref<128x128xf32, #tpu.memory_space<vmem>>, vector<128x128xf32>
    %c0_2 = arith.constant 0 : index
    %c0_3 = arith.constant 0 : index
    %4 = vector.load %arg3[%c0_2, %c0_3] : memref<128x256xbf16, #tpu.memory_space<vmem>>, vector<128x256xbf16>
    %c0_4 = arith.constant 0 : index
    %c0_5 = arith.constant 0 : index
    %5 = vector.load %arg4[%c0_4, %c0_5] : memref<256x128xbf16, #tpu.memory_space<vmem>>, vector<256x128xbf16>
    %cst = arith.constant dense<0.000000e+00> : vector<128x128xf32>
    %6 = tpu.matmul %4, %5, %cst {dimension_numbers = #tpu.dot_dimension_numbers<[1], [0], [0], [1], [0, 0, 1, 1], [], []>} : vector<128x256xbf16>, vector<256x128xbf16>, vector<128x128xf32> -> vector<128x128xf32>
    %7 = arith.addf %3, %6 : vector<128x128xf32>
    %c0_6 = arith.constant 0 : index
    %c0_7 = arith.constant 0 : index
    %8 = vector.load %arg8[%c0_6, %c0_7] : memref<128x128xf32, #tpu.memory_space<vmem>>, vector<128x128xf32>
    tpu.vector_store %arg8[%c0_6, %c0_7], %7 {strides = array<i32>} : memref<128x128xf32, #tpu.memory_space<vmem>>, vector<128x128xf32>,
    %c2_i32 = arith.constant 2 : i32
    %9 = arith.cmpi eq, %arg2, %c2_i32 : i32
    %10 = arith.extui %9 : i1 to i32
    %c0_i32_8 = arith.constant 0 : i32
    %11 = arith.cmpi ne, %10, %c0_i32_8 : i32
    scf.if %11 {
      %c0_9 = arith.constant 0 : index
      %c0_10 = arith.constant 0 : index
      %12 = vector.load %arg8[%c0_9, %c0_10] : memref<128x128xf32, #tpu.memory_space<vmem>>, vector<128x128xf32>
      %c0_11 = arith.constant 0 : index
      %c0_12 = arith.constant 0 : index
      %13 = vector.load %arg5[%c0_11, %c0_12] : memref<1x128xf32, #tpu.memory_space<vmem>>, vector<1x128xf32>
      %14 = vector.broadcast %13 : vector<1x128xf32> to vector<128x128xf32>
      %15 = arith.mulf %12, %14 : vector<128x128xf32>
      %c0_13 = arith.constant 0 : index
      %c0_14 = arith.constant 0 : index
      %16 = vector.load %arg6[%c0_13, %c0_14] : memref<1x128xf32, #tpu.memory_space<vmem>>, vector<1x128xf32>
      %17 = vector.broadcast %16 : vector<1x128xf32> to vector<128x128xf32>
      %18 = arith.addf %15, %17 : vector<128x128xf32>
      %cst_15 = arith.constant 0.000000e+00 : f32
      %19 = vector.broadcast %cst_15 : f32 to vector<128x128xf32>
      %20 = arith.maximumf %18, %19 : vector<128x128xf32>
      %c0_16 = arith.constant 0 : index
      %c0_17 = arith.constant 0 : index
      %21 = vector.load %arg7[%c0_16, %c0_17] : memref<128x128xf32, #tpu.memory_space<vmem>>, vector<128x128xf32>
      tpu.vector_store %arg7[%c0_16, %c0_17], %20 {strides = array<i32>} : memref<128x128xf32, #tpu.memory_space<vmem>>, vector<128x128xf32>,
    } else {
    }
    return
  }
  func.func @transform_0(%arg0: i32, %arg1: i32, %arg2: i32) -> (i32, i32) {
    %c0_i32 = arith.constant 0 : i32
    return %arg0, %arg2 : i32, i32
  }
  func.func @transform_1(%arg0: i32, %arg1: i32, %arg2: i32) -> (i32, i32) {
    %c0_i32 = arith.constant 0 : i32
    return %arg2, %arg1 : i32, i32
  }
  func.func @transform_2(%arg0: i32, %arg1: i32, %arg2: i32) -> (i32, i32) {
    %c0_i32 = arith.constant 0 : i32
    %c0_i32_0 = arith.constant 0 : i32
    return %c0_i32, %arg1 : i32, i32
  }
  func.func @transform_3(%arg0: i32, %arg1: i32, %arg2: i32) -> (i32, i32) {
    %c0_i32 = arith.constant 0 : i32
    %c0_i32_0 = arith.constant 0 : i32
    return %c0_i32, %arg1 : i32, i32
  }
  func.func @transform_4(%arg0: i32, %arg1: i32, %arg2: i32) -> (i32, i32) {
    %c0_i32 = arith.constant 0 : i32
    return %arg0, %arg1 : i32, i32
  }
}

module attributes {stable_mosaic.version = 11 : i64} {
  func.func @_matmul_affine_kernel(%arg0: i32, %arg1: i32, %arg2: i32, %arg3: memref<128x256xbf16, #tpu.memory_space<vmem>>, %arg4: memref<256x128xbf16, #tpu.memory_space<vmem>>, %arg5: memref<1x128xf32, #tpu.memory_space<vmem>>, %arg6: memref<1x128xf32, #tpu.memory_space<vmem>>, %arg7: memref<128x128xf32, #tpu.memory_space<vmem>>, %arg8: memref<128x128xf32, #tpu.memory_space<vmem>>, %arg9: memref<128x128xf32, #tpu.memory_space<vmem>>) attributes {dimension_semantics = [#tpu.dimension_semantics<parallel>, #tpu.dimension_semantics<parallel>, #tpu.dimension_semantics<arbitrary>], iteration_bounds = array<i64: 1, 1, 3>, scalar_prefetch = 0 : i64, scratch_operands = 1 : i64, tpu.core_type = #tpu.core_type<tc>, window_params = [{transform_indices = @transform_0, window_bounds = array<i64: 128, 256>}, {transform_indices = @transform_1, window_bounds = array<i64: 256, 128>}, {transform_indices = @transform_2, window_bounds = array<i64: 1, 128>}, {transform_indices = @transform_3, window_bounds = array<i64: 1, 128>}, {transform_indices = @transform_4, window_bounds = array<i64: 128, 128>}, {transform_indices = @transform_5, window_bounds = array<i64: 128, 128>}]} {
    %c0_i32 = arith.constant 0 : i32
    %0 = arith.cmpi eq, %arg2, %c0_i32 : i32
    %1 = arith.extui %0 : i1 to i32
    %c0_i32_0 = arith.constant 0 : i32
    %2 = arith.cmpi ne, %1, %c0_i32_0 : i32
    scf.if %2 {
      %cst_9 = arith.constant 0.000000e+00 : f32
      %12 = vector.broadcast %cst_9 : f32 to vector<128x128xf32>
      %c0_10 = arith.constant 0 : index
      %c0_11 = arith.constant 0 : index
      %13 = vector.load %arg9[%c0_10, %c0_11] : memref<128x128xf32, #tpu.memory_space<vmem>>, vector<128x128xf32>
      tpu.vector_store %arg9[%c0_10, %c0_11], %12 {strides = array<i32>} : memref<128x128xf32, #tpu.memory_space<vmem>>, vector<128x128xf32>,
    } else {
    }
    %c0 = arith.constant 0 : index
    %c0_1 = arith.constant 0 : index
    %3 = vector.load %arg9[%c0, %c0_1] : memref<128x128xf32, #tpu.memory_space<vmem>>, vector<128x128xf32>
    %c0_2 = arith.constant 0 : index
    %c0_3 = arith.constant 0 : index
    %4 = vector.load %arg3[%c0_2, %c0_3] : memref<128x256xbf16, #tpu.memory_space<vmem>>, vector<128x256xbf16>
    %c0_4 = arith.constant 0 : index
    %c0_5 = arith.constant 0 : index
    %5 = vector.load %arg4[%c0_4, %c0_5] : memref<256x128xbf16, #tpu.memory_space<vmem>>, vector<256x128xbf16>
    %cst = arith.constant dense<0.000000e+00> : vector<128x128xf32>
    %6 = tpu.matmul %4, %5, %cst {dimension_numbers = #tpu.dot_dimension_numbers<[1], [0], [0], [1], [0, 0, 1, 1], [], []>} : vector<128x256xbf16>, vector<256x128xbf16>, vector<128x128xf32> -> vector<128x128xf32>
    %7 = arith.addf %3, %6 : vector<128x128xf32>
    %c0_6 = arith.constant 0 : index
    %c0_7 = arith.constant 0 : index
    %8 = vector.load %arg9[%c0_6, %c0_7] : memref<128x128xf32, #tpu.memory_space<vmem>>, vector<128x128xf32>
    tpu.vector_store %arg9[%c0_6, %c0_7], %7 {strides = array<i32>} : memref<128x128xf32, #tpu.memory_space<vmem>>, vector<128x128xf32>,
    %c2_i32 = arith.constant 2 : i32
    %9 = arith.cmpi eq, %arg2, %c2_i32 : i32
    %10 = arith.extui %9 : i1 to i32
    %c0_i32_8 = arith.constant 0 : i32
    %11 = arith.cmpi ne, %10, %c0_i32_8 : i32
    scf.if %11 {
      %c0_9 = arith.constant 0 : index
      %c0_10 = arith.constant 0 : index
      %12 = vector.load %arg9[%c0_9, %c0_10] : memref<128x128xf32, #tpu.memory_space<vmem>>, vector<128x128xf32>
      %c0_11 = arith.constant 0 : index
      %c0_12 = arith.constant 0 : index
      %13 = vector.load %arg5[%c0_11, %c0_12] : memref<1x128xf32, #tpu.memory_space<vmem>>, vector<1x128xf32>
      %14 = vector.broadcast %13 : vector<1x128xf32> to vector<128x128xf32>
      %15 = arith.mulf %12, %14 : vector<128x128xf32>
      %c0_13 = arith.constant 0 : index
      %c0_14 = arith.constant 0 : index
      %16 = vector.load %arg6[%c0_13, %c0_14] : memref<1x128xf32, #tpu.memory_space<vmem>>, vector<1x128xf32>
      %17 = vector.broadcast %16 : vector<1x128xf32> to vector<128x128xf32>
      %18 = arith.addf %15, %17 : vector<128x128xf32>
      %c0_15 = arith.constant 0 : index
      %c0_16 = arith.constant 0 : index
      %19 = vector.load %arg7[%c0_15, %c0_16] : memref<128x128xf32, #tpu.memory_space<vmem>>, vector<128x128xf32>
      %20 = arith.addf %18, %19 : vector<128x128xf32>
      %cst_17 = arith.constant 0.000000e+00 : f32
      %21 = vector.broadcast %cst_17 : f32 to vector<128x128xf32>
      %22 = arith.maximumf %20, %21 : vector<128x128xf32>
      %c0_18 = arith.constant 0 : index
      %c0_19 = arith.constant 0 : index
      %23 = vector.load %arg8[%c0_18, %c0_19] : memref<128x128xf32, #tpu.memory_space<vmem>>, vector<128x128xf32>
      tpu.vector_store %arg8[%c0_18, %c0_19], %22 {strides = array<i32>} : memref<128x128xf32, #tpu.memory_space<vmem>>, vector<128x128xf32>,
    } else {
    }
    return
  }
  func.func @transform_0(%arg0: i32, %arg1: i32, %arg2: i32) -> (i32, i32) {
    %c0_i32 = arith.constant 0 : i32
    return %arg0, %arg2 : i32, i32
  }
  func.func @transform_1(%arg0: i32, %arg1: i32, %arg2: i32) -> (i32, i32) {
    %c0_i32 = arith.constant 0 : i32
    return %arg2, %arg1 : i32, i32
  }
  func.func @transform_2(%arg0: i32, %arg1: i32, %arg2: i32) -> (i32, i32) {
    %c0_i32 = arith.constant 0 : i32
    %c0_i32_0 = arith.constant 0 : i32
    return %c0_i32, %arg1 : i32, i32
  }
  func.func @transform_3(%arg0: i32, %arg1: i32, %arg2: i32) -> (i32, i32) {
    %c0_i32 = arith.constant 0 : i32
    %c0_i32_0 = arith.constant 0 : i32
    return %c0_i32, %arg1 : i32, i32
  }
  func.func @transform_4(%arg0: i32, %arg1: i32, %arg2: i32) -> (i32, i32) {
    %c0_i32 = arith.constant 0 : i32
    return %arg0, %arg1 : i32, i32
  }
  func.func @transform_5(%arg0: i32, %arg1: i32, %arg2: i32) -> (i32, i32) {
    %c0_i32 = arith.constant 0 : i32
    return %arg0, %arg1 : i32, i32
  }
}

module attributes {stable_mosaic.version = 11 : i64} {
  func.func @_matmul_affine_kernel(%arg0: i32, %arg1: i32, %arg2: i32, %arg3: memref<32x256xbf16, #tpu.memory_space<vmem>>, %arg4: memref<256x128xbf16, #tpu.memory_space<vmem>>, %arg5: memref<1x128xf32, #tpu.memory_space<vmem>>, %arg6: memref<1x128xf32, #tpu.memory_space<vmem>>, %arg7: memref<32x128xf32, #tpu.memory_space<vmem>>, %arg8: memref<32x128xf32, #tpu.memory_space<vmem>>) attributes {dimension_semantics = [#tpu.dimension_semantics<parallel>, #tpu.dimension_semantics<parallel>, #tpu.dimension_semantics<arbitrary>], iteration_bounds = array<i64: 1, 1, 3>, scalar_prefetch = 0 : i64, scratch_operands = 1 : i64, tpu.core_type = #tpu.core_type<tc>, window_params = [{transform_indices = @transform_0, window_bounds = array<i64: 32, 256>}, {transform_indices = @transform_1, window_bounds = array<i64: 256, 128>}, {transform_indices = @transform_2, window_bounds = array<i64: 1, 128>}, {transform_indices = @transform_3, window_bounds = array<i64: 1, 128>}, {transform_indices = @transform_4, window_bounds = array<i64: 32, 128>}]} {
    %c0_i32 = arith.constant 0 : i32
    %0 = arith.cmpi eq, %arg2, %c0_i32 : i32
    %1 = arith.extui %0 : i1 to i32
    %c0_i32_0 = arith.constant 0 : i32
    %2 = arith.cmpi ne, %1, %c0_i32_0 : i32
    scf.if %2 {
      %cst_9 = arith.constant 0.000000e+00 : f32
      %12 = vector.broadcast %cst_9 : f32 to vector<32x128xf32>
      %c0_10 = arith.constant 0 : index
      %c0_11 = arith.constant 0 : index
      %13 = vector.load %arg8[%c0_10, %c0_11] : memref<32x128xf32, #tpu.memory_space<vmem>>, vector<32x128xf32>
      tpu.vector_store %arg8[%c0_10, %c0_11], %12 {strides = array<i32>} : memref<32x128xf32, #tpu.memory_space<vmem>>, vector<32x128xf32>,
    } else {
    }
    %c0 = arith.constant 0 : index
    %c0_1 = arith.constant 0 : index
    %3 = vector.load %arg8[%c0, %c0_1] : memref<32x128xf32, #tpu.memory_space<vmem>>, vector<32x128xf32>
    %c0_2 = arith.constant 0 : index
    %c0_3 = arith.constant 0 : index
    %4 = vector.load %arg3[%c0_2, %c0_3] : memref<32x256xbf16, #tpu.memory_space<vmem>>, vector<32x256xbf16>
    %c0_4 = arith.constant 0 : index
    %c0_5 = arith.constant 0 : index
    %5 = vector.load %arg4[%c0_4, %c0_5] : memref<256x128xbf16, #tpu.memory_space<vmem>>, vector<256x128xbf16>
    %cst = arith.constant dense<0.000000e+00> : vector<32x128xf32>
    %6 = tpu.matmul %4, %5, %cst {dimension_numbers = #tpu.dot_dimension_numbers<[1], [0], [0], [1], [0, 0, 1, 1], [], []>} : vector<32x256xbf16>, vector<256x128xbf16>, vector<32x128xf32> -> vector<32x128xf32>
    %7 = arith.addf %3, %6 : vector<32x128xf32>
    %c0_6 = arith.constant 0 : index
    %c0_7 = arith.constant 0 : index
    %8 = vector.load %arg8[%c0_6, %c0_7] : memref<32x128xf32, #tpu.memory_space<vmem>>, vector<32x128xf32>
    tpu.vector_store %arg8[%c0_6, %c0_7], %7 {strides = array<i32>} : memref<32x128xf32, #tpu.memory_space<vmem>>, vector<32x128xf32>,
    %c2_i32 = arith.constant 2 : i32
    %9 = arith.cmpi eq, %arg2, %c2_i32 : i32
    %10 = arith.extui %9 : i1 to i32
    %c0_i32_8 = arith.constant 0 : i32
    %11 = arith.cmpi ne, %10, %c0_i32_8 : i32
    scf.if %11 {
      %c0_9 = arith.constant 0 : index
      %c0_10 = arith.constant 0 : index
      %12 = vector.load %arg8[%c0_9, %c0_10] : memref<32x128xf32, #tpu.memory_space<vmem>>, vector<32x128xf32>
      %c0_11 = arith.constant 0 : index
      %c0_12 = arith.constant 0 : index
      %13 = vector.load %arg5[%c0_11, %c0_12] : memref<1x128xf32, #tpu.memory_space<vmem>>, vector<1x128xf32>
      %14 = vector.broadcast %13 : vector<1x128xf32> to vector<32x128xf32>
      %15 = arith.mulf %12, %14 : vector<32x128xf32>
      %c0_13 = arith.constant 0 : index
      %c0_14 = arith.constant 0 : index
      %16 = vector.load %arg6[%c0_13, %c0_14] : memref<1x128xf32, #tpu.memory_space<vmem>>, vector<1x128xf32>
      %17 = vector.broadcast %16 : vector<1x128xf32> to vector<32x128xf32>
      %18 = arith.addf %15, %17 : vector<32x128xf32>
      %cst_15 = arith.constant 0.000000e+00 : f32
      %19 = vector.broadcast %cst_15 : f32 to vector<32x128xf32>
      %20 = arith.maximumf %18, %19 : vector<32x128xf32>
      %c0_16 = arith.constant 0 : index
      %c0_17 = arith.constant 0 : index
      %21 = vector.load %arg7[%c0_16, %c0_17] : memref<32x128xf32, #tpu.memory_space<vmem>>, vector<32x128xf32>
      tpu.vector_store %arg7[%c0_16, %c0_17], %20 {strides = array<i32>} : memref<32x128xf32, #tpu.memory_space<vmem>>, vector<32x128xf32>,
    } else {
    }
    return
  }
  func.func @transform_0(%arg0: i32, %arg1: i32, %arg2: i32) -> (i32, i32) {
    %c0_i32 = arith.constant 0 : i32
    return %arg0, %arg2 : i32, i32
  }
  func.func @transform_1(%arg0: i32, %arg1: i32, %arg2: i32) -> (i32, i32) {
    %c0_i32 = arith.constant 0 : i32
    return %arg2, %arg1 : i32, i32
  }
  func.func @transform_2(%arg0: i32, %arg1: i32, %arg2: i32) -> (i32, i32) {
    %c0_i32 = arith.constant 0 : i32
    %c0_i32_0 = arith.constant 0 : i32
    return %c0_i32, %arg1 : i32, i32
  }
  func.func @transform_3(%arg0: i32, %arg1: i32, %arg2: i32) -> (i32, i32) {
    %c0_i32 = arith.constant 0 : i32
    %c0_i32_0 = arith.constant 0 : i32
    return %c0_i32, %arg1 : i32, i32
  }
  func.func @transform_4(%arg0: i32, %arg1: i32, %arg2: i32) -> (i32, i32) {
    %c0_i32 = arith.constant 0 : i32
    return %arg0, %arg1 : i32, i32
  }
}

module attributes {stable_mosaic.version = 11 : i64} {
  func.func @_matmul_affine_kernel(%arg0: i32, %arg1: i32, %arg2: i32, %arg3: memref<32x128xbf16, #tpu.memory_space<vmem>>, %arg4: memref<128x128xbf16, #tpu.memory_space<vmem>>, %arg5: memref<1x128xf32, #tpu.memory_space<vmem>>, %arg6: memref<1x128xf32, #tpu.memory_space<vmem>>, %arg7: memref<32x128xf32, #tpu.memory_space<vmem>>, %arg8: memref<32x128xf32, #tpu.memory_space<vmem>>) attributes {dimension_semantics = [#tpu.dimension_semantics<parallel>, #tpu.dimension_semantics<parallel>, #tpu.dimension_semantics<arbitrary>], iteration_bounds = array<i64: 1, 1, 1>, scalar_prefetch = 0 : i64, scratch_operands = 1 : i64, tpu.core_type = #tpu.core_type<tc>, window_params = [{transform_indices = @transform_0, window_bounds = array<i64: 32, 128>}, {transform_indices = @transform_1, window_bounds = array<i64: 128, 128>}, {transform_indices = @transform_2, window_bounds = array<i64: 1, 128>}, {transform_indices = @transform_3, window_bounds = array<i64: 1, 128>}, {transform_indices = @transform_4, window_bounds = array<i64: 32, 128>}]} {
    %c0_i32 = arith.constant 0 : i32
    %0 = arith.cmpi eq, %arg2, %c0_i32 : i32
    %1 = arith.extui %0 : i1 to i32
    %c0_i32_0 = arith.constant 0 : i32
    %2 = arith.cmpi ne, %1, %c0_i32_0 : i32
    scf.if %2 {
      %cst_10 = arith.constant 0.000000e+00 : f32
      %12 = vector.broadcast %cst_10 : f32 to vector<32x128xf32>
      %c0_11 = arith.constant 0 : index
      %c0_12 = arith.constant 0 : index
      %13 = vector.load %arg8[%c0_11, %c0_12] : memref<32x128xf32, #tpu.memory_space<vmem>>, vector<32x128xf32>
      tpu.vector_store %arg8[%c0_11, %c0_12], %12 {strides = array<i32>} : memref<32x128xf32, #tpu.memory_space<vmem>>, vector<32x128xf32>,
    } else {
    }
    %c0 = arith.constant 0 : index
    %c0_1 = arith.constant 0 : index
    %3 = vector.load %arg8[%c0, %c0_1] : memref<32x128xf32, #tpu.memory_space<vmem>>, vector<32x128xf32>
    %c0_2 = arith.constant 0 : index
    %c0_3 = arith.constant 0 : index
    %4 = vector.load %arg3[%c0_2, %c0_3] : memref<32x128xbf16, #tpu.memory_space<vmem>>, vector<32x128xbf16>
    %c0_4 = arith.constant 0 : index
    %c0_5 = arith.constant 0 : index
    %5 = vector.load %arg4[%c0_4, %c0_5] : memref<128x128xbf16, #tpu.memory_space<vmem>>, vector<128x128xbf16>
    %cst = arith.constant dense<0.000000e+00> : vector<32x128xf32>
    %6 = tpu.matmul %4, %5, %cst {dimension_numbers = #tpu.dot_dimension_numbers<[1], [0], [0], [1], [0, 0, 1, 1], [], []>} : vector<32x128xbf16>, vector<128x128xbf16>, vector<32x128xf32> -> vector<32x128xf32>
    %7 = arith.addf %3, %6 : vector<32x128xf32>
    %c0_6 = arith.constant 0 : index
    %c0_7 = arith.constant 0 : index
    %8 = vector.load %arg8[%c0_6, %c0_7] : memref<32x128xf32, #tpu.memory_space<vmem>>, vector<32x128xf32>
    tpu.vector_store %arg8[%c0_6, %c0_7], %7 {strides = array<i32>} : memref<32x128xf32, #tpu.memory_space<vmem>>, vector<32x128xf32>,
    %c0_i32_8 = arith.constant 0 : i32
    %9 = arith.cmpi eq, %arg2, %c0_i32_8 : i32
    %10 = arith.extui %9 : i1 to i32
    %c0_i32_9 = arith.constant 0 : i32
    %11 = arith.cmpi ne, %10, %c0_i32_9 : i32
    scf.if %11 {
      %c0_10 = arith.constant 0 : index
      %c0_11 = arith.constant 0 : index
      %12 = vector.load %arg8[%c0_10, %c0_11] : memref<32x128xf32, #tpu.memory_space<vmem>>, vector<32x128xf32>
      %c0_12 = arith.constant 0 : index
      %c0_13 = arith.constant 0 : index
      %13 = vector.load %arg5[%c0_12, %c0_13] : memref<1x128xf32, #tpu.memory_space<vmem>>, vector<1x128xf32>
      %14 = vector.broadcast %13 : vector<1x128xf32> to vector<32x128xf32>
      %15 = arith.mulf %12, %14 : vector<32x128xf32>
      %c0_14 = arith.constant 0 : index
      %c0_15 = arith.constant 0 : index
      %16 = vector.load %arg6[%c0_14, %c0_15] : memref<1x128xf32, #tpu.memory_space<vmem>>, vector<1x128xf32>
      %17 = vector.broadcast %16 : vector<1x128xf32> to vector<32x128xf32>
      %18 = arith.addf %15, %17 : vector<32x128xf32>
      %c0_16 = arith.constant 0 : index
      %c0_17 = arith.constant 0 : index
      %19 = vector.load %arg7[%c0_16, %c0_17] : memref<32x128xf32, #tpu.memory_space<vmem>>, vector<32x128xf32>
      tpu.vector_store %arg7[%c0_16, %c0_17], %18 {strides = array<i32>} : memref<32x128xf32, #tpu.memory_space<vmem>>, vector<32x128xf32>,
    } else {
    }
    return
  }
  func.func @transform_0(%arg0: i32, %arg1: i32, %arg2: i32) -> (i32, i32) {
    %c0_i32 = arith.constant 0 : i32
    return %arg0, %arg2 : i32, i32
  }
  func.func @transform_1(%arg0: i32, %arg1: i32, %arg2: i32) -> (i32, i32) {
    %c0_i32 = arith.constant 0 : i32
    return %arg2, %arg1 : i32, i32
  }
  func.func @transform_2(%arg0: i32, %arg1: i32, %arg2: i32) -> (i32, i32) {
    %c0_i32 = arith.constant 0 : i32
    %c0_i32_0 = arith.constant 0 : i32
    return %c0_i32, %arg1 : i32, i32
  }
  func.func @transform_3(%arg0: i32, %arg1: i32, %arg2: i32) -> (i32, i32) {
    %c0_i32 = arith.constant 0 : i32
    %c0_i32_0 = arith.constant 0 : i32
    return %c0_i32, %arg1 : i32, i32
  }
  func.func @transform_4(%arg0: i32, %arg1: i32, %arg2: i32) -> (i32, i32) {
    %c0_i32 = arith.constant 0 : i32
    return %arg0, %arg1 : i32, i32
  }
}

module attributes {stable_mosaic.version = 11 : i64} {
  func.func @_matmul_affine_kernel(%arg0: i32, %arg1: i32, %arg2: i32, %arg3: memref<32x256xbf16, #tpu.memory_space<vmem>>, %arg4: memref<256x128xbf16, #tpu.memory_space<vmem>>, %arg5: memref<1x128xf32, #tpu.memory_space<vmem>>, %arg6: memref<1x128xf32, #tpu.memory_space<vmem>>, %arg7: memref<32x128xf32, #tpu.memory_space<vmem>>, %arg8: memref<32x128xf32, #tpu.memory_space<vmem>>, %arg9: memref<32x128xf32, #tpu.memory_space<vmem>>) attributes {dimension_semantics = [#tpu.dimension_semantics<parallel>, #tpu.dimension_semantics<parallel>, #tpu.dimension_semantics<arbitrary>], iteration_bounds = array<i64: 1, 1, 5>, scalar_prefetch = 0 : i64, scratch_operands = 1 : i64, tpu.core_type = #tpu.core_type<tc>, window_params = [{transform_indices = @transform_0, window_bounds = array<i64: 32, 256>}, {transform_indices = @transform_1, window_bounds = array<i64: 256, 128>}, {transform_indices = @transform_2, window_bounds = array<i64: 1, 128>}, {transform_indices = @transform_3, window_bounds = array<i64: 1, 128>}, {transform_indices = @transform_4, window_bounds = array<i64: 32, 128>}, {transform_indices = @transform_5, window_bounds = array<i64: 32, 128>}]} {
    %c0_i32 = arith.constant 0 : i32
    %0 = arith.cmpi eq, %arg2, %c0_i32 : i32
    %1 = arith.extui %0 : i1 to i32
    %c0_i32_0 = arith.constant 0 : i32
    %2 = arith.cmpi ne, %1, %c0_i32_0 : i32
    scf.if %2 {
      %cst_9 = arith.constant 0.000000e+00 : f32
      %12 = vector.broadcast %cst_9 : f32 to vector<32x128xf32>
      %c0_10 = arith.constant 0 : index
      %c0_11 = arith.constant 0 : index
      %13 = vector.load %arg9[%c0_10, %c0_11] : memref<32x128xf32, #tpu.memory_space<vmem>>, vector<32x128xf32>
      tpu.vector_store %arg9[%c0_10, %c0_11], %12 {strides = array<i32>} : memref<32x128xf32, #tpu.memory_space<vmem>>, vector<32x128xf32>,
    } else {
    }
    %c0 = arith.constant 0 : index
    %c0_1 = arith.constant 0 : index
    %3 = vector.load %arg9[%c0, %c0_1] : memref<32x128xf32, #tpu.memory_space<vmem>>, vector<32x128xf32>
    %c0_2 = arith.constant 0 : index
    %c0_3 = arith.constant 0 : index
    %4 = vector.load %arg3[%c0_2, %c0_3] : memref<32x256xbf16, #tpu.memory_space<vmem>>, vector<32x256xbf16>
    %c0_4 = arith.constant 0 : index
    %c0_5 = arith.constant 0 : index
    %5 = vector.load %arg4[%c0_4, %c0_5] : memref<256x128xbf16, #tpu.memory_space<vmem>>, vector<256x128xbf16>
    %cst = arith.constant dense<0.000000e+00> : vector<32x128xf32>
    %6 = tpu.matmul %4, %5, %cst {dimension_numbers = #tpu.dot_dimension_numbers<[1], [0], [0], [1], [0, 0, 1, 1], [], []>} : vector<32x256xbf16>, vector<256x128xbf16>, vector<32x128xf32> -> vector<32x128xf32>
    %7 = arith.addf %3, %6 : vector<32x128xf32>
    %c0_6 = arith.constant 0 : index
    %c0_7 = arith.constant 0 : index
    %8 = vector.load %arg9[%c0_6, %c0_7] : memref<32x128xf32, #tpu.memory_space<vmem>>, vector<32x128xf32>
    tpu.vector_store %arg9[%c0_6, %c0_7], %7 {strides = array<i32>} : memref<32x128xf32, #tpu.memory_space<vmem>>, vector<32x128xf32>,
    %c4_i32 = arith.constant 4 : i32
    %9 = arith.cmpi eq, %arg2, %c4_i32 : i32
    %10 = arith.extui %9 : i1 to i32
    %c0_i32_8 = arith.constant 0 : i32
    %11 = arith.cmpi ne, %10, %c0_i32_8 : i32
    scf.if %11 {
      %c0_9 = arith.constant 0 : index
      %c0_10 = arith.constant 0 : index
      %12 = vector.load %arg9[%c0_9, %c0_10] : memref<32x128xf32, #tpu.memory_space<vmem>>, vector<32x128xf32>
      %c0_11 = arith.constant 0 : index
      %c0_12 = arith.constant 0 : index
      %13 = vector.load %arg5[%c0_11, %c0_12] : memref<1x128xf32, #tpu.memory_space<vmem>>, vector<1x128xf32>
      %14 = vector.broadcast %13 : vector<1x128xf32> to vector<32x128xf32>
      %15 = arith.mulf %12, %14 : vector<32x128xf32>
      %c0_13 = arith.constant 0 : index
      %c0_14 = arith.constant 0 : index
      %16 = vector.load %arg6[%c0_13, %c0_14] : memref<1x128xf32, #tpu.memory_space<vmem>>, vector<1x128xf32>
      %17 = vector.broadcast %16 : vector<1x128xf32> to vector<32x128xf32>
      %18 = arith.addf %15, %17 : vector<32x128xf32>
      %c0_15 = arith.constant 0 : index
      %c0_16 = arith.constant 0 : index
      %19 = vector.load %arg7[%c0_15, %c0_16] : memref<32x128xf32, #tpu.memory_space<vmem>>, vector<32x128xf32>
      %20 = arith.addf %18, %19 : vector<32x128xf32>
      %cst_17 = arith.constant 0.000000e+00 : f32
      %21 = vector.broadcast %cst_17 : f32 to vector<32x128xf32>
      %22 = arith.maximumf %20, %21 : vector<32x128xf32>
      %c0_18 = arith.constant 0 : index
      %c0_19 = arith.constant 0 : index
      %23 = vector.load %arg8[%c0_18, %c0_19] : memref<32x128xf32, #tpu.memory_space<vmem>>, vector<32x128xf32>
      tpu.vector_store %arg8[%c0_18, %c0_19], %22 {strides = array<i32>} : memref<32x128xf32, #tpu.memory_space<vmem>>, vector<32x128xf32>,
    } else {
    }
    return
  }
  func.func @transform_0(%arg0: i32, %arg1: i32, %arg2: i32) -> (i32, i32) {
    %c0_i32 = arith.constant 0 : i32
    return %arg0, %arg2 : i32, i32
  }
  func.func @transform_1(%arg0: i32, %arg1: i32, %arg2: i32) -> (i32, i32) {
    %c0_i32 = arith.constant 0 : i32
    return %arg2, %arg1 : i32, i32
  }
  func.func @transform_2(%arg0: i32, %arg1: i32, %arg2: i32) -> (i32, i32) {
    %c0_i32 = arith.constant 0 : i32
    %c0_i32_0 = arith.constant 0 : i32
    return %c0_i32, %arg1 : i32, i32
  }
  func.func @transform_3(%arg0: i32, %arg1: i32, %arg2: i32) -> (i32, i32) {
    %c0_i32 = arith.constant 0 : i32
    %c0_i32_0 = arith.constant 0 : i32
    return %c0_i32, %arg1 : i32, i32
  }
  func.func @transform_4(%arg0: i32, %arg1: i32, %arg2: i32) -> (i32, i32) {
    %c0_i32 = arith.constant 0 : i32
    return %arg0, %arg1 : i32, i32
  }
  func.func @transform_5(%arg0: i32, %arg1: i32, %arg2: i32) -> (i32, i32) {
    %c0_i32 = arith.constant 0 : i32
    return %arg0, %arg1 : i32, i32
  }
}

module attributes {stable_mosaic.version = 11 : i64} {
  func.func @_matmul_affine_kernel(%arg0: i32, %arg1: i32, %arg2: i32, %arg3: memref<32x256xbf16, #tpu.memory_space<vmem>>, %arg4: memref<256x128xbf16, #tpu.memory_space<vmem>>, %arg5: memref<1x128xf32, #tpu.memory_space<vmem>>, %arg6: memref<1x128xf32, #tpu.memory_space<vmem>>, %arg7: memref<32x128xf32, #tpu.memory_space<vmem>>, %arg8: memref<32x128xf32, #tpu.memory_space<vmem>>) attributes {dimension_semantics = [#tpu.dimension_semantics<parallel>, #tpu.dimension_semantics<parallel>, #tpu.dimension_semantics<arbitrary>], iteration_bounds = array<i64: 1, 1, 5>, scalar_prefetch = 0 : i64, scratch_operands = 1 : i64, tpu.core_type = #tpu.core_type<tc>, window_params = [{transform_indices = @transform_0, window_bounds = array<i64: 32, 256>}, {transform_indices = @transform_1, window_bounds = array<i64: 256, 128>}, {transform_indices = @transform_2, window_bounds = array<i64: 1, 128>}, {transform_indices = @transform_3, window_bounds = array<i64: 1, 128>}, {transform_indices = @transform_4, window_bounds = array<i64: 32, 128>}]} {
    %c0_i32 = arith.constant 0 : i32
    %0 = arith.cmpi eq, %arg2, %c0_i32 : i32
    %1 = arith.extui %0 : i1 to i32
    %c0_i32_0 = arith.constant 0 : i32
    %2 = arith.cmpi ne, %1, %c0_i32_0 : i32
    scf.if %2 {
      %cst_9 = arith.constant 0.000000e+00 : f32
      %12 = vector.broadcast %cst_9 : f32 to vector<32x128xf32>
      %c0_10 = arith.constant 0 : index
      %c0_11 = arith.constant 0 : index
      %13 = vector.load %arg8[%c0_10, %c0_11] : memref<32x128xf32, #tpu.memory_space<vmem>>, vector<32x128xf32>
      tpu.vector_store %arg8[%c0_10, %c0_11], %12 {strides = array<i32>} : memref<32x128xf32, #tpu.memory_space<vmem>>, vector<32x128xf32>,
    } else {
    }
    %c0 = arith.constant 0 : index
    %c0_1 = arith.constant 0 : index
    %3 = vector.load %arg8[%c0, %c0_1] : memref<32x128xf32, #tpu.memory_space<vmem>>, vector<32x128xf32>
    %c0_2 = arith.constant 0 : index
    %c0_3 = arith.constant 0 : index
    %4 = vector.load %arg3[%c0_2, %c0_3] : memref<32x256xbf16, #tpu.memory_space<vmem>>, vector<32x256xbf16>
    %c0_4 = arith.constant 0 : index
    %c0_5 = arith.constant 0 : index
    %5 = vector.load %arg4[%c0_4, %c0_5] : memref<256x128xbf16, #tpu.memory_space<vmem>>, vector<256x128xbf16>
    %cst = arith.constant dense<0.000000e+00> : vector<32x128xf32>
    %6 = tpu.matmul %4, %5, %cst {dimension_numbers = #tpu.dot_dimension_numbers<[1], [0], [0], [1], [0, 0, 1, 1], [], []>} : vector<32x256xbf16>, vector<256x128xbf16>, vector<32x128xf32> -> vector<32x128xf32>
    %7 = arith.addf %3, %6 : vector<32x128xf32>
    %c0_6 = arith.constant 0 : index
    %c0_7 = arith.constant 0 : index
    %8 = vector.load %arg8[%c0_6, %c0_7] : memref<32x128xf32, #tpu.memory_space<vmem>>, vector<32x128xf32>
    tpu.vector_store %arg8[%c0_6, %c0_7], %7 {strides = array<i32>} : memref<32x128xf32, #tpu.memory_space<vmem>>, vector<32x128xf32>,
    %c4_i32 = arith.constant 4 : i32
    %9 = arith.cmpi eq, %arg2, %c4_i32 : i32
    %10 = arith.extui %9 : i1 to i32
    %c0_i32_8 = arith.constant 0 : i32
    %11 = arith.cmpi ne, %10, %c0_i32_8 : i32
    scf.if %11 {
      %c0_9 = arith.constant 0 : index
      %c0_10 = arith.constant 0 : index
      %12 = vector.load %arg8[%c0_9, %c0_10] : memref<32x128xf32, #tpu.memory_space<vmem>>, vector<32x128xf32>
      %c0_11 = arith.constant 0 : index
      %c0_12 = arith.constant 0 : index
      %13 = vector.load %arg5[%c0_11, %c0_12] : memref<1x128xf32, #tpu.memory_space<vmem>>, vector<1x128xf32>
      %14 = vector.broadcast %13 : vector<1x128xf32> to vector<32x128xf32>
      %15 = arith.mulf %12, %14 : vector<32x128xf32>
      %c0_13 = arith.constant 0 : index
      %c0_14 = arith.constant 0 : index
      %16 = vector.load %arg6[%c0_13, %c0_14] : memref<1x128xf32, #tpu.memory_space<vmem>>, vector<1x128xf32>
      %17 = vector.broadcast %16 : vector<1x128xf32> to vector<32x128xf32>
      %18 = arith.addf %15, %17 : vector<32x128xf32>
      %cst_15 = arith.constant 0.000000e+00 : f32
      %19 = vector.broadcast %cst_15 : f32 to vector<32x128xf32>
      %20 = arith.maximumf %18, %19 : vector<32x128xf32>
      %c0_16 = arith.constant 0 : index
      %c0_17 = arith.constant 0 : index
      %21 = vector.load %arg7[%c0_16, %c0_17] : memref<32x128xf32, #tpu.memory_space<vmem>>, vector<32x128xf32>
      tpu.vector_store %arg7[%c0_16, %c0_17], %20 {strides = array<i32>} : memref<32x128xf32, #tpu.memory_space<vmem>>, vector<32x128xf32>,
    } else {
    }
    return
  }
  func.func @transform_0(%arg0: i32, %arg1: i32, %arg2: i32) -> (i32, i32) {
    %c0_i32 = arith.constant 0 : i32
    return %arg0, %arg2 : i32, i32
  }
  func.func @transform_1(%arg0: i32, %arg1: i32, %arg2: i32) -> (i32, i32) {
    %c0_i32 = arith.constant 0 : i32
    return %arg2, %arg1 : i32, i32
  }
  func.func @transform_2(%arg0: i32, %arg1: i32, %arg2: i32) -> (i32, i32) {
    %c0_i32 = arith.constant 0 : i32
    %c0_i32_0 = arith.constant 0 : i32
    return %c0_i32, %arg1 : i32, i32
  }
  func.func @transform_3(%arg0: i32, %arg1: i32, %arg2: i32) -> (i32, i32) {
    %c0_i32 = arith.constant 0 : i32
    %c0_i32_0 = arith.constant 0 : i32
    return %c0_i32, %arg1 : i32, i32
  }
  func.func @transform_4(%arg0: i32, %arg1: i32, %arg2: i32) -> (i32, i32) {
    %c0_i32 = arith.constant 0 : i32
    return %arg0, %arg1 : i32, i32
  }
}

module attributes {stable_mosaic.version = 11 : i64} {
  func.func @_matmul_affine_kernel(%arg0: i32, %arg1: i32, %arg2: i32, %arg3: memref<8x256xbf16, #tpu.memory_space<vmem>>, %arg4: memref<256x256xbf16, #tpu.memory_space<vmem>>, %arg5: memref<1x256xf32, #tpu.memory_space<vmem>>, %arg6: memref<1x256xf32, #tpu.memory_space<vmem>>, %arg7: memref<8x256xf32, #tpu.memory_space<vmem>>, %arg8: memref<8x256xf32, #tpu.memory_space<vmem>>) attributes {dimension_semantics = [#tpu.dimension_semantics<parallel>, #tpu.dimension_semantics<parallel>, #tpu.dimension_semantics<arbitrary>], iteration_bounds = array<i64: 1, 1, 5>, scalar_prefetch = 0 : i64, scratch_operands = 1 : i64, tpu.core_type = #tpu.core_type<tc>, window_params = [{transform_indices = @transform_0, window_bounds = array<i64: 8, 256>}, {transform_indices = @transform_1, window_bounds = array<i64: 256, 256>}, {transform_indices = @transform_2, window_bounds = array<i64: 1, 256>}, {transform_indices = @transform_3, window_bounds = array<i64: 1, 256>}, {transform_indices = @transform_4, window_bounds = array<i64: 8, 256>}]} {
    %c0_i32 = arith.constant 0 : i32
    %0 = arith.cmpi eq, %arg2, %c0_i32 : i32
    %1 = arith.extui %0 : i1 to i32
    %c0_i32_0 = arith.constant 0 : i32
    %2 = arith.cmpi ne, %1, %c0_i32_0 : i32
    scf.if %2 {
      %cst_9 = arith.constant 0.000000e+00 : f32
      %12 = vector.broadcast %cst_9 : f32 to vector<8x256xf32>
      %c0_10 = arith.constant 0 : index
      %c0_11 = arith.constant 0 : index
      %13 = vector.load %arg8[%c0_10, %c0_11] : memref<8x256xf32, #tpu.memory_space<vmem>>, vector<8x256xf32>
      tpu.vector_store %arg8[%c0_10, %c0_11], %12 {strides = array<i32>} : memref<8x256xf32, #tpu.memory_space<vmem>>, vector<8x256xf32>,
    } else {
    }
    %c0 = arith.constant 0 : index
    %c0_1 = arith.constant 0 : index
    %3 = vector.load %arg8[%c0, %c0_1] : memref<8x256xf32, #tpu.memory_space<vmem>>, vector<8x256xf32>
    %c0_2 = arith.constant 0 : index
    %c0_3 = arith.constant 0 : index
    %4 = vector.load %arg3[%c0_2, %c0_3] : memref<8x256xbf16, #tpu.memory_space<vmem>>, vector<8x256xbf16>
    %c0_4 = arith.constant 0 : index
    %c0_5 = arith.constant 0 : index
    %5 = vector.load %arg4[%c0_4, %c0_5] : memref<256x256xbf16, #tpu.memory_space<vmem>>, vector<256x256xbf16>
    %cst = arith.constant dense<0.000000e+00> : vector<8x256xf32>
    %6 = tpu.matmul %4, %5, %cst {dimension_numbers = #tpu.dot_dimension_numbers<[1], [0], [0], [1], [0, 0, 1, 1], [], []>} : vector<8x256xbf16>, vector<256x256xbf16>, vector<8x256xf32> -> vector<8x256xf32>
    %7 = arith.addf %3, %6 : vector<8x256xf32>
    %c0_6 = arith.constant 0 : index
    %c0_7 = arith.constant 0 : index
    %8 = vector.load %arg8[%c0_6, %c0_7] : memref<8x256xf32, #tpu.memory_space<vmem>>, vector<8x256xf32>
    tpu.vector_store %arg8[%c0_6, %c0_7], %7 {strides = array<i32>} : memref<8x256xf32, #tpu.memory_space<vmem>>, vector<8x256xf32>,
    %c4_i32 = arith.constant 4 : i32
    %9 = arith.cmpi eq, %arg2, %c4_i32 : i32
    %10 = arith.extui %9 : i1 to i32
    %c0_i32_8 = arith.constant 0 : i32
    %11 = arith.cmpi ne, %10, %c0_i32_8 : i32
    scf.if %11 {
      %c0_9 = arith.constant 0 : index
      %c0_10 = arith.constant 0 : index
      %12 = vector.load %arg8[%c0_9, %c0_10] : memref<8x256xf32, #tpu.memory_space<vmem>>, vector<8x256xf32>
      %c0_11 = arith.constant 0 : index
      %c0_12 = arith.constant 0 : index
      %13 = vector.load %arg5[%c0_11, %c0_12] : memref<1x256xf32, #tpu.memory_space<vmem>>, vector<1x256xf32>
      %14 = vector.broadcast %13 : vector<1x256xf32> to vector<8x256xf32>
      %15 = arith.mulf %12, %14 : vector<8x256xf32>
      %c0_13 = arith.constant 0 : index
      %c0_14 = arith.constant 0 : index
      %16 = vector.load %arg6[%c0_13, %c0_14] : memref<1x256xf32, #tpu.memory_space<vmem>>, vector<1x256xf32>
      %17 = vector.broadcast %16 : vector<1x256xf32> to vector<8x256xf32>
      %18 = arith.addf %15, %17 : vector<8x256xf32>
      %cst_15 = arith.constant 0.000000e+00 : f32
      %19 = vector.broadcast %cst_15 : f32 to vector<8x256xf32>
      %20 = arith.maximumf %18, %19 : vector<8x256xf32>
      %c0_16 = arith.constant 0 : index
      %c0_17 = arith.constant 0 : index
      %21 = vector.load %arg7[%c0_16, %c0_17] : memref<8x256xf32, #tpu.memory_space<vmem>>, vector<8x256xf32>
      tpu.vector_store %arg7[%c0_16, %c0_17], %20 {strides = array<i32>} : memref<8x256xf32, #tpu.memory_space<vmem>>, vector<8x256xf32>,
    } else {
    }
    return
  }
  func.func @transform_0(%arg0: i32, %arg1: i32, %arg2: i32) -> (i32, i32) {
    %c0_i32 = arith.constant 0 : i32
    return %arg0, %arg2 : i32, i32
  }
  func.func @transform_1(%arg0: i32, %arg1: i32, %arg2: i32) -> (i32, i32) {
    %c0_i32 = arith.constant 0 : i32
    return %arg2, %arg1 : i32, i32
  }
  func.func @transform_2(%arg0: i32, %arg1: i32, %arg2: i32) -> (i32, i32) {
    %c0_i32 = arith.constant 0 : i32
    %c0_i32_0 = arith.constant 0 : i32
    return %c0_i32, %arg1 : i32, i32
  }
  func.func @transform_3(%arg0: i32, %arg1: i32, %arg2: i32) -> (i32, i32) {
    %c0_i32 = arith.constant 0 : i32
    %c0_i32_0 = arith.constant 0 : i32
    return %c0_i32, %arg1 : i32, i32
  }
  func.func @transform_4(%arg0: i32, %arg1: i32, %arg2: i32) -> (i32, i32) {
    %c0_i32 = arith.constant 0 : i32
    return %arg0, %arg1 : i32, i32
  }
}

module attributes {stable_mosaic.version = 11 : i64} {
  func.func @_matmul_affine_kernel(%arg0: i32, %arg1: i32, %arg2: i32, %arg3: memref<8x128xbf16, #tpu.memory_space<vmem>>, %arg4: memref<128x256xbf16, #tpu.memory_space<vmem>>, %arg5: memref<1x256xf32, #tpu.memory_space<vmem>>, %arg6: memref<1x256xf32, #tpu.memory_space<vmem>>, %arg7: memref<8x256xf32, #tpu.memory_space<vmem>>, %arg8: memref<8x256xf32, #tpu.memory_space<vmem>>) attributes {dimension_semantics = [#tpu.dimension_semantics<parallel>, #tpu.dimension_semantics<parallel>, #tpu.dimension_semantics<arbitrary>], iteration_bounds = array<i64: 1, 1, 1>, scalar_prefetch = 0 : i64, scratch_operands = 1 : i64, tpu.core_type = #tpu.core_type<tc>, window_params = [{transform_indices = @transform_0, window_bounds = array<i64: 8, 128>}, {transform_indices = @transform_1, window_bounds = array<i64: 128, 256>}, {transform_indices = @transform_2, window_bounds = array<i64: 1, 256>}, {transform_indices = @transform_3, window_bounds = array<i64: 1, 256>}, {transform_indices = @transform_4, window_bounds = array<i64: 8, 256>}]} {
    %c0_i32 = arith.constant 0 : i32
    %0 = arith.cmpi eq, %arg2, %c0_i32 : i32
    %1 = arith.extui %0 : i1 to i32
    %c0_i32_0 = arith.constant 0 : i32
    %2 = arith.cmpi ne, %1, %c0_i32_0 : i32
    scf.if %2 {
      %cst_10 = arith.constant 0.000000e+00 : f32
      %12 = vector.broadcast %cst_10 : f32 to vector<8x256xf32>
      %c0_11 = arith.constant 0 : index
      %c0_12 = arith.constant 0 : index
      %13 = vector.load %arg8[%c0_11, %c0_12] : memref<8x256xf32, #tpu.memory_space<vmem>>, vector<8x256xf32>
      tpu.vector_store %arg8[%c0_11, %c0_12], %12 {strides = array<i32>} : memref<8x256xf32, #tpu.memory_space<vmem>>, vector<8x256xf32>,
    } else {
    }
    %c0 = arith.constant 0 : index
    %c0_1 = arith.constant 0 : index
    %3 = vector.load %arg8[%c0, %c0_1] : memref<8x256xf32, #tpu.memory_space<vmem>>, vector<8x256xf32>
    %c0_2 = arith.constant 0 : index
    %c0_3 = arith.constant 0 : index
    %4 = vector.load %arg3[%c0_2, %c0_3] : memref<8x128xbf16, #tpu.memory_space<vmem>>, vector<8x128xbf16>
    %c0_4 = arith.constant 0 : index
    %c0_5 = arith.constant 0 : index
    %5 = vector.load %arg4[%c0_4, %c0_5] : memref<128x256xbf16, #tpu.memory_space<vmem>>, vector<128x256xbf16>
    %cst = arith.constant dense<0.000000e+00> : vector<8x256xf32>
    %6 = tpu.matmul %4, %5, %cst {dimension_numbers = #tpu.dot_dimension_numbers<[1], [0], [0], [1], [0, 0, 1, 1], [], []>} : vector<8x128xbf16>, vector<128x256xbf16>, vector<8x256xf32> -> vector<8x256xf32>
    %7 = arith.addf %3, %6 : vector<8x256xf32>
    %c0_6 = arith.constant 0 : index
    %c0_7 = arith.constant 0 : index
    %8 = vector.load %arg8[%c0_6, %c0_7] : memref<8x256xf32, #tpu.memory_space<vmem>>, vector<8x256xf32>
    tpu.vector_store %arg8[%c0_6, %c0_7], %7 {strides = array<i32>} : memref<8x256xf32, #tpu.memory_space<vmem>>, vector<8x256xf32>,
    %c0_i32_8 = arith.constant 0 : i32
    %9 = arith.cmpi eq, %arg2, %c0_i32_8 : i32
    %10 = arith.extui %9 : i1 to i32
    %c0_i32_9 = arith.constant 0 : i32
    %11 = arith.cmpi ne, %10, %c0_i32_9 : i32
    scf.if %11 {
      %c0_10 = arith.constant 0 : index
      %c0_11 = arith.constant 0 : index
      %12 = vector.load %arg8[%c0_10, %c0_11] : memref<8x256xf32, #tpu.memory_space<vmem>>, vector<8x256xf32>
      %c0_12 = arith.constant 0 : index
      %c0_13 = arith.constant 0 : index
      %13 = vector.load %arg5[%c0_12, %c0_13] : memref<1x256xf32, #tpu.memory_space<vmem>>, vector<1x256xf32>
      %14 = vector.broadcast %13 : vector<1x256xf32> to vector<8x256xf32>
      %15 = arith.mulf %12, %14 : vector<8x256xf32>
      %c0_14 = arith.constant 0 : index
      %c0_15 = arith.constant 0 : index
      %16 = vector.load %arg6[%c0_14, %c0_15] : memref<1x256xf32, #tpu.memory_space<vmem>>, vector<1x256xf32>
      %17 = vector.broadcast %16 : vector<1x256xf32> to vector<8x256xf32>
      %18 = arith.addf %15, %17 : vector<8x256xf32>
      %c0_16 = arith.constant 0 : index
      %c0_17 = arith.constant 0 : index
      %19 = vector.load %arg7[%c0_16, %c0_17] : memref<8x256xf32, #tpu.memory_space<vmem>>, vector<8x256xf32>
      tpu.vector_store %arg7[%c0_16, %c0_17], %18 {strides = array<i32>} : memref<8x256xf32, #tpu.memory_space<vmem>>, vector<8x256xf32>,
    } else {
    }
    return
  }
  func.func @transform_0(%arg0: i32, %arg1: i32, %arg2: i32) -> (i32, i32) {
    %c0_i32 = arith.constant 0 : i32
    return %arg0, %arg2 : i32, i32
  }
  func.func @transform_1(%arg0: i32, %arg1: i32, %arg2: i32) -> (i32, i32) {
    %c0_i32 = arith.constant 0 : i32
    return %arg2, %arg1 : i32, i32
  }
  func.func @transform_2(%arg0: i32, %arg1: i32, %arg2: i32) -> (i32, i32) {
    %c0_i32 = arith.constant 0 : i32
    %c0_i32_0 = arith.constant 0 : i32
    return %c0_i32, %arg1 : i32, i32
  }
  func.func @transform_3(%arg0: i32, %arg1: i32, %arg2: i32) -> (i32, i32) {
    %c0_i32 = arith.constant 0 : i32
    %c0_i32_0 = arith.constant 0 : i32
    return %c0_i32, %arg1 : i32, i32
  }
  func.func @transform_4(%arg0: i32, %arg1: i32, %arg2: i32) -> (i32, i32) {
    %c0_i32 = arith.constant 0 : i32
    return %arg0, %arg1 : i32, i32
  }
}

module attributes {stable_mosaic.version = 11 : i64} {
  func.func @_matmul_affine_kernel(%arg0: i32, %arg1: i32, %arg2: i32, %arg3: memref<8x256xbf16, #tpu.memory_space<vmem>>, %arg4: memref<256x256xbf16, #tpu.memory_space<vmem>>, %arg5: memref<1x256xf32, #tpu.memory_space<vmem>>, %arg6: memref<1x256xf32, #tpu.memory_space<vmem>>, %arg7: memref<8x256xf32, #tpu.memory_space<vmem>>, %arg8: memref<8x256xf32, #tpu.memory_space<vmem>>, %arg9: memref<8x256xf32, #tpu.memory_space<vmem>>) attributes {dimension_semantics = [#tpu.dimension_semantics<parallel>, #tpu.dimension_semantics<parallel>, #tpu.dimension_semantics<arbitrary>], iteration_bounds = array<i64: 1, 1, 9>, scalar_prefetch = 0 : i64, scratch_operands = 1 : i64, tpu.core_type = #tpu.core_type<tc>, window_params = [{transform_indices = @transform_0, window_bounds = array<i64: 8, 256>}, {transform_indices = @transform_1, window_bounds = array<i64: 256, 256>}, {transform_indices = @transform_2, window_bounds = array<i64: 1, 256>}, {transform_indices = @transform_3, window_bounds = array<i64: 1, 256>}, {transform_indices = @transform_4, window_bounds = array<i64: 8, 256>}, {transform_indices = @transform_5, window_bounds = array<i64: 8, 256>}]} {
    %c0_i32 = arith.constant 0 : i32
    %0 = arith.cmpi eq, %arg2, %c0_i32 : i32
    %1 = arith.extui %0 : i1 to i32
    %c0_i32_0 = arith.constant 0 : i32
    %2 = arith.cmpi ne, %1, %c0_i32_0 : i32
    scf.if %2 {
      %cst_9 = arith.constant 0.000000e+00 : f32
      %12 = vector.broadcast %cst_9 : f32 to vector<8x256xf32>
      %c0_10 = arith.constant 0 : index
      %c0_11 = arith.constant 0 : index
      %13 = vector.load %arg9[%c0_10, %c0_11] : memref<8x256xf32, #tpu.memory_space<vmem>>, vector<8x256xf32>
      tpu.vector_store %arg9[%c0_10, %c0_11], %12 {strides = array<i32>} : memref<8x256xf32, #tpu.memory_space<vmem>>, vector<8x256xf32>,
    } else {
    }
    %c0 = arith.constant 0 : index
    %c0_1 = arith.constant 0 : index
    %3 = vector.load %arg9[%c0, %c0_1] : memref<8x256xf32, #tpu.memory_space<vmem>>, vector<8x256xf32>
    %c0_2 = arith.constant 0 : index
    %c0_3 = arith.constant 0 : index
    %4 = vector.load %arg3[%c0_2, %c0_3] : memref<8x256xbf16, #tpu.memory_space<vmem>>, vector<8x256xbf16>
    %c0_4 = arith.constant 0 : index
    %c0_5 = arith.constant 0 : index
    %5 = vector.load %arg4[%c0_4, %c0_5] : memref<256x256xbf16, #tpu.memory_space<vmem>>, vector<256x256xbf16>
    %cst = arith.constant dense<0.000000e+00> : vector<8x256xf32>
    %6 = tpu.matmul %4, %5, %cst {dimension_numbers = #tpu.dot_dimension_numbers<[1], [0], [0], [1], [0, 0, 1, 1], [], []>} : vector<8x256xbf16>, vector<256x256xbf16>, vector<8x256xf32> -> vector<8x256xf32>
    %7 = arith.addf %3, %6 : vector<8x256xf32>
    %c0_6 = arith.constant 0 : index
    %c0_7 = arith.constant 0 : index
    %8 = vector.load %arg9[%c0_6, %c0_7] : memref<8x256xf32, #tpu.memory_space<vmem>>, vector<8x256xf32>
    tpu.vector_store %arg9[%c0_6, %c0_7], %7 {strides = array<i32>} : memref<8x256xf32, #tpu.memory_space<vmem>>, vector<8x256xf32>,
    %c8_i32 = arith.constant 8 : i32
    %9 = arith.cmpi eq, %arg2, %c8_i32 : i32
    %10 = arith.extui %9 : i1 to i32
    %c0_i32_8 = arith.constant 0 : i32
    %11 = arith.cmpi ne, %10, %c0_i32_8 : i32
    scf.if %11 {
      %c0_9 = arith.constant 0 : index
      %c0_10 = arith.constant 0 : index
      %12 = vector.load %arg9[%c0_9, %c0_10] : memref<8x256xf32, #tpu.memory_space<vmem>>, vector<8x256xf32>
      %c0_11 = arith.constant 0 : index
      %c0_12 = arith.constant 0 : index
      %13 = vector.load %arg5[%c0_11, %c0_12] : memref<1x256xf32, #tpu.memory_space<vmem>>, vector<1x256xf32>
      %14 = vector.broadcast %13 : vector<1x256xf32> to vector<8x256xf32>
      %15 = arith.mulf %12, %14 : vector<8x256xf32>
      %c0_13 = arith.constant 0 : index
      %c0_14 = arith.constant 0 : index
      %16 = vector.load %arg6[%c0_13, %c0_14] : memref<1x256xf32, #tpu.memory_space<vmem>>, vector<1x256xf32>
      %17 = vector.broadcast %16 : vector<1x256xf32> to vector<8x256xf32>
      %18 = arith.addf %15, %17 : vector<8x256xf32>
      %c0_15 = arith.constant 0 : index
      %c0_16 = arith.constant 0 : index
      %19 = vector.load %arg7[%c0_15, %c0_16] : memref<8x256xf32, #tpu.memory_space<vmem>>, vector<8x256xf32>
      %20 = arith.addf %18, %19 : vector<8x256xf32>
      %cst_17 = arith.constant 0.000000e+00 : f32
      %21 = vector.broadcast %cst_17 : f32 to vector<8x256xf32>
      %22 = arith.maximumf %20, %21 : vector<8x256xf32>
      %c0_18 = arith.constant 0 : index
      %c0_19 = arith.constant 0 : index
      %23 = vector.load %arg8[%c0_18, %c0_19] : memref<8x256xf32, #tpu.memory_space<vmem>>, vector<8x256xf32>
      tpu.vector_store %arg8[%c0_18, %c0_19], %22 {strides = array<i32>} : memref<8x256xf32, #tpu.memory_space<vmem>>, vector<8x256xf32>,
    } else {
    }
    return
  }
  func.func @transform_0(%arg0: i32, %arg1: i32, %arg2: i32) -> (i32, i32) {
    %c0_i32 = arith.constant 0 : i32
    return %arg0, %arg2 : i32, i32
  }
  func.func @transform_1(%arg0: i32, %arg1: i32, %arg2: i32) -> (i32, i32) {
    %c0_i32 = arith.constant 0 : i32
    return %arg2, %arg1 : i32, i32
  }
  func.func @transform_2(%arg0: i32, %arg1: i32, %arg2: i32) -> (i32, i32) {
    %c0_i32 = arith.constant 0 : i32
    %c0_i32_0 = arith.constant 0 : i32
    return %c0_i32, %arg1 : i32, i32
  }
  func.func @transform_3(%arg0: i32, %arg1: i32, %arg2: i32) -> (i32, i32) {
    %c0_i32 = arith.constant 0 : i32
    %c0_i32_0 = arith.constant 0 : i32
    return %c0_i32, %arg1 : i32, i32
  }
  func.func @transform_4(%arg0: i32, %arg1: i32, %arg2: i32) -> (i32, i32) {
    %c0_i32 = arith.constant 0 : i32
    return %arg0, %arg1 : i32, i32
  }
  func.func @transform_5(%arg0: i32, %arg1: i32, %arg2: i32) -> (i32, i32) {
    %c0_i32 = arith.constant 0 : i32
    return %arg0, %arg1 : i32, i32
  }
}

module attributes {stable_mosaic.version = 11 : i64} {
  func.func @_matmul_affine_kernel(%arg0: i32, %arg1: i32, %arg2: i32, %arg3: memref<8x256xbf16, #tpu.memory_space<vmem>>, %arg4: memref<256x256xbf16, #tpu.memory_space<vmem>>, %arg5: memref<1x256xf32, #tpu.memory_space<vmem>>, %arg6: memref<1x256xf32, #tpu.memory_space<vmem>>, %arg7: memref<8x256xf32, #tpu.memory_space<vmem>>, %arg8: memref<8x256xf32, #tpu.memory_space<vmem>>) attributes {dimension_semantics = [#tpu.dimension_semantics<parallel>, #tpu.dimension_semantics<parallel>, #tpu.dimension_semantics<arbitrary>], iteration_bounds = array<i64: 1, 1, 9>, scalar_prefetch = 0 : i64, scratch_operands = 1 : i64, tpu.core_type = #tpu.core_type<tc>, window_params = [{transform_indices = @transform_0, window_bounds = array<i64: 8, 256>}, {transform_indices = @transform_1, window_bounds = array<i64: 256, 256>}, {transform_indices = @transform_2, window_bounds = array<i64: 1, 256>}, {transform_indices = @transform_3, window_bounds = array<i64: 1, 256>}, {transform_indices = @transform_4, window_bounds = array<i64: 8, 256>}]} {
    %c0_i32 = arith.constant 0 : i32
    %0 = arith.cmpi eq, %arg2, %c0_i32 : i32
    %1 = arith.extui %0 : i1 to i32
    %c0_i32_0 = arith.constant 0 : i32
    %2 = arith.cmpi ne, %1, %c0_i32_0 : i32
    scf.if %2 {
      %cst_9 = arith.constant 0.000000e+00 : f32
      %12 = vector.broadcast %cst_9 : f32 to vector<8x256xf32>
      %c0_10 = arith.constant 0 : index
      %c0_11 = arith.constant 0 : index
      %13 = vector.load %arg8[%c0_10, %c0_11] : memref<8x256xf32, #tpu.memory_space<vmem>>, vector<8x256xf32>
      tpu.vector_store %arg8[%c0_10, %c0_11], %12 {strides = array<i32>} : memref<8x256xf32, #tpu.memory_space<vmem>>, vector<8x256xf32>,
    } else {
    }
    %c0 = arith.constant 0 : index
    %c0_1 = arith.constant 0 : index
    %3 = vector.load %arg8[%c0, %c0_1] : memref<8x256xf32, #tpu.memory_space<vmem>>, vector<8x256xf32>
    %c0_2 = arith.constant 0 : index
    %c0_3 = arith.constant 0 : index
    %4 = vector.load %arg3[%c0_2, %c0_3] : memref<8x256xbf16, #tpu.memory_space<vmem>>, vector<8x256xbf16>
    %c0_4 = arith.constant 0 : index
    %c0_5 = arith.constant 0 : index
    %5 = vector.load %arg4[%c0_4, %c0_5] : memref<256x256xbf16, #tpu.memory_space<vmem>>, vector<256x256xbf16>
    %cst = arith.constant dense<0.000000e+00> : vector<8x256xf32>
    %6 = tpu.matmul %4, %5, %cst {dimension_numbers = #tpu.dot_dimension_numbers<[1], [0], [0], [1], [0, 0, 1, 1], [], []>} : vector<8x256xbf16>, vector<256x256xbf16>, vector<8x256xf32> -> vector<8x256xf32>
    %7 = arith.addf %3, %6 : vector<8x256xf32>
    %c0_6 = arith.constant 0 : index
    %c0_7 = arith.constant 0 : index
    %8 = vector.load %arg8[%c0_6, %c0_7] : memref<8x256xf32, #tpu.memory_space<vmem>>, vector<8x256xf32>
    tpu.vector_store %arg8[%c0_6, %c0_7], %7 {strides = array<i32>} : memref<8x256xf32, #tpu.memory_space<vmem>>, vector<8x256xf32>,
    %c8_i32 = arith.constant 8 : i32
    %9 = arith.cmpi eq, %arg2, %c8_i32 : i32
    %10 = arith.extui %9 : i1 to i32
    %c0_i32_8 = arith.constant 0 : i32
    %11 = arith.cmpi ne, %10, %c0_i32_8 : i32
    scf.if %11 {
      %c0_9 = arith.constant 0 : index
      %c0_10 = arith.constant 0 : index
      %12 = vector.load %arg8[%c0_9, %c0_10] : memref<8x256xf32, #tpu.memory_space<vmem>>, vector<8x256xf32>
      %c0_11 = arith.constant 0 : index
      %c0_12 = arith.constant 0 : index
      %13 = vector.load %arg5[%c0_11, %c0_12] : memref<1x256xf32, #tpu.memory_space<vmem>>, vector<1x256xf32>
      %14 = vector.broadcast %13 : vector<1x256xf32> to vector<8x256xf32>
      %15 = arith.mulf %12, %14 : vector<8x256xf32>
      %c0_13 = arith.constant 0 : index
      %c0_14 = arith.constant 0 : index
      %16 = vector.load %arg6[%c0_13, %c0_14] : memref<1x256xf32, #tpu.memory_space<vmem>>, vector<1x256xf32>
      %17 = vector.broadcast %16 : vector<1x256xf32> to vector<8x256xf32>
      %18 = arith.addf %15, %17 : vector<8x256xf32>
      %cst_15 = arith.constant 0.000000e+00 : f32
      %19 = vector.broadcast %cst_15 : f32 to vector<8x256xf32>
      %20 = arith.maximumf %18, %19 : vector<8x256xf32>
      %c0_16 = arith.constant 0 : index
      %c0_17 = arith.constant 0 : index
      %21 = vector.load %arg7[%c0_16, %c0_17] : memref<8x256xf32, #tpu.memory_space<vmem>>, vector<8x256xf32>
      tpu.vector_store %arg7[%c0_16, %c0_17], %20 {strides = array<i32>} : memref<8x256xf32, #tpu.memory_space<vmem>>, vector<8x256xf32>,
    } else {
    }
    return
  }
  func.func @transform_0(%arg0: i32, %arg1: i32, %arg2: i32) -> (i32, i32) {
    %c0_i32 = arith.constant 0 : i32
    return %arg0, %arg2 : i32, i32
  }
  func.func @transform_1(%arg0: i32, %arg1: i32, %arg2: i32) -> (i32, i32) {
    %c0_i32 = arith.constant 0 : i32
    return %arg2, %arg1 : i32, i32
  }
  func.func @transform_2(%arg0: i32, %arg1: i32, %arg2: i32) -> (i32, i32) {
    %c0_i32 = arith.constant 0 : i32
    %c0_i32_0 = arith.constant 0 : i32
    return %c0_i32, %arg1 : i32, i32
  }
  func.func @transform_3(%arg0: i32, %arg1: i32, %arg2: i32) -> (i32, i32) {
    %c0_i32 = arith.constant 0 : i32
    %c0_i32_0 = arith.constant 0 : i32
    return %c0_i32, %arg1 : i32, i32
  }
  func.func @transform_4(%arg0: i32, %arg1: i32, %arg2: i32) -> (i32, i32) {
    %c0_i32 = arith.constant 0 : i32
    return %arg0, %arg1 : i32, i32
  }
}

module attributes {stable_mosaic.version = 11 : i64} {
  func.func @_matmul_affine_kernel(%arg0: i32, %arg1: i32, %arg2: i32, %arg3: memref<8x256xbf16, #tpu.memory_space<vmem>>, %arg4: memref<256x256xbf16, #tpu.memory_space<vmem>>, %arg5: memref<1x256xf32, #tpu.memory_space<vmem>>, %arg6: memref<1x256xf32, #tpu.memory_space<vmem>>, %arg7: memref<8x256xf32, #tpu.memory_space<vmem>>, %arg8: memref<8x256xf32, #tpu.memory_space<vmem>>) attributes {dimension_semantics = [#tpu.dimension_semantics<parallel>, #tpu.dimension_semantics<parallel>, #tpu.dimension_semantics<arbitrary>], iteration_bounds = array<i64: 1, 2, 9>, scalar_prefetch = 0 : i64, scratch_operands = 1 : i64, tpu.core_type = #tpu.core_type<tc>, window_params = [{transform_indices = @transform_0, window_bounds = array<i64: 8, 256>}, {transform_indices = @transform_1, window_bounds = array<i64: 256, 256>}, {transform_indices = @transform_2, window_bounds = array<i64: 1, 256>}, {transform_indices = @transform_3, window_bounds = array<i64: 1, 256>}, {transform_indices = @transform_4, window_bounds = array<i64: 8, 256>}]} {
    %c0_i32 = arith.constant 0 : i32
    %0 = arith.cmpi eq, %arg2, %c0_i32 : i32
    %1 = arith.extui %0 : i1 to i32
    %c0_i32_0 = arith.constant 0 : i32
    %2 = arith.cmpi ne, %1, %c0_i32_0 : i32
    scf.if %2 {
      %cst_9 = arith.constant 0.000000e+00 : f32
      %12 = vector.broadcast %cst_9 : f32 to vector<8x256xf32>
      %c0_10 = arith.constant 0 : index
      %c0_11 = arith.constant 0 : index
      %13 = vector.load %arg8[%c0_10, %c0_11] : memref<8x256xf32, #tpu.memory_space<vmem>>, vector<8x256xf32>
      tpu.vector_store %arg8[%c0_10, %c0_11], %12 {strides = array<i32>} : memref<8x256xf32, #tpu.memory_space<vmem>>, vector<8x256xf32>,
    } else {
    }
    %c0 = arith.constant 0 : index
    %c0_1 = arith.constant 0 : index
    %3 = vector.load %arg8[%c0, %c0_1] : memref<8x256xf32, #tpu.memory_space<vmem>>, vector<8x256xf32>
    %c0_2 = arith.constant 0 : index
    %c0_3 = arith.constant 0 : index
    %4 = vector.load %arg3[%c0_2, %c0_3] : memref<8x256xbf16, #tpu.memory_space<vmem>>, vector<8x256xbf16>
    %c0_4 = arith.constant 0 : index
    %c0_5 = arith.constant 0 : index
    %5 = vector.load %arg4[%c0_4, %c0_5] : memref<256x256xbf16, #tpu.memory_space<vmem>>, vector<256x256xbf16>
    %cst = arith.constant dense<0.000000e+00> : vector<8x256xf32>
    %6 = tpu.matmul %4, %5, %cst {dimension_numbers = #tpu.dot_dimension_numbers<[1], [0], [0], [1], [0, 0, 1, 1], [], []>} : vector<8x256xbf16>, vector<256x256xbf16>, vector<8x256xf32> -> vector<8x256xf32>
    %7 = arith.addf %3, %6 : vector<8x256xf32>
    %c0_6 = arith.constant 0 : index
    %c0_7 = arith.constant 0 : index
    %8 = vector.load %arg8[%c0_6, %c0_7] : memref<8x256xf32, #tpu.memory_space<vmem>>, vector<8x256xf32>
    tpu.vector_store %arg8[%c0_6, %c0_7], %7 {strides = array<i32>} : memref<8x256xf32, #tpu.memory_space<vmem>>, vector<8x256xf32>,
    %c8_i32 = arith.constant 8 : i32
    %9 = arith.cmpi eq, %arg2, %c8_i32 : i32
    %10 = arith.extui %9 : i1 to i32
    %c0_i32_8 = arith.constant 0 : i32
    %11 = arith.cmpi ne, %10, %c0_i32_8 : i32
    scf.if %11 {
      %c0_9 = arith.constant 0 : index
      %c0_10 = arith.constant 0 : index
      %12 = vector.load %arg8[%c0_9, %c0_10] : memref<8x256xf32, #tpu.memory_space<vmem>>, vector<8x256xf32>
      %c0_11 = arith.constant 0 : index
      %c0_12 = arith.constant 0 : index
      %13 = vector.load %arg5[%c0_11, %c0_12] : memref<1x256xf32, #tpu.memory_space<vmem>>, vector<1x256xf32>
      %14 = vector.broadcast %13 : vector<1x256xf32> to vector<8x256xf32>
      %15 = arith.mulf %12, %14 : vector<8x256xf32>
      %c0_13 = arith.constant 0 : index
      %c0_14 = arith.constant 0 : index
      %16 = vector.load %arg6[%c0_13, %c0_14] : memref<1x256xf32, #tpu.memory_space<vmem>>, vector<1x256xf32>
      %17 = vector.broadcast %16 : vector<1x256xf32> to vector<8x256xf32>
      %18 = arith.addf %15, %17 : vector<8x256xf32>
      %cst_15 = arith.constant 0.000000e+00 : f32
      %19 = vector.broadcast %cst_15 : f32 to vector<8x256xf32>
      %20 = arith.maximumf %18, %19 : vector<8x256xf32>
      %c0_16 = arith.constant 0 : index
      %c0_17 = arith.constant 0 : index
      %21 = vector.load %arg7[%c0_16, %c0_17] : memref<8x256xf32, #tpu.memory_space<vmem>>, vector<8x256xf32>
      tpu.vector_store %arg7[%c0_16, %c0_17], %20 {strides = array<i32>} : memref<8x256xf32, #tpu.memory_space<vmem>>, vector<8x256xf32>,
    } else {
    }
    return
  }
  func.func @transform_0(%arg0: i32, %arg1: i32, %arg2: i32) -> (i32, i32) {
    %c0_i32 = arith.constant 0 : i32
    return %arg0, %arg2 : i32, i32
  }
  func.func @transform_1(%arg0: i32, %arg1: i32, %arg2: i32) -> (i32, i32) {
    %c0_i32 = arith.constant 0 : i32
    return %arg2, %arg1 : i32, i32
  }
  func.func @transform_2(%arg0: i32, %arg1: i32, %arg2: i32) -> (i32, i32) {
    %c0_i32 = arith.constant 0 : i32
    %c0_i32_0 = arith.constant 0 : i32
    return %c0_i32, %arg1 : i32, i32
  }
  func.func @transform_3(%arg0: i32, %arg1: i32, %arg2: i32) -> (i32, i32) {
    %c0_i32 = arith.constant 0 : i32
    %c0_i32_0 = arith.constant 0 : i32
    return %c0_i32, %arg1 : i32, i32
  }
  func.func @transform_4(%arg0: i32, %arg1: i32, %arg2: i32) -> (i32, i32) {
    %c0_i32 = arith.constant 0 : i32
    return %arg0, %arg1 : i32, i32
  }
}

module attributes {stable_mosaic.version = 11 : i64} {
  func.func @_matmul_affine_kernel(%arg0: i32, %arg1: i32, %arg2: i32, %arg3: memref<8x256xbf16, #tpu.memory_space<vmem>>, %arg4: memref<256x256xbf16, #tpu.memory_space<vmem>>, %arg5: memref<1x256xf32, #tpu.memory_space<vmem>>, %arg6: memref<1x256xf32, #tpu.memory_space<vmem>>, %arg7: memref<8x256xf32, #tpu.memory_space<vmem>>, %arg8: memref<8x256xf32, #tpu.memory_space<vmem>>) attributes {dimension_semantics = [#tpu.dimension_semantics<parallel>, #tpu.dimension_semantics<parallel>, #tpu.dimension_semantics<arbitrary>], iteration_bounds = array<i64: 1, 2, 1>, scalar_prefetch = 0 : i64, scratch_operands = 1 : i64, tpu.core_type = #tpu.core_type<tc>, window_params = [{transform_indices = @transform_0, window_bounds = array<i64: 8, 256>}, {transform_indices = @transform_1, window_bounds = array<i64: 256, 256>}, {transform_indices = @transform_2, window_bounds = array<i64: 1, 256>}, {transform_indices = @transform_3, window_bounds = array<i64: 1, 256>}, {transform_indices = @transform_4, window_bounds = array<i64: 8, 256>}]} {
    %c0_i32 = arith.constant 0 : i32
    %0 = arith.cmpi eq, %arg2, %c0_i32 : i32
    %1 = arith.extui %0 : i1 to i32
    %c0_i32_0 = arith.constant 0 : i32
    %2 = arith.cmpi ne, %1, %c0_i32_0 : i32
    scf.if %2 {
      %cst_10 = arith.constant 0.000000e+00 : f32
      %12 = vector.broadcast %cst_10 : f32 to vector<8x256xf32>
      %c0_11 = arith.constant 0 : index
      %c0_12 = arith.constant 0 : index
      %13 = vector.load %arg8[%c0_11, %c0_12] : memref<8x256xf32, #tpu.memory_space<vmem>>, vector<8x256xf32>
      tpu.vector_store %arg8[%c0_11, %c0_12], %12 {strides = array<i32>} : memref<8x256xf32, #tpu.memory_space<vmem>>, vector<8x256xf32>,
    } else {
    }
    %c0 = arith.constant 0 : index
    %c0_1 = arith.constant 0 : index
    %3 = vector.load %arg8[%c0, %c0_1] : memref<8x256xf32, #tpu.memory_space<vmem>>, vector<8x256xf32>
    %c0_2 = arith.constant 0 : index
    %c0_3 = arith.constant 0 : index
    %4 = vector.load %arg3[%c0_2, %c0_3] : memref<8x256xbf16, #tpu.memory_space<vmem>>, vector<8x256xbf16>
    %c0_4 = arith.constant 0 : index
    %c0_5 = arith.constant 0 : index
    %5 = vector.load %arg4[%c0_4, %c0_5] : memref<256x256xbf16, #tpu.memory_space<vmem>>, vector<256x256xbf16>
    %cst = arith.constant dense<0.000000e+00> : vector<8x256xf32>
    %6 = tpu.matmul %4, %5, %cst {dimension_numbers = #tpu.dot_dimension_numbers<[1], [0], [0], [1], [0, 0, 1, 1], [], []>} : vector<8x256xbf16>, vector<256x256xbf16>, vector<8x256xf32> -> vector<8x256xf32>
    %7 = arith.addf %3, %6 : vector<8x256xf32>
    %c0_6 = arith.constant 0 : index
    %c0_7 = arith.constant 0 : index
    %8 = vector.load %arg8[%c0_6, %c0_7] : memref<8x256xf32, #tpu.memory_space<vmem>>, vector<8x256xf32>
    tpu.vector_store %arg8[%c0_6, %c0_7], %7 {strides = array<i32>} : memref<8x256xf32, #tpu.memory_space<vmem>>, vector<8x256xf32>,
    %c0_i32_8 = arith.constant 0 : i32
    %9 = arith.cmpi eq, %arg2, %c0_i32_8 : i32
    %10 = arith.extui %9 : i1 to i32
    %c0_i32_9 = arith.constant 0 : i32
    %11 = arith.cmpi ne, %10, %c0_i32_9 : i32
    scf.if %11 {
      %c0_10 = arith.constant 0 : index
      %c0_11 = arith.constant 0 : index
      %12 = vector.load %arg8[%c0_10, %c0_11] : memref<8x256xf32, #tpu.memory_space<vmem>>, vector<8x256xf32>
      %c0_12 = arith.constant 0 : index
      %c0_13 = arith.constant 0 : index
      %13 = vector.load %arg5[%c0_12, %c0_13] : memref<1x256xf32, #tpu.memory_space<vmem>>, vector<1x256xf32>
      %14 = vector.broadcast %13 : vector<1x256xf32> to vector<8x256xf32>
      %15 = arith.mulf %12, %14 : vector<8x256xf32>
      %c0_14 = arith.constant 0 : index
      %c0_15 = arith.constant 0 : index
      %16 = vector.load %arg6[%c0_14, %c0_15] : memref<1x256xf32, #tpu.memory_space<vmem>>, vector<1x256xf32>
      %17 = vector.broadcast %16 : vector<1x256xf32> to vector<8x256xf32>
      %18 = arith.addf %15, %17 : vector<8x256xf32>
      %c0_16 = arith.constant 0 : index
      %c0_17 = arith.constant 0 : index
      %19 = vector.load %arg7[%c0_16, %c0_17] : memref<8x256xf32, #tpu.memory_space<vmem>>, vector<8x256xf32>
      tpu.vector_store %arg7[%c0_16, %c0_17], %18 {strides = array<i32>} : memref<8x256xf32, #tpu.memory_space<vmem>>, vector<8x256xf32>,
    } else {
    }
    return
  }
  func.func @transform_0(%arg0: i32, %arg1: i32, %arg2: i32) -> (i32, i32) {
    %c0_i32 = arith.constant 0 : i32
    return %arg0, %arg2 : i32, i32
  }
  func.func @transform_1(%arg0: i32, %arg1: i32, %arg2: i32) -> (i32, i32) {
    %c0_i32 = arith.constant 0 : i32
    return %arg2, %arg1 : i32, i32
  }
  func.func @transform_2(%arg0: i32, %arg1: i32, %arg2: i32) -> (i32, i32) {
    %c0_i32 = arith.constant 0 : i32
    %c0_i32_0 = arith.constant 0 : i32
    return %c0_i32, %arg1 : i32, i32
  }
  func.func @transform_3(%arg0: i32, %arg1: i32, %arg2: i32) -> (i32, i32) {
    %c0_i32 = arith.constant 0 : i32
    %c0_i32_0 = arith.constant 0 : i32
    return %c0_i32, %arg1 : i32, i32
  }
  func.func @transform_4(%arg0: i32, %arg1: i32, %arg2: i32) -> (i32, i32) {
    %c0_i32 = arith.constant 0 : i32
    return %arg0, %arg1 : i32, i32
  }
}

module attributes {stable_mosaic.version = 11 : i64} {
  func.func @_matmul_affine_kernel(%arg0: i32, %arg1: i32, %arg2: i32, %arg3: memref<8x256xbf16, #tpu.memory_space<vmem>>, %arg4: memref<256x256xbf16, #tpu.memory_space<vmem>>, %arg5: memref<1x256xf32, #tpu.memory_space<vmem>>, %arg6: memref<1x256xf32, #tpu.memory_space<vmem>>, %arg7: memref<8x256xf32, #tpu.memory_space<vmem>>, %arg8: memref<8x256xf32, #tpu.memory_space<vmem>>, %arg9: memref<8x256xf32, #tpu.memory_space<vmem>>) attributes {dimension_semantics = [#tpu.dimension_semantics<parallel>, #tpu.dimension_semantics<parallel>, #tpu.dimension_semantics<arbitrary>], iteration_bounds = array<i64: 1, 2, 18>, scalar_prefetch = 0 : i64, scratch_operands = 1 : i64, tpu.core_type = #tpu.core_type<tc>, window_params = [{transform_indices = @transform_0, window_bounds = array<i64: 8, 256>}, {transform_indices = @transform_1, window_bounds = array<i64: 256, 256>}, {transform_indices = @transform_2, window_bounds = array<i64: 1, 256>}, {transform_indices = @transform_3, window_bounds = array<i64: 1, 256>}, {transform_indices = @transform_4, window_bounds = array<i64: 8, 256>}, {transform_indices = @transform_5, window_bounds = array<i64: 8, 256>}]} {
    %c0_i32 = arith.constant 0 : i32
    %0 = arith.cmpi eq, %arg2, %c0_i32 : i32
    %1 = arith.extui %0 : i1 to i32
    %c0_i32_0 = arith.constant 0 : i32
    %2 = arith.cmpi ne, %1, %c0_i32_0 : i32
    scf.if %2 {
      %cst_9 = arith.constant 0.000000e+00 : f32
      %12 = vector.broadcast %cst_9 : f32 to vector<8x256xf32>
      %c0_10 = arith.constant 0 : index
      %c0_11 = arith.constant 0 : index
      %13 = vector.load %arg9[%c0_10, %c0_11] : memref<8x256xf32, #tpu.memory_space<vmem>>, vector<8x256xf32>
      tpu.vector_store %arg9[%c0_10, %c0_11], %12 {strides = array<i32>} : memref<8x256xf32, #tpu.memory_space<vmem>>, vector<8x256xf32>,
    } else {
    }
    %c0 = arith.constant 0 : index
    %c0_1 = arith.constant 0 : index
    %3 = vector.load %arg9[%c0, %c0_1] : memref<8x256xf32, #tpu.memory_space<vmem>>, vector<8x256xf32>
    %c0_2 = arith.constant 0 : index
    %c0_3 = arith.constant 0 : index
    %4 = vector.load %arg3[%c0_2, %c0_3] : memref<8x256xbf16, #tpu.memory_space<vmem>>, vector<8x256xbf16>
    %c0_4 = arith.constant 0 : index
    %c0_5 = arith.constant 0 : index
    %5 = vector.load %arg4[%c0_4, %c0_5] : memref<256x256xbf16, #tpu.memory_space<vmem>>, vector<256x256xbf16>
    %cst = arith.constant dense<0.000000e+00> : vector<8x256xf32>
    %6 = tpu.matmul %4, %5, %cst {dimension_numbers = #tpu.dot_dimension_numbers<[1], [0], [0], [1], [0, 0, 1, 1], [], []>} : vector<8x256xbf16>, vector<256x256xbf16>, vector<8x256xf32> -> vector<8x256xf32>
    %7 = arith.addf %3, %6 : vector<8x256xf32>
    %c0_6 = arith.constant 0 : index
    %c0_7 = arith.constant 0 : index
    %8 = vector.load %arg9[%c0_6, %c0_7] : memref<8x256xf32, #tpu.memory_space<vmem>>, vector<8x256xf32>
    tpu.vector_store %arg9[%c0_6, %c0_7], %7 {strides = array<i32>} : memref<8x256xf32, #tpu.memory_space<vmem>>, vector<8x256xf32>,
    %c17_i32 = arith.constant 17 : i32
    %9 = arith.cmpi eq, %arg2, %c17_i32 : i32
    %10 = arith.extui %9 : i1 to i32
    %c0_i32_8 = arith.constant 0 : i32
    %11 = arith.cmpi ne, %10, %c0_i32_8 : i32
    scf.if %11 {
      %c0_9 = arith.constant 0 : index
      %c0_10 = arith.constant 0 : index
      %12 = vector.load %arg9[%c0_9, %c0_10] : memref<8x256xf32, #tpu.memory_space<vmem>>, vector<8x256xf32>
      %c0_11 = arith.constant 0 : index
      %c0_12 = arith.constant 0 : index
      %13 = vector.load %arg5[%c0_11, %c0_12] : memref<1x256xf32, #tpu.memory_space<vmem>>, vector<1x256xf32>
      %14 = vector.broadcast %13 : vector<1x256xf32> to vector<8x256xf32>
      %15 = arith.mulf %12, %14 : vector<8x256xf32>
      %c0_13 = arith.constant 0 : index
      %c0_14 = arith.constant 0 : index
      %16 = vector.load %arg6[%c0_13, %c0_14] : memref<1x256xf32, #tpu.memory_space<vmem>>, vector<1x256xf32>
      %17 = vector.broadcast %16 : vector<1x256xf32> to vector<8x256xf32>
      %18 = arith.addf %15, %17 : vector<8x256xf32>
      %c0_15 = arith.constant 0 : index
      %c0_16 = arith.constant 0 : index
      %19 = vector.load %arg7[%c0_15, %c0_16] : memref<8x256xf32, #tpu.memory_space<vmem>>, vector<8x256xf32>
      %20 = arith.addf %18, %19 : vector<8x256xf32>
      %cst_17 = arith.constant 0.000000e+00 : f32
      %21 = vector.broadcast %cst_17 : f32 to vector<8x256xf32>
      %22 = arith.maximumf %20, %21 : vector<8x256xf32>
      %c0_18 = arith.constant 0 : index
      %c0_19 = arith.constant 0 : index
      %23 = vector.load %arg8[%c0_18, %c0_19] : memref<8x256xf32, #tpu.memory_space<vmem>>, vector<8x256xf32>
      tpu.vector_store %arg8[%c0_18, %c0_19], %22 {strides = array<i32>} : memref<8x256xf32, #tpu.memory_space<vmem>>, vector<8x256xf32>,
    } else {
    }
    return
  }
  func.func @transform_0(%arg0: i32, %arg1: i32, %arg2: i32) -> (i32, i32) {
    %c0_i32 = arith.constant 0 : i32
    return %arg0, %arg2 : i32, i32
  }
  func.func @transform_1(%arg0: i32, %arg1: i32, %arg2: i32) -> (i32, i32) {
    %c0_i32 = arith.constant 0 : i32
    return %arg2, %arg1 : i32, i32
  }
  func.func @transform_2(%arg0: i32, %arg1: i32, %arg2: i32) -> (i32, i32) {
    %c0_i32 = arith.constant 0 : i32
    %c0_i32_0 = arith.constant 0 : i32
    return %c0_i32, %arg1 : i32, i32
  }
  func.func @transform_3(%arg0: i32, %arg1: i32, %arg2: i32) -> (i32, i32) {
    %c0_i32 = arith.constant 0 : i32
    %c0_i32_0 = arith.constant 0 : i32
    return %c0_i32, %arg1 : i32, i32
  }
  func.func @transform_4(%arg0: i32, %arg1: i32, %arg2: i32) -> (i32, i32) {
    %c0_i32 = arith.constant 0 : i32
    return %arg0, %arg1 : i32, i32
  }
  func.func @transform_5(%arg0: i32, %arg1: i32, %arg2: i32) -> (i32, i32) {
    %c0_i32 = arith.constant 0 : i32
    return %arg0, %arg1 : i32, i32
  }
}

module attributes {stable_mosaic.version = 11 : i64} {
  func.func @_matmul_affine_kernel(%arg0: i32, %arg1: i32, %arg2: i32, %arg3: memref<8x256xbf16, #tpu.memory_space<vmem>>, %arg4: memref<256x256xbf16, #tpu.memory_space<vmem>>, %arg5: memref<1x256xf32, #tpu.memory_space<vmem>>, %arg6: memref<1x256xf32, #tpu.memory_space<vmem>>, %arg7: memref<8x256xf32, #tpu.memory_space<vmem>>, %arg8: memref<8x256xf32, #tpu.memory_space<vmem>>) attributes {dimension_semantics = [#tpu.dimension_semantics<parallel>, #tpu.dimension_semantics<parallel>, #tpu.dimension_semantics<arbitrary>], iteration_bounds = array<i64: 1, 2, 18>, scalar_prefetch = 0 : i64, scratch_operands = 1 : i64, tpu.core_type = #tpu.core_type<tc>, window_params = [{transform_indices = @transform_0, window_bounds = array<i64: 8, 256>}, {transform_indices = @transform_1, window_bounds = array<i64: 256, 256>}, {transform_indices = @transform_2, window_bounds = array<i64: 1, 256>}, {transform_indices = @transform_3, window_bounds = array<i64: 1, 256>}, {transform_indices = @transform_4, window_bounds = array<i64: 8, 256>}]} {
    %c0_i32 = arith.constant 0 : i32
    %0 = arith.cmpi eq, %arg2, %c0_i32 : i32
    %1 = arith.extui %0 : i1 to i32
    %c0_i32_0 = arith.constant 0 : i32
    %2 = arith.cmpi ne, %1, %c0_i32_0 : i32
    scf.if %2 {
      %cst_9 = arith.constant 0.000000e+00 : f32
      %12 = vector.broadcast %cst_9 : f32 to vector<8x256xf32>
      %c0_10 = arith.constant 0 : index
      %c0_11 = arith.constant 0 : index
      %13 = vector.load %arg8[%c0_10, %c0_11] : memref<8x256xf32, #tpu.memory_space<vmem>>, vector<8x256xf32>
      tpu.vector_store %arg8[%c0_10, %c0_11], %12 {strides = array<i32>} : memref<8x256xf32, #tpu.memory_space<vmem>>, vector<8x256xf32>,
    } else {
    }
    %c0 = arith.constant 0 : index
    %c0_1 = arith.constant 0 : index
    %3 = vector.load %arg8[%c0, %c0_1] : memref<8x256xf32, #tpu.memory_space<vmem>>, vector<8x256xf32>
    %c0_2 = arith.constant 0 : index
    %c0_3 = arith.constant 0 : index
    %4 = vector.load %arg3[%c0_2, %c0_3] : memref<8x256xbf16, #tpu.memory_space<vmem>>, vector<8x256xbf16>
    %c0_4 = arith.constant 0 : index
    %c0_5 = arith.constant 0 : index
    %5 = vector.load %arg4[%c0_4, %c0_5] : memref<256x256xbf16, #tpu.memory_space<vmem>>, vector<256x256xbf16>
    %cst = arith.constant dense<0.000000e+00> : vector<8x256xf32>
    %6 = tpu.matmul %4, %5, %cst {dimension_numbers = #tpu.dot_dimension_numbers<[1], [0], [0], [1], [0, 0, 1, 1], [], []>} : vector<8x256xbf16>, vector<256x256xbf16>, vector<8x256xf32> -> vector<8x256xf32>
    %7 = arith.addf %3, %6 : vector<8x256xf32>
    %c0_6 = arith.constant 0 : index
    %c0_7 = arith.constant 0 : index
    %8 = vector.load %arg8[%c0_6, %c0_7] : memref<8x256xf32, #tpu.memory_space<vmem>>, vector<8x256xf32>
    tpu.vector_store %arg8[%c0_6, %c0_7], %7 {strides = array<i32>} : memref<8x256xf32, #tpu.memory_space<vmem>>, vector<8x256xf32>,
    %c17_i32 = arith.constant 17 : i32
    %9 = arith.cmpi eq, %arg2, %c17_i32 : i32
    %10 = arith.extui %9 : i1 to i32
    %c0_i32_8 = arith.constant 0 : i32
    %11 = arith.cmpi ne, %10, %c0_i32_8 : i32
    scf.if %11 {
      %c0_9 = arith.constant 0 : index
      %c0_10 = arith.constant 0 : index
      %12 = vector.load %arg8[%c0_9, %c0_10] : memref<8x256xf32, #tpu.memory_space<vmem>>, vector<8x256xf32>
      %c0_11 = arith.constant 0 : index
      %c0_12 = arith.constant 0 : index
      %13 = vector.load %arg5[%c0_11, %c0_12] : memref<1x256xf32, #tpu.memory_space<vmem>>, vector<1x256xf32>
      %14 = vector.broadcast %13 : vector<1x256xf32> to vector<8x256xf32>
      %15 = arith.mulf %12, %14 : vector<8x256xf32>
      %c0_13 = arith.constant 0 : index
      %c0_14 = arith.constant 0 : index
      %16 = vector.load %arg6[%c0_13, %c0_14] : memref<1x256xf32, #tpu.memory_space<vmem>>, vector<1x256xf32>
      %17 = vector.broadcast %16 : vector<1x256xf32> to vector<8x256xf32>
      %18 = arith.addf %15, %17 : vector<8x256xf32>
      %cst_15 = arith.constant 0.000000e+00 : f32
      %19 = vector.broadcast %cst_15 : f32 to vector<8x256xf32>
      %20 = arith.maximumf %18, %19 : vector<8x256xf32>
      %c0_16 = arith.constant 0 : index
      %c0_17 = arith.constant 0 : index
      %21 = vector.load %arg7[%c0_16, %c0_17] : memref<8x256xf32, #tpu.memory_space<vmem>>, vector<8x256xf32>
      tpu.vector_store %arg7[%c0_16, %c0_17], %20 {strides = array<i32>} : memref<8x256xf32, #tpu.memory_space<vmem>>, vector<8x256xf32>,
    } else {
    }
    return
  }
  func.func @transform_0(%arg0: i32, %arg1: i32, %arg2: i32) -> (i32, i32) {
    %c0_i32 = arith.constant 0 : i32
    return %arg0, %arg2 : i32, i32
  }
  func.func @transform_1(%arg0: i32, %arg1: i32, %arg2: i32) -> (i32, i32) {
    %c0_i32 = arith.constant 0 : i32
    return %arg2, %arg1 : i32, i32
  }
  func.func @transform_2(%arg0: i32, %arg1: i32, %arg2: i32) -> (i32, i32) {
    %c0_i32 = arith.constant 0 : i32
    %c0_i32_0 = arith.constant 0 : i32
    return %c0_i32, %arg1 : i32, i32
  }
  func.func @transform_3(%arg0: i32, %arg1: i32, %arg2: i32) -> (i32, i32) {
    %c0_i32 = arith.constant 0 : i32
    %c0_i32_0 = arith.constant 0 : i32
    return %c0_i32, %arg1 : i32, i32
  }
  func.func @transform_4(%arg0: i32, %arg1: i32, %arg2: i32) -> (i32, i32) {
    %c0_i32 = arith.constant 0 : i32
    return %arg0, %arg1 : i32, i32
  }
}

module attributes {stable_mosaic.version = 11 : i64} {
  func.func @_gap_kernel(%arg0: i32, %arg1: memref<2x1x512xf32, #tpu.memory_space<vmem>>, %arg2: memref<2x512xf32, #tpu.memory_space<vmem>>) attributes {dimension_semantics = [#tpu.dimension_semantics<arbitrary>], iteration_bounds = array<i64: 1>, scalar_prefetch = 0 : i64, scratch_operands = 0 : i64, tpu.core_type = #tpu.core_type<tc>, window_params = [{pipeline_mode = #tpu.pipeline_mode<synchronous>, transform_indices = @transform_0, window_bounds = array<i64: 2, 1, 512>}, {pipeline_mode = #tpu.pipeline_mode<synchronous>, transform_indices = @transform_1, window_bounds = array<i64: 2, 512>}]} {
    %c0 = arith.constant 0 : index
    %c0_0 = arith.constant 0 : index
    %c0_1 = arith.constant 0 : index
    %0 = vector.load %arg1[%c0, %c0_0, %c0_1] : memref<2x1x512xf32, #tpu.memory_space<vmem>>, vector<2x1x512xf32>
    %cst = arith.constant dense<0.000000e+00> : vector<2x512xf32>
    %1 = vector.multi_reduction <add>, %0, %cst [1] : vector<2x1x512xf32> to vector<2x512xf32>
    %cst_2 = arith.constant 1.000000e+00 : f32
    %2 = vector.broadcast %cst_2 : f32 to vector<2x512xf32>
    %3 = arith.divf %1, %2 : vector<2x512xf32>
    %c0_3 = arith.constant 0 : index
    %c0_4 = arith.constant 0 : index
    %4 = vector.load %arg2[%c0_3, %c0_4] : memref<2x512xf32, #tpu.memory_space<vmem>>, vector<2x512xf32>
    tpu.vector_store %arg2[%c0_3, %c0_4], %3 {strides = array<i32>} : memref<2x512xf32, #tpu.memory_space<vmem>>, vector<2x512xf32>,
    return
  }
  func.func @transform_0(%arg0: i32) -> (i32, i32, i32) {
    %c0_i32 = arith.constant 0 : i32
    %c0_i32_0 = arith.constant 0 : i32
    %c0_i32_1 = arith.constant 0 : i32
    %c0_i32_2 = arith.constant 0 : i32
    return %c0_i32, %c0_i32_0, %c0_i32_1 : i32, i32, i32
  }
  func.func @transform_1(%arg0: i32) -> (i32, i32) {
    %c0_i32 = arith.constant 0 : i32
    %c0_i32_0 = arith.constant 0 : i32
    %c0_i32_1 = arith.constant 0 : i32
    return %c0_i32, %c0_i32_0 : i32, i32
  }
}

module attributes {stable_mosaic.version = 11 : i64} {
  func.func @_matmul_affine_kernel(%arg0: i32, %arg1: i32, %arg2: i32, %arg3: memref<8x256xbf16, #tpu.memory_space<vmem>>, %arg4: memref<256x256xbf16, #tpu.memory_space<vmem>>, %arg5: memref<1x256xf32, #tpu.memory_space<vmem>>, %arg6: memref<1x256xf32, #tpu.memory_space<vmem>>, %arg7: memref<8x256xf32, #tpu.memory_space<vmem>>, %arg8: memref<8x256xf32, #tpu.memory_space<vmem>>) attributes {dimension_semantics = [#tpu.dimension_semantics<parallel>, #tpu.dimension_semantics<parallel>, #tpu.dimension_semantics<arbitrary>], iteration_bounds = array<i64: 1, 1, 2>, scalar_prefetch = 0 : i64, scratch_operands = 1 : i64, tpu.core_type = #tpu.core_type<tc>, window_params = [{transform_indices = @transform_0, window_bounds = array<i64: 8, 256>}, {transform_indices = @transform_1, window_bounds = array<i64: 256, 256>}, {transform_indices = @transform_2, window_bounds = array<i64: 1, 256>}, {transform_indices = @transform_3, window_bounds = array<i64: 1, 256>}, {transform_indices = @transform_4, window_bounds = array<i64: 8, 256>}]} {
    %c0_i32 = arith.constant 0 : i32
    %0 = arith.cmpi eq, %arg2, %c0_i32 : i32
    %1 = arith.extui %0 : i1 to i32
    %c0_i32_0 = arith.constant 0 : i32
    %2 = arith.cmpi ne, %1, %c0_i32_0 : i32
    scf.if %2 {
      %cst_9 = arith.constant 0.000000e+00 : f32
      %12 = vector.broadcast %cst_9 : f32 to vector<8x256xf32>
      %c0_10 = arith.constant 0 : index
      %c0_11 = arith.constant 0 : index
      %13 = vector.load %arg8[%c0_10, %c0_11] : memref<8x256xf32, #tpu.memory_space<vmem>>, vector<8x256xf32>
      tpu.vector_store %arg8[%c0_10, %c0_11], %12 {strides = array<i32>} : memref<8x256xf32, #tpu.memory_space<vmem>>, vector<8x256xf32>,
    } else {
    }
    %c0 = arith.constant 0 : index
    %c0_1 = arith.constant 0 : index
    %3 = vector.load %arg8[%c0, %c0_1] : memref<8x256xf32, #tpu.memory_space<vmem>>, vector<8x256xf32>
    %c0_2 = arith.constant 0 : index
    %c0_3 = arith.constant 0 : index
    %4 = vector.load %arg3[%c0_2, %c0_3] : memref<8x256xbf16, #tpu.memory_space<vmem>>, vector<8x256xbf16>
    %c0_4 = arith.constant 0 : index
    %c0_5 = arith.constant 0 : index
    %5 = vector.load %arg4[%c0_4, %c0_5] : memref<256x256xbf16, #tpu.memory_space<vmem>>, vector<256x256xbf16>
    %cst = arith.constant dense<0.000000e+00> : vector<8x256xf32>
    %6 = tpu.matmul %4, %5, %cst {dimension_numbers = #tpu.dot_dimension_numbers<[1], [0], [0], [1], [0, 0, 1, 1], [], []>} : vector<8x256xbf16>, vector<256x256xbf16>, vector<8x256xf32> -> vector<8x256xf32>
    %7 = arith.addf %3, %6 : vector<8x256xf32>
    %c0_6 = arith.constant 0 : index
    %c0_7 = arith.constant 0 : index
    %8 = vector.load %arg8[%c0_6, %c0_7] : memref<8x256xf32, #tpu.memory_space<vmem>>, vector<8x256xf32>
    tpu.vector_store %arg8[%c0_6, %c0_7], %7 {strides = array<i32>} : memref<8x256xf32, #tpu.memory_space<vmem>>, vector<8x256xf32>,
    %c1_i32 = arith.constant 1 : i32
    %9 = arith.cmpi eq, %arg2, %c1_i32 : i32
    %10 = arith.extui %9 : i1 to i32
    %c0_i32_8 = arith.constant 0 : i32
    %11 = arith.cmpi ne, %10, %c0_i32_8 : i32
    scf.if %11 {
      %c0_9 = arith.constant 0 : index
      %c0_10 = arith.constant 0 : index
      %12 = vector.load %arg8[%c0_9, %c0_10] : memref<8x256xf32, #tpu.memory_space<vmem>>, vector<8x256xf32>
      %c0_11 = arith.constant 0 : index
      %c0_12 = arith.constant 0 : index
      %13 = vector.load %arg5[%c0_11, %c0_12] : memref<1x256xf32, #tpu.memory_space<vmem>>, vector<1x256xf32>
      %14 = vector.broadcast %13 : vector<1x256xf32> to vector<8x256xf32>
      %15 = arith.mulf %12, %14 : vector<8x256xf32>
      %c0_13 = arith.constant 0 : index
      %c0_14 = arith.constant 0 : index
      %16 = vector.load %arg6[%c0_13, %c0_14] : memref<1x256xf32, #tpu.memory_space<vmem>>, vector<1x256xf32>
      %17 = vector.broadcast %16 : vector<1x256xf32> to vector<8x256xf32>
      %18 = arith.addf %15, %17 : vector<8x256xf32>
      %c0_15 = arith.constant 0 : index
      %c0_16 = arith.constant 0 : index
      %19 = vector.load %arg7[%c0_15, %c0_16] : memref<8x256xf32, #tpu.memory_space<vmem>>, vector<8x256xf32>
      tpu.vector_store %arg7[%c0_15, %c0_16], %18 {strides = array<i32>} : memref<8x256xf32, #tpu.memory_space<vmem>>, vector<8x256xf32>,
    } else {
    }
    return
  }
  func.func @transform_0(%arg0: i32, %arg1: i32, %arg2: i32) -> (i32, i32) {
    %c0_i32 = arith.constant 0 : i32
    return %arg0, %arg2 : i32, i32
  }
  func.func @transform_1(%arg0: i32, %arg1: i32, %arg2: i32) -> (i32, i32) {
    %c0_i32 = arith.constant 0 : i32
    return %arg2, %arg1 : i32, i32
  }
  func.func @transform_2(%arg0: i32, %arg1: i32, %arg2: i32) -> (i32, i32) {
    %c0_i32 = arith.constant 0 : i32
    %c0_i32_0 = arith.constant 0 : i32
    return %c0_i32, %arg1 : i32, i32
  }
  func.func @transform_3(%arg0: i32, %arg1: i32, %arg2: i32) -> (i32, i32) {
    %c0_i32 = arith.constant 0 : i32
    %c0_i32_0 = arith.constant 0 : i32
    return %c0_i32, %arg1 : i32, i32
  }
  func.func @transform_4(%arg0: i32, %arg1: i32, %arg2: i32) -> (i32, i32) {
    %c0_i32 = arith.constant 0 : i32
    return %arg0, %arg1 : i32, i32
  }
}

</mosaic_0001>

<bundles_post_ra>
// kernel: resnet34_forward.40
= control target key start
LH: loop header
LB: loop body
LE: loop exit
PB: predicated region body
PF: predicated region fallthrough
CT: control target
= control target key end

     0   :  { %s406_s0 = inlined_call_operand.vmem [shape: f32[9,64,128], index: 0, kind: input, shape index: {}]   ;;  %s407_s1 = inlined_call_operand.vmem [shape: f32[64,128], index: 1, kind: output, shape index: {}]  }
   0x1   :  { %v8_v0 = vld [vmem:[%s406_s0] sm:$0xff]  ;;  %v9_v6 = vld [vmem:[%s406_s0 + $0x8] sm:$0xff]  ;;  %v10_v15 = vld [vmem:[%s406_s0 + $0x10] sm:$0xff] }
   0x2   :  { %v16_v1 = vld [vmem:[%s406_s0 + $0x40] sm:$0xff]  ;;  %v17_v7 = vld [vmem:[%s406_s0 + $0x48] sm:$0xff]  ;;  %v18_v16 = vld [vmem:[%s406_s0 + $0x50] sm:$0xff] }
   0x3   :  { %v24_v2 = vld [vmem:[%s406_s0 + $0x80] sm:$0xff]  ;;  %v80_v3 = vmax.f32 %v8_v0, %v16_v1  ;;  %v25_v8 = vld [vmem:[%s406_s0 + $0x88] sm:$0xff]  ;;  %v88_v10 = vmax.f32 %v9_v6, %v17_v7  ;;  %v26_v17 = vld [vmem:[%s406_s0 + $0x90] sm:$0xff]  ;;  %v96_v20 = vmax.f32 %v10_v15, %v18_v16 }
   0x4   :  { %v32_v4 = vld [vmem:[%s406_s0 + $0xc0] sm:$0xff]  ;;  %v33_v13 = vld [vmem:[%s406_s0 + $0xc8] sm:$0xff]  ;;  %v34_v24 = vld [vmem:[%s406_s0 + $0xd0] sm:$0xff] }
   0x5   :  { %v81_v5 = vmax.f32 %v80_v3, %v24_v2  ;;  %v40_v9 = vld [vmem:[%s406_s0 + $0x100] sm:$0xff]  ;;  %v89_v14 = vmax.f32 %v88_v10, %v25_v8  ;;  %v41_v19 = vld [vmem:[%s406_s0 + $0x108] sm:$0xff]  ;;  %v97_v26 = vmax.f32 %v96_v20, %v26_v17  ;;  %v11_v27 = vld [vmem:[%s406_s0 + $0x18] sm:$0xff] }
   0x6   :  { %v48_v11 = vld [vmem:[%s406_s0 + $0x140] sm:$0xff]  ;;  %v49_v22 = vld [vmem:[%s406_s0 + $0x148] sm:$0xff]  ;;  %v19_v28 = vld [vmem:[%s406_s0 + $0x58] sm:$0xff] }
   0x7   :  { %v82_v12 = vmax.f32 %v81_v5, %v32_v4  ;;  %v56_v21 = vld [vmem:[%s406_s0 + $0x180] sm:$0xff]  ;;  %v90_v23 = vmax.f32 %v89_v14, %v33_v13  ;;  %v27_v29 = vld [vmem:[%s406_s0 + $0x98] sm:$0xff]  ;;  %v42_v33 = vld [vmem:[%s406_s0 + $0x110] sm:$0xff]  ;;  %v104_v34 = vmax.f32 %v11_v27, %v19_v28  ;;  %v98_v38 = vmax.f32 %v97_v26, %v34_v24 }
   0x8   :  { %v64_v30 = vld [vmem:[%s406_s0 + $0x1c0] sm:$0xff]  ;;  %v57_v36 = vld [vmem:[%s406_s0 + $0x188] sm:$0xff]  ;;  %v50_v37 = vld [vmem:[%s406_s0 + $0x150] sm:$0xff] }
   0x9   :  { %v83_v18 = vmax.f32 %v82_v12, %v40_v9  ;;  %v72_v31 = vld [vmem:[%s406_s0 + $0x200] sm:$0xff]  ;;  %v91_v32 = vmax.f32 %v90_v23, %v41_v19  ;;  %v35_v39 = vld [vmem:[%s406_s0 + $0xd8] sm:$0xff]  ;;  %v105_v41 = vmax.f32 %v104_v34, %v27_v29  ;;  %v65_v46 = vld [vmem:[%s406_s0 + $0x1c8] sm:$0xff]  ;;  %v99_v48 = vmax.f32 %v98_v38, %v42_v33 }
   0xa   :  { %v12_v42 = vld [vmem:[%s406_s0 + $0x20] sm:$0xff]  ;;  %v73_v47 = vld [vmem:[%s406_s0 + $0x208] sm:$0xff]  ;;  %v43_v49 = vld [vmem:[%s406_s0 + $0x118] sm:$0xff] }
   0xb   :  { %v84_v25 = vmax.f32 %v83_v18, %v48_v11  ;;  %v92_v40 = vmax.f32 %v91_v32, %v49_v22  ;;  %v20_v43 = vld [vmem:[%s406_s0 + $0x60] sm:$0xff]  ;;  %v58_v52 = vld [vmem:[%s406_s0 + $0x190] sm:$0xff]  ;;  %v51_v53 = vld [vmem:[%s406_s0 + $0x158] sm:$0xff]  ;;  %v106_v54 = vmax.f32 %v105_v41, %v35_v39  ;;  %v100_v57 = vmax.f32 %v99_v48, %v50_v37 }
   0xc   :  { %v28_v44 = vld [vmem:[%s406_s0 + $0xa0] sm:$0xff]  ;;  %v112_v50 = vmax.f32 %v12_v42, %v20_v43  ;;  %v13_v59 = vld [vmem:[%s406_s0 + $0x28] sm:$0xff]  ;;  %v66_v63 = vld [vmem:[%s406_s0 + $0x1d0] sm:$0xff] }
   0xd   :  { %v85_v35 = vmax.f32 %v84_v25, %v56_v21  ;;  %v93_v51 = vmax.f32 %v92_v40, %v57_v36  ;;  %v36_v55 = vld [vmem:[%s406_s0 + $0xe0] sm:$0xff]  ;;  %v21_v60 = vld [vmem:[%s406_s0 + $0x68] sm:$0xff]  ;;  %v74_v0 = vld [vmem:[%s406_s0 + $0x210] sm:$0xff]  ;;  %v107_v1 = vmax.f32 %v106_v54, %v43_v49  ;;  %v101_v4 = vmax.f32 %v100_v57, %v58_v52 }
   0xe   :  { %v113_v58 = vmax.f32 %v112_v50, %v28_v44  ;;  %v29_v61 = vld [vmem:[%s406_s0 + $0xa8] sm:$0xff]  ;;  %v44_v2 = vld [vmem:[%s406_s0 + $0x120] sm:$0xff]  ;;  %v120_v3 = vmax.f32 %v13_v59, %v21_v60  ;;  %v59_v5 = vld [vmem:[%s406_s0 + $0x198] sm:$0xff] }
   0xf   :  { %v86_v45 = vmax.f32 %v85_v35, %v64_v30  ;;  %v94_v62 = vmax.f32 %v93_v51, %v65_v46  ;;  %v52_v6 = vld [vmem:[%s406_s0 + $0x160] sm:$0xff]  ;;  %v37_v8 = vld [vmem:[%s406_s0 + $0xe8] sm:$0xff]  ;;  %v108_v10 = vmax.f32 %v107_v1, %v51_v53  ;;  %v14_v12 = vld [vmem:[%s406_s0 + $0x30] sm:$0xff]  ;;  %v102_v15 = vmax.f32 %v101_v4, %v66_v63 }
  0x10   :  { %v114_v7 = vmax.f32 %v113_v58, %v36_v55  ;;  %v121_v11 = vmax.f32 %v120_v3, %v29_v61  ;;  %v22_v13 = vld [vmem:[%s406_s0 + $0x70] sm:$0xff]  ;;  %v67_v16 = vld [vmem:[%s406_s0 + $0x1d8] sm:$0xff]  ;;  %v45_v19 = vld [vmem:[%s406_s0 + $0x128] sm:$0xff] }
  0x11   :  { %v87_v56 = vmax.f32 %v86_v45, %v72_v31  ;;  %v95_v9 = vmax.f32 %v94_v62, %v73_v47  ;;  %v30_v14 = vld [vmem:[%s406_s0 + $0xb0] sm:$0xff]  ;;  %v75_v17 = vld [vmem:[%s406_s0 + $0x218] sm:$0xff]  ;;  %v128_v20 = vmax.f32 %v14_v12, %v22_v13  ;;  %v109_v21 = vmax.f32 %v108_v10, %v59_v5  ;;  %v60_v22 = vld [vmem:[%s406_s0 + $0x1a0] sm:$0xff] }
  0x12   :  { %v115_v18 = vmax.f32 %v114_v7, %v44_v2  ;;  %v53_v23 = vld [vmem:[%s406_s0 + $0x168] sm:$0xff]  ;;  %v122_v24 = vmax.f32 %v121_v11, %v37_v8  ;;  %v38_v25 = vld [vmem:[%s406_s0 + $0xf0] sm:$0xff]  ;;  %v103_v26 = vmax.f32 %v102_v15, %v74_v0  ;;  %v15_v29 = vld [vmem:[%s406_s0 + $0x38] sm:$0xff] }
  0x13   :  { %144 = vst [vmem:[%s407_s1] sm:$0xff] %v87_v56  ;;  %145 = vst [vmem:[%s407_s1 + $0x8] sm:$0xff] %v95_v9  ;;  %v129_v28 = vmax.f32 %v128_v20, %v30_v14  ;;  %v23_v30 = vld [vmem:[%s406_s0 + $0x78] sm:$0xff]  ;;  %v110_v32 = vmax.f32 %v109_v21, %v67_v16  ;;  %v68_v33 = vld [vmem:[%s406_s0 + $0x1e0] sm:$0xff] }
  0x14   :  { %v116_v27 = vmax.f32 %v115_v18, %v52_v6  ;;  %v31_v31 = vld [vmem:[%s406_s0 + $0xb8] sm:$0xff]  ;;  %v123_v34 = vmax.f32 %v122_v24, %v45_v19  ;;  %v46_v35 = vld [vmem:[%s406_s0 + $0x130] sm:$0xff]  ;;  %v136_v36 = vmax.f32 %v15_v29, %v23_v30  ;;  %146 = vst [vmem:[%s407_s1 + $0x10] sm:$0xff] %v103_v26  ;;  %v61_v38 = vld [vmem:[%s406_s0 + $0x1a8] sm:$0xff] }
  0x15   :  { %v130_v39 = vmax.f32 %v129_v28, %v38_v25  ;;  %v39_v40 = vld [vmem:[%s406_s0 + $0xf8] sm:$0xff]  ;;  %v111_v41 = vmax.f32 %v110_v32, %v75_v17  ;;  %v76_v42 = vld [vmem:[%s406_s0 + $0x220] sm:$0xff]  ;;  %v54_v44 = vld [vmem:[%s406_s0 + $0x170] sm:$0xff] }
  0x16   :  { %v117_v37 = vmax.f32 %v116_v27, %v60_v22  ;;  %v124_v43 = vmax.f32 %v123_v34, %v53_v23  ;;  %v137_v45 = vmax.f32 %v136_v36, %v31_v31  ;;  %v69_v47 = vld [vmem:[%s406_s0 + $0x1e8] sm:$0xff]  ;;  %v47_v49 = vld [vmem:[%s406_s0 + $0x138] sm:$0xff]  ;;  %v62_v51 = vld [vmem:[%s406_s0 + $0x1b0] sm:$0xff] }
  0x17   :  { %v131_v48 = vmax.f32 %v130_v39, %v46_v35  ;;  %147 = vst [vmem:[%s407_s1 + $0x18] sm:$0xff] %v111_v41  ;;  %v77_v54 = vld [vmem:[%s406_s0 + $0x228] sm:$0xff]  ;;  %v55_v56 = vld [vmem:[%s406_s0 + $0x178] sm:$0xff]  ;;  %v70_v58 = vld [vmem:[%s406_s0 + $0x1f0] sm:$0xff] }
  0x18   :  { %v118_v46 = vmax.f32 %v117_v37, %v68_v33  ;;  %v125_v50 = vmax.f32 %v124_v43, %v61_v38  ;;  %v138_v52 = vmax.f32 %v137_v45, %v39_v40  ;;  %v63_v61 = vld [vmem:[%s406_s0 + $0x1b8] sm:$0xff]  ;;  %v78_v63 = vld [vmem:[%s406_s0 + $0x230] sm:$0xff] }
  0x19   :  { %v132_v55 = vmax.f32 %v131_v48, %v54_v44  ;;  %v71_v2 = vld [vmem:[%s406_s0 + $0x1f8] sm:$0xff] }
  0x1a   :  { %v119_v53 = vmax.f32 %v118_v46, %v76_v42  ;;  %v126_v57 = vmax.f32 %v125_v50, %v69_v47  ;;  %v139_v59 = vmax.f32 %v138_v52, %v47_v49  ;;  %v79_v5 = vld [vmem:[%s406_s0 + $0x238] sm:$0xff] }
  0x1b   :  { %v133_v60 = vmax.f32 %v132_v55, %v62_v51 }
  0x1c   :  { %148 = vst [vmem:[%s407_s1 + $0x20] sm:$0xff] %v119_v53  ;;  %v127_v62 = vmax.f32 %v126_v57, %v77_v54  ;;  %v140_v0 = vmax.f32 %v139_v59, %v55_v56 }
  0x1d   :  { %v134_v1 = vmax.f32 %v133_v60, %v70_v58 }
  0x1e   :  { %149 = vst [vmem:[%s407_s1 + $0x28] sm:$0xff] %v127_v62  ;;  %v141_v3 = vmax.f32 %v140_v0, %v63_v61 }
  0x1f   :  { %v135_v4 = vmax.f32 %v134_v1, %v78_v63 }
  0x20   :  { %v142_v6 = vmax.f32 %v141_v3, %v71_v2 }
  0x21   :  { %150 = vst [vmem:[%s407_s1 + $0x30] sm:$0xff] %v135_v4 }
  0x22   :  { %v143_v7 = vmax.f32 %v142_v6, %v79_v5 }
  0x24   :  { %151 = vst [vmem:[%s407_s1 + $0x38] sm:$0xff] %v143_v7 }

// kernel: resnet34_forward.39
= control target key start
LH: loop header
LB: loop body
LE: loop exit
PB: predicated region body
PF: predicated region fallthrough
CT: control target
= control target key end

     0   :  { %s1556_s15 = smov 0   ;;  %s1558_s16 = smov 0   ;;  %s1786_s0 = inlined_call_operand.vmem [shape: bf16[512,256], index: 0, kind: input, shape index: {}]   ;;  %s1787_s1 = inlined_call_operand.vmem [shape: bf16[256,128], index: 1, kind: input, shape index: {}]   ;;  %s1788_s2 = inlined_call_operand.vmem [shape: f32[1,128], index: 2, kind: input, shape index: {}]   ;;  %s1789_s3 = inlined_call_operand.vmem [shape: f32[1,128], index: 3, kind: input, shape index: {}]   ;;  %s1790_s4 = inlined_call_operand.vmem [shape: f32[512,128], index: 4, kind: output, shape index: {}]  }
   0x1   :  { %s1560_s17 = smov 0  }
   0x2 LB: > { %s33_s18 = sadd.s32 1, %s1525_s16  ;;  %p1232_p0 = scmp.ge.s32.totalorder %s1529_s17, 1  ;;  %s1529_s17 = sphi %s1560_s17, %s14_s17   ;;  %s1525_s16 = sphi %s1558_s16, %s1792_s16   ;;  %s1521_s15 = sphi %s1556_s15, %s1791_s15  }
   0x3   : > { %p35_p1 = scmp.ge.s32.totalorder %s33_s18, 2  ;;  %p224_p2 = scmp.lt.s32.totalorder %s1529_s17, 3 }
   0x5   : > { %s1794_s18 = smov (%p35_p1, %s33_s18), 0  ;;  %p225_p3 = pnand %p1232_p0, %p224_p2 }
   0x6   : > { %v1443_v0 = vld [vmem:[%s1787_s1 + $0x40] sm:$0xff] (!%p225_p3)   ;;  %s1233_s21 = sshll.u32 (!%p225_p3), %s1521_s15, 5  ;;  %v1445_v2 = vld [vmem:[%s1787_s1 + $0x48] sm:$0xff] (!%p225_p3)   ;;  %v1447_v4 = vld [vmem:[%s1787_s1 + $0x50] sm:$0xff] (!%p225_p3)  }
   0x7   : > { %228 = sbr.rel (%p225_p3) target bundleno = 320 (0x140), region = 36  ;;  %v1444_v1 = vld [vmem:[%s1787_s1] sm:$0xff] (!%p225_p3)   ;;  %1291 = vmatprep.subr.bf16.mxu0 (!%p225_p3), %v1443_v0  ;;  %1403 = vmatprep.subr.bf16.mxu1 (!%p225_p3), %v1443_v0  ;;  %v1446_v3 = vld [vmem:[%s1787_s1 + $0x8] sm:$0xff] (!%p225_p3)   ;;  %p274_p4 = scmp.lt.s32.totalorder (!%p225_p3), %s1233_s21, 63  ;;  %v1448_v5 = vld [vmem:[%s1787_s1 + $0x10] sm:$0xff] (!%p225_p3)  }
   0x8   : > { %1292 = vmatpush3.bf16.msra.mxu0 (!%p225_p3), %v1444_v1  ;;  %1411 = vmatpush3.bf16.msra.mxu1 (!%p225_p3), %v1444_v1  ;;  %v1449_v6 = vld [vmem:[%s1787_s1 + $0x58] sm:$0xff] (!%p225_p3)   ;;  %v1451_v8 = vld [vmem:[%s1787_s1 + $0x60] sm:$0xff] (!%p225_p3)   ;;  %v1453_v10 = vld [vmem:[%s1787_s1 + $0x68] sm:$0xff] (!%p225_p3)  }
   0x9   : > { %1293 = vmatprep.subr.bf16.mxu0 (!%p225_p3), %v1445_v2  ;;  %1404 = vmatprep.subr.bf16.mxu1 (!%p225_p3), %v1445_v2  ;;  %v1450_v7 = vld [vmem:[%s1787_s1 + $0x18] sm:$0xff] (!%p225_p3)   ;;  %v1452_v9 = vld [vmem:[%s1787_s1 + $0x20] sm:$0xff] (!%p225_p3)   ;;  %v1454_v13 = vld [vmem:[%s1787_s1 + $0x28] sm:$0xff] (!%p225_p3)  }
   0xa   : > { %v1455_v14 = vld [vmem:[%s1787_s1 + $0x70] sm:$0xff] (!%p225_p3)   ;;  %v1457_v16 = vld [vmem:[%s1787_s1 + $0x78] sm:$0xff] (!%p225_p3)   ;;  %v1667_v51 = vld [vmem:[%s1788_s2] ss:$0 sm:$0xff] (!%p225_p3) }
   0xb   : > { %v1456_v15 = vld [vmem:[%s1787_s1 + $0x30] sm:$0xff] (!%p225_p3)   ;;  %v1458_v17 = vld [vmem:[%s1787_s1 + $0x38] sm:$0xff] (!%p225_p3)   ;;  %v1672_v57 = vld [vmem:[%s1789_s3] ss:$0 sm:$0xff] (!%p225_p3) }
   0xc   : > { %1294 = vmatpush3.bf16.msra.mxu0 (!%p225_p3), %v1446_v3  ;;  %1412 = vmatpush3.bf16.msra.mxu1 (!%p225_p3), %v1446_v3 }
   0xd   : > { %1295 = vmatprep.subr.bf16.mxu0 (!%p225_p3), %v1447_v4  ;;  %1405 = vmatprep.subr.bf16.mxu1 (!%p225_p3), %v1447_v4 }
   0xe   : > { %s1796_s21 = smov (!%p274_p4, %s1233_s21), 63 }
   0xf   : > { %s1290_s10 = sshll.u32 %s1796_s21, 3 }
  0x10   : > { %1296 = vmatpush3.bf16.msra.mxu0 %v1448_v5  ;;  %1413 = vmatpush3.bf16.msra.mxu1 %v1448_v5  ;;  %s1609_s15 = scalar_lea.vmem %s1786_s0, %s1290_s10 }
  0x11   : > { %1297 = vmatprep.subr.bf16.mxu0 %v1449_v6  ;;  %1406 = vmatprep.subr.bf16.mxu1 %v1449_v6  ;;  %v1461_v11 = vld [vmem:[%s1609_s15 + $0x4] ss:$8 sps:$4 sm:$0xff]   ;;  %v1459_v18 = vld [vmem:[%s1609_s15] ss:$8 sps:$4 sm:$0xff]   ;;  %v1465_v20 = vld [vmem:[%s1609_s15 + $0x14] ss:$8 sps:$4 sm:$0xff]  }
  0x12   : > { %v1464_v12 = vld [vmem:[%s1609_s15 + $0x84] ss:$8 sps:$4 sm:$0xff]   ;;  %729 = vmatprep.mubr.bf16.mxu0 %v1461_v11  ;;  %v1462_v19 = vld [vmem:[%s1609_s15 + $0x80] ss:$8 sps:$4 sm:$0xff]   ;;  %v1467_v21 = vld [vmem:[%s1609_s15 + $0x94] ss:$8 sps:$4 sm:$0xff]  }
  0x13   : > { %793 = vmatprep.mubr.bf16.mxu1 %v1464_v12  ;;  %v1469_v22 = vld [vmem:[%s1609_s15 + $0x10] ss:$8 sps:$4 sm:$0xff]   ;;  %v1471_v24 = vld [vmem:[%s1609_s15 + $0x24] ss:$8 sps:$4 sm:$0xff]   ;;  %v1475_v26 = vld [vmem:[%s1609_s15 + $0x20] ss:$8 sps:$4 sm:$0xff]  }
  0x14   : > { %1298 = vmatpush3.bf16.msra.mxu0 %v1450_v7  ;;  %1414 = vmatpush3.bf16.msra.mxu1 %v1450_v7  ;;  %v1470_v23 = vld [vmem:[%s1609_s15 + $0x90] ss:$8 sps:$4 sm:$0xff]   ;;  %v1473_v25 = vld [vmem:[%s1609_s15 + $0xa4] ss:$8 sps:$4 sm:$0xff]   ;;  %v1476_v27 = vld [vmem:[%s1609_s15 + $0xa0] ss:$8 sps:$4 sm:$0xff]  }
  0x15   : > { %1299 = vmatprep.subr.bf16.mxu0 %v1451_v8  ;;  %1407 = vmatprep.subr.bf16.mxu1 %v1451_v8  ;;  %v1477_v28 = vld [vmem:[%s1609_s15 + $0x34] ss:$8 sps:$4 sm:$0xff]   ;;  %v1481_v30 = vld [vmem:[%s1609_s15 + $0x30] ss:$8 sps:$4 sm:$0xff]   ;;  %v1483_v32 = vld [vmem:[%s1609_s15 + $0x44] ss:$8 sps:$4 sm:$0xff]  }
  0x16   : > { %v1479_v29 = vld [vmem:[%s1609_s15 + $0xb4] ss:$8 sps:$4 sm:$0xff]   ;;  %v1482_v31 = vld [vmem:[%s1609_s15 + $0xb0] ss:$8 sps:$4 sm:$0xff]   ;;  %v1485_v33 = vld [vmem:[%s1609_s15 + $0xc4] ss:$8 sps:$4 sm:$0xff]  }
  0x17   : > { %v1487_v34 = vld [vmem:[%s1609_s15 + $0x40] ss:$8 sps:$4 sm:$0xff]   ;;  %v1489_v36 = vld [vmem:[%s1609_s15 + $0x54] ss:$8 sps:$4 sm:$0xff]   ;;  %v1493_v38 = vld [vmem:[%s1609_s15 + $0x50] ss:$8 sps:$4 sm:$0xff]  }
  0x18   : > { %1300 = vmatpush3.bf16.msra.mxu0 %v1452_v9  ;;  %1415 = vmatpush3.bf16.msra.mxu1 %v1452_v9  ;;  %v1488_v35 = vld [vmem:[%s1609_s15 + $0xc0] ss:$8 sps:$4 sm:$0xff]   ;;  %v1491_v37 = vld [vmem:[%s1609_s15 + $0xd4] ss:$8 sps:$4 sm:$0xff]   ;;  %v1494_v39 = vld [vmem:[%s1609_s15 + $0xd0] ss:$8 sps:$4 sm:$0xff]  }
  0x19   : > { %1301 = vmatprep.subr.bf16.mxu0 %v1453_v10  ;;  %1408 = vmatprep.subr.bf16.mxu1 %v1453_v10  ;;  %v1495_v40 = vld [vmem:[%s1609_s15 + $0x64] ss:$8 sps:$4 sm:$0xff]   ;;  %v1499_v42 = vld [vmem:[%s1609_s15 + $0x60] ss:$8 sps:$4 sm:$0xff]   ;;  %v1501_v44 = vld [vmem:[%s1609_s15 + $0x74] ss:$8 sps:$4 sm:$0xff]  }
  0x1a   : > { %v1497_v41 = vld [vmem:[%s1609_s15 + $0xe4] ss:$8 sps:$4 sm:$0xff]   ;;  %v1500_v43 = vld [vmem:[%s1609_s15 + $0xe0] ss:$8 sps:$4 sm:$0xff]   ;;  %v1503_v45 = vld [vmem:[%s1609_s15 + $0xf4] ss:$8 sps:$4 sm:$0xff]  }
  0x1b   : > { %v1505_v46 = vld [vmem:[%s1609_s15 + $0x70] ss:$8 sps:$4 sm:$0xff]  }
  0x1c   : > { %1302 = vmatpush3.bf16.msra.mxu0 %v1454_v13  ;;  %1416 = vmatpush3.bf16.msra.mxu1 %v1454_v13  ;;  %v1506_v47 = vld [vmem:[%s1609_s15 + $0xf0] ss:$8 sps:$4 sm:$0xff]   ;;  %s1685_s15 = scalar_lea.vmem %s1790_s4, %s1290_s10 }
  0x1d   : > { %1303 = vmatprep.subr.bf16.mxu0 %v1455_v14  ;;  %1409 = vmatprep.subr.bf16.mxu1 %v1455_v14 }
  0x20   : > { %1304 = vmatpush3.bf16.msra.mxu0 %v1456_v15  ;;  %1417 = vmatpush3.bf16.msra.mxu1 %v1456_v15 }
  0x21   : > { %1305 = vmatprep.subr.bf16.mxu0 %v1457_v16  ;;  %1410 = vmatprep.subr.bf16.mxu1 %v1457_v16 }
  0x24   : > { %1306 = vmatpush3.bf16.msra.mxu0 %v1458_v17  ;;  %1418 = vmatpush3.bf16.msra.mxu1 %v1458_v17 }
  0x27   : > { %730 = vmatmul.mubr.bf16.vlgmr.msra.gmra.mrb[0].mxu0 %v1459_v18  ;;  %794 = vmatmul.mubr.bf16.vlgmr.msra.gmra.mrb[0].mxu1 %v1462_v19 }
  0x28   : > { %737 = vmatprep.mubr.bf16.mxu0 %v1465_v20  ;;  %801 = vmatprep.mubr.bf16.mxu1 %v1467_v21 }
  0x2f   : > { %738 = vmatmul.mubr.bf16.gmra.mrb[4].mxu0 %v1469_v22  ;;  %802 = vmatmul.mubr.bf16.gmra.mrb[4].mxu1 %v1470_v23 }
  0x30   : > { %745 = vmatprep.mubr.bf16.mxu0 %v1471_v24  ;;  %809 = vmatprep.mubr.bf16.mxu1 %v1473_v25 }
  0x37   : > { %746 = vmatmul.mubr.bf16.gmra.mrb[8].mxu0 %v1475_v26  ;;  %810 = vmatmul.mubr.bf16.gmra.mrb[8].mxu1 %v1476_v27 }
  0x38   : > { %753 = vmatprep.mubr.bf16.mxu0 %v1477_v28  ;;  %817 = vmatprep.mubr.bf16.mxu1 %v1479_v29 }
  0x3f   : > { %754 = vmatmul.mubr.bf16.gmra.mrb[12].mxu0 %v1481_v30  ;;  %818 = vmatmul.mubr.bf16.gmra.mrb[12].mxu1 %v1482_v31 }
  0x40   : > { %761 = vmatprep.mubr.bf16.mxu0 %v1483_v32  ;;  %825 = vmatprep.mubr.bf16.mxu1 %v1485_v33 }
  0x47   : > { %762 = vmatmul.mubr.bf16.gmra.mrb[16].mxu0 %v1487_v34  ;;  %826 = vmatmul.mubr.bf16.gmra.mrb[16].mxu1 %v1488_v35 }
  0x48   : > { %769 = vmatprep.mubr.bf16.mxu0 %v1489_v36  ;;  %833 = vmatprep.mubr.bf16.mxu1 %v1491_v37 }
  0x4f   : > { %770 = vmatmul.mubr.bf16.gmra.mrb[20].mxu0 %v1493_v38  ;;  %834 = vmatmul.mubr.bf16.gmra.mrb[20].mxu1 %v1494_v39 }
  0x50   : > { %777 = vmatprep.mubr.bf16.mxu0 %v1495_v40  ;;  %841 = vmatprep.mubr.bf16.mxu1 %v1497_v41 }
  0x57   : > { %778 = vmatmul.mubr.bf16.gmra.mrb[24].mxu0 %v1499_v42  ;;  %842 = vmatmul.mubr.bf16.gmra.mrb[24].mxu1 %v1500_v43 }
  0x58   : > { %785 = vmatprep.mubr.bf16.mxu0 %v1501_v44  ;;  %849 = vmatprep.mubr.bf16.mxu1 %v1503_v45 }
  0x5f   : > { %786 = vmatmul.mubr.bf16.gmra.mrb[28].mxu0 %v1505_v46  ;;  %850 = vmatmul.mubr.bf16.gmra.mrb[28].mxu1 %v1506_v47 }
  0xfa   : > { %v1307_v48 = vpop.f32.mrb[0].mxu0  ;;  %v1355_v49 = vpop.f32.mrb[0].mxu1 }
  0xfb   : > { %v1308_v50 = vpop.f32.mrb[1].mxu0  ;;  %v1356_v52 = vpop.f32.mrb[1].mxu1 }
  0xfc   : > { %v1309_v53 = vadd.f32 %v1308_v50, %v1307_v48  ;;  %v1357_v54 = vadd.f32 %v1356_v52, %v1355_v49  ;;  %v1310_v55 = vpop.f32.mrb[2].mxu0  ;;  %v1358_v56 = vpop.f32.mrb[2].mxu1 }
  0xfd   : > { %v1311_v58 = vpop.f32.mrb[3].mxu0  ;;  %v1359_v59 = vpop.f32.mrb[3].mxu1 }
  0xfe   : > { %v964_v60 = vmul.f32 %v1309_v53, %v1667_v51  ;;  %v980_v61 = vmul.f32 %v1357_v54, %v1667_v51  ;;  %v1312_v62 = vadd.f32 %v1311_v58, %v1310_v55  ;;  %v1360_v63 = vadd.f32 %v1359_v59, %v1358_v56 }
 0x100   : > { %v1003_v0 = vadd.f32 %v1672_v57, %v964_v60  ;;  %v1019_v1 = vadd.f32 %v1672_v57, %v980_v61  ;;  %v965_v2 = vmul.f32 %v1312_v62, %v1667_v51  ;;  %v981_v3 = vmul.f32 %v1360_v63, %v1667_v51 }
 0x102   : > { %v1035_v4 = vmax.f32 %v1003_v0, 0.0  ;;  %v1051_v5 = vmax.f32 %v1019_v1, 0.0  ;;  %v1004_v6 = vadd.f32 %v1672_v57, %v965_v2  ;;  %v1020_v7 = vadd.f32 %v1672_v57, %v981_v3  ;;  %v1313_v8 = vpop.f32.mrb[4].mxu0  ;;  %v1361_v9 = vpop.f32.mrb[4].mxu1 }
 0x103   : > { %v1314_v10 = vpop.f32.mrb[5].mxu0  ;;  %v1362_v11 = vpop.f32.mrb[5].mxu1 }
 0x104   : > { %1067 = vst [vmem:[%s1685_s15] sm:$0xff] %v1035_v4  ;;  %1083 = vst [vmem:[%s1685_s15 + $0x80] sm:$0xff] %v1051_v5  ;;  %v1036_v12 = vmax.f32 %v1004_v6, 0.0  ;;  %v1052_v13 = vmax.f32 %v1020_v7, 0.0  ;;  %v1315_v14 = vadd.f32 %v1314_v10, %v1313_v8  ;;  %v1363_v15 = vadd.f32 %v1362_v11, %v1361_v9  ;;  %v1316_v16 = vpop.f32.mrb[6].mxu0  ;;  %v1364_v17 = vpop.f32.mrb[6].mxu1 }
 0x105   : > { %v1317_v18 = vpop.f32.mrb[7].mxu0  ;;  %v1365_v19 = vpop.f32.mrb[7].mxu1 }
 0x106   : > { %1068 = vst [vmem:[%s1685_s15 + $0x8] sm:$0xff] %v1036_v12  ;;  %1084 = vst [vmem:[%s1685_s15 + $0x88] sm:$0xff] %v1052_v13  ;;  %v966_v20 = vmul.f32 %v1315_v14, %v1667_v51  ;;  %v982_v21 = vmul.f32 %v1363_v15, %v1667_v51  ;;  %v1318_v22 = vadd.f32 %v1317_v18, %v1316_v16 }
 0x107   : > { %v1366_v23 = vadd.f32 %v1365_v19, %v1364_v17 }
 0x108   : > { %v1005_v24 = vadd.f32 %v1672_v57, %v966_v20  ;;  %v1021_v25 = vadd.f32 %v1672_v57, %v982_v21  ;;  %v967_v26 = vmul.f32 %v1318_v22, %v1667_v51 }
 0x109   : > { %v983_v27 = vmul.f32 %v1366_v23, %v1667_v51 }
 0x10a   : > { %v1037_v28 = vmax.f32 %v1005_v24, 0.0  ;;  %v1053_v29 = vmax.f32 %v1021_v25, 0.0  ;;  %v1006_v30 = vadd.f32 %v1672_v57, %v967_v26  ;;  %v1319_v32 = vpop.f32.mrb[8].mxu0  ;;  %v1367_v33 = vpop.f32.mrb[8].mxu1 }
 0x10b   : > { %v1022_v31 = vadd.f32 %v1672_v57, %v983_v27  ;;  %v1320_v34 = vpop.f32.mrb[9].mxu0  ;;  %v1368_v35 = vpop.f32.mrb[9].mxu1 }
 0x10c   : > { %1069 = vst [vmem:[%s1685_s15 + $0x10] sm:$0xff] %v1037_v28  ;;  %1085 = vst [vmem:[%s1685_s15 + $0x90] sm:$0xff] %v1053_v29  ;;  %v1038_v36 = vmax.f32 %v1006_v30, 0.0  ;;  %v1321_v38 = vadd.f32 %v1320_v34, %v1319_v32  ;;  %v1369_v39 = vadd.f32 %v1368_v35, %v1367_v33  ;;  %v1322_v40 = vpop.f32.mrb[10].mxu0  ;;  %v1370_v41 = vpop.f32.mrb[10].mxu1 }
 0x10d   : > { %v1054_v37 = vmax.f32 %v1022_v31, 0.0  ;;  %v1323_v42 = vpop.f32.mrb[11].mxu0  ;;  %v1371_v43 = vpop.f32.mrb[11].mxu1 }
 0x10e   : > { %1070 = vst [vmem:[%s1685_s15 + $0x18] sm:$0xff] %v1038_v36  ;;  %v968_v44 = vmul.f32 %v1321_v38, %v1667_v51  ;;  %v984_v45 = vmul.f32 %v1369_v39, %v1667_v51  ;;  %v1324_v46 = vadd.f32 %v1323_v42, %v1322_v40  ;;  %v1372_v47 = vadd.f32 %v1371_v43, %v1370_v41 }
 0x10f   : > { %1086 = vst [vmem:[%s1685_s15 + $0x98] sm:$0xff] %v1054_v37 }
 0x110   : > { %v1007_v48 = vadd.f32 %v1672_v57, %v968_v44  ;;  %v1023_v49 = vadd.f32 %v1672_v57, %v984_v45  ;;  %v969_v50 = vmul.f32 %v1324_v46, %v1667_v51  ;;  %v985_v52 = vmul.f32 %v1372_v47, %v1667_v51 }
 0x112   : > { %v1039_v53 = vmax.f32 %v1007_v48, 0.0  ;;  %v1055_v54 = vmax.f32 %v1023_v49, 0.0  ;;  %v1008_v55 = vadd.f32 %v1672_v57, %v969_v50  ;;  %v1024_v56 = vadd.f32 %v1672_v57, %v985_v52  ;;  %v1325_v58 = vpop.f32.mrb[12].mxu0  ;;  %v1373_v59 = vpop.f32.mrb[12].mxu1 }
 0x113   : > { %v1326_v60 = vpop.f32.mrb[13].mxu0  ;;  %v1374_v61 = vpop.f32.mrb[13].mxu1 }
 0x114   : > { %1071 = vst [vmem:[%s1685_s15 + $0x20] sm:$0xff] %v1039_v53  ;;  %1087 = vst [vmem:[%s1685_s15 + $0xa0] sm:$0xff] %v1055_v54  ;;  %v1040_v62 = vmax.f32 %v1008_v55, 0.0  ;;  %v1056_v63 = vmax.f32 %v1024_v56, 0.0  ;;  %v1327_v0 = vadd.f32 %v1326_v60, %v1325_v58  ;;  %v1375_v1 = vadd.f32 %v1374_v61, %v1373_v59  ;;  %v1328_v2 = vpop.f32.mrb[14].mxu0  ;;  %v1376_v3 = vpop.f32.mrb[14].mxu1 }
 0x115   : > { %v1329_v4 = vpop.f32.mrb[15].mxu0  ;;  %v1377_v5 = vpop.f32.mrb[15].mxu1 }
 0x116   : > { %1072 = vst [vmem:[%s1685_s15 + $0x28] sm:$0xff] %v1040_v62  ;;  %1088 = vst [vmem:[%s1685_s15 + $0xa8] sm:$0xff] %v1056_v63  ;;  %v970_v6 = vmul.f32 %v1327_v0, %v1667_v51  ;;  %v986_v7 = vmul.f32 %v1375_v1, %v1667_v51  ;;  %v1330_v8 = vadd.f32 %v1329_v4, %v1328_v2 }
 0x117   : > { %v1378_v9 = vadd.f32 %v1377_v5, %v1376_v3 }
 0x118   : > { %v1009_v10 = vadd.f32 %v1672_v57, %v970_v6  ;;  %v1025_v11 = vadd.f32 %v1672_v57, %v986_v7  ;;  %v971_v12 = vmul.f32 %v1330_v8, %v1667_v51 }
 0x119   : > { %v987_v13 = vmul.f32 %v1378_v9, %v1667_v51 }
 0x11a   : > { %v1041_v14 = vmax.f32 %v1009_v10, 0.0  ;;  %v1057_v15 = vmax.f32 %v1025_v11, 0.0  ;;  %v1010_v16 = vadd.f32 %v1672_v57, %v971_v12  ;;  %v1331_v18 = vpop.f32.mrb[16].mxu0  ;;  %v1379_v19 = vpop.f32.mrb[16].mxu1 }
 0x11b   : > { %v1026_v17 = vadd.f32 %v1672_v57, %v987_v13  ;;  %v1332_v20 = vpop.f32.mrb[17].mxu0  ;;  %v1380_v21 = vpop.f32.mrb[17].mxu1 }
 0x11c   : > { %1073 = vst [vmem:[%s1685_s15 + $0x30] sm:$0xff] %v1041_v14  ;;  %1089 = vst [vmem:[%s1685_s15 + $0xb0] sm:$0xff] %v1057_v15  ;;  %v1042_v22 = vmax.f32 %v1010_v16, 0.0  ;;  %v1333_v24 = vadd.f32 %v1332_v20, %v1331_v18  ;;  %v1381_v25 = vadd.f32 %v1380_v21, %v1379_v19  ;;  %v1334_v26 = vpop.f32.mrb[18].mxu0  ;;  %v1382_v27 = vpop.f32.mrb[18].mxu1 }
 0x11d   : > { %v1058_v23 = vmax.f32 %v1026_v17, 0.0  ;;  %v1335_v28 = vpop.f32.mrb[19].mxu0  ;;  %v1383_v29 = vpop.f32.mrb[19].mxu1 }
 0x11e   : > { %1074 = vst [vmem:[%s1685_s15 + $0x38] sm:$0xff] %v1042_v22  ;;  %v972_v30 = vmul.f32 %v1333_v24, %v1667_v51  ;;  %v988_v31 = vmul.f32 %v1381_v25, %v1667_v51  ;;  %v1336_v32 = vadd.f32 %v1335_v28, %v1334_v26  ;;  %v1384_v33 = vadd.f32 %v1383_v29, %v1382_v27 }
 0x11f   : > { %1090 = vst [vmem:[%s1685_s15 + $0xb8] sm:$0xff] %v1058_v23 }
 0x120   : > { %v1011_v34 = vadd.f32 %v1672_v57, %v972_v30  ;;  %v1027_v35 = vadd.f32 %v1672_v57, %v988_v31  ;;  %v973_v36 = vmul.f32 %v1336_v32, %v1667_v51  ;;  %v989_v37 = vmul.f32 %v1384_v33, %v1667_v51 }
 0x122   : > { %v1043_v38 = vmax.f32 %v1011_v34, 0.0  ;;  %v1059_v39 = vmax.f32 %v1027_v35, 0.0  ;;  %v1012_v40 = vadd.f32 %v1672_v57, %v973_v36  ;;  %v1028_v41 = vadd.f32 %v1672_v57, %v989_v37  ;;  %v1337_v42 = vpop.f32.mrb[20].mxu0  ;;  %v1385_v43 = vpop.f32.mrb[20].mxu1 }
 0x123   : > { %v1338_v44 = vpop.f32.mrb[21].mxu0  ;;  %v1386_v45 = vpop.f32.mrb[21].mxu1 }
 0x124   : > { %1075 = vst [vmem:[%s1685_s15 + $0x40] sm:$0xff] %v1043_v38  ;;  %1091 = vst [vmem:[%s1685_s15 + $0xc0] sm:$0xff] %v1059_v39  ;;  %v1044_v46 = vmax.f32 %v1012_v40, 0.0  ;;  %v1060_v47 = vmax.f32 %v1028_v41, 0.0  ;;  %v1339_v48 = vadd.f32 %v1338_v44, %v1337_v42  ;;  %v1387_v49 = vadd.f32 %v1386_v45, %v1385_v43  ;;  %v1340_v50 = vpop.f32.mrb[22].mxu0  ;;  %v1388_v52 = vpop.f32.mrb[22].mxu1 }
 0x125   : > { %v1341_v53 = vpop.f32.mrb[23].mxu0  ;;  %v1389_v54 = vpop.f32.mrb[23].mxu1 }
 0x126   : > { %1076 = vst [vmem:[%s1685_s15 + $0x48] sm:$0xff] %v1044_v46  ;;  %1092 = vst [vmem:[%s1685_s15 + $0xc8] sm:$0xff] %v1060_v47  ;;  %v974_v55 = vmul.f32 %v1339_v48, %v1667_v51  ;;  %v990_v56 = vmul.f32 %v1387_v49, %v1667_v51  ;;  %v1342_v58 = vadd.f32 %v1341_v53, %v1340_v50 }
 0x127   : > { %v1390_v59 = vadd.f32 %v1389_v54, %v1388_v52 }
 0x128   : > { %v1013_v60 = vadd.f32 %v1672_v57, %v974_v55  ;;  %v1029_v61 = vadd.f32 %v1672_v57, %v990_v56  ;;  %v975_v62 = vmul.f32 %v1342_v58, %v1667_v51 }
 0x129   : > { %v991_v63 = vmul.f32 %v1390_v59, %v1667_v51 }
 0x12a   : > { %v1045_v0 = vmax.f32 %v1013_v60, 0.0  ;;  %v1061_v1 = vmax.f32 %v1029_v61, 0.0  ;;  %v1014_v2 = vadd.f32 %v1672_v57, %v975_v62  ;;  %v1343_v4 = vpop.f32.mrb[24].mxu0  ;;  %v1391_v5 = vpop.f32.mrb[24].mxu1 }
 0x12b   : > { %v1030_v3 = vadd.f32 %v1672_v57, %v991_v63  ;;  %v1344_v6 = vpop.f32.mrb[25].mxu0  ;;  %v1392_v7 = vpop.f32.mrb[25].mxu1 }
 0x12c   : > { %1077 = vst [vmem:[%s1685_s15 + $0x50] sm:$0xff] %v1045_v0  ;;  %1093 = vst [vmem:[%s1685_s15 + $0xd0] sm:$0xff] %v1061_v1  ;;  %v1046_v8 = vmax.f32 %v1014_v2, 0.0  ;;  %v1345_v10 = vadd.f32 %v1344_v6, %v1343_v4  ;;  %v1393_v11 = vadd.f32 %v1392_v7, %v1391_v5  ;;  %v1346_v12 = vpop.f32.mrb[26].mxu0  ;;  %v1394_v13 = vpop.f32.mrb[26].mxu1 }
 0x12d   : > { %v1062_v9 = vmax.f32 %v1030_v3, 0.0  ;;  %v1347_v14 = vpop.f32.mrb[27].mxu0  ;;  %v1395_v15 = vpop.f32.mrb[27].mxu1 }
 0x12e   : > { %1078 = vst [vmem:[%s1685_s15 + $0x58] sm:$0xff] %v1046_v8  ;;  %v976_v16 = vmul.f32 %v1345_v10, %v1667_v51  ;;  %v992_v17 = vmul.f32 %v1393_v11, %v1667_v51  ;;  %v1348_v18 = vadd.f32 %v1347_v14, %v1346_v12  ;;  %v1396_v19 = vadd.f32 %v1395_v15, %v1394_v13 }
 0x12f   : > { %1094 = vst [vmem:[%s1685_s15 + $0xd8] sm:$0xff] %v1062_v9 }
 0x130   : > { %v1015_v20 = vadd.f32 %v1672_v57, %v976_v16  ;;  %v1031_v21 = vadd.f32 %v1672_v57, %v992_v17  ;;  %v977_v22 = vmul.f32 %v1348_v18, %v1667_v51  ;;  %v993_v23 = vmul.f32 %v1396_v19, %v1667_v51 }
 0x132   : > { %v1047_v24 = vmax.f32 %v1015_v20, 0.0  ;;  %v1063_v25 = vmax.f32 %v1031_v21, 0.0  ;;  %v1016_v26 = vadd.f32 %v1672_v57, %v977_v22  ;;  %v1032_v27 = vadd.f32 %v1672_v57, %v993_v23  ;;  %v1349_v28 = vpop.f32.mrb[28].mxu0  ;;  %v1397_v29 = vpop.f32.mrb[28].mxu1 }
 0x133   : > { %v1350_v30 = vpop.f32.mrb[29].mxu0  ;;  %v1398_v31 = vpop.f32.mrb[29].mxu1 }
 0x134   : > { %1079 = vst [vmem:[%s1685_s15 + $0x60] sm:$0xff] %v1047_v24  ;;  %1095 = vst [vmem:[%s1685_s15 + $0xe0] sm:$0xff] %v1063_v25  ;;  %v1048_v32 = vmax.f32 %v1016_v26, 0.0  ;;  %v1064_v33 = vmax.f32 %v1032_v27, 0.0  ;;  %v1351_v34 = vadd.f32 %v1350_v30, %v1349_v28  ;;  %v1399_v35 = vadd.f32 %v1398_v31, %v1397_v29  ;;  %v1352_v36 = vpop.f32.mrb[30].mxu0  ;;  %v1400_v37 = vpop.f32.mrb[30].mxu1 }
 0x135   : > { %v1353_v38 = vpop.f32.mrb[31].mxu0  ;;  %v1401_v39 = vpop.f32.mrb[31].mxu1 }
 0x136   : > { %1080 = vst [vmem:[%s1685_s15 + $0x68] sm:$0xff] %v1048_v32  ;;  %1096 = vst [vmem:[%s1685_s15 + $0xe8] sm:$0xff] %v1064_v33  ;;  %v978_v40 = vmul.f32 %v1351_v34, %v1667_v51  ;;  %v994_v41 = vmul.f32 %v1399_v35, %v1667_v51  ;;  %v1354_v42 = vadd.f32 %v1353_v38, %v1352_v36 }
 0x137   : > { %v1402_v43 = vadd.f32 %v1401_v39, %v1400_v37 }
 0x138   : > { %v1017_v44 = vadd.f32 %v1672_v57, %v978_v40  ;;  %v1033_v45 = vadd.f32 %v1672_v57, %v994_v41  ;;  %v979_v46 = vmul.f32 %v1354_v42, %v1667_v51 }
 0x139   : > { %v995_v47 = vmul.f32 %v1402_v43, %v1667_v51 }
 0x13a   : > { %v1049_v48 = vmax.f32 %v1017_v44, 0.0  ;;  %v1065_v49 = vmax.f32 %v1033_v45, 0.0  ;;  %v1018_v50 = vadd.f32 %v1672_v57, %v979_v46 }
 0x13b   : > { %v1034_v52 = vadd.f32 %v1672_v57, %v995_v47 }
 0x13c   : > { %1081 = vst [vmem:[%s1685_s15 + $0x70] sm:$0xff] %v1049_v48  ;;  %1097 = vst [vmem:[%s1685_s15 + $0xf0] sm:$0xff] %v1065_v49  ;;  %v1050_v53 = vmax.f32 %v1018_v50, 0.0 }
 0x13d   : > { %v1066_v54 = vmax.f32 %v1034_v52, 0.0 }
 0x13e   : > { %1082 = vst [vmem:[%s1685_s15 + $0x78] sm:$0xff] %v1050_v53 }
 0x13f   : > { %1098 = vst [vmem:[%s1685_s15 + $0xf8] sm:$0xff] %v1066_v54 }
 0x140 PF: > { %s14_s17 = sadd.s32 1, %s1529_s17   ;;  %s1791_s15 = smov %s1525_s16 }
 0x141   : > { %p11_p5 = scmp.ge.s32.totalorder %s14_s17, 4   ;;  %s1792_s16 = smov %s1794_s18 }
 0x143   :  { %13 = sbr.rel (!%p11_p5) target bundleno = 2 (0x2), region = 83 }

// kernel: resnet34_forward.41
= control target key start
LH: loop header
LB: loop body
LE: loop exit
PB: predicated region body
PF: predicated region fallthrough
CT: control target
= control target key end

     0   :  { %s1280_s15 = smov 0   ;;  %s1282_s16 = smov 0   ;;  %s1473_s0 = inlined_call_operand.vmem [shape: bf16[128,768], index: 0, kind: input, shape index: {}]   ;;  %s1474_s1 = inlined_call_operand.vmem [shape: bf16[768,128], index: 1, kind: input, shape index: {}]   ;;  %s1475_s2 = inlined_call_operand.vmem [shape: f32[1,128], index: 2, kind: input, shape index: {}]   ;;  %s1476_s3 = inlined_call_operand.vmem [shape: f32[1,128], index: 3, kind: input, shape index: {}]   ;;  %s1477_s4 = inlined_call_operand.vmem [shape: f32[128,128], index: 4, kind: output, shape index: {}]  }
   0x1   :  { %s1284_s17 = smov 0   ;;  %s1286_s18 = smov 0  }
   0x2   :  { %s1288_s19 = smov 0  }
   0x3 LB: > { %s26_s20 = sadd.s32 1, %s1248_s18  ;;  %p49_p1 = scmp.ne.s32.totalorder %s1240_s16, %s1236_s15  ;;  %s1252_s19 = sphi %s1288_s19, %s14_s19   ;;  %s1248_s18 = sphi %s1286_s18, %s1481_s18   ;;  %s1244_s17 = sphi %s1284_s17, %s1480_s17   ;;  %s1240_s16 = sphi %s1282_s16, %s1479_s16   ;;  %s1236_s15 = sphi %s1280_s15, %s1478_s15  }
   0x4   : > { %p27_p0 = scmp.ge.s32.totalorder %s26_s20, 3  ;;  %p50_p2 = scmp.eq.s32.totalorder %s1252_s19, 0 }
   0x5   : > { %s42_s22 = sadd.s32 1, %s1240_s16  ;;  %p1004_p5 = scmp.ge.s32.totalorder %s1252_s19, 3 }
   0x6   : > { %s1483_s20 = smov (%p27_p0, %s26_s20), 0  ;;  %p51_p3 = por %p50_p2, %p49_p1 }
   0x7   : > { %s38_s21 = ssub.s32 %s1248_s18, %s1483_s20  ;;  %195 = sbr.rel (%p1004_p5) target bundleno = 26 (0x1a), region = 24 }
   0x8   : > { %p40_p4 = scmp.eq.s32.totalorder %s38_s21, 0 }
   0xa   : > { %s1315_s23 = scalar_select %p40_p4, %s1240_s16, %s42_s22  }
   0xe   : > { %198 = sbr.rel (!%p51_p3) target bundleno = 26 (0x1a), region = 28  ;;  %s200_s24 = sand.u32 (%p51_p3), 1, %s1240_s16  }
   0xf   : > { %s1052_s25 = sshll.u32 (%p51_p3), %s1248_s18, 3  ;;  %s1005_s26 = sshll.u32 (%p51_p3), %s200_s24, 7 }
  0x10   : > { %s1323_s29 = scalar_lea.vmem (%p51_p3), %s1473_s0, %s1052_s25  ;;  %s202_s30 = scalar_lea.vmem (%p51_p3), [#allocation3], %s1005_s26 }
  0x11   : > { %v266_v0 = vld [vmem:[%s1323_s29] sm:$0xff] (%p51_p3)  ;;  %v268_v1 = vld [vmem:[%s1323_s29 + $0x18] sm:$0xff] (%p51_p3)  ;;  %v270_v2 = vld [vmem:[%s1323_s29 + $0x30] sm:$0xff] (%p51_p3) }
  0x12   : > { %267 = vst [vmem:[%s202_s30] sm:$0xff] (%p51_p3), %v266_v0  ;;  %269 = vst [vmem:[%s202_s30 + $0x8] sm:$0xff] (%p51_p3), %v268_v1  ;;  %v272_v3 = vld [vmem:[%s1323_s29 + $0x48] sm:$0xff] (%p51_p3)  ;;  %v274_v4 = vld [vmem:[%s1323_s29 + $0x60] sm:$0xff] (%p51_p3) }
  0x13   : > { %271 = vst [vmem:[%s202_s30 + $0x10] sm:$0xff] (%p51_p3), %v270_v2  ;;  %v276_v5 = vld [vmem:[%s1323_s29 + $0x78] sm:$0xff] (%p51_p3)  ;;  %273 = vst [vmem:[%s202_s30 + $0x18] sm:$0xff] (%p51_p3), %v272_v3  ;;  %v278_v6 = vld [vmem:[%s1323_s29 + $0x90] sm:$0xff] (%p51_p3) }
  0x14   : > { %275 = vst [vmem:[%s202_s30 + $0x20] sm:$0xff] (%p51_p3), %v274_v4  ;;  %277 = vst [vmem:[%s202_s30 + $0x28] sm:$0xff] (%p51_p3), %v276_v5  ;;  %v280_v7 = vld [vmem:[%s1323_s29 + $0xa8] sm:$0xff] (%p51_p3)  ;;  %v282_v8 = vld [vmem:[%s1323_s29 + $0xc0] sm:$0xff] (%p51_p3) }
  0x15   : > { %279 = vst [vmem:[%s202_s30 + $0x30] sm:$0xff] %v278_v6  ;;  %281 = vst [vmem:[%s202_s30 + $0x38] sm:$0xff] %v280_v7  ;;  %v284_v9 = vld [vmem:[%s1323_s29 + $0xd8] sm:$0xff]  ;;  %v286_v10 = vld [vmem:[%s1323_s29 + $0xf0] sm:$0xff] }
  0x16   : > { %283 = vst [vmem:[%s202_s30 + $0x40] sm:$0xff] %v282_v8  ;;  %v288_v11 = vld [vmem:[%s1323_s29 + $0x108] sm:$0xff]  ;;  %285 = vst [vmem:[%s202_s30 + $0x48] sm:$0xff] %v284_v9  ;;  %v290_v12 = vld [vmem:[%s1323_s29 + $0x120] sm:$0xff] }
  0x17   : > { %287 = vst [vmem:[%s202_s30 + $0x50] sm:$0xff] %v286_v10  ;;  %289 = vst [vmem:[%s202_s30 + $0x58] sm:$0xff] %v288_v11  ;;  %v292_v13 = vld [vmem:[%s1323_s29 + $0x138] sm:$0xff]  ;;  %v294_v14 = vld [vmem:[%s1323_s29 + $0x150] sm:$0xff] }
  0x18   : > { %291 = vst [vmem:[%s202_s30 + $0x60] sm:$0xff] %v290_v12  ;;  %293 = vst [vmem:[%s202_s30 + $0x68] sm:$0xff] %v292_v13  ;;  %v296_v15 = vld [vmem:[%s1323_s29 + $0x168] sm:$0xff] }
  0x19   : > { %295 = vst [vmem:[%s202_s30 + $0x70] sm:$0xff] %v294_v14  ;;  %297 = vst [vmem:[%s202_s30 + $0x78] sm:$0xff] %v296_v15 }
  0x1a PF: > { %p1008_p6 = scmp.ge.s32.totalorder %s1252_s19, 1  ;;  %p314_p7 = scmp.lt.s32.totalorder %s1252_s19, 4 }
  0x1c   : > { %p315_p8 = pnand %p1008_p6, %p314_p7 }
  0x1d   : > { %s321_s5 = sand.u32 (!%p315_p8), 1, %s1236_s15   ;;  %s1010_s6 = sshll.u32 (!%p315_p8), %s1244_s17, 5 }
  0x1e   : > { %318 = sbr.rel (%p315_p8) target bundleno = 339 (0x153), region = 70  ;;  %s1009_s7 = sshll.u32 (!%p315_p8), %s321_s5, 7 }
  0x1f   : > { %p366_p9 = scmp.lt.s32.totalorder (!%p315_p8), %s1010_s6, 95  ;;  %s1350_s12 = scalar_lea.vmem (!%p315_p8), [#allocation3], %s1009_s7 }
  0x20   : > { %p1012_p10 = scmp.ne.s32.totalorder (!%p315_p8), %s1244_s17, 0 }
  0x25   : > { %s1485_s6 = smov (!%p366_p9, %s1010_s6), 95  ;;  %393 = sbr.rel (%p1012_p10) target bundleno = 47 (0x2f), region = 78 }
  0x26   : > { %s1011_s8 = sshll.u32 %s1485_s6, 2  ;;  %v1254_v16 = vmov (!%p1012_p10), 0.0  }
  0x27   : > { %s1348_s11 = scalar_lea.vmem %s1474_s1, %s1011_s8  ;;  %394 = vst [vmem:[#allocation2] sm:$0xff] (!%p1012_p10), %v1254_v16  ;;  %395 = vst [vmem:[#allocation2 + $0x8] sm:$0xff] (!%p1012_p10), %v1254_v16 }
  0x28   : > { %396 = vst [vmem:[#allocation2 + $0x10] sm:$0xff] (!%p1012_p10), %v1254_v16  ;;  %397 = vst [vmem:[#allocation2 + $0x18] sm:$0xff] (!%p1012_p10), %v1254_v16 }
  0x29   : > { %398 = vst [vmem:[#allocation2 + $0x20] sm:$0xff] (!%p1012_p10), %v1254_v16  ;;  %399 = vst [vmem:[#allocation2 + $0x28] sm:$0xff] (!%p1012_p10), %v1254_v16 }
  0x2a   : > { %400 = vst [vmem:[#allocation2 + $0x30] sm:$0xff] (!%p1012_p10), %v1254_v16  ;;  %401 = vst [vmem:[#allocation2 + $0x38] sm:$0xff] (!%p1012_p10), %v1254_v16 }
  0x2b   : > { %402 = vst [vmem:[#allocation2 + $0x40] sm:$0xff] (!%p1012_p10), %v1254_v16  ;;  %403 = vst [vmem:[#allocation2 + $0x48] sm:$0xff] (!%p1012_p10), %v1254_v16 }
  0x2c   : > { %404 = vst [vmem:[#allocation2 + $0x50] sm:$0xff] %v1254_v16  ;;  %405 = vst [vmem:[#allocation2 + $0x58] sm:$0xff] %v1254_v16 }
  0x2d   : > { %406 = vst [vmem:[#allocation2 + $0x60] sm:$0xff] %v1254_v16  ;;  %407 = vst [vmem:[#allocation2 + $0x68] sm:$0xff] %v1254_v16 }
  0x2e   : > { %408 = vst [vmem:[#allocation2 + $0x70] sm:$0xff] %v1254_v16  ;;  %409 = vst [vmem:[#allocation2 + $0x78] sm:$0xff] %v1254_v16 }
  0x2f PF: > { %v1174_v17 = vld [vmem:[%s1348_s11 + $0x40] sm:$0xff]   ;;  %v1176_v19 = vld [vmem:[%s1348_s11 + $0x48] sm:$0xff]   ;;  %v1178_v21 = vld [vmem:[%s1348_s11 + $0x50] sm:$0xff]   ;;  %p1045_p11 = scmp.ne.s32.totalorder %s1244_s17, 2 }
  0x30   : > { %v1175_v18 = vld [vmem:[%s1348_s11] sm:$0xff]   ;;  %1053 = vmatprep.subr.bf16.mxu0 %v1174_v17  ;;  %1117 = vmatprep.subr.bf16.mxu1 %v1174_v17  ;;  %v1177_v20 = vld [vmem:[%s1348_s11 + $0x8] sm:$0xff]   ;;  %v1179_v22 = vld [vmem:[%s1348_s11 + $0x10] sm:$0xff]  }
  0x31   : > { %1054 = vmatpush3.bf16.msra.mxu0 %v1175_v18  ;;  %1125 = vmatpush3.bf16.msra.mxu1 %v1175_v18  ;;  %v1180_v23 = vld [vmem:[%s1348_s11 + $0x58] sm:$0xff]   ;;  %v1182_v25 = vld [vmem:[%s1348_s11 + $0x60] sm:$0xff]   ;;  %v1184_v27 = vld [vmem:[%s1348_s11 + $0x68] sm:$0xff]  }
  0x32   : > { %1055 = vmatprep.subr.bf16.mxu0 %v1176_v19  ;;  %1118 = vmatprep.subr.bf16.mxu1 %v1176_v19  ;;  %v1181_v24 = vld [vmem:[%s1348_s11 + $0x18] sm:$0xff]   ;;  %v1183_v26 = vld [vmem:[%s1348_s11 + $0x20] sm:$0xff]   ;;  %v1185_v30 = vld [vmem:[%s1348_s11 + $0x28] sm:$0xff]  }
  0x33   : > { %v1192_v28 = vld [vmem:[%s1350_s12 + $0x4] ss:$8 sps:$4 sm:$0xff]   ;;  %v1186_v31 = vld [vmem:[%s1348_s11 + $0x70] sm:$0xff]   ;;  %v1188_v33 = vld [vmem:[%s1348_s11 + $0x78] sm:$0xff]  }
  0x34   : > { %v1195_v29 = vld [vmem:[%s1350_s12 + $0x44] ss:$8 sps:$4 sm:$0xff]   ;;  %682 = vmatprep.mubr.bf16.mxu0 %v1192_v28  ;;  %v1187_v32 = vld [vmem:[%s1348_s11 + $0x30] sm:$0xff]   ;;  %v1189_v34 = vld [vmem:[%s1348_s11 + $0x38] sm:$0xff]  }
  0x35   : > { %1056 = vmatpush3.bf16.msra.mxu0 %v1177_v20  ;;  %1126 = vmatpush3.bf16.msra.mxu1 %v1177_v20  ;;  %v1190_v35 = vld [vmem:[%s1350_s12] ss:$8 sps:$4 sm:$0xff]   ;;  %v1196_v37 = vld [vmem:[%s1350_s12 + $0x14] ss:$8 sps:$4 sm:$0xff]   ;;  %v1200_v39 = vld [vmem:[%s1350_s12 + $0x10] ss:$8 sps:$4 sm:$0xff]  }
  0x36   : > { %1057 = vmatprep.subr.bf16.mxu0 %v1178_v21  ;;  %1119 = vmatprep.subr.bf16.mxu1 %v1178_v21  ;;  %v1193_v36 = vld [vmem:[%s1350_s12 + $0x40] ss:$8 sps:$4 sm:$0xff]   ;;  %v1198_v38 = vld [vmem:[%s1350_s12 + $0x54] ss:$8 sps:$4 sm:$0xff]   ;;  %v1201_v40 = vld [vmem:[%s1350_s12 + $0x50] ss:$8 sps:$4 sm:$0xff]  }
  0x37   : > { %714 = vmatprep.mubr.bf16.mxu1 %v1195_v29  ;;  %v1202_v41 = vld [vmem:[%s1350_s12 + $0x24] ss:$8 sps:$4 sm:$0xff]   ;;  %v1206_v43 = vld [vmem:[%s1350_s12 + $0x20] ss:$8 sps:$4 sm:$0xff]   ;;  %v1208_v45 = vld [vmem:[%s1350_s12 + $0x34] ss:$8 sps:$4 sm:$0xff]  }
  0x38   : > { %v1204_v42 = vld [vmem:[%s1350_s12 + $0x64] ss:$8 sps:$4 sm:$0xff]   ;;  %v1207_v44 = vld [vmem:[%s1350_s12 + $0x60] ss:$8 sps:$4 sm:$0xff]   ;;  %v1210_v46 = vld [vmem:[%s1350_s12 + $0x74] ss:$8 sps:$4 sm:$0xff]  }
  0x39   : > { %1058 = vmatpush3.bf16.msra.mxu0 %v1179_v22  ;;  %1127 = vmatpush3.bf16.msra.mxu1 %v1179_v22  ;;  %v1212_v47 = vld [vmem:[%s1350_s12 + $0x30] ss:$8 sps:$4 sm:$0xff]   ;;  %v410_v51 = vld [vmem:[#allocation2] sm:$0xff]  ;;  %v411_v59 = vld [vmem:[#allocation2 + $0x8] sm:$0xff] }
  0x3a   : > { %1059 = vmatprep.subr.bf16.mxu0 %v1180_v23  ;;  %1120 = vmatprep.subr.bf16.mxu1 %v1180_v23  ;;  %v1213_v48 = vld [vmem:[%s1350_s12 + $0x70] ss:$8 sps:$4 sm:$0xff]   ;;  %v418_v53 = vld [vmem:[#allocation2 + $0x40] sm:$0xff]  ;;  %v419_v61 = vld [vmem:[#allocation2 + $0x48] sm:$0xff] }
  0x3b   : > { %v412_v7 = vld [vmem:[#allocation2 + $0x10] sm:$0xff]  ;;  %v413_v15 = vld [vmem:[#allocation2 + $0x18] sm:$0xff]  ;;  %v422_v29 = vld [vmem:[#allocation2 + $0x60] sm:$0xff] }
  0x3c   : > { %v420_v9 = vld [vmem:[#allocation2 + $0x50] sm:$0xff]  ;;  %v421_v17 = vld [vmem:[#allocation2 + $0x58] sm:$0xff] }
  0x3d   : > { %1060 = vmatpush3.bf16.msra.mxu0 %v1181_v24  ;;  %1128 = vmatpush3.bf16.msra.mxu1 %v1181_v24 }
  0x3e   : > { %1061 = vmatprep.subr.bf16.mxu0 %v1182_v25  ;;  %1121 = vmatprep.subr.bf16.mxu1 %v1182_v25 }
  0x41   : > { %1062 = vmatpush3.bf16.msra.mxu0 %v1183_v26  ;;  %1129 = vmatpush3.bf16.msra.mxu1 %v1183_v26 }
  0x42   : > { %1063 = vmatprep.subr.bf16.mxu0 %v1184_v27  ;;  %1122 = vmatprep.subr.bf16.mxu1 %v1184_v27  ;;  %v414_v27 = vld [vmem:[#allocation2 + $0x20] sm:$0xff] }
  0x45   : > { %1064 = vmatpush3.bf16.msra.mxu0 %v1185_v30  ;;  %1130 = vmatpush3.bf16.msra.mxu1 %v1185_v30 }
  0x46   : > { %1065 = vmatprep.subr.bf16.mxu0 %v1186_v31  ;;  %1123 = vmatprep.subr.bf16.mxu1 %v1186_v31 }
  0x49   : > { %1066 = vmatpush3.bf16.msra.mxu0 %v1187_v32  ;;  %1131 = vmatpush3.bf16.msra.mxu1 %v1187_v32 }
  0x4a   : > { %1067 = vmatprep.subr.bf16.mxu0 %v1188_v33  ;;  %1124 = vmatprep.subr.bf16.mxu1 %v1188_v33 }
  0x4d   : > { %1068 = vmatpush3.bf16.msra.mxu0 %v1189_v34  ;;  %1132 = vmatpush3.bf16.msra.mxu1 %v1189_v34 }
  0x50   : > { %683 = vmatmul.mubr.bf16.vlgmr.msra.gmra.mrb[0].mxu0 %v1190_v35  ;;  %715 = vmatmul.mubr.bf16.vlgmr.msra.gmra.mrb[0].mxu1 %v1193_v36  ;;  %v415_v35 = vld [vmem:[#allocation2 + $0x28] sm:$0xff] }
  0x51   : > { %690 = vmatprep.mubr.bf16.mxu0 %v1196_v37  ;;  %722 = vmatprep.mubr.bf16.mxu1 %v1198_v38  ;;  %v423_v37 = vld [vmem:[#allocation2 + $0x68] sm:$0xff] }
  0x58   : > { %691 = vmatmul.mubr.bf16.gmra.mrb[4].mxu0 %v1200_v39  ;;  %723 = vmatmul.mubr.bf16.gmra.mrb[4].mxu1 %v1201_v40 }
  0x59   : > { %698 = vmatprep.mubr.bf16.mxu0 %v1202_v41  ;;  %730 = vmatprep.mubr.bf16.mxu1 %v1204_v42 }
  0x60   : > { %699 = vmatmul.mubr.bf16.gmra.mrb[8].mxu0 %v1206_v43  ;;  %731 = vmatmul.mubr.bf16.gmra.mrb[8].mxu1 %v1207_v44 }
  0x61   : > { %706 = vmatprep.mubr.bf16.mxu0 %v1208_v45  ;;  %738 = vmatprep.mubr.bf16.mxu1 %v1210_v46 }
  0x68   : > { %707 = vmatmul.mubr.bf16.gmra.mrb[12].mxu0 %v1212_v47  ;;  %739 = vmatmul.mubr.bf16.gmra.mrb[12].mxu1 %v1213_v48  ;;  %v416_v47 = vld [vmem:[#allocation2 + $0x30] sm:$0xff] }
 0x123   : > { %v1069_v49 = vpop.f32.mrb[0].mxu0  ;;  %v1093_v50 = vpop.f32.mrb[0].mxu1 }
 0x124   : > { %v1070_v52 = vpop.f32.mrb[1].mxu0  ;;  %v1094_v54 = vpop.f32.mrb[1].mxu1 }
 0x125   : > { %v1071_v55 = vadd.f32 %v1070_v52, %v1069_v49  ;;  %v1095_v56 = vadd.f32 %v1094_v54, %v1093_v50  ;;  %v1072_v57 = vpop.f32.mrb[2].mxu0  ;;  %v1096_v58 = vpop.f32.mrb[2].mxu1  ;;  %v424_v49 = vld [vmem:[#allocation2 + $0x70] sm:$0xff] }
 0x126   : > { %v1073_v60 = vpop.f32.mrb[3].mxu0  ;;  %v1097_v62 = vpop.f32.mrb[3].mxu1 }
 0x127   : > { %v747_v63 = vadd.f32 %v1071_v55, %v410_v51  ;;  %v755_v0 = vadd.f32 %v1095_v56, %v418_v53  ;;  %v1074_v1 = vadd.f32 %v1073_v60, %v1072_v57  ;;  %v1098_v2 = vadd.f32 %v1097_v62, %v1096_v58  ;;  %v417_v55 = vld [vmem:[#allocation2 + $0x38] sm:$0xff] }
 0x128   : > { %v425_v57 = vld [vmem:[#allocation2 + $0x78] sm:$0xff] }
 0x129   : > { %763 = vst [vmem:[#allocation2] sm:$0xff] %v747_v63  ;;  %771 = vst [vmem:[#allocation2 + $0x40] sm:$0xff] %v755_v0  ;;  %v748_v3 = vadd.f32 %v1074_v1, %v411_v59  ;;  %v756_v4 = vadd.f32 %v1098_v2, %v419_v61  ;;  %v1046_v2 = vld [vmem:[%s1475_s2] ss:$0 sm:$0xff] (!%p1045_p11) }
 0x12b   : > { %764 = vst [vmem:[#allocation2 + $0x8] sm:$0xff] %v748_v3  ;;  %772 = vst [vmem:[#allocation2 + $0x48] sm:$0xff] %v756_v4  ;;  %v1075_v5 = vpop.f32.mrb[4].mxu0  ;;  %v1099_v6 = vpop.f32.mrb[4].mxu1  ;;  %v1392_v3 = vld [vmem:[%s1476_s3] ss:$0 sm:$0xff] (!%p1045_p11) }
 0x12c   : > { %v1076_v8 = vpop.f32.mrb[5].mxu0  ;;  %v1100_v10 = vpop.f32.mrb[5].mxu1 }
 0x12d   : > { %v1077_v11 = vadd.f32 %v1076_v8, %v1075_v5  ;;  %v1101_v12 = vadd.f32 %v1100_v10, %v1099_v6  ;;  %v1078_v13 = vpop.f32.mrb[6].mxu0  ;;  %v1102_v14 = vpop.f32.mrb[6].mxu1 }
 0x12e   : > { %v1079_v16 = vpop.f32.mrb[7].mxu0  ;;  %v1103_v18 = vpop.f32.mrb[7].mxu1 }
 0x12f   : > { %v749_v19 = vadd.f32 %v1077_v11, %v412_v7  ;;  %v757_v20 = vadd.f32 %v1101_v12, %v420_v9  ;;  %v1080_v21 = vadd.f32 %v1079_v16, %v1078_v13  ;;  %v1104_v22 = vadd.f32 %v1103_v18, %v1102_v14 }
 0x130   : > { %v783_v1 = vld [vmem:[#allocation2] sm:$0xff] (!%p1045_p11) }
 0x131   : > { %765 = vst [vmem:[#allocation2 + $0x10] sm:$0xff] %v749_v19  ;;  %773 = vst [vmem:[#allocation2 + $0x50] sm:$0xff] %v757_v20  ;;  %v750_v23 = vadd.f32 %v1080_v21, %v413_v15  ;;  %v758_v24 = vadd.f32 %v1104_v22, %v421_v17  ;;  %v806_v4 = vmul.f32 (!%p1045_p11), %v1046_v2, %v783_v1 }
 0x132   : > { %v784_v5 = vld [vmem:[#allocation2 + $0x8] sm:$0xff] (!%p1045_p11) }
 0x133   : > { %766 = vst [vmem:[#allocation2 + $0x18] sm:$0xff] %v750_v23  ;;  %774 = vst [vmem:[#allocation2 + $0x58] sm:$0xff] %v758_v24  ;;  %v1081_v25 = vpop.f32.mrb[8].mxu0  ;;  %v1105_v26 = vpop.f32.mrb[8].mxu1  ;;  %v807_v8 = vmul.f32 (!%p1045_p11), %v1046_v2, %v784_v5  ;;  %v829_v14 = vadd.f32 (!%p1045_p11), %v1392_v3, %v806_v4  ;;  %v791_v23 = vld [vmem:[#allocation2 + $0x40] sm:$0xff] (!%p1045_p11) }
 0x134   : > { %v1082_v28 = vpop.f32.mrb[9].mxu0  ;;  %v1106_v30 = vpop.f32.mrb[9].mxu1 }
 0x135   : > { %v1083_v31 = vadd.f32 %v1082_v28, %v1081_v25  ;;  %v1107_v32 = vadd.f32 %v1106_v30, %v1105_v26  ;;  %v1084_v33 = vpop.f32.mrb[10].mxu0  ;;  %v1108_v34 = vpop.f32.mrb[10].mxu1  ;;  %v830_v19 = vadd.f32 (!%p1045_p11), %v1392_v3, %v807_v8  ;;  %v845_v24 = vmax.f32 (!%p1045_p11), %v829_v14, 0.0  ;;  %v792_v28 = vld [vmem:[#allocation2 + $0x48] sm:$0xff] (!%p1045_p11) }
 0x136   : > { %v1085_v36 = vpop.f32.mrb[11].mxu0  ;;  %v1109_v38 = vpop.f32.mrb[11].mxu1 }
 0x137   : > { %v751_v39 = vadd.f32 %v1083_v31, %v414_v27  ;;  %v759_v40 = vadd.f32 %v1107_v32, %v422_v29  ;;  %v1086_v41 = vadd.f32 %v1085_v36, %v1084_v33  ;;  %v1110_v42 = vadd.f32 %v1109_v38, %v1108_v34  ;;  %861 = vst [vmem:[%s1477_s4] sm:$0xff] (!%p1045_p11), %v845_v24 }
 0x138   : > { %v785_v6 = vld [vmem:[#allocation2 + $0x10] sm:$0xff] (!%p1045_p11)  ;;  %v846_v31 = vmax.f32 (!%p1045_p11), %v830_v19, 0.0 }
 0x139   : > { %767 = vst [vmem:[#allocation2 + $0x20] sm:$0xff] %v751_v39  ;;  %775 = vst [vmem:[#allocation2 + $0x60] sm:$0xff] %v759_v40  ;;  %v752_v43 = vadd.f32 %v1086_v41, %v415_v35  ;;  %v760_v44 = vadd.f32 %v1110_v42, %v423_v37  ;;  %v808_v9 = vmul.f32 (!%p1045_p11), %v1046_v2, %v785_v6  ;;  %v793_v29 = vld [vmem:[#allocation2 + $0x50] sm:$0xff] (!%p1045_p11) }
 0x13a   : > { %v786_v7 = vld [vmem:[#allocation2 + $0x18] sm:$0xff] (!%p1045_p11)  ;;  %v814_v41 = vmul.f32 (!%p1045_p11), %v1046_v2, %v791_v23  ;;  %862 = vst [vmem:[%s1477_s4 + $0x8] sm:$0xff] (!%p1045_p11), %v846_v31 }
 0x13b   : > { %768 = vst [vmem:[#allocation2 + $0x28] sm:$0xff] %v752_v43  ;;  %776 = vst [vmem:[#allocation2 + $0x68] sm:$0xff] %v760_v44  ;;  %v1087_v45 = vpop.f32.mrb[12].mxu0  ;;  %v1111_v46 = vpop.f32.mrb[12].mxu1  ;;  %v809_v10 = vmul.f32 (!%p1045_p11), %v1046_v2, %v786_v7  ;;  %v831_v20 = vadd.f32 (!%p1045_p11), %v1392_v3, %v808_v9  ;;  %v794_v30 = vld [vmem:[#allocation2 + $0x58] sm:$0xff] (!%p1045_p11)  ;;  %v815_v44 = vmul.f32 (!%p1045_p11), %v1046_v2, %v792_v28 }
 0x13c   : > { %v1088_v48 = vpop.f32.mrb[13].mxu0  ;;  %v1112_v50 = vpop.f32.mrb[13].mxu1 }
 0x13d   : > { %v1089_v51 = vadd.f32 %v1088_v48, %v1087_v45  ;;  %v1113_v52 = vadd.f32 %v1112_v50, %v1111_v46  ;;  %v1090_v53 = vpop.f32.mrb[14].mxu0  ;;  %v1114_v54 = vpop.f32.mrb[14].mxu1  ;;  %782 = sbr.rel (%p1045_p11) target bundleno = 339 (0x153), region = 82  ;;  %v832_v21 = vadd.f32 (!%p1045_p11), %v1392_v3, %v809_v10  ;;  %v847_v32 = vmax.f32 (!%p1045_p11), %v831_v20, 0.0 }
 0x13e   : > { %v1091_v56 = vpop.f32.mrb[15].mxu0  ;;  %v1115_v58 = vpop.f32.mrb[15].mxu1  ;;  %v816_v45 = vmul.f32 (!%p1045_p11), %v1046_v2, %v793_v29  ;;  %v817_v46 = vmul.f32 (!%p1045_p11), %v1046_v2, %v794_v30 }
 0x13f   : > { %v753_v59 = vadd.f32 %v1089_v51, %v416_v47  ;;  %v761_v60 = vadd.f32 %v1113_v52, %v424_v49  ;;  %v1092_v61 = vadd.f32 %v1091_v56, %v1090_v53  ;;  %v1116_v62 = vadd.f32 %v1115_v58, %v1114_v54  ;;  %863 = vst [vmem:[%s1477_s4 + $0x10] sm:$0xff] (!%p1045_p11), %v847_v32 }
 0x140   : > { %v787_v11 = vld [vmem:[#allocation2 + $0x20] sm:$0xff] (!%p1045_p11)  ;;  %v848_v33 = vmax.f32 (!%p1045_p11), %v832_v21, 0.0  ;;  %v837_v47 = vadd.f32 (!%p1045_p11), %v1392_v3, %v814_v41  ;;  %v838_v51 = vadd.f32 (!%p1045_p11), %v1392_v3, %v815_v44  ;;  %v839_v52 = vadd.f32 (!%p1045_p11), %v1392_v3, %v816_v45 }
 0x141   : > { %769 = vst [vmem:[#allocation2 + $0x30] sm:$0xff] %v753_v59  ;;  %777 = vst [vmem:[#allocation2 + $0x70] sm:$0xff] %v761_v60  ;;  %v754_v63 = vadd.f32 %v1092_v61, %v417_v55  ;;  %v762_v0 = vadd.f32 %v1116_v62, %v425_v57  ;;  %v810_v15 = vmul.f32 (!%p1045_p11), %v1046_v2, %v787_v11  ;;  %v795_v35 = vld [vmem:[#allocation2 + $0x60] sm:$0xff] (!%p1045_p11) }
 0x142   : > { %v788_v12 = vld [vmem:[#allocation2 + $0x28] sm:$0xff] (!%p1045_p11)  ;;  %864 = vst [vmem:[%s1477_s4 + $0x18] sm:$0xff] (!%p1045_p11), %v848_v33  ;;  %v818_v48 = vmul.f32 (!%p1045_p11), %v1046_v2, %v795_v35  ;;  %v840_v53 = vadd.f32 (!%p1045_p11), %v1392_v3, %v817_v46  ;;  %v853_v55 = vmax.f32 (!%p1045_p11), %v837_v47, 0.0  ;;  %v854_v59 = vmax.f32 (!%p1045_p11), %v838_v51, 0.0 }
 0x143   : > { %770 = vst [vmem:[#allocation2 + $0x38] sm:$0xff] %v754_v63  ;;  %778 = vst [vmem:[#allocation2 + $0x78] sm:$0xff] %v762_v0  ;;  %v811_v16 = vmul.f32 (!%p1045_p11), %v1046_v2, %v788_v12  ;;  %v833_v25 = vadd.f32 (!%p1045_p11), %v1392_v3, %v810_v15  ;;  %v796_v36 = vld [vmem:[#allocation2 + $0x68] sm:$0xff] (!%p1045_p11)  ;;  %v855_v60 = vmax.f32 (!%p1045_p11), %v839_v52, 0.0 }
 0x144   : > { %v819_v49 = vmul.f32 %v1046_v2, %v796_v36  ;;  %v841_v56 = vadd.f32 %v1392_v3, %v818_v48  ;;  %v856_v61 = vmax.f32 %v840_v53, 0.0  ;;  %869 = vst [vmem:[%s1477_s4 + $0x40] sm:$0xff] %v853_v55  ;;  %870 = vst [vmem:[%s1477_s4 + $0x48] sm:$0xff] %v854_v59 }
 0x145   : > { %v834_v26 = vadd.f32 %v1392_v3, %v811_v16  ;;  %v849_v38 = vmax.f32 %v833_v25, 0.0  ;;  %871 = vst [vmem:[%s1477_s4 + $0x50] sm:$0xff] %v855_v60 }
 0x146   : > { %v842_v57 = vadd.f32 %v1392_v3, %v819_v49  ;;  %v857_v63 = vmax.f32 %v841_v56, 0.0  ;;  %872 = vst [vmem:[%s1477_s4 + $0x58] sm:$0xff] %v856_v61 }
 0x147   : > { %v850_v39 = vmax.f32 %v834_v26, 0.0  ;;  %865 = vst [vmem:[%s1477_s4 + $0x20] sm:$0xff] %v849_v38 }
 0x148   : > { %v789_v13 = vld [vmem:[#allocation2 + $0x30] sm:$0xff]  ;;  %v858_v0 = vmax.f32 %v842_v57, 0.0  ;;  %873 = vst [vmem:[%s1477_s4 + $0x60] sm:$0xff] %v857_v63 }
 0x149   : > { %v812_v17 = vmul.f32 %v1046_v2, %v789_v13  ;;  %v797_v37 = vld [vmem:[#allocation2 + $0x70] sm:$0xff]  ;;  %866 = vst [vmem:[%s1477_s4 + $0x28] sm:$0xff] %v850_v39 }
 0x14a   : > { %v790_v18 = vld [vmem:[#allocation2 + $0x38] sm:$0xff]  ;;  %v820_v50 = vmul.f32 %v1046_v2, %v797_v37  ;;  %874 = vst [vmem:[%s1477_s4 + $0x68] sm:$0xff] %v858_v0 }
 0x14b   : > { %v813_v22 = vmul.f32 %v1046_v2, %v790_v18  ;;  %v835_v27 = vadd.f32 %v1392_v3, %v812_v17  ;;  %v798_v42 = vld [vmem:[#allocation2 + $0x78] sm:$0xff] }
 0x14c   : > { %v821_v54 = vmul.f32 %v1046_v2, %v798_v42  ;;  %v843_v58 = vadd.f32 %v1392_v3, %v820_v50 }
 0x14d   : > { %v836_v34 = vadd.f32 %v1392_v3, %v813_v22  ;;  %v851_v40 = vmax.f32 %v835_v27, 0.0 }
 0x14e   : > { %v844_v62 = vadd.f32 %v1392_v3, %v821_v54  ;;  %v859_v1 = vmax.f32 %v843_v58, 0.0 }
 0x14f   : > { %v852_v43 = vmax.f32 %v836_v34, 0.0  ;;  %867 = vst [vmem:[%s1477_s4 + $0x30] sm:$0xff] %v851_v40 }
 0x150   : > { %v860_v2 = vmax.f32 %v844_v62, 0.0  ;;  %875 = vst [vmem:[%s1477_s4 + $0x70] sm:$0xff] %v859_v1 }
 0x151   : > { %868 = vst [vmem:[%s1477_s4 + $0x38] sm:$0xff] %v852_v43 }
 0x152   : > { %876 = vst [vmem:[%s1477_s4 + $0x78] sm:$0xff] %v860_v2 }
 0x153 PF: > { %s14_s19 = sadd.s32 1, %s1252_s19   ;;  %s1478_s15 = smov %s1240_s16 }
 0x154   : > { %p11_p12 = scmp.ge.s32.totalorder %s14_s19, 5   ;;  %s1479_s16 = smov %s1315_s23 }
 0x155   : > { %s1480_s17 = smov %s1248_s18  ;;  %s1481_s18 = smov %s1483_s20 }
 0x156   :  { %13 = sbr.rel (!%p11_p12) target bundleno = 3 (0x3), region = 126 }

// kernel: resnet34_forward.42
= control target key start
LH: loop header
LB: loop body
LE: loop exit
PB: predicated region body
PF: predicated region fallthrough
CT: control target
= control target key end

     0   :  { %s1396_s18 = smov 0   ;;  %s1398_s19 = smov 0   ;;  %s1655_s0 = inlined_call_operand.vmem [shape: bf16[128,768], index: 0, kind: input, shape index: {}]   ;;  %s1656_s1 = inlined_call_operand.vmem [shape: bf16[768,128], index: 1, kind: input, shape index: {}]   ;;  %s1657_s2 = inlined_call_operand.vmem [shape: f32[1,128], index: 2, kind: input, shape index: {}]   ;;  %s1658_s3 = inlined_call_operand.vmem [shape: f32[1,128], index: 3, kind: input, shape index: {}]   ;;  %s1659_s4 = inlined_call_operand.vmem [shape: f32[128,128], index: 4, kind: input, shape index: {}]   ;;  %s1660_s5 = inlined_call_operand.vmem [shape: f32[128,128], index: 5, kind: output, shape index: {}]  }
   0x1   :  { %s1400_s20 = smov 0   ;;  %s1402_s21 = smov 0  }
   0x2   :  { %s1404_s22 = smov 0  }
   0x3 LB: > { %s27_s23 = sadd.s32 1, %s1359_s21  ;;  %p50_p1 = scmp.ne.s32.totalorder %s1351_s19, %s1347_s18  ;;  %s1363_s22 = sphi %s1404_s22, %s15_s22   ;;  %s1359_s21 = sphi %s1402_s21, %s1664_s21   ;;  %s1355_s20 = sphi %s1400_s20, %s1663_s20   ;;  %s1351_s19 = sphi %s1398_s19, %s1662_s19   ;;  %s1347_s18 = sphi %s1396_s18, %s1661_s18  }
   0x4   : > { %p28_p0 = scmp.ge.s32.totalorder %s27_s23, 3  ;;  %p51_p2 = scmp.eq.s32.totalorder %s1363_s22, 0 }
   0x5   : > { %s43_s25 = sadd.s32 1, %s1351_s19  ;;  %p1115_p5 = scmp.ge.s32.totalorder %s1363_s22, 3 }
   0x6   : > { %s1666_s23 = smov (%p28_p0, %s27_s23), 0  ;;  %p52_p3 = por %p51_p2, %p50_p1 }
   0x7   : > { %s39_s24 = ssub.s32 %s1359_s21, %s1666_s23  ;;  %236 = sbr.rel (%p1115_p5) target bundleno = 26 (0x1a), region = 28 }
   0x8   : > { %p41_p4 = scmp.eq.s32.totalorder %s39_s24, 0 }
   0xa   : > { %s1431_s26 = scalar_select %p41_p4, %s1351_s19, %s43_s25  }
   0xe   : > { %239 = sbr.rel (!%p52_p3) target bundleno = 26 (0x1a), region = 32  ;;  %s241_s27 = sand.u32 (%p52_p3), 1, %s1351_s19  }
   0xf   : > { %s1163_s28 = sshll.u32 (%p52_p3), %s1359_s21, 3  ;;  %s1116_s29 = sshll.u32 (%p52_p3), %s241_s27, 7 }
  0x10   : > { %s1439_s7 = scalar_lea.vmem (%p52_p3), %s1655_s0, %s1163_s28  ;;  %s243_s8 = scalar_lea.vmem (%p52_p3), [#allocation3], %s1116_s29 }
  0x11   : > { %v307_v0 = vld [vmem:[%s1439_s7] sm:$0xff] (%p52_p3)  ;;  %v309_v1 = vld [vmem:[%s1439_s7 + $0x18] sm:$0xff] (%p52_p3)  ;;  %v311_v2 = vld [vmem:[%s1439_s7 + $0x30] sm:$0xff] (%p52_p3) }
  0x12   : > { %308 = vst [vmem:[%s243_s8] sm:$0xff] (%p52_p3), %v307_v0  ;;  %310 = vst [vmem:[%s243_s8 + $0x8] sm:$0xff] (%p52_p3), %v309_v1  ;;  %v313_v3 = vld [vmem:[%s1439_s7 + $0x48] sm:$0xff] (%p52_p3)  ;;  %v315_v4 = vld [vmem:[%s1439_s7 + $0x60] sm:$0xff] (%p52_p3) }
  0x13   : > { %312 = vst [vmem:[%s243_s8 + $0x10] sm:$0xff] (%p52_p3), %v311_v2  ;;  %v317_v5 = vld [vmem:[%s1439_s7 + $0x78] sm:$0xff] (%p52_p3)  ;;  %314 = vst [vmem:[%s243_s8 + $0x18] sm:$0xff] (%p52_p3), %v313_v3  ;;  %v319_v6 = vld [vmem:[%s1439_s7 + $0x90] sm:$0xff] (%p52_p3) }
  0x14   : > { %316 = vst [vmem:[%s243_s8 + $0x20] sm:$0xff] (%p52_p3), %v315_v4  ;;  %318 = vst [vmem:[%s243_s8 + $0x28] sm:$0xff] (%p52_p3), %v317_v5  ;;  %v321_v7 = vld [vmem:[%s1439_s7 + $0xa8] sm:$0xff] (%p52_p3)  ;;  %v323_v8 = vld [vmem:[%s1439_s7 + $0xc0] sm:$0xff] (%p52_p3) }
  0x15   : > { %320 = vst [vmem:[%s243_s8 + $0x30] sm:$0xff] %v319_v6  ;;  %322 = vst [vmem:[%s243_s8 + $0x38] sm:$0xff] %v321_v7  ;;  %v325_v9 = vld [vmem:[%s1439_s7 + $0xd8] sm:$0xff]  ;;  %v327_v10 = vld [vmem:[%s1439_s7 + $0xf0] sm:$0xff] }
  0x16   : > { %324 = vst [vmem:[%s243_s8 + $0x40] sm:$0xff] %v323_v8  ;;  %v329_v11 = vld [vmem:[%s1439_s7 + $0x108] sm:$0xff]  ;;  %326 = vst [vmem:[%s243_s8 + $0x48] sm:$0xff] %v325_v9  ;;  %v331_v12 = vld [vmem:[%s1439_s7 + $0x120] sm:$0xff] }
  0x17   : > { %328 = vst [vmem:[%s243_s8 + $0x50] sm:$0xff] %v327_v10  ;;  %330 = vst [vmem:[%s243_s8 + $0x58] sm:$0xff] %v329_v11  ;;  %v333_v13 = vld [vmem:[%s1439_s7 + $0x138] sm:$0xff]  ;;  %v335_v14 = vld [vmem:[%s1439_s7 + $0x150] sm:$0xff] }
  0x18   : > { %332 = vst [vmem:[%s243_s8 + $0x60] sm:$0xff] %v331_v12  ;;  %334 = vst [vmem:[%s243_s8 + $0x68] sm:$0xff] %v333_v13  ;;  %v337_v15 = vld [vmem:[%s1439_s7 + $0x168] sm:$0xff] }
  0x19   : > { %336 = vst [vmem:[%s243_s8 + $0x70] sm:$0xff] %v335_v14  ;;  %338 = vst [vmem:[%s243_s8 + $0x78] sm:$0xff] %v337_v15 }
  0x1a PF: > { %p1119_p6 = scmp.ge.s32.totalorder %s1363_s22, 1  ;;  %p355_p7 = scmp.lt.s32.totalorder %s1363_s22, 4 }
  0x1c   : > { %p356_p8 = pnand %p1119_p6, %p355_p7 }
  0x1d   : > { %s362_s9 = sand.u32 (!%p356_p8), 1, %s1347_s18   ;;  %s1121_s10 = sshll.u32 (!%p356_p8), %s1355_s20, 5 }
  0x1e   : > { %359 = sbr.rel (%p356_p8) target bundleno = 341 (0x155), region = 74  ;;  %s1120_s11 = sshll.u32 (!%p356_p8), %s362_s9, 7 }
  0x1f   : > { %p417_p9 = scmp.lt.s32.totalorder (!%p356_p8), %s1121_s10, 95  ;;  %s1466_s16 = scalar_lea.vmem (!%p356_p8), [#allocation3], %s1120_s11 }
  0x20   : > { %p1123_p10 = scmp.ne.s32.totalorder (!%p356_p8), %s1355_s20, 0 }
  0x25   : > { %s1668_s10 = smov (!%p417_p9, %s1121_s10), 95  ;;  %453 = sbr.rel (%p1123_p10) target bundleno = 47 (0x2f), region = 82 }
  0x26   : > { %s1122_s12 = sshll.u32 %s1668_s10, 2  ;;  %v1365_v16 = vmov (!%p1123_p10), 0.0  }
  0x27   : > { %s1464_s15 = scalar_lea.vmem %s1656_s1, %s1122_s12  ;;  %454 = vst [vmem:[#allocation2] sm:$0xff] (!%p1123_p10), %v1365_v16  ;;  %455 = vst [vmem:[#allocation2 + $0x8] sm:$0xff] (!%p1123_p10), %v1365_v16 }
  0x28   : > { %456 = vst [vmem:[#allocation2 + $0x10] sm:$0xff] (!%p1123_p10), %v1365_v16  ;;  %457 = vst [vmem:[#allocation2 + $0x18] sm:$0xff] (!%p1123_p10), %v1365_v16 }
  0x29   : > { %458 = vst [vmem:[#allocation2 + $0x20] sm:$0xff] (!%p1123_p10), %v1365_v16  ;;  %459 = vst [vmem:[#allocation2 + $0x28] sm:$0xff] (!%p1123_p10), %v1365_v16 }
  0x2a   : > { %460 = vst [vmem:[#allocation2 + $0x30] sm:$0xff] (!%p1123_p10), %v1365_v16  ;;  %461 = vst [vmem:[#allocation2 + $0x38] sm:$0xff] (!%p1123_p10), %v1365_v16 }
  0x2b   : > { %462 = vst [vmem:[#allocation2 + $0x40] sm:$0xff] (!%p1123_p10), %v1365_v16  ;;  %463 = vst [vmem:[#allocation2 + $0x48] sm:$0xff] (!%p1123_p10), %v1365_v16 }
  0x2c   : > { %464 = vst [vmem:[#allocation2 + $0x50] sm:$0xff] %v1365_v16  ;;  %465 = vst [vmem:[#allocation2 + $0x58] sm:$0xff] %v1365_v16 }
  0x2d   : > { %466 = vst [vmem:[#allocation2 + $0x60] sm:$0xff] %v1365_v16  ;;  %467 = vst [vmem:[#allocation2 + $0x68] sm:$0xff] %v1365_v16 }
  0x2e   : > { %468 = vst [vmem:[#allocation2 + $0x70] sm:$0xff] %v1365_v16  ;;  %469 = vst [vmem:[#allocation2 + $0x78] sm:$0xff] %v1365_v16 }
  0x2f PF: > { %v1285_v17 = vld [vmem:[%s1464_s15 + $0x40] sm:$0xff]   ;;  %v1287_v19 = vld [vmem:[%s1464_s15 + $0x48] sm:$0xff]   ;;  %v1289_v21 = vld [vmem:[%s1464_s15 + $0x50] sm:$0xff]   ;;  %p1156_p11 = scmp.ne.s32.totalorder %s1355_s20, 2 }
  0x30   : > { %v1286_v18 = vld [vmem:[%s1464_s15] sm:$0xff]   ;;  %1164 = vmatprep.subr.bf16.mxu0 %v1285_v17  ;;  %1228 = vmatprep.subr.bf16.mxu1 %v1285_v17  ;;  %v1288_v20 = vld [vmem:[%s1464_s15 + $0x8] sm:$0xff]   ;;  %v1290_v22 = vld [vmem:[%s1464_s15 + $0x10] sm:$0xff]  }
  0x31   : > { %1165 = vmatpush3.bf16.msra.mxu0 %v1286_v18  ;;  %1236 = vmatpush3.bf16.msra.mxu1 %v1286_v18  ;;  %v1291_v23 = vld [vmem:[%s1464_s15 + $0x58] sm:$0xff]   ;;  %v1293_v25 = vld [vmem:[%s1464_s15 + $0x60] sm:$0xff]   ;;  %v1295_v27 = vld [vmem:[%s1464_s15 + $0x68] sm:$0xff]  }
  0x32   : > { %1166 = vmatprep.subr.bf16.mxu0 %v1287_v19  ;;  %1229 = vmatprep.subr.bf16.mxu1 %v1287_v19  ;;  %v1292_v24 = vld [vmem:[%s1464_s15 + $0x18] sm:$0xff]   ;;  %v1294_v26 = vld [vmem:[%s1464_s15 + $0x20] sm:$0xff]   ;;  %v1296_v30 = vld [vmem:[%s1464_s15 + $0x28] sm:$0xff]  }
  0x33   : > { %v1303_v28 = vld [vmem:[%s1466_s16 + $0x4] ss:$8 sps:$4 sm:$0xff]   ;;  %v1297_v31 = vld [vmem:[%s1464_s15 + $0x70] sm:$0xff]   ;;  %v1299_v33 = vld [vmem:[%s1464_s15 + $0x78] sm:$0xff]  }
  0x34   : > { %v1306_v29 = vld [vmem:[%s1466_s16 + $0x44] ss:$8 sps:$4 sm:$0xff]   ;;  %742 = vmatprep.mubr.bf16.mxu0 %v1303_v28  ;;  %v1298_v32 = vld [vmem:[%s1464_s15 + $0x30] sm:$0xff]   ;;  %v1300_v34 = vld [vmem:[%s1464_s15 + $0x38] sm:$0xff]  }
  0x35   : > { %1167 = vmatpush3.bf16.msra.mxu0 %v1288_v20  ;;  %1237 = vmatpush3.bf16.msra.mxu1 %v1288_v20  ;;  %v1301_v35 = vld [vmem:[%s1466_s16] ss:$8 sps:$4 sm:$0xff]   ;;  %v1307_v37 = vld [vmem:[%s1466_s16 + $0x14] ss:$8 sps:$4 sm:$0xff]   ;;  %v1311_v39 = vld [vmem:[%s1466_s16 + $0x10] ss:$8 sps:$4 sm:$0xff]  }
  0x36   : > { %1168 = vmatprep.subr.bf16.mxu0 %v1289_v21  ;;  %1230 = vmatprep.subr.bf16.mxu1 %v1289_v21  ;;  %v1304_v36 = vld [vmem:[%s1466_s16 + $0x40] ss:$8 sps:$4 sm:$0xff]   ;;  %v1309_v38 = vld [vmem:[%s1466_s16 + $0x54] ss:$8 sps:$4 sm:$0xff]   ;;  %v1312_v40 = vld [vmem:[%s1466_s16 + $0x50] ss:$8 sps:$4 sm:$0xff]  }
  0x37   : > { %774 = vmatprep.mubr.bf16.mxu1 %v1306_v29  ;;  %v1313_v41 = vld [vmem:[%s1466_s16 + $0x24] ss:$8 sps:$4 sm:$0xff]   ;;  %v1317_v43 = vld [vmem:[%s1466_s16 + $0x20] ss:$8 sps:$4 sm:$0xff]   ;;  %v1319_v45 = vld [vmem:[%s1466_s16 + $0x34] ss:$8 sps:$4 sm:$0xff]  }
  0x38   : > { %v1315_v42 = vld [vmem:[%s1466_s16 + $0x64] ss:$8 sps:$4 sm:$0xff]   ;;  %v1318_v44 = vld [vmem:[%s1466_s16 + $0x60] ss:$8 sps:$4 sm:$0xff]   ;;  %v1321_v46 = vld [vmem:[%s1466_s16 + $0x74] ss:$8 sps:$4 sm:$0xff]  }
  0x39   : > { %1169 = vmatpush3.bf16.msra.mxu0 %v1290_v22  ;;  %1238 = vmatpush3.bf16.msra.mxu1 %v1290_v22  ;;  %v1323_v47 = vld [vmem:[%s1466_s16 + $0x30] ss:$8 sps:$4 sm:$0xff]   ;;  %v470_v51 = vld [vmem:[#allocation2] sm:$0xff]  ;;  %v471_v59 = vld [vmem:[#allocation2 + $0x8] sm:$0xff] }
  0x3a   : > { %1170 = vmatprep.subr.bf16.mxu0 %v1291_v23  ;;  %1231 = vmatprep.subr.bf16.mxu1 %v1291_v23  ;;  %v1324_v48 = vld [vmem:[%s1466_s16 + $0x70] ss:$8 sps:$4 sm:$0xff]   ;;  %v478_v53 = vld [vmem:[#allocation2 + $0x40] sm:$0xff]  ;;  %v479_v61 = vld [vmem:[#allocation2 + $0x48] sm:$0xff] }
  0x3b   : > { %v472_v7 = vld [vmem:[#allocation2 + $0x10] sm:$0xff]  ;;  %v473_v15 = vld [vmem:[#allocation2 + $0x18] sm:$0xff]  ;;  %v482_v29 = vld [vmem:[#allocation2 + $0x60] sm:$0xff] }
  0x3c   : > { %v480_v9 = vld [vmem:[#allocation2 + $0x50] sm:$0xff]  ;;  %v481_v17 = vld [vmem:[#allocation2 + $0x58] sm:$0xff] }
  0x3d   : > { %1171 = vmatpush3.bf16.msra.mxu0 %v1292_v24  ;;  %1239 = vmatpush3.bf16.msra.mxu1 %v1292_v24 }
  0x3e   : > { %1172 = vmatprep.subr.bf16.mxu0 %v1293_v25  ;;  %1232 = vmatprep.subr.bf16.mxu1 %v1293_v25 }
  0x41   : > { %1173 = vmatpush3.bf16.msra.mxu0 %v1294_v26  ;;  %1240 = vmatpush3.bf16.msra.mxu1 %v1294_v26 }
  0x42   : > { %1174 = vmatprep.subr.bf16.mxu0 %v1295_v27  ;;  %1233 = vmatprep.subr.bf16.mxu1 %v1295_v27  ;;  %v474_v27 = vld [vmem:[#allocation2 + $0x20] sm:$0xff] }
  0x45   : > { %1175 = vmatpush3.bf16.msra.mxu0 %v1296_v30  ;;  %1241 = vmatpush3.bf16.msra.mxu1 %v1296_v30 }
  0x46   : > { %1176 = vmatprep.subr.bf16.mxu0 %v1297_v31  ;;  %1234 = vmatprep.subr.bf16.mxu1 %v1297_v31 }
  0x49   : > { %1177 = vmatpush3.bf16.msra.mxu0 %v1298_v32  ;;  %1242 = vmatpush3.bf16.msra.mxu1 %v1298_v32 }
  0x4a   : > { %1178 = vmatprep.subr.bf16.mxu0 %v1299_v33  ;;  %1235 = vmatprep.subr.bf16.mxu1 %v1299_v33 }
  0x4d   : > { %1179 = vmatpush3.bf16.msra.mxu0 %v1300_v34  ;;  %1243 = vmatpush3.bf16.msra.mxu1 %v1300_v34 }
  0x50   : > { %743 = vmatmul.mubr.bf16.vlgmr.msra.gmra.mrb[0].mxu0 %v1301_v35  ;;  %775 = vmatmul.mubr.bf16.vlgmr.msra.gmra.mrb[0].mxu1 %v1304_v36  ;;  %v475_v35 = vld [vmem:[#allocation2 + $0x28] sm:$0xff] }
  0x51   : > { %750 = vmatprep.mubr.bf16.mxu0 %v1307_v37  ;;  %782 = vmatprep.mubr.bf16.mxu1 %v1309_v38  ;;  %v483_v37 = vld [vmem:[#allocation2 + $0x68] sm:$0xff] }
  0x58   : > { %751 = vmatmul.mubr.bf16.gmra.mrb[4].mxu0 %v1311_v39  ;;  %783 = vmatmul.mubr.bf16.gmra.mrb[4].mxu1 %v1312_v40 }
  0x59   : > { %758 = vmatprep.mubr.bf16.mxu0 %v1313_v41  ;;  %790 = vmatprep.mubr.bf16.mxu1 %v1315_v42 }
  0x60   : > { %759 = vmatmul.mubr.bf16.gmra.mrb[8].mxu0 %v1317_v43  ;;  %791 = vmatmul.mubr.bf16.gmra.mrb[8].mxu1 %v1318_v44 }
  0x61   : > { %766 = vmatprep.mubr.bf16.mxu0 %v1319_v45  ;;  %798 = vmatprep.mubr.bf16.mxu1 %v1321_v46 }
  0x68   : > { %767 = vmatmul.mubr.bf16.gmra.mrb[12].mxu0 %v1323_v47  ;;  %799 = vmatmul.mubr.bf16.gmra.mrb[12].mxu1 %v1324_v48  ;;  %v476_v47 = vld [vmem:[#allocation2 + $0x30] sm:$0xff] }
 0x123   : > { %v1180_v49 = vpop.f32.mrb[0].mxu0  ;;  %v1204_v50 = vpop.f32.mrb[0].mxu1 }
 0x124   : > { %v1181_v52 = vpop.f32.mrb[1].mxu0  ;;  %v1205_v54 = vpop.f32.mrb[1].mxu1 }
 0x125   : > { %v1182_v55 = vadd.f32 %v1181_v52, %v1180_v49  ;;  %v1206_v56 = vadd.f32 %v1205_v54, %v1204_v50  ;;  %v1183_v57 = vpop.f32.mrb[2].mxu0  ;;  %v1207_v58 = vpop.f32.mrb[2].mxu1  ;;  %v484_v49 = vld [vmem:[#allocation2 + $0x70] sm:$0xff] }
 0x126   : > { %v1184_v60 = vpop.f32.mrb[3].mxu0  ;;  %v1208_v62 = vpop.f32.mrb[3].mxu1 }
 0x127   : > { %v807_v63 = vadd.f32 %v1182_v55, %v470_v51  ;;  %v815_v0 = vadd.f32 %v1206_v56, %v478_v53  ;;  %v1185_v1 = vadd.f32 %v1184_v60, %v1183_v57  ;;  %v1209_v2 = vadd.f32 %v1208_v62, %v1207_v58  ;;  %v477_v55 = vld [vmem:[#allocation2 + $0x38] sm:$0xff] }
 0x128   : > { %v485_v57 = vld [vmem:[#allocation2 + $0x78] sm:$0xff] }
 0x129   : > { %823 = vst [vmem:[#allocation2] sm:$0xff] %v807_v63  ;;  %831 = vst [vmem:[#allocation2 + $0x40] sm:$0xff] %v815_v0  ;;  %v808_v3 = vadd.f32 %v1185_v1, %v471_v59  ;;  %v816_v4 = vadd.f32 %v1209_v2, %v479_v61  ;;  %v1505_v2 = vld [vmem:[%s1657_s2] ss:$0 sm:$0xff] (!%p1156_p11) }
 0x12b   : > { %824 = vst [vmem:[#allocation2 + $0x8] sm:$0xff] %v808_v3  ;;  %832 = vst [vmem:[#allocation2 + $0x48] sm:$0xff] %v816_v4  ;;  %v1186_v5 = vpop.f32.mrb[4].mxu0  ;;  %v1210_v6 = vpop.f32.mrb[4].mxu1  ;;  %v1510_v3 = vld [vmem:[%s1658_s3] ss:$0 sm:$0xff] (!%p1156_p11) }
 0x12c   : > { %v1187_v8 = vpop.f32.mrb[5].mxu0  ;;  %v1211_v10 = vpop.f32.mrb[5].mxu1 }
 0x12d   : > { %v1188_v11 = vadd.f32 %v1187_v8, %v1186_v5  ;;  %v1212_v12 = vadd.f32 %v1211_v10, %v1210_v6  ;;  %v1189_v13 = vpop.f32.mrb[6].mxu0  ;;  %v1213_v14 = vpop.f32.mrb[6].mxu1  ;;  %v905_v6 = vld [vmem:[%s1659_s4] sm:$0xff] (!%p1156_p11) }
 0x12e   : > { %v1190_v16 = vpop.f32.mrb[7].mxu0  ;;  %v1214_v18 = vpop.f32.mrb[7].mxu1 }
 0x12f   : > { %v809_v19 = vadd.f32 %v1188_v11, %v472_v7  ;;  %v817_v20 = vadd.f32 %v1212_v12, %v480_v9  ;;  %v1191_v21 = vadd.f32 %v1190_v16, %v1189_v13  ;;  %v1215_v22 = vadd.f32 %v1214_v18, %v1213_v14  ;;  %v906_v11 = vld [vmem:[%s1659_s4 + $0x8] sm:$0xff] (!%p1156_p11)  ;;  %v907_v13 = vld [vmem:[%s1659_s4 + $0x10] sm:$0xff] (!%p1156_p11) }
 0x130   : > { %v843_v1 = vld [vmem:[#allocation2] sm:$0xff] (!%p1156_p11) }
 0x131   : > { %825 = vst [vmem:[#allocation2 + $0x10] sm:$0xff] %v809_v19  ;;  %833 = vst [vmem:[#allocation2 + $0x50] sm:$0xff] %v817_v20  ;;  %v810_v23 = vadd.f32 %v1191_v21, %v473_v15  ;;  %v818_v24 = vadd.f32 %v1215_v22, %v481_v17  ;;  %v866_v4 = vmul.f32 (!%p1156_p11), %v1505_v2, %v843_v1  ;;  %v908_v17 = vld [vmem:[%s1659_s4 + $0x18] sm:$0xff] (!%p1156_p11) }
 0x132   : > { %v844_v5 = vld [vmem:[#allocation2 + $0x8] sm:$0xff] (!%p1156_p11) }
 0x133   : > { %826 = vst [vmem:[#allocation2 + $0x18] sm:$0xff] %v810_v23  ;;  %834 = vst [vmem:[#allocation2 + $0x58] sm:$0xff] %v818_v24  ;;  %v1192_v25 = vpop.f32.mrb[8].mxu0  ;;  %v1216_v26 = vpop.f32.mrb[8].mxu1  ;;  %v867_v7 = vmul.f32 (!%p1156_p11), %v1505_v2, %v844_v5  ;;  %v889_v10 = vadd.f32 (!%p1156_p11), %v1510_v3, %v866_v4  ;;  %v909_v24 = vld [vmem:[%s1659_s4 + $0x20] sm:$0xff] (!%p1156_p11)  ;;  %v915_v5 = vld [vmem:[%s1659_s4 + $0x50] sm:$0xff] (!%p1156_p11) }
 0x134   : > { %v1193_v28 = vpop.f32.mrb[9].mxu0  ;;  %v1217_v30 = vpop.f32.mrb[9].mxu1 }
 0x135   : > { %v1194_v31 = vadd.f32 %v1193_v28, %v1192_v25  ;;  %v1218_v32 = vadd.f32 %v1217_v30, %v1216_v26  ;;  %v1195_v33 = vpop.f32.mrb[10].mxu0  ;;  %v1219_v34 = vpop.f32.mrb[10].mxu1  ;;  %v890_v16 = vadd.f32 (!%p1156_p11), %v1510_v3, %v867_v7  ;;  %v921_v21 = vadd.f32 (!%p1156_p11), %v905_v6, %v889_v10  ;;  %v916_v6 = vld [vmem:[%s1659_s4 + $0x58] sm:$0xff] (!%p1156_p11) }
 0x136   : > { %v1196_v36 = vpop.f32.mrb[11].mxu0  ;;  %v1220_v38 = vpop.f32.mrb[11].mxu1 }
 0x137   : > { %v811_v39 = vadd.f32 %v1194_v31, %v474_v27  ;;  %v819_v40 = vadd.f32 %v1218_v32, %v482_v29  ;;  %v1197_v41 = vadd.f32 %v1196_v36, %v1195_v33  ;;  %v1221_v42 = vadd.f32 %v1220_v38, %v1219_v34  ;;  %v910_v29 = vld [vmem:[%s1659_s4 + $0x28] sm:$0xff] (!%p1156_p11)  ;;  %v851_v32 = vld [vmem:[#allocation2 + $0x40] sm:$0xff] (!%p1156_p11)  ;;  %v912_v38 = vld [vmem:[%s1659_s4 + $0x38] sm:$0xff] (!%p1156_p11) }
 0x138   : > { %v845_v8 = vld [vmem:[#allocation2 + $0x10] sm:$0xff] (!%p1156_p11)  ;;  %v922_v27 = vadd.f32 (!%p1156_p11), %v906_v11, %v890_v16  ;;  %v937_v33 = vmax.f32 (!%p1156_p11), %v921_v21, 0.0  ;;  %v917_v11 = vld [vmem:[%s1659_s4 + $0x60] sm:$0xff] (!%p1156_p11) }
 0x139   : > { %827 = vst [vmem:[#allocation2 + $0x20] sm:$0xff] %v811_v39  ;;  %835 = vst [vmem:[#allocation2 + $0x60] sm:$0xff] %v819_v40  ;;  %v812_v43 = vadd.f32 %v1197_v41, %v475_v35  ;;  %v820_v44 = vadd.f32 %v1221_v42, %v483_v37  ;;  %v868_v12 = vmul.f32 (!%p1156_p11), %v1505_v2, %v845_v8  ;;  %v911_v37 = vld [vmem:[%s1659_s4 + $0x30] sm:$0xff] (!%p1156_p11)  ;;  %v852_v39 = vld [vmem:[#allocation2 + $0x48] sm:$0xff] (!%p1156_p11) }
 0x13a   : > { %v846_v9 = vld [vmem:[#allocation2 + $0x18] sm:$0xff] (!%p1156_p11)  ;;  %v938_v40 = vmax.f32 (!%p1156_p11), %v922_v27, 0.0  ;;  %953 = vst [vmem:[%s1660_s5] sm:$0xff] (!%p1156_p11), %v937_v33 }
 0x13b   : > { %828 = vst [vmem:[#allocation2 + $0x28] sm:$0xff] %v812_v43  ;;  %836 = vst [vmem:[#allocation2 + $0x68] sm:$0xff] %v820_v44  ;;  %v1198_v45 = vpop.f32.mrb[12].mxu0  ;;  %v1222_v46 = vpop.f32.mrb[12].mxu1  ;;  %v869_v14 = vmul.f32 (!%p1156_p11), %v1505_v2, %v846_v9  ;;  %v891_v22 = vadd.f32 (!%p1156_p11), %v1510_v3, %v868_v12  ;;  %v853_v44 = vld [vmem:[#allocation2 + $0x50] sm:$0xff] (!%p1156_p11) }
 0x13c   : > { %v1199_v48 = vpop.f32.mrb[13].mxu0  ;;  %v1223_v50 = vpop.f32.mrb[13].mxu1  ;;  %954 = vst [vmem:[%s1660_s5 + $0x8] sm:$0xff] (!%p1156_p11), %v938_v40 }
 0x13d   : > { %v1200_v51 = vadd.f32 %v1199_v48, %v1198_v45  ;;  %v1224_v52 = vadd.f32 %v1223_v50, %v1222_v46  ;;  %v1201_v53 = vpop.f32.mrb[14].mxu0  ;;  %v1225_v54 = vpop.f32.mrb[14].mxu1  ;;  %842 = sbr.rel (%p1156_p11) target bundleno = 341 (0x155), region = 86  ;;  %v892_v23 = vadd.f32 (!%p1156_p11), %v1510_v3, %v869_v14  ;;  %v923_v34 = vadd.f32 (!%p1156_p11), %v907_v13, %v891_v22  ;;  %v854_v45 = vld [vmem:[#allocation2 + $0x58] sm:$0xff] (!%p1156_p11)  ;;  %v919_v22 = vld [vmem:[%s1659_s4 + $0x70] sm:$0xff] (!%p1156_p11) }
 0x13e   : > { %v1202_v56 = vpop.f32.mrb[15].mxu0  ;;  %v1226_v58 = vpop.f32.mrb[15].mxu1 }
 0x13f   : > { %v813_v59 = vadd.f32 %v1200_v51, %v476_v47  ;;  %v821_v60 = vadd.f32 %v1224_v52, %v484_v49  ;;  %v1203_v61 = vadd.f32 %v1202_v56, %v1201_v53  ;;  %v1227_v62 = vadd.f32 %v1226_v58, %v1225_v54  ;;  %v913_v54 = vld [vmem:[%s1659_s4 + $0x40] sm:$0xff] (!%p1156_p11) }
 0x140   : > { %v847_v15 = vld [vmem:[#allocation2 + $0x20] sm:$0xff] (!%p1156_p11)  ;;  %v924_v35 = vadd.f32 (!%p1156_p11), %v908_v17, %v892_v23  ;;  %v939_v46 = vmax.f32 (!%p1156_p11), %v923_v34, 0.0  ;;  %v874_v49 = vmul.f32 (!%p1156_p11), %v1505_v2, %v851_v32  ;;  %v920_v23 = vld [vmem:[%s1659_s4 + $0x78] sm:$0xff] (!%p1156_p11) }
 0x141   : > { %829 = vst [vmem:[#allocation2 + $0x30] sm:$0xff] %v813_v59  ;;  %837 = vst [vmem:[#allocation2 + $0x70] sm:$0xff] %v821_v60  ;;  %v814_v63 = vadd.f32 %v1203_v61, %v477_v55  ;;  %v822_v0 = vadd.f32 %v1227_v62, %v485_v57  ;;  %v870_v18 = vmul.f32 (!%p1156_p11), %v1505_v2, %v847_v15  ;;  %v855_v50 = vld [vmem:[#allocation2 + $0x60] sm:$0xff] (!%p1156_p11)  ;;  %v914_v59 = vld [vmem:[%s1659_s4 + $0x48] sm:$0xff] (!%p1156_p11) }
 0x142   : > { %v848_v19 = vld [vmem:[#allocation2 + $0x28] sm:$0xff] (!%p1156_p11)  ;;  %v940_v47 = vmax.f32 (!%p1156_p11), %v924_v35, 0.0  ;;  %v875_v55 = vmul.f32 (!%p1156_p11), %v1505_v2, %v852_v39  ;;  %955 = vst [vmem:[%s1660_s5 + $0x10] sm:$0xff] (!%p1156_p11), %v939_v46  ;;  %v897_v58 = vadd.f32 (!%p1156_p11), %v1510_v3, %v874_v49  ;;  %v876_v60 = vmul.f32 (!%p1156_p11), %v1505_v2, %v853_v44 }
 0x143   : > { %830 = vst [vmem:[#allocation2 + $0x38] sm:$0xff] %v814_v63  ;;  %838 = vst [vmem:[#allocation2 + $0x78] sm:$0xff] %v822_v0  ;;  %v871_v25 = vmul.f32 (!%p1156_p11), %v1505_v2, %v848_v19  ;;  %v893_v28 = vadd.f32 (!%p1156_p11), %v1510_v3, %v870_v18  ;;  %v856_v56 = vld [vmem:[#allocation2 + $0x68] sm:$0xff] (!%p1156_p11)  ;;  %v877_v61 = vmul.f32 (!%p1156_p11), %v1505_v2, %v854_v45 }
 0x144   : > { %956 = vst [vmem:[%s1660_s5 + $0x18] sm:$0xff] %v940_v47  ;;  %v898_v4 = vadd.f32 %v1510_v3, %v875_v55  ;;  %v878_v7 = vmul.f32 %v1505_v2, %v855_v50  ;;  %v929_v8 = vadd.f32 %v913_v54, %v897_v58  ;;  %v899_v9 = vadd.f32 %v1510_v3, %v876_v60  ;;  %v918_v15 = vld [vmem:[%s1659_s4 + $0x68] sm:$0xff] }
 0x145   : > { %v894_v36 = vadd.f32 %v1510_v3, %v871_v25  ;;  %v925_v41 = vadd.f32 %v909_v24, %v893_v28  ;;  %v900_v10 = vadd.f32 %v1510_v3, %v877_v61  ;;  %v879_v12 = vmul.f32 %v1505_v2, %v856_v56 }
 0x146   : > { %v930_v13 = vadd.f32 %v914_v59, %v898_v4  ;;  %v901_v14 = vadd.f32 %v1510_v3, %v878_v7  ;;  %v945_v18 = vmax.f32 %v929_v8, 0.0  ;;  %v931_v19 = vadd.f32 %v915_v5, %v899_v9 }
 0x147   : > { %v926_v48 = vadd.f32 %v910_v29, %v894_v36  ;;  %v941_v51 = vmax.f32 %v925_v41, 0.0  ;;  %v902_v21 = vadd.f32 %v1510_v3, %v879_v12 }
 0x148   : > { %v849_v20 = vld [vmem:[#allocation2 + $0x30] sm:$0xff]  ;;  %v946_v24 = vmax.f32 %v930_v13, 0.0  ;;  %v933_v25 = vadd.f32 %v917_v11, %v901_v14  ;;  %961 = vst [vmem:[%s1660_s5 + $0x40] sm:$0xff] %v945_v18 }
 0x149   : > { %v872_v30 = vmul.f32 %v1505_v2, %v849_v20  ;;  %v942_v57 = vmax.f32 %v926_v48, 0.0  ;;  %v857_v62 = vld [vmem:[#allocation2 + $0x70] sm:$0xff]  ;;  %957 = vst [vmem:[%s1660_s5 + $0x20] sm:$0xff] %v941_v51  ;;  %v932_v20 = vadd.f32 %v916_v6, %v900_v10  ;;  %v934_v29 = vadd.f32 %v918_v15, %v902_v21 }
 0x14a   : > { %v850_v26 = vld [vmem:[#allocation2 + $0x38] sm:$0xff]  ;;  %v880_v16 = vmul.f32 %v1505_v2, %v857_v62  ;;  %962 = vst [vmem:[%s1660_s5 + $0x48] sm:$0xff] %v946_v24 }
 0x14b   : > { %v873_v31 = vmul.f32 %v1505_v2, %v850_v26  ;;  %v895_v42 = vadd.f32 %v1510_v3, %v872_v30  ;;  %v858_v63 = vld [vmem:[#allocation2 + $0x78] sm:$0xff]  ;;  %958 = vst [vmem:[%s1660_s5 + $0x28] sm:$0xff] %v942_v57  ;;  %v948_v28 = vmax.f32 %v932_v20, 0.0  ;;  %v949_v30 = vmax.f32 %v933_v25, 0.0 }
 0x14c   : > { %v881_v17 = vmul.f32 %v1505_v2, %v858_v63  ;;  %v903_v26 = vadd.f32 %v1510_v3, %v880_v16  ;;  %v947_v2 = vmax.f32 %v931_v19, 0.0 }
 0x14d   : > { %v896_v43 = vadd.f32 %v1510_v3, %v873_v31  ;;  %v927_v52 = vadd.f32 %v911_v37, %v895_v42  ;;  %964 = vst [vmem:[%s1660_s5 + $0x58] sm:$0xff] %v948_v28  ;;  %965 = vst [vmem:[%s1660_s5 + $0x60] sm:$0xff] %v949_v30 }
 0x14e   : > { %v904_v27 = vadd.f32 %v1510_v3, %v881_v17  ;;  %v935_v31 = vadd.f32 %v919_v22, %v903_v26  ;;  %963 = vst [vmem:[%s1660_s5 + $0x50] sm:$0xff] %v947_v2  ;;  %v950_v3 = vmax.f32 %v934_v29, 0.0 }
 0x14f   : > { %v928_v53 = vadd.f32 %v912_v38, %v896_v43  ;;  %v943_v0 = vmax.f32 %v927_v52, 0.0 }
 0x150   : > { %v936_v32 = vadd.f32 %v920_v23, %v904_v27  ;;  %v951_v33 = vmax.f32 %v935_v31, 0.0  ;;  %966 = vst [vmem:[%s1660_s5 + $0x68] sm:$0xff] %v950_v3 }
 0x151   : > { %v944_v1 = vmax.f32 %v928_v53, 0.0  ;;  %959 = vst [vmem:[%s1660_s5 + $0x30] sm:$0xff] %v943_v0 }
 0x152   : > { %v952_v34 = vmax.f32 %v936_v32, 0.0  ;;  %967 = vst [vmem:[%s1660_s5 + $0x70] sm:$0xff] %v951_v33 }
 0x153   : > { %960 = vst [vmem:[%s1660_s5 + $0x38] sm:$0xff] %v944_v1 }
 0x154   : > { %968 = vst [vmem:[%s1660_s5 + $0x78] sm:$0xff] %v952_v34 }
 0x155 PF: > { %s15_s22 = sadd.s32 1, %s1363_s22   ;;  %s1661_s18 = smov %s1351_s19 }
 0x156   : > { %p12_p12 = scmp.ge.s32.totalorder %s15_s22, 5   ;;  %s1662_s19 = smov %s1431_s26 }
 0x157   : > { %s1663_s20 = smov %s1359_s21  ;;  %s1664_s21 = smov %s1666_s23 }
 0x158   :  { %14 = sbr.rel (!%p12_p12) target bundleno = 3 (0x3), region = 133 }

// kernel: resnet34_forward.47
= control target key start
LH: loop header
LB: loop body
LE: loop exit
PB: predicated region body
PF: predicated region fallthrough
CT: control target
= control target key end

     0   :  { %s938_s15 = smov 0   ;;  %s940_s16 = smov 0   ;;  %s1047_s0 = inlined_call_operand.vmem [shape: bf16[32,768], index: 0, kind: input, shape index: {}]   ;;  %s1048_s1 = inlined_call_operand.vmem [shape: bf16[768,128], index: 1, kind: input, shape index: {}]   ;;  %s1049_s2 = inlined_call_operand.vmem [shape: f32[1,128], index: 2, kind: input, shape index: {}]   ;;  %s1050_s3 = inlined_call_operand.vmem [shape: f32[1,128], index: 3, kind: input, shape index: {}]   ;;  %s1051_s4 = inlined_call_operand.vmem [shape: f32[32,128], index: 4, kind: output, shape index: {}]  }
   0x1   :  { %s942_s17 = smov 0   ;;  %s944_s18 = smov 0  }
   0x2   :  { %s946_s19 = smov 0  }
   0x3 LB: > { %s26_s20 = sadd.s32 1, %s906_s18  ;;  %p49_p1 = scmp.ne.s32.totalorder %s898_s16, %s894_s15  ;;  %s910_s19 = sphi %s946_s19, %s14_s19   ;;  %s906_s18 = sphi %s944_s18, %s1055_s18   ;;  %s902_s17 = sphi %s942_s17, %s1054_s17   ;;  %s898_s16 = sphi %s940_s16, %s1053_s16   ;;  %s894_s15 = sphi %s938_s15, %s1052_s15  }
   0x4   : > { %p27_p0 = scmp.ge.s32.totalorder %s26_s20, 3  ;;  %p50_p2 = scmp.eq.s32.totalorder %s910_s19, 0 }
   0x5   : > { %s42_s22 = sadd.s32 1, %s898_s16  ;;  %p728_p5 = scmp.ge.s32.totalorder %s910_s19, 3 }
   0x6   : > { %s1057_s20 = smov (%p27_p0, %s26_s20), 0  ;;  %p51_p3 = por %p50_p2, %p49_p1 }
   0x7   : > { %s38_s21 = ssub.s32 %s906_s18, %s1057_s20  ;;  %195 = sbr.rel (%p728_p5) target bundleno = 21 (0x15), region = 24 }
   0x8   : > { %p40_p4 = scmp.eq.s32.totalorder %s38_s21, 0 }
   0xa   : > { %s973_s23 = scalar_select %p40_p4, %s898_s16, %s42_s22  }
   0xe   : > { %198 = sbr.rel (!%p51_p3) target bundleno = 21 (0x15), region = 28  ;;  %s200_s24 = sand.u32 (%p51_p3), 1, %s898_s16  }
   0xf   : > { %s764_s25 = sshll.u32 (%p51_p3), %s906_s18, 3  ;;  %s729_s26 = sshll.u32 (%p51_p3), %s200_s24, 5 }
  0x10   : > { %s208_s29 = scalar_lea.vmem (%p51_p3), %s1047_s0, %s764_s25  ;;  %s202_s30 = scalar_lea.vmem (%p51_p3), [#allocation3], %s729_s26 }
  0x11   : > { %v242_v0 = vld [vmem:[%s208_s29] sm:$0xff] (%p51_p3)  ;;  %v244_v1 = vld [vmem:[%s208_s29 + $0x18] sm:$0xff] (%p51_p3)  ;;  %v246_v2 = vld [vmem:[%s208_s29 + $0x30] sm:$0xff] (%p51_p3) }
  0x12   : > { %243 = vst [vmem:[%s202_s30] sm:$0xff] (%p51_p3), %v242_v0  ;;  %245 = vst [vmem:[%s202_s30 + $0x8] sm:$0xff] (%p51_p3), %v244_v1  ;;  %v248_v3 = vld [vmem:[%s208_s29 + $0x48] sm:$0xff] (%p51_p3) }
  0x13   : > { %247 = vst [vmem:[%s202_s30 + $0x10] sm:$0xff] (%p51_p3), %v246_v2  ;;  %249 = vst [vmem:[%s202_s30 + $0x18] sm:$0xff] (%p51_p3), %v248_v3 }
  0x15 PF: > { %p732_p6 = scmp.ge.s32.totalorder %s910_s19, 1  ;;  %p266_p7 = scmp.lt.s32.totalorder %s910_s19, 4 }
  0x17   : > { %p267_p8 = pnand %p732_p6, %p266_p7 }
  0x18   : > { %s273_s5 = sand.u32 (!%p267_p8), 1, %s894_s15   ;;  %s734_s6 = sshll.u32 (!%p267_p8), %s902_s17, 5 }
  0x19   : > { %270 = sbr.rel (%p267_p8) target bundleno = 306 (0x132), region = 70  ;;  %s733_s7 = sshll.u32 (!%p267_p8), %s273_s5, 5 }
  0x1a   : > { %p318_p9 = scmp.lt.s32.totalorder (!%p267_p8), %s734_s6, 95  ;;  %s990_s12 = scalar_lea.vmem (!%p267_p8), [#allocation3], %s733_s7 }
  0x1b   : > { %p736_p10 = scmp.ne.s32.totalorder (!%p267_p8), %s902_s17, 0 }
  0x20   : > { %s1059_s6 = smov (!%p318_p9, %s734_s6), 95  ;;  %345 = sbr.rel (%p736_p10) target bundleno = 39 (0x27), region = 78 }
  0x21   : > { %s735_s8 = sshll.u32 %s1059_s6, 2  ;;  %v912_v4 = vmov (!%p736_p10), 0.0  }
  0x22   : > { %s988_s11 = scalar_lea.vmem %s1048_s1, %s735_s8  ;;  %346 = vst [vmem:[#allocation2] sm:$0xff] (!%p736_p10), %v912_v4  ;;  %347 = vst [vmem:[#allocation2 + $0x8] sm:$0xff] (!%p736_p10), %v912_v4 }
  0x23   : > { %348 = vst [vmem:[#allocation2 + $0x10] sm:$0xff] (!%p736_p10), %v912_v4  ;;  %349 = vst [vmem:[#allocation2 + $0x18] sm:$0xff] (!%p736_p10), %v912_v4 }
  0x27 PF: > { %v850_v5 = vld [vmem:[%s988_s11 + $0x40] sm:$0xff]   ;;  %v852_v7 = vld [vmem:[%s988_s11 + $0x48] sm:$0xff]   ;;  %v854_v9 = vld [vmem:[%s988_s11 + $0x50] sm:$0xff]   ;;  %p757_p11 = scmp.ne.s32.totalorder %s902_s17, 2 }
  0x28   : > { %v851_v6 = vld [vmem:[%s988_s11] sm:$0xff]   ;;  %765 = vmatprep.subr.bf16.mxu0 %v850_v5  ;;  %793 = vmatprep.subr.bf16.mxu1 %v850_v5  ;;  %v853_v8 = vld [vmem:[%s988_s11 + $0x8] sm:$0xff]   ;;  %v855_v10 = vld [vmem:[%s988_s11 + $0x10] sm:$0xff]  }
  0x29   : > { %766 = vmatpush3.bf16.msra.mxu0 %v851_v6  ;;  %801 = vmatpush3.bf16.msra.mxu1 %v851_v6  ;;  %v856_v11 = vld [vmem:[%s988_s11 + $0x58] sm:$0xff]   ;;  %v858_v13 = vld [vmem:[%s988_s11 + $0x60] sm:$0xff]   ;;  %v860_v15 = vld [vmem:[%s988_s11 + $0x68] sm:$0xff]  }
  0x2a   : > { %767 = vmatprep.subr.bf16.mxu0 %v852_v7  ;;  %794 = vmatprep.subr.bf16.mxu1 %v852_v7  ;;  %v857_v12 = vld [vmem:[%s988_s11 + $0x18] sm:$0xff]   ;;  %v859_v14 = vld [vmem:[%s988_s11 + $0x20] sm:$0xff]   ;;  %v861_v18 = vld [vmem:[%s988_s11 + $0x28] sm:$0xff]  }
  0x2b   : > { %v868_v16 = vld [vmem:[%s990_s12 + $0x4] ss:$8 sps:$4 sm:$0xff]   ;;  %v871_v17 = vld [vmem:[%s990_s12 + $0x14] ss:$8 sps:$4 sm:$0xff]   ;;  %v866_v23 = vld [vmem:[%s990_s12] ss:$8 sps:$4 sm:$0xff]  }
  0x2c   : > { %v862_v19 = vld [vmem:[%s988_s11 + $0x70] sm:$0xff]   ;;  %538 = vmatprep.mubr.bf16.mxu0 %v868_v16  ;;  %546 = vmatprep.mubr.bf16.mxu1 %v871_v17  ;;  %v864_v21 = vld [vmem:[%s988_s11 + $0x78] sm:$0xff]   ;;  %v350_v27 = vld [vmem:[#allocation2] sm:$0xff] }
  0x2d   : > { %768 = vmatpush3.bf16.msra.mxu0 %v853_v8  ;;  %802 = vmatpush3.bf16.msra.mxu1 %v853_v8  ;;  %v863_v20 = vld [vmem:[%s988_s11 + $0x30] sm:$0xff]   ;;  %v865_v22 = vld [vmem:[%s988_s11 + $0x38] sm:$0xff]   ;;  %v351_v35 = vld [vmem:[#allocation2 + $0x8] sm:$0xff] }
  0x2e   : > { %769 = vmatprep.subr.bf16.mxu0 %v854_v9  ;;  %795 = vmatprep.subr.bf16.mxu1 %v854_v9  ;;  %v869_v24 = vld [vmem:[%s990_s12 + $0x10] ss:$8 sps:$4 sm:$0xff]   ;;  %v758_v46 = vld [vmem:[%s1049_s2] ss:$0 sm:$0xff] (!%p757_p11) }
  0x2f   : > { %v352_v29 = vld [vmem:[#allocation2 + $0x10] sm:$0xff]  ;;  %v353_v37 = vld [vmem:[#allocation2 + $0x18] sm:$0xff]  ;;  %v759_v47 = vld [vmem:[%s1050_s3] ss:$0 sm:$0xff] (!%p757_p11) }
  0x31   : > { %770 = vmatpush3.bf16.msra.mxu0 %v855_v10  ;;  %803 = vmatpush3.bf16.msra.mxu1 %v855_v10 }
  0x32   : > { %771 = vmatprep.subr.bf16.mxu0 %v856_v11  ;;  %796 = vmatprep.subr.bf16.mxu1 %v856_v11 }
  0x35   : > { %772 = vmatpush3.bf16.msra.mxu0 %v857_v12  ;;  %804 = vmatpush3.bf16.msra.mxu1 %v857_v12 }
  0x36   : > { %773 = vmatprep.subr.bf16.mxu0 %v858_v13  ;;  %797 = vmatprep.subr.bf16.mxu1 %v858_v13 }
  0x39   : > { %774 = vmatpush3.bf16.msra.mxu0 %v859_v14  ;;  %805 = vmatpush3.bf16.msra.mxu1 %v859_v14 }
  0x3a   : > { %775 = vmatprep.subr.bf16.mxu0 %v860_v15  ;;  %798 = vmatprep.subr.bf16.mxu1 %v860_v15 }
  0x3d   : > { %776 = vmatpush3.bf16.msra.mxu0 %v861_v18  ;;  %806 = vmatpush3.bf16.msra.mxu1 %v861_v18 }
  0x3e   : > { %777 = vmatprep.subr.bf16.mxu0 %v862_v19  ;;  %799 = vmatprep.subr.bf16.mxu1 %v862_v19 }
  0x41   : > { %778 = vmatpush3.bf16.msra.mxu0 %v863_v20  ;;  %807 = vmatpush3.bf16.msra.mxu1 %v863_v20 }
  0x42   : > { %779 = vmatprep.subr.bf16.mxu0 %v864_v21  ;;  %800 = vmatprep.subr.bf16.mxu1 %v864_v21 }
  0x45   : > { %780 = vmatpush3.bf16.msra.mxu0 %v865_v22  ;;  %808 = vmatpush3.bf16.msra.mxu1 %v865_v22 }
  0x48   : > { %539 = vmatmul.mubr.bf16.vlgmr.msra.gmra.mrb[0].mxu0 %v866_v23  ;;  %547 = vmatmul.mubr.bf16.vlgmr.msra.gmra.mrb[0].mxu1 %v869_v24 }
 0x11b   : > { %v781_v25 = vpop.f32.mrb[0].mxu0  ;;  %v787_v26 = vpop.f32.mrb[0].mxu1 }
 0x11c   : > { %v782_v28 = vpop.f32.mrb[1].mxu0  ;;  %v788_v30 = vpop.f32.mrb[1].mxu1 }
 0x11d   : > { %v783_v31 = vadd.f32 %v782_v28, %v781_v25  ;;  %v789_v32 = vadd.f32 %v788_v30, %v787_v26  ;;  %v784_v33 = vpop.f32.mrb[2].mxu0  ;;  %v790_v34 = vpop.f32.mrb[2].mxu1  ;;  %566 = sbr.rel (%p757_p11) target bundleno = 306 (0x132), region = 82 }
 0x11e   : > { %v785_v36 = vpop.f32.mrb[3].mxu0  ;;  %v791_v38 = vpop.f32.mrb[3].mxu1 }
 0x11f   : > { %v555_v39 = vadd.f32 %v783_v31, %v350_v27  ;;  %v557_v40 = vadd.f32 %v789_v32, %v352_v29  ;;  %v786_v41 = vadd.f32 %v785_v36, %v784_v33  ;;  %v792_v42 = vadd.f32 %v791_v38, %v790_v34 }
 0x121   : > { %559 = vst [vmem:[#allocation2] sm:$0xff] %v555_v39  ;;  %561 = vst [vmem:[#allocation2 + $0x10] sm:$0xff] %v557_v40  ;;  %v556_v43 = vadd.f32 %v786_v41, %v351_v35  ;;  %v558_v44 = vadd.f32 %v792_v42, %v353_v37 }
 0x123   : > { %560 = vst [vmem:[#allocation2 + $0x8] sm:$0xff] %v556_v43  ;;  %562 = vst [vmem:[#allocation2 + $0x18] sm:$0xff] %v558_v44 }
 0x128   : > { %v567_v45 = vld [vmem:[#allocation2] sm:$0xff]  ;;  %v569_v50 = vld [vmem:[#allocation2 + $0x10] sm:$0xff] }
 0x129   : > { %v578_v48 = vmul.f32 %v758_v46, %v567_v45  ;;  %v580_v53 = vmul.f32 %v758_v46, %v569_v50 }
 0x12a   : > { %v568_v49 = vld [vmem:[#allocation2 + $0x8] sm:$0xff]  ;;  %v570_v51 = vld [vmem:[#allocation2 + $0x18] sm:$0xff] }
 0x12b   : > { %v579_v52 = vmul.f32 %v758_v46, %v568_v49  ;;  %v581_v54 = vmul.f32 %v758_v46, %v570_v51  ;;  %v589_v55 = vadd.f32 %v759_v47, %v578_v48  ;;  %v591_v57 = vadd.f32 %v759_v47, %v580_v53 }
 0x12d   : > { %v590_v56 = vadd.f32 %v759_v47, %v579_v52  ;;  %v592_v58 = vadd.f32 %v759_v47, %v581_v54  ;;  %v593_v59 = vmax.f32 %v589_v55, 0.0  ;;  %v595_v61 = vmax.f32 %v591_v57, 0.0 }
 0x12f   : > { %v594_v60 = vmax.f32 %v590_v56, 0.0  ;;  %v596_v62 = vmax.f32 %v592_v58, 0.0  ;;  %597 = vst [vmem:[%s1051_s4] sm:$0xff] %v593_v59  ;;  %599 = vst [vmem:[%s1051_s4 + $0x10] sm:$0xff] %v595_v61 }
 0x131   : > { %598 = vst [vmem:[%s1051_s4 + $0x8] sm:$0xff] %v594_v60  ;;  %600 = vst [vmem:[%s1051_s4 + $0x18] sm:$0xff] %v596_v62 }
 0x132 PF: > { %s14_s19 = sadd.s32 1, %s910_s19   ;;  %s1052_s15 = smov %s898_s16 }
 0x133   : > { %p11_p12 = scmp.ge.s32.totalorder %s14_s19, 5   ;;  %s1053_s16 = smov %s973_s23 }
 0x134   : > { %s1054_s17 = smov %s906_s18  ;;  %s1055_s18 = smov %s1057_s20 }
 0x135   :  { %13 = sbr.rel (!%p11_p12) target bundleno = 3 (0x3), region = 126 }

// kernel: resnet34_forward.48
= control target key start
LH: loop header
LB: loop body
LE: loop exit
PB: predicated region body
PF: predicated region fallthrough
CT: control target
= control target key end

     0   :  { %s329_s1 = inlined_call_operand.vmem [shape: bf16[128,128], index: 1, kind: input, shape index: {}]   ;;  %s330_s0 = inlined_call_operand.vmem [shape: bf16[32,128], index: 0, kind: input, shape index: {}]   ;;  %s331_s2 = inlined_call_operand.vmem [shape: f32[1,128], index: 2, kind: input, shape index: {}]   ;;  %s332_s3 = inlined_call_operand.vmem [shape: f32[1,128], index: 3, kind: input, shape index: {}]   ;;  %s333_s4 = inlined_call_operand.vmem [shape: f32[32,128], index: 4, kind: output, shape index: {}]  }
   0x1   :  { %v246_v0 = vld [vmem:[%s329_s1] sm:$0xff]   ;;  %v247_v1 = vld [vmem:[%s329_s1 + $0x8] sm:$0xff]   ;;  %v248_v2 = vld [vmem:[%s329_s1 + $0x10] sm:$0xff]  }
   0x2   :  { %226 = vmatprep.subr.bf16.mxu0 %v246_v0  ;;  %v249_v3 = vld [vmem:[%s329_s1 + $0x18] sm:$0xff]   ;;  %v254_v4 = vld [vmem:[%s330_s0] sm:$0xff]   ;;  %v251_v6 = vld [vmem:[%s329_s1 + $0x28] sm:$0xff]  }
   0x3   :  { %227 = vmatpush3.bf16.msra.mxu0 %v246_v0  ;;  %242 = vmatprep.mubr.bf16.mxu0 %v254_v4  ;;  %v250_v5 = vld [vmem:[%s329_s1 + $0x20] sm:$0xff]   ;;  %v252_v7 = vld [vmem:[%s329_s1 + $0x30] sm:$0xff]   ;;  %v253_v8 = vld [vmem:[%s329_s1 + $0x38] sm:$0xff]  }
   0x4   :  { %228 = vmatprep.subr.bf16.mxu0 %v247_v1  ;;  %v255_v9 = vld [vmem:[%s330_s0 + $0x8] sm:$0xff]   ;;  %v214_v10 = vld [vmem:[%s331_s2] ss:$0 sm:$0xff] }
   0x5   :  { %v215_v12 = vld [vmem:[%s332_s3] ss:$0 sm:$0xff] }
   0x7   :  { %229 = vmatpush3.bf16.msra.mxu0 %v247_v1 }
   0x8   :  { %230 = vmatprep.subr.bf16.mxu0 %v248_v2 }
   0xb   :  { %231 = vmatpush3.bf16.msra.mxu0 %v248_v2 }
   0xc   :  { %232 = vmatprep.subr.bf16.mxu0 %v249_v3 }
   0xf   :  { %233 = vmatpush3.bf16.msra.mxu0 %v249_v3 }
  0x10   :  { %234 = vmatprep.subr.bf16.mxu0 %v250_v5 }
  0x13   :  { %235 = vmatpush3.bf16.msra.mxu0 %v250_v5 }
  0x14   :  { %236 = vmatprep.subr.bf16.mxu0 %v251_v6 }
  0x17   :  { %237 = vmatpush3.bf16.msra.mxu0 %v251_v6 }
  0x18   :  { %238 = vmatprep.subr.bf16.mxu0 %v252_v7 }
  0x1b   :  { %239 = vmatpush3.bf16.msra.mxu0 %v252_v7 }
  0x1c   :  { %240 = vmatprep.subr.bf16.mxu0 %v253_v8 }
  0x1f   :  { %241 = vmatpush3.bf16.msra.mxu0 %v253_v8 }
  0x22   :  { %243 = vmatmul.mubr.bf16.vlgmr.msra.gmra.mrb[0].mxu0 %v255_v9 }
  0xf5   :  { %v244_v11 = vpop.f32.mrb[0].mxu0 }
  0xf6   :  { %v183_v13 = vmul.f32 %v244_v11, %v214_v10  ;;  %v144_v14 = vpop.f32.mrb[1].mxu0 }
  0xf7   :  { %v181_v15 = vmul.f32 %v214_v10, %v144_v14  ;;  %v245_v16 = vpop.f32.mrb[2].mxu0 }
  0xf8   :  { %v194_v17 = vadd.f32 %v215_v12, %v183_v13  ;;  %v184_v18 = vmul.f32 %v245_v16, %v214_v10  ;;  %v147_v19 = vpop.f32.mrb[3].mxu0 }
  0xf9   :  { %v192_v20 = vadd.f32 %v215_v12, %v181_v15  ;;  %v182_v21 = vmul.f32 %v214_v10, %v147_v19 }
  0xfa   :  { %198 = vst [vmem:[%s333_s4 + $0x10] sm:$0xff] %v194_v17  ;;  %v195_v22 = vadd.f32 %v215_v12, %v184_v18 }
  0xfb   :  { %196 = vst [vmem:[%s333_s4] sm:$0xff] %v192_v20  ;;  %v193_v23 = vadd.f32 %v215_v12, %v182_v21 }
  0xfc   :  { %199 = vst [vmem:[%s333_s4 + $0x18] sm:$0xff] %v195_v22 }
  0xfd   :  { %197 = vst [vmem:[%s333_s4 + $0x8] sm:$0xff] %v193_v23 }

// kernel: resnet34_forward.49
= control target key start
LH: loop header
LB: loop body
LE: loop exit
PB: predicated region body
PF: predicated region fallthrough
CT: control target
= control target key end

     0   :  { %s1030_s18 = smov 0   ;;  %s1032_s19 = smov 0   ;;  %s1151_s0 = inlined_call_operand.vmem [shape: bf16[32,1280], index: 0, kind: input, shape index: {}]   ;;  %s1152_s1 = inlined_call_operand.vmem [shape: bf16[1280,128], index: 1, kind: input, shape index: {}]   ;;  %s1153_s2 = inlined_call_operand.vmem [shape: f32[1,128], index: 2, kind: input, shape index: {}]   ;;  %s1154_s3 = inlined_call_operand.vmem [shape: f32[1,128], index: 3, kind: input, shape index: {}]   ;;  %s1155_s4 = inlined_call_operand.vmem [shape: f32[32,128], index: 4, kind: input, shape index: {}]   ;;  %s1156_s5 = inlined_call_operand.vmem [shape: f32[32,128], index: 5, kind: output, shape index: {}]  }
   0x1   :  { %s1034_s20 = smov 0   ;;  %s1036_s21 = smov 0  }
   0x2   :  { %s1038_s22 = smov 0  }
   0x3 LB: > { %s27_s23 = sadd.s32 1, %s993_s21  ;;  %p50_p1 = scmp.ne.s32.totalorder %s985_s19, %s981_s18  ;;  %s997_s22 = sphi %s1038_s22, %s15_s22   ;;  %s993_s21 = sphi %s1036_s21, %s1160_s21   ;;  %s989_s20 = sphi %s1034_s20, %s1159_s20   ;;  %s985_s19 = sphi %s1032_s19, %s1158_s19   ;;  %s981_s18 = sphi %s1030_s18, %s1157_s18  }
   0x4   : > { %p28_p0 = scmp.ge.s32.totalorder %s27_s23, 5  ;;  %p51_p2 = scmp.eq.s32.totalorder %s997_s22, 0 }
   0x5   : > { %s43_s25 = sadd.s32 1, %s985_s19  ;;  %p815_p5 = scmp.ge.s32.totalorder %s997_s22, 5 }
   0x6   : > { %s1162_s23 = smov (%p28_p0, %s27_s23), 0  ;;  %p52_p3 = por %p51_p2, %p50_p1 }
   0x7   : > { %s39_s24 = ssub.s32 %s993_s21, %s1162_s23  ;;  %236 = sbr.rel (%p815_p5) target bundleno = 21 (0x15), region = 28 }
   0x8   : > { %p41_p4 = scmp.eq.s32.totalorder %s39_s24, 0 }
   0xa   : > { %s1065_s26 = scalar_select %p41_p4, %s985_s19, %s43_s25  }
   0xe   : > { %239 = sbr.rel (!%p52_p3) target bundleno = 21 (0x15), region = 32  ;;  %s241_s27 = sand.u32 (%p52_p3), 1, %s985_s19  }
   0xf   : > { %s851_s28 = sshll.u32 (%p52_p3), %s993_s21, 3  ;;  %s816_s29 = sshll.u32 (%p52_p3), %s241_s27, 5 }
  0x10   : > { %s249_s7 = scalar_lea.vmem (%p52_p3), %s1151_s0, %s851_s28  ;;  %s243_s8 = scalar_lea.vmem (%p52_p3), [#allocation3], %s816_s29 }
  0x11   : > { %v283_v0 = vld [vmem:[%s249_s7] sm:$0xff] (%p52_p3)  ;;  %v285_v1 = vld [vmem:[%s249_s7 + $0x28] sm:$0xff] (%p52_p3)  ;;  %v287_v2 = vld [vmem:[%s249_s7 + $0x50] sm:$0xff] (%p52_p3) }
  0x12   : > { %284 = vst [vmem:[%s243_s8] sm:$0xff] (%p52_p3), %v283_v0  ;;  %286 = vst [vmem:[%s243_s8 + $0x8] sm:$0xff] (%p52_p3), %v285_v1  ;;  %v289_v3 = vld [vmem:[%s249_s7 + $0x78] sm:$0xff] (%p52_p3) }
  0x13   : > { %288 = vst [vmem:[%s243_s8 + $0x10] sm:$0xff] (%p52_p3), %v287_v2  ;;  %290 = vst [vmem:[%s243_s8 + $0x18] sm:$0xff] (%p52_p3), %v289_v3 }
  0x15 PF: > { %p819_p6 = scmp.ge.s32.totalorder %s997_s22, 1  ;;  %p307_p7 = scmp.lt.s32.totalorder %s997_s22, 6 }
  0x17   : > { %p308_p8 = pnand %p819_p6, %p307_p7 }
  0x18   : > { %s314_s9 = sand.u32 (!%p308_p8), 1, %s981_s18   ;;  %s821_s10 = sshll.u32 (!%p308_p8), %s989_s20, 5 }
  0x19   : > { %311 = sbr.rel (%p308_p8) target bundleno = 308 (0x134), region = 74  ;;  %s820_s11 = sshll.u32 (!%p308_p8), %s314_s9, 5 }
  0x1a   : > { %p369_p9 = scmp.lt.s32.totalorder (!%p308_p8), %s821_s10, 159  ;;  %s1082_s16 = scalar_lea.vmem (!%p308_p8), [#allocation3], %s820_s11 }
  0x1b   : > { %p823_p10 = scmp.ne.s32.totalorder (!%p308_p8), %s989_s20, 0 }
  0x20   : > { %s1164_s10 = smov (!%p369_p9, %s821_s10), 159  ;;  %405 = sbr.rel (%p823_p10) target bundleno = 39 (0x27), region = 82 }
  0x21   : > { %s822_s12 = sshll.u32 %s1164_s10, 2  ;;  %v999_v4 = vmov (!%p823_p10), 0.0  }
  0x22   : > { %s1080_s15 = scalar_lea.vmem %s1152_s1, %s822_s12  ;;  %406 = vst [vmem:[#allocation2] sm:$0xff] (!%p823_p10), %v999_v4  ;;  %407 = vst [vmem:[#allocation2 + $0x8] sm:$0xff] (!%p823_p10), %v999_v4 }
  0x23   : > { %408 = vst [vmem:[#allocation2 + $0x10] sm:$0xff] (!%p823_p10), %v999_v4  ;;  %409 = vst [vmem:[#allocation2 + $0x18] sm:$0xff] (!%p823_p10), %v999_v4 }
  0x27 PF: > { %v937_v5 = vld [vmem:[%s1080_s15 + $0x40] sm:$0xff]   ;;  %v939_v7 = vld [vmem:[%s1080_s15 + $0x48] sm:$0xff]   ;;  %v941_v9 = vld [vmem:[%s1080_s15 + $0x50] sm:$0xff]   ;;  %p844_p11 = scmp.ne.s32.totalorder %s989_s20, 4 }
  0x28   : > { %v938_v6 = vld [vmem:[%s1080_s15] sm:$0xff]   ;;  %852 = vmatprep.subr.bf16.mxu0 %v937_v5  ;;  %880 = vmatprep.subr.bf16.mxu1 %v937_v5  ;;  %v940_v8 = vld [vmem:[%s1080_s15 + $0x8] sm:$0xff]   ;;  %v942_v10 = vld [vmem:[%s1080_s15 + $0x10] sm:$0xff]  }
  0x29   : > { %853 = vmatpush3.bf16.msra.mxu0 %v938_v6  ;;  %888 = vmatpush3.bf16.msra.mxu1 %v938_v6  ;;  %v943_v11 = vld [vmem:[%s1080_s15 + $0x58] sm:$0xff]   ;;  %v945_v13 = vld [vmem:[%s1080_s15 + $0x60] sm:$0xff]   ;;  %v947_v15 = vld [vmem:[%s1080_s15 + $0x68] sm:$0xff]  }
  0x2a   : > { %854 = vmatprep.subr.bf16.mxu0 %v939_v7  ;;  %881 = vmatprep.subr.bf16.mxu1 %v939_v7  ;;  %v944_v12 = vld [vmem:[%s1080_s15 + $0x18] sm:$0xff]   ;;  %v946_v14 = vld [vmem:[%s1080_s15 + $0x20] sm:$0xff]   ;;  %v948_v18 = vld [vmem:[%s1080_s15 + $0x28] sm:$0xff]  }
  0x2b   : > { %v955_v16 = vld [vmem:[%s1082_s16 + $0x4] ss:$8 sps:$4 sm:$0xff]   ;;  %v958_v17 = vld [vmem:[%s1082_s16 + $0x14] ss:$8 sps:$4 sm:$0xff]   ;;  %v953_v23 = vld [vmem:[%s1082_s16] ss:$8 sps:$4 sm:$0xff]  }
  0x2c   : > { %v949_v19 = vld [vmem:[%s1080_s15 + $0x70] sm:$0xff]   ;;  %598 = vmatprep.mubr.bf16.mxu0 %v955_v16  ;;  %606 = vmatprep.mubr.bf16.mxu1 %v958_v17  ;;  %v951_v21 = vld [vmem:[%s1080_s15 + $0x78] sm:$0xff]   ;;  %v410_v27 = vld [vmem:[#allocation2] sm:$0xff] }
  0x2d   : > { %855 = vmatpush3.bf16.msra.mxu0 %v940_v8  ;;  %889 = vmatpush3.bf16.msra.mxu1 %v940_v8  ;;  %v950_v20 = vld [vmem:[%s1080_s15 + $0x30] sm:$0xff]   ;;  %v952_v22 = vld [vmem:[%s1080_s15 + $0x38] sm:$0xff]   ;;  %v411_v35 = vld [vmem:[#allocation2 + $0x8] sm:$0xff] }
  0x2e   : > { %856 = vmatprep.subr.bf16.mxu0 %v941_v9  ;;  %882 = vmatprep.subr.bf16.mxu1 %v941_v9  ;;  %v956_v24 = vld [vmem:[%s1082_s16 + $0x10] ss:$8 sps:$4 sm:$0xff]   ;;  %v845_v46 = vld [vmem:[%s1153_s2] ss:$0 sm:$0xff] (!%p844_p11)  ;;  %v654_v55 = vld [vmem:[%s1155_s4 + $0x8] sm:$0xff] (!%p844_p11) }
  0x2f   : > { %v412_v29 = vld [vmem:[#allocation2 + $0x10] sm:$0xff]  ;;  %v413_v37 = vld [vmem:[#allocation2 + $0x18] sm:$0xff]  ;;  %v846_v47 = vld [vmem:[%s1154_s3] ss:$0 sm:$0xff] (!%p844_p11) }
  0x30   : > { %v653_v50 = vld [vmem:[%s1155_s4] sm:$0xff] (!%p844_p11)  ;;  %v655_v59 = vld [vmem:[%s1155_s4 + $0x10] sm:$0xff] (!%p844_p11)  ;;  %v656_v60 = vld [vmem:[%s1155_s4 + $0x18] sm:$0xff] (!%p844_p11) }
  0x31   : > { %857 = vmatpush3.bf16.msra.mxu0 %v942_v10  ;;  %890 = vmatpush3.bf16.msra.mxu1 %v942_v10 }
  0x32   : > { %858 = vmatprep.subr.bf16.mxu0 %v943_v11  ;;  %883 = vmatprep.subr.bf16.mxu1 %v943_v11 }
  0x35   : > { %859 = vmatpush3.bf16.msra.mxu0 %v944_v12  ;;  %891 = vmatpush3.bf16.msra.mxu1 %v944_v12 }
  0x36   : > { %860 = vmatprep.subr.bf16.mxu0 %v945_v13  ;;  %884 = vmatprep.subr.bf16.mxu1 %v945_v13 }
  0x39   : > { %861 = vmatpush3.bf16.msra.mxu0 %v946_v14  ;;  %892 = vmatpush3.bf16.msra.mxu1 %v946_v14 }
  0x3a   : > { %862 = vmatprep.subr.bf16.mxu0 %v947_v15  ;;  %885 = vmatprep.subr.bf16.mxu1 %v947_v15 }
  0x3d   : > { %863 = vmatpush3.bf16.msra.mxu0 %v948_v18  ;;  %893 = vmatpush3.bf16.msra.mxu1 %v948_v18 }
  0x3e   : > { %864 = vmatprep.subr.bf16.mxu0 %v949_v19  ;;  %886 = vmatprep.subr.bf16.mxu1 %v949_v19 }
  0x41   : > { %865 = vmatpush3.bf16.msra.mxu0 %v950_v20  ;;  %894 = vmatpush3.bf16.msra.mxu1 %v950_v20 }
  0x42   : > { %866 = vmatprep.subr.bf16.mxu0 %v951_v21  ;;  %887 = vmatprep.subr.bf16.mxu1 %v951_v21 }
  0x45   : > { %867 = vmatpush3.bf16.msra.mxu0 %v952_v22  ;;  %895 = vmatpush3.bf16.msra.mxu1 %v952_v22 }
  0x48   : > { %599 = vmatmul.mubr.bf16.vlgmr.msra.gmra.mrb[0].mxu0 %v953_v23  ;;  %607 = vmatmul.mubr.bf16.vlgmr.msra.gmra.mrb[0].mxu1 %v956_v24 }
 0x11b   : > { %v868_v25 = vpop.f32.mrb[0].mxu0  ;;  %v874_v26 = vpop.f32.mrb[0].mxu1 }
 0x11c   : > { %v869_v28 = vpop.f32.mrb[1].mxu0  ;;  %v875_v30 = vpop.f32.mrb[1].mxu1 }
 0x11d   : > { %v870_v31 = vadd.f32 %v869_v28, %v868_v25  ;;  %v876_v32 = vadd.f32 %v875_v30, %v874_v26  ;;  %v871_v33 = vpop.f32.mrb[2].mxu0  ;;  %v877_v34 = vpop.f32.mrb[2].mxu1  ;;  %626 = sbr.rel (%p844_p11) target bundleno = 308 (0x134), region = 86 }
 0x11e   : > { %v872_v36 = vpop.f32.mrb[3].mxu0  ;;  %v878_v38 = vpop.f32.mrb[3].mxu1 }
 0x11f   : > { %v615_v39 = vadd.f32 %v870_v31, %v410_v27  ;;  %v617_v40 = vadd.f32 %v876_v32, %v412_v29  ;;  %v873_v41 = vadd.f32 %v872_v36, %v871_v33  ;;  %v879_v42 = vadd.f32 %v878_v38, %v877_v34 }
 0x121   : > { %619 = vst [vmem:[#allocation2] sm:$0xff] %v615_v39  ;;  %621 = vst [vmem:[#allocation2 + $0x10] sm:$0xff] %v617_v40  ;;  %v616_v43 = vadd.f32 %v873_v41, %v411_v35  ;;  %v618_v44 = vadd.f32 %v879_v42, %v413_v37 }
 0x123   : > { %620 = vst [vmem:[#allocation2 + $0x8] sm:$0xff] %v616_v43  ;;  %622 = vst [vmem:[#allocation2 + $0x18] sm:$0xff] %v618_v44 }
 0x128   : > { %v627_v45 = vld [vmem:[#allocation2] sm:$0xff]  ;;  %v629_v52 = vld [vmem:[#allocation2 + $0x10] sm:$0xff] }
 0x129   : > { %v638_v48 = vmul.f32 %v845_v46, %v627_v45  ;;  %v640_v56 = vmul.f32 %v845_v46, %v629_v52 }
 0x12a   : > { %v628_v49 = vld [vmem:[#allocation2 + $0x8] sm:$0xff]  ;;  %v630_v53 = vld [vmem:[#allocation2 + $0x18] sm:$0xff] }
 0x12b   : > { %v639_v51 = vmul.f32 %v845_v46, %v628_v49  ;;  %v649_v54 = vadd.f32 %v846_v47, %v638_v48  ;;  %v641_v57 = vmul.f32 %v845_v46, %v630_v53  ;;  %v651_v62 = vadd.f32 %v846_v47, %v640_v56 }
 0x12d   : > { %v650_v58 = vadd.f32 %v846_v47, %v639_v51  ;;  %v657_v61 = vadd.f32 %v653_v50, %v649_v54  ;;  %v652_v63 = vadd.f32 %v846_v47, %v641_v57  ;;  %v659_v2 = vadd.f32 %v655_v59, %v651_v62 }
 0x12f   : > { %v658_v0 = vadd.f32 %v654_v55, %v650_v58  ;;  %v661_v1 = vmax.f32 %v657_v61, 0.0  ;;  %v660_v3 = vadd.f32 %v656_v60, %v652_v63  ;;  %v663_v5 = vmax.f32 %v659_v2, 0.0 }
 0x131   : > { %v662_v4 = vmax.f32 %v658_v0, 0.0  ;;  %665 = vst [vmem:[%s1156_s5] sm:$0xff] %v661_v1  ;;  %v664_v6 = vmax.f32 %v660_v3, 0.0  ;;  %667 = vst [vmem:[%s1156_s5 + $0x10] sm:$0xff] %v663_v5 }
 0x133   : > { %666 = vst [vmem:[%s1156_s5 + $0x8] sm:$0xff] %v662_v4  ;;  %668 = vst [vmem:[%s1156_s5 + $0x18] sm:$0xff] %v664_v6 }
 0x134 PF: > { %s15_s22 = sadd.s32 1, %s997_s22   ;;  %s1157_s18 = smov %s985_s19 }
 0x135   : > { %p12_p12 = scmp.ge.s32.totalorder %s15_s22, 7   ;;  %s1158_s19 = smov %s1065_s26 }
 0x136   : > { %s1159_s20 = smov %s993_s21  ;;  %s1160_s21 = smov %s1162_s23 }
 0x137   :  { %14 = sbr.rel (!%p12_p12) target bundleno = 3 (0x3), region = 133 }

// kernel: resnet34_forward.50
= control target key start
LH: loop header
LB: loop body
LE: loop exit
PB: predicated region body
PF: predicated region fallthrough
CT: control target
= control target key end

     0   :  { %s938_s15 = smov 0   ;;  %s940_s16 = smov 0   ;;  %s1047_s0 = inlined_call_operand.vmem [shape: bf16[32,1280], index: 0, kind: input, shape index: {}]   ;;  %s1048_s1 = inlined_call_operand.vmem [shape: bf16[1280,128], index: 1, kind: input, shape index: {}]   ;;  %s1049_s2 = inlined_call_operand.vmem [shape: f32[1,128], index: 2, kind: input, shape index: {}]   ;;  %s1050_s3 = inlined_call_operand.vmem [shape: f32[1,128], index: 3, kind: input, shape index: {}]   ;;  %s1051_s4 = inlined_call_operand.vmem [shape: f32[32,128], index: 4, kind: output, shape index: {}]  }
   0x1   :  { %s942_s17 = smov 0   ;;  %s944_s18 = smov 0  }
   0x2   :  { %s946_s19 = smov 0  }
   0x3 LB: > { %s26_s20 = sadd.s32 1, %s906_s18  ;;  %p49_p1 = scmp.ne.s32.totalorder %s898_s16, %s894_s15  ;;  %s910_s19 = sphi %s946_s19, %s14_s19   ;;  %s906_s18 = sphi %s944_s18, %s1055_s18   ;;  %s902_s17 = sphi %s942_s17, %s1054_s17   ;;  %s898_s16 = sphi %s940_s16, %s1053_s16   ;;  %s894_s15 = sphi %s938_s15, %s1052_s15  }
   0x4   : > { %p27_p0 = scmp.ge.s32.totalorder %s26_s20, 5  ;;  %p50_p2 = scmp.eq.s32.totalorder %s910_s19, 0 }
   0x5   : > { %s42_s22 = sadd.s32 1, %s898_s16  ;;  %p728_p5 = scmp.ge.s32.totalorder %s910_s19, 5 }
   0x6   : > { %s1057_s20 = smov (%p27_p0, %s26_s20), 0  ;;  %p51_p3 = por %p50_p2, %p49_p1 }
   0x7   : > { %s38_s21 = ssub.s32 %s906_s18, %s1057_s20  ;;  %195 = sbr.rel (%p728_p5) target bundleno = 21 (0x15), region = 24 }
   0x8   : > { %p40_p4 = scmp.eq.s32.totalorder %s38_s21, 0 }
   0xa   : > { %s973_s23 = scalar_select %p40_p4, %s898_s16, %s42_s22  }
   0xe   : > { %198 = sbr.rel (!%p51_p3) target bundleno = 21 (0x15), region = 28  ;;  %s200_s24 = sand.u32 (%p51_p3), 1, %s898_s16  }
   0xf   : > { %s764_s25 = sshll.u32 (%p51_p3), %s906_s18, 3  ;;  %s729_s26 = sshll.u32 (%p51_p3), %s200_s24, 5 }
  0x10   : > { %s208_s29 = scalar_lea.vmem (%p51_p3), %s1047_s0, %s764_s25  ;;  %s202_s30 = scalar_lea.vmem (%p51_p3), [#allocation3], %s729_s26 }
  0x11   : > { %v242_v0 = vld [vmem:[%s208_s29] sm:$0xff] (%p51_p3)  ;;  %v244_v1 = vld [vmem:[%s208_s29 + $0x28] sm:$0xff] (%p51_p3)  ;;  %v246_v2 = vld [vmem:[%s208_s29 + $0x50] sm:$0xff] (%p51_p3) }
  0x12   : > { %243 = vst [vmem:[%s202_s30] sm:$0xff] (%p51_p3), %v242_v0  ;;  %245 = vst [vmem:[%s202_s30 + $0x8] sm:$0xff] (%p51_p3), %v244_v1  ;;  %v248_v3 = vld [vmem:[%s208_s29 + $0x78] sm:$0xff] (%p51_p3) }
  0x13   : > { %247 = vst [vmem:[%s202_s30 + $0x10] sm:$0xff] (%p51_p3), %v246_v2  ;;  %249 = vst [vmem:[%s202_s30 + $0x18] sm:$0xff] (%p51_p3), %v248_v3 }
  0x15 PF: > { %p732_p6 = scmp.ge.s32.totalorder %s910_s19, 1  ;;  %p266_p7 = scmp.lt.s32.totalorder %s910_s19, 6 }
  0x17   : > { %p267_p8 = pnand %p732_p6, %p266_p7 }
  0x18   : > { %s273_s5 = sand.u32 (!%p267_p8), 1, %s894_s15   ;;  %s734_s6 = sshll.u32 (!%p267_p8), %s902_s17, 5 }
  0x19   : > { %270 = sbr.rel (%p267_p8) target bundleno = 306 (0x132), region = 70  ;;  %s733_s7 = sshll.u32 (!%p267_p8), %s273_s5, 5 }
  0x1a   : > { %p318_p9 = scmp.lt.s32.totalorder (!%p267_p8), %s734_s6, 159  ;;  %s990_s12 = scalar_lea.vmem (!%p267_p8), [#allocation3], %s733_s7 }
  0x1b   : > { %p736_p10 = scmp.ne.s32.totalorder (!%p267_p8), %s902_s17, 0 }
  0x20   : > { %s1059_s6 = smov (!%p318_p9, %s734_s6), 159  ;;  %345 = sbr.rel (%p736_p10) target bundleno = 39 (0x27), region = 78 }
  0x21   : > { %s735_s8 = sshll.u32 %s1059_s6, 2  ;;  %v912_v4 = vmov (!%p736_p10), 0.0  }
  0x22   : > { %s988_s11 = scalar_lea.vmem %s1048_s1, %s735_s8  ;;  %346 = vst [vmem:[#allocation2] sm:$0xff] (!%p736_p10), %v912_v4  ;;  %347 = vst [vmem:[#allocation2 + $0x8] sm:$0xff] (!%p736_p10), %v912_v4 }
  0x23   : > { %348 = vst [vmem:[#allocation2 + $0x10] sm:$0xff] (!%p736_p10), %v912_v4  ;;  %349 = vst [vmem:[#allocation2 + $0x18] sm:$0xff] (!%p736_p10), %v912_v4 }
  0x27 PF: > { %v850_v5 = vld [vmem:[%s988_s11 + $0x40] sm:$0xff]   ;;  %v852_v7 = vld [vmem:[%s988_s11 + $0x48] sm:$0xff]   ;;  %v854_v9 = vld [vmem:[%s988_s11 + $0x50] sm:$0xff]   ;;  %p757_p11 = scmp.ne.s32.totalorder %s902_s17, 4 }
  0x28   : > { %v851_v6 = vld [vmem:[%s988_s11] sm:$0xff]   ;;  %765 = vmatprep.subr.bf16.mxu0 %v850_v5  ;;  %793 = vmatprep.subr.bf16.mxu1 %v850_v5  ;;  %v853_v8 = vld [vmem:[%s988_s11 + $0x8] sm:$0xff]   ;;  %v855_v10 = vld [vmem:[%s988_s11 + $0x10] sm:$0xff]  }
  0x29   : > { %766 = vmatpush3.bf16.msra.mxu0 %v851_v6  ;;  %801 = vmatpush3.bf16.msra.mxu1 %v851_v6  ;;  %v856_v11 = vld [vmem:[%s988_s11 + $0x58] sm:$0xff]   ;;  %v858_v13 = vld [vmem:[%s988_s11 + $0x60] sm:$0xff]   ;;  %v860_v15 = vld [vmem:[%s988_s11 + $0x68] sm:$0xff]  }
  0x2a   : > { %767 = vmatprep.subr.bf16.mxu0 %v852_v7  ;;  %794 = vmatprep.subr.bf16.mxu1 %v852_v7  ;;  %v857_v12 = vld [vmem:[%s988_s11 + $0x18] sm:$0xff]   ;;  %v859_v14 = vld [vmem:[%s988_s11 + $0x20] sm:$0xff]   ;;  %v861_v18 = vld [vmem:[%s988_s11 + $0x28] sm:$0xff]  }
  0x2b   : > { %v868_v16 = vld [vmem:[%s990_s12 + $0x4] ss:$8 sps:$4 sm:$0xff]   ;;  %v871_v17 = vld [vmem:[%s990_s12 + $0x14] ss:$8 sps:$4 sm:$0xff]   ;;  %v866_v23 = vld [vmem:[%s990_s12] ss:$8 sps:$4 sm:$0xff]  }
  0x2c   : > { %v862_v19 = vld [vmem:[%s988_s11 + $0x70] sm:$0xff]   ;;  %538 = vmatprep.mubr.bf16.mxu0 %v868_v16  ;;  %546 = vmatprep.mubr.bf16.mxu1 %v871_v17  ;;  %v864_v21 = vld [vmem:[%s988_s11 + $0x78] sm:$0xff]   ;;  %v350_v27 = vld [vmem:[#allocation2] sm:$0xff] }
  0x2d   : > { %768 = vmatpush3.bf16.msra.mxu0 %v853_v8  ;;  %802 = vmatpush3.bf16.msra.mxu1 %v853_v8  ;;  %v863_v20 = vld [vmem:[%s988_s11 + $0x30] sm:$0xff]   ;;  %v865_v22 = vld [vmem:[%s988_s11 + $0x38] sm:$0xff]   ;;  %v351_v35 = vld [vmem:[#allocation2 + $0x8] sm:$0xff] }
  0x2e   : > { %769 = vmatprep.subr.bf16.mxu0 %v854_v9  ;;  %795 = vmatprep.subr.bf16.mxu1 %v854_v9  ;;  %v869_v24 = vld [vmem:[%s990_s12 + $0x10] ss:$8 sps:$4 sm:$0xff]   ;;  %v758_v46 = vld [vmem:[%s1049_s2] ss:$0 sm:$0xff] (!%p757_p11) }
  0x2f   : > { %v352_v29 = vld [vmem:[#allocation2 + $0x10] sm:$0xff]  ;;  %v353_v37 = vld [vmem:[#allocation2 + $0x18] sm:$0xff]  ;;  %v759_v47 = vld [vmem:[%s1050_s3] ss:$0 sm:$0xff] (!%p757_p11) }
  0x31   : > { %770 = vmatpush3.bf16.msra.mxu0 %v855_v10  ;;  %803 = vmatpush3.bf16.msra.mxu1 %v855_v10 }
  0x32   : > { %771 = vmatprep.subr.bf16.mxu0 %v856_v11  ;;  %796 = vmatprep.subr.bf16.mxu1 %v856_v11 }
  0x35   : > { %772 = vmatpush3.bf16.msra.mxu0 %v857_v12  ;;  %804 = vmatpush3.bf16.msra.mxu1 %v857_v12 }
  0x36   : > { %773 = vmatprep.subr.bf16.mxu0 %v858_v13  ;;  %797 = vmatprep.subr.bf16.mxu1 %v858_v13 }
  0x39   : > { %774 = vmatpush3.bf16.msra.mxu0 %v859_v14  ;;  %805 = vmatpush3.bf16.msra.mxu1 %v859_v14 }
  0x3a   : > { %775 = vmatprep.subr.bf16.mxu0 %v860_v15  ;;  %798 = vmatprep.subr.bf16.mxu1 %v860_v15 }
  0x3d   : > { %776 = vmatpush3.bf16.msra.mxu0 %v861_v18  ;;  %806 = vmatpush3.bf16.msra.mxu1 %v861_v18 }
  0x3e   : > { %777 = vmatprep.subr.bf16.mxu0 %v862_v19  ;;  %799 = vmatprep.subr.bf16.mxu1 %v862_v19 }
  0x41   : > { %778 = vmatpush3.bf16.msra.mxu0 %v863_v20  ;;  %807 = vmatpush3.bf16.msra.mxu1 %v863_v20 }
  0x42   : > { %779 = vmatprep.subr.bf16.mxu0 %v864_v21  ;;  %800 = vmatprep.subr.bf16.mxu1 %v864_v21 }
  0x45   : > { %780 = vmatpush3.bf16.msra.mxu0 %v865_v22  ;;  %808 = vmatpush3.bf16.msra.mxu1 %v865_v22 }
  0x48   : > { %539 = vmatmul.mubr.bf16.vlgmr.msra.gmra.mrb[0].mxu0 %v866_v23  ;;  %547 = vmatmul.mubr.bf16.vlgmr.msra.gmra.mrb[0].mxu1 %v869_v24 }
 0x11b   : > { %v781_v25 = vpop.f32.mrb[0].mxu0  ;;  %v787_v26 = vpop.f32.mrb[0].mxu1 }
 0x11c   : > { %v782_v28 = vpop.f32.mrb[1].mxu0  ;;  %v788_v30 = vpop.f32.mrb[1].mxu1 }
 0x11d   : > { %v783_v31 = vadd.f32 %v782_v28, %v781_v25  ;;  %v789_v32 = vadd.f32 %v788_v30, %v787_v26  ;;  %v784_v33 = vpop.f32.mrb[2].mxu0  ;;  %v790_v34 = vpop.f32.mrb[2].mxu1  ;;  %566 = sbr.rel (%p757_p11) target bundleno = 306 (0x132), region = 82 }
 0x11e   : > { %v785_v36 = vpop.f32.mrb[3].mxu0  ;;  %v791_v38 = vpop.f32.mrb[3].mxu1 }
 0x11f   : > { %v555_v39 = vadd.f32 %v783_v31, %v350_v27  ;;  %v557_v40 = vadd.f32 %v789_v32, %v352_v29  ;;  %v786_v41 = vadd.f32 %v785_v36, %v784_v33  ;;  %v792_v42 = vadd.f32 %v791_v38, %v790_v34 }
 0x121   : > { %559 = vst [vmem:[#allocation2] sm:$0xff] %v555_v39  ;;  %561 = vst [vmem:[#allocation2 + $0x10] sm:$0xff] %v557_v40  ;;  %v556_v43 = vadd.f32 %v786_v41, %v351_v35  ;;  %v558_v44 = vadd.f32 %v792_v42, %v353_v37 }
 0x123   : > { %560 = vst [vmem:[#allocation2 + $0x8] sm:$0xff] %v556_v43  ;;  %562 = vst [vmem:[#allocation2 + $0x18] sm:$0xff] %v558_v44 }
 0x128   : > { %v567_v45 = vld [vmem:[#allocation2] sm:$0xff]  ;;  %v569_v50 = vld [vmem:[#allocation2 + $0x10] sm:$0xff] }
 0x129   : > { %v578_v48 = vmul.f32 %v758_v46, %v567_v45  ;;  %v580_v53 = vmul.f32 %v758_v46, %v569_v50 }
 0x12a   : > { %v568_v49 = vld [vmem:[#allocation2 + $0x8] sm:$0xff]  ;;  %v570_v51 = vld [vmem:[#allocation2 + $0x18] sm:$0xff] }
 0x12b   : > { %v579_v52 = vmul.f32 %v758_v46, %v568_v49  ;;  %v581_v54 = vmul.f32 %v758_v46, %v570_v51  ;;  %v589_v55 = vadd.f32 %v759_v47, %v578_v48  ;;  %v591_v57 = vadd.f32 %v759_v47, %v580_v53 }
 0x12d   : > { %v590_v56 = vadd.f32 %v759_v47, %v579_v52  ;;  %v592_v58 = vadd.f32 %v759_v47, %v581_v54  ;;  %v593_v59 = vmax.f32 %v589_v55, 0.0  ;;  %v595_v61 = vmax.f32 %v591_v57, 0.0 }
 0x12f   : > { %v594_v60 = vmax.f32 %v590_v56, 0.0  ;;  %v596_v62 = vmax.f32 %v592_v58, 0.0  ;;  %597 = vst [vmem:[%s1051_s4] sm:$0xff] %v593_v59  ;;  %599 = vst [vmem:[%s1051_s4 + $0x10] sm:$0xff] %v595_v61 }
 0x131   : > { %598 = vst [vmem:[%s1051_s4 + $0x8] sm:$0xff] %v594_v60  ;;  %600 = vst [vmem:[%s1051_s4 + $0x18] sm:$0xff] %v596_v62 }
 0x132 PF: > { %s14_s19 = sadd.s32 1, %s910_s19   ;;  %s1052_s15 = smov %s898_s16 }
 0x133   : > { %p11_p12 = scmp.ge.s32.totalorder %s14_s19, 7   ;;  %s1053_s16 = smov %s973_s23 }
 0x134   : > { %s1054_s17 = smov %s906_s18  ;;  %s1055_s18 = smov %s1057_s20 }
 0x135   :  { %13 = sbr.rel (!%p11_p12) target bundleno = 3 (0x3), region = 126 }

// kernel: resnet34_forward.56
= control target key start
LH: loop header
LB: loop body
LE: loop exit
PB: predicated region body
PF: predicated region fallthrough
CT: control target
= control target key end

     0   :  { %s920_s15 = smov 0   ;;  %s922_s16 = smov 0   ;;  %s1008_s0 = inlined_call_operand.vmem [shape: bf16[8,1280], index: 0, kind: input, shape index: {}]   ;;  %s1009_s1 = inlined_call_operand.vmem [shape: bf16[1280,256], index: 1, kind: input, shape index: {}]   ;;  %s1010_s2 = inlined_call_operand.vmem [shape: f32[1,256], index: 2, kind: input, shape index: {}]   ;;  %s1011_s3 = inlined_call_operand.vmem [shape: f32[1,256], index: 3, kind: input, shape index: {}]   ;;  %s1012_s4 = inlined_call_operand.vmem [shape: f32[8,256], index: 4, kind: output, shape index: {}]  }
   0x1   :  { %s924_s17 = smov 0  }
   0x2 LB: > { %s26_s18 = sadd.s32 1, %s888_s16  ;;  %p748_p0 = scmp.ge.s32.totalorder %s892_s17, 1  ;;  %s892_s17 = sphi %s924_s17, %s14_s17   ;;  %s888_s16 = sphi %s922_s16, %s1014_s16   ;;  %s884_s15 = sphi %s920_s15, %s1013_s15  }
   0x3   : > { %p27_p1 = scmp.ge.s32.totalorder %s26_s18, 5  ;;  %p229_p2 = scmp.lt.s32.totalorder %s892_s17, 6 }
   0x5   : > { %s1016_s18 = smov (%p27_p1, %s26_s18), 0  ;;  %p230_p3 = pnand %p748_p0, %p229_p2 }
   0x6   : > { %s749_s19 = sshll.u32 (!%p230_p3), %s884_s15, 1  ;;  %s751_s20 = sshll.u32 (!%p230_p3), %s884_s15, 5 }
   0x7   : > { %233 = sbr.rel (%p230_p3) target bundleno = 319 (0x13f), region = 36  ;;  %p284_p4 = scmp.lt.s32.totalorder (!%p230_p3), %s749_s19, 9 }
   0x8   : > { %p293_p5 = scmp.lt.s32.totalorder (!%p230_p3), %s751_s20, 159  ;;  %p754_p6 = scmp.ne.s32.totalorder (!%p230_p3), %s884_s15, 0 }
   0xe   : > { %s1018_s19 = smov (!%p284_p4, %s749_s19), 9  ;;  %s1020_s20 = smov (!%p293_p5, %s751_s20), 159 }
   0xf   : > { %s750_s21 = sshll.u32 %s1018_s19, 2  ;;  %s794_s25 = sshll.u32 %s1020_s20, 3  ;;  %v894_v0 = vmov (!%p754_p6), 0.0  }
  0x10   : > { %s945_s24 = scalar_lea.vmem %s1008_s0, %s750_s21  ;;  %s950_s28 = scalar_lea.vmem %s1009_s1, %s794_s25  ;;  %327 = vst [vmem:[#allocation2] sm:$0xff] (!%p754_p6), %v894_v0  ;;  %328 = vst [vmem:[#allocation2 + $0x8] sm:$0xff] (!%p754_p6), %v894_v0 }
  0x11   : > { %326 = sbr.rel (%p754_p6) target bundleno = 24 (0x18), region = 40 }
  0x18 PF: > { %v820_v1 = vld [vmem:[%s950_s28 + $0x4] ss:$8 sps:$4 sm:$0xff]   ;;  %v822_v2 = vld [vmem:[%s950_s28] ss:$8 sps:$4 sm:$0xff]   ;;  %v823_v3 = vld [vmem:[%s950_s28 + $0x14] ss:$8 sps:$4 sm:$0xff]  }
  0x19   : > { %531 = vmatprep.subr.bf16.mxu0 %v820_v1  ;;  %v825_v4 = vld [vmem:[%s950_s28 + $0x10] ss:$8 sps:$4 sm:$0xff]   ;;  %v826_v5 = vld [vmem:[%s950_s28 + $0x24] ss:$8 sps:$4 sm:$0xff]   ;;  %v828_v6 = vld [vmem:[%s950_s28 + $0x20] ss:$8 sps:$4 sm:$0xff]  }
  0x1a   : > { %532 = vmatpush1.bf16.msra.mxu0 %v822_v2  ;;  %v829_v7 = vld [vmem:[%s950_s28 + $0x34] ss:$8 sps:$4 sm:$0xff]   ;;  %v831_v8 = vld [vmem:[%s950_s28 + $0x30] ss:$8 sps:$4 sm:$0xff]   ;;  %v832_v9 = vld [vmem:[%s950_s28 + $0x44] ss:$8 sps:$4 sm:$0xff]  }
  0x1b   : > { %533 = vmatprep.subr.bf16.mxu0 %v823_v3  ;;  %v834_v10 = vld [vmem:[%s950_s28 + $0x40] ss:$8 sps:$4 sm:$0xff]   ;;  %v835_v11 = vld [vmem:[%s950_s28 + $0x54] ss:$8 sps:$4 sm:$0xff]   ;;  %v837_v12 = vld [vmem:[%s950_s28 + $0x50] ss:$8 sps:$4 sm:$0xff]  }
  0x1c   : > { %v838_v13 = vld [vmem:[%s950_s28 + $0x64] ss:$8 sps:$4 sm:$0xff]   ;;  %v840_v16 = vld [vmem:[%s950_s28 + $0x60] ss:$8 sps:$4 sm:$0xff]   ;;  %v841_v17 = vld [vmem:[%s950_s28 + $0x74] ss:$8 sps:$4 sm:$0xff]  }
  0x1d   : > { %v331_v14 = vld [vmem:[%s945_s24] sm:$0xff]  ;;  %v843_v18 = vld [vmem:[%s950_s28 + $0x70] ss:$8 sps:$4 sm:$0xff]   ;;  %v847_v21 = vld [vmem:[%s950_s28 + $0x94] ss:$8 sps:$4 sm:$0xff]   ;;  %p789_p7 = scmp.ne.s32.totalorder %s884_s15, 4 }
  0x1e   : > { %534 = vmatpush1.bf16.msra.mxu0 %v825_v4  ;;  %v756_v15 = vcombine.high %v331_v14, %v331_v14  ;;  %v844_v19 = vld [vmem:[%s950_s28 + $0x84] ss:$8 sps:$4 sm:$0xff]   ;;  %v846_v20 = vld [vmem:[%s950_s28 + $0x80] ss:$8 sps:$4 sm:$0xff]   ;;  %v849_v22 = vld [vmem:[%s950_s28 + $0x90] ss:$8 sps:$4 sm:$0xff]   ;;  %v755_v35 = vcombine.low %v331_v14, %v331_v14  ;;  %v584_v44 = vlaneseq (!%p789_p7) }
  0x1f   : > { %535 = vmatprep.subr.bf16.mxu0 %v826_v5  ;;  %v850_v23 = vld [vmem:[%s950_s28 + $0xa4] ss:$8 sps:$4 sm:$0xff]   ;;  %v852_v24 = vld [vmem:[%s950_s28 + $0xa0] ss:$8 sps:$4 sm:$0xff]   ;;  %v853_v25 = vld [vmem:[%s950_s28 + $0xb4] ss:$8 sps:$4 sm:$0xff]  }
  0x20   : > { %563 = vmatprep.mubr.bf16.mxu0 %v756_v15  ;;  %v855_v26 = vld [vmem:[%s950_s28 + $0xb0] ss:$8 sps:$4 sm:$0xff]   ;;  %v856_v27 = vld [vmem:[%s950_s28 + $0xc4] ss:$8 sps:$4 sm:$0xff]   ;;  %v858_v28 = vld [vmem:[%s950_s28 + $0xc0] ss:$8 sps:$4 sm:$0xff]  }
  0x21   : > { %v859_v29 = vld [vmem:[%s950_s28 + $0xd4] ss:$8 sps:$4 sm:$0xff]   ;;  %v861_v30 = vld [vmem:[%s950_s28 + $0xd0] ss:$8 sps:$4 sm:$0xff]   ;;  %v862_v31 = vld [vmem:[%s950_s28 + $0xe4] ss:$8 sps:$4 sm:$0xff]  }
  0x22   : > { %536 = vmatpush1.bf16.msra.mxu0 %v828_v6  ;;  %v864_v32 = vld [vmem:[%s950_s28 + $0xe0] ss:$8 sps:$4 sm:$0xff]   ;;  %v865_v33 = vld [vmem:[%s950_s28 + $0xf4] ss:$8 sps:$4 sm:$0xff]   ;;  %v867_v34 = vld [vmem:[%s950_s28 + $0xf0] ss:$8 sps:$4 sm:$0xff]  }
  0x23   : > { %537 = vmatprep.subr.bf16.mxu0 %v829_v7  ;;  %v329_v36 = vld [vmem:[#allocation2] sm:$0xff]  ;;  %v330_v37 = vld [vmem:[#allocation2 + $0x8] sm:$0xff]  ;;  %v585_v45 = vshrl.u32 (!%p789_p7), %v584_v44, 7 }
  0x24   : > { %v582_v46 = vld [vmem:[%s1010_s2] sm:$0x3] (!%p789_p7) }
  0x25   : > { %v596_v47 = vld [vmem:[%s1011_s3] sm:$0x3] (!%p789_p7)  ;;  %v586_v48 = vsub.s32 (!%p789_p7), 0, %v585_v45  ;;  %v590_v49 = vsub.s32 (!%p789_p7), 1, %v585_v45 }
  0x26   : > { %538 = vmatpush1.bf16.msra.mxu0 %v831_v8 }
  0x27   : > { %539 = vmatprep.subr.bf16.mxu0 %v832_v9  ;;  %v587_v52 = vrot.slane (!%p789_p7), %v582_v46, %v586_v48  ;;  %v601_v53 = vrot.slane (!%p789_p7), %v596_v47, %v586_v48  ;;  %v591_v54 = vrot.slane (!%p789_p7), %v582_v46, %v590_v49  ;;  %v605_v55 = vrot.slane (!%p789_p7), %v596_v47, %v590_v49 }
  0x2a   : > { %540 = vmatpush1.bf16.msra.mxu0 %v834_v10 }
  0x2b   : > { %541 = vmatprep.subr.bf16.mxu0 %v835_v11 }
  0x2e   : > { %542 = vmatpush1.bf16.msra.mxu0 %v837_v12 }
  0x2f   : > { %543 = vmatprep.subr.bf16.mxu0 %v838_v13 }
  0x32   : > { %544 = vmatpush1.bf16.msra.mxu0 %v840_v16 }
  0x33   : > { %545 = vmatprep.subr.bf16.mxu0 %v841_v17 }
  0x36   : > { %546 = vmatpush1.bf16.msra.mxu0 %v843_v18 }
  0x37   : > { %547 = vmatprep.subr.bf16.mxu0 %v844_v19 }
  0x3a   : > { %548 = vmatpush1.bf16.msra.mxu0 %v846_v20 }
  0x3b   : > { %549 = vmatprep.subr.bf16.mxu0 %v847_v21 }
  0x3e   : > { %550 = vmatpush1.bf16.msra.mxu0 %v849_v22 }
  0x3f   : > { %551 = vmatprep.subr.bf16.mxu0 %v850_v23 }
  0x42   : > { %552 = vmatpush1.bf16.msra.mxu0 %v852_v24 }
  0x43   : > { %553 = vmatprep.subr.bf16.mxu0 %v853_v25 }
  0x46   : > { %554 = vmatpush1.bf16.msra.mxu0 %v855_v26 }
  0x47   : > { %555 = vmatprep.subr.bf16.mxu0 %v856_v27 }
  0x4a   : > { %556 = vmatpush1.bf16.msra.mxu0 %v858_v28 }
  0x4b   : > { %557 = vmatprep.subr.bf16.mxu0 %v859_v29 }
  0x4e   : > { %558 = vmatpush1.bf16.msra.mxu0 %v861_v30 }
  0x4f   : > { %559 = vmatprep.subr.bf16.mxu0 %v862_v31 }
  0x52   : > { %560 = vmatpush1.bf16.msra.mxu0 %v864_v32 }
  0x53   : > { %561 = vmatprep.subr.bf16.mxu0 %v865_v33 }
  0x56   : > { %562 = vmatpush1.bf16.msra.mxu0 %v867_v34 }
  0x59   : > { %564 = vmatmul.mubr.bf16.vlgmr.msra.gmra.mrb[0].mxu0 %v755_v35 }
 0x12a   : > { %579 = sbr.rel (%p789_p7) target bundleno = 319 (0x13f), region = 44 }
 0x12c   : > { %v565_v38 = vpop.f32.mrb[0].mxu0 }
 0x12d   : > { %v572_v39 = vadd.f32 %v565_v38, %v329_v36  ;;  %v567_v40 = vpop.f32.mrb[1].mxu0 }
 0x12e   : > { %v573_v41 = vadd.f32 %v567_v40, %v330_v37  ;;  %v569_v42 = vpop.f32.mrb[2].mxu0 }
 0x12f   : > { %574 = vst [vmem:[#allocation2] sm:$0xff] %v572_v39  ;;  %v570_v43 = vpop.f32.mrb[3].mxu0 }
 0x130   : > { %575 = vst [vmem:[#allocation2 + $0x8] sm:$0xff] %v573_v41 }
 0x136   : > { %v580_v50 = vld [vmem:[#allocation2] sm:$0xff] }
 0x137   : > { %v581_v51 = vld [vmem:[#allocation2 + $0x8] sm:$0xff]  ;;  %v594_v56 = vmul.f32 %v587_v52, %v580_v50 }
 0x138   : > { %v595_v57 = vmul.f32 %v591_v54, %v581_v51 }
 0x139   : > { %v608_v58 = vadd.f32 %v601_v53, %v594_v56 }
 0x13a   : > { %v609_v59 = vadd.f32 %v605_v55, %v595_v57 }
 0x13b   : > { %v610_v60 = vmax.f32 %v608_v58, 0.0 }
 0x13c   : > { %v611_v61 = vmax.f32 %v609_v59, 0.0 }
 0x13d   : > { %612 = vst [vmem:[%s1012_s4] sm:$0xff] %v610_v60 }
 0x13e   : > { %613 = vst [vmem:[%s1012_s4 + $0x8] sm:$0xff] %v611_v61 }
 0x13f PF: > { %s14_s17 = sadd.s32 1, %s892_s17   ;;  %s1013_s15 = smov %s888_s16 }
 0x140   : > { %p11_p8 = scmp.ge.s32.totalorder %s14_s17, 7   ;;  %s1014_s16 = smov %s1016_s18 }
 0x142   :  { %13 = sbr.rel (!%p11_p8) target bundleno = 2 (0x2), region = 83 }

// kernel: resnet34_forward.57
= control target key start
LH: loop header
LB: loop body
LE: loop exit
PB: predicated region body
PF: predicated region fallthrough
CT: control target
= control target key end

     0   :  { %v248_v1 = vmov 0   ;;  %v175_v18 = vlaneseq  ;;  %s337_s1 = inlined_call_operand.vmem [shape: bf16[128,256], index: 1, kind: input, shape index: {}]   ;;  %s338_s0 = inlined_call_operand.vmem [shape: bf16[8,128], index: 0, kind: input, shape index: {}]   ;;  %s339_s2 = inlined_call_operand.vmem [shape: f32[1,256], index: 2, kind: input, shape index: {}]   ;;  %s340_s3 = inlined_call_operand.vmem [shape: f32[1,256], index: 3, kind: input, shape index: {}]   ;;  %s341_s4 = inlined_call_operand.vmem [shape: f32[8,256], index: 4, kind: output, shape index: {}]  }
   0x1   :  { %v224_v0 = vld [vmem:[%s337_s1 + $0x4] ss:$8 sps:$4 sm:$0xff]   ;;  %155 = vmatprep.mubr.bf16.mxu0 %v248_v1  ;;  %v226_v2 = vld [vmem:[%s337_s1] ss:$8 sps:$4 sm:$0xff]   ;;  %v227_v3 = vld [vmem:[%s337_s1 + $0x14] ss:$8 sps:$4 sm:$0xff]  }
   0x2   :  { %123 = vmatprep.subr.bf16.mxu0 %v224_v0  ;;  %v229_v4 = vld [vmem:[%s337_s1 + $0x10] ss:$8 sps:$4 sm:$0xff]   ;;  %v230_v5 = vld [vmem:[%s337_s1 + $0x24] ss:$8 sps:$4 sm:$0xff]   ;;  %v232_v6 = vld [vmem:[%s337_s1 + $0x20] ss:$8 sps:$4 sm:$0xff]  }
   0x3   :  { %124 = vmatpush1.bf16.msra.mxu0 %v226_v2  ;;  %v233_v7 = vld [vmem:[%s337_s1 + $0x34] ss:$8 sps:$4 sm:$0xff]   ;;  %v235_v8 = vld [vmem:[%s337_s1 + $0x30] ss:$8 sps:$4 sm:$0xff]   ;;  %v236_v9 = vld [vmem:[%s337_s1 + $0x44] ss:$8 sps:$4 sm:$0xff]  }
   0x4   :  { %125 = vmatprep.subr.bf16.mxu0 %v227_v3  ;;  %v238_v10 = vld [vmem:[%s337_s1 + $0x40] ss:$8 sps:$4 sm:$0xff]   ;;  %v239_v11 = vld [vmem:[%s337_s1 + $0x54] ss:$8 sps:$4 sm:$0xff]   ;;  %v241_v12 = vld [vmem:[%s337_s1 + $0x50] ss:$8 sps:$4 sm:$0xff]  }
   0x5   :  { %v242_v13 = vld [vmem:[%s337_s1 + $0x64] ss:$8 sps:$4 sm:$0xff]   ;;  %v244_v14 = vld [vmem:[%s337_s1 + $0x60] ss:$8 sps:$4 sm:$0xff]   ;;  %v245_v15 = vld [vmem:[%s337_s1 + $0x74] ss:$8 sps:$4 sm:$0xff]  }
   0x6   :  { %v247_v16 = vld [vmem:[%s337_s1 + $0x70] ss:$8 sps:$4 sm:$0xff]   ;;  %v26_v17 = vld [vmem:[%s338_s0] sm:$0xf]  ;;  %v176_v19 = vshrl.u32 %v175_v18, 7 }
   0x7   :  { %126 = vmatpush1.bf16.msra.mxu0 %v229_v4  ;;  %v173_v21 = vld [vmem:[%s339_s2] sm:$0x3] }
   0x8   :  { %127 = vmatprep.subr.bf16.mxu0 %v230_v5  ;;  %v177_v20 = vsub.s32 0, %v176_v19  ;;  %v181_v22 = vsub.s32 1, %v176_v19  ;;  %v187_v23 = vld [vmem:[%s340_s3] sm:$0x3] }
   0xa   :  { %v178_v24 = vrot.slane %v173_v21, %v177_v20  ;;  %v182_v25 = vrot.slane %v173_v21, %v181_v22  ;;  %v192_v26 = vrot.slane %v187_v23, %v177_v20  ;;  %v196_v28 = vrot.slane %v187_v23, %v181_v22 }
   0xb   :  { %128 = vmatpush1.bf16.msra.mxu0 %v232_v6 }
   0xc   :  { %129 = vmatprep.subr.bf16.mxu0 %v233_v7 }
   0xf   :  { %130 = vmatpush1.bf16.msra.mxu0 %v235_v8 }
  0x10   :  { %131 = vmatprep.subr.bf16.mxu0 %v236_v9 }
  0x13   :  { %132 = vmatpush1.bf16.msra.mxu0 %v238_v10 }
  0x14   :  { %133 = vmatprep.subr.bf16.mxu0 %v239_v11 }
  0x17   :  { %134 = vmatpush1.bf16.msra.mxu0 %v241_v12 }
  0x18   :  { %135 = vmatprep.subr.bf16.mxu0 %v242_v13 }
  0x1b   :  { %136 = vmatpush1.bf16.msra.mxu0 %v244_v14 }
  0x1c   :  { %137 = vmatprep.subr.bf16.mxu0 %v245_v15 }
  0x1f   :  { %138 = vmatpush1.bf16.msra.mxu0 %v247_v16 }
  0x22   :  { %156 = vmatmul.mubr.bf16.vlgmr.msra.gmra.mrb[0].mxu0 %v26_v17 }
  0xf5   :  { %v157_v27 = vpop.f32.mrb[0].mxu0 }
  0xf6   :  { %v185_v29 = vmul.f32 %v178_v24, %v157_v27  ;;  %v159_v30 = vpop.f32.mrb[1].mxu0 }
  0xf7   :  { %v186_v31 = vmul.f32 %v182_v25, %v159_v30  ;;  %v161_v32 = vpop.f32.mrb[2].mxu0 }
  0xf8   :  { %v199_v33 = vadd.f32 %v192_v26, %v185_v29  ;;  %v162_v34 = vpop.f32.mrb[3].mxu0 }
  0xf9   :  { %v200_v35 = vadd.f32 %v196_v28, %v186_v31 }
  0xfa   :  { %201 = vst [vmem:[%s341_s4] sm:$0xff] %v199_v33 }
  0xfb   :  { %202 = vst [vmem:[%s341_s4 + $0x8] sm:$0xff] %v200_v35 }

// kernel: resnet34_forward.58
= control target key start
LH: loop header
LB: loop body
LE: loop exit
PB: predicated region body
PF: predicated region fallthrough
CT: control target
= control target key end

     0   :  { %s1014_s18 = smov 0   ;;  %s1016_s19 = smov 0   ;;  %s1108_s0 = inlined_call_operand.vmem [shape: bf16[8,2304], index: 0, kind: input, shape index: {}]   ;;  %s1109_s1 = inlined_call_operand.vmem [shape: bf16[2304,256], index: 1, kind: input, shape index: {}]   ;;  %s1110_s2 = inlined_call_operand.vmem [shape: f32[1,256], index: 2, kind: input, shape index: {}]   ;;  %s1111_s3 = inlined_call_operand.vmem [shape: f32[1,256], index: 3, kind: input, shape index: {}]   ;;  %s1112_s4 = inlined_call_operand.vmem [shape: f32[8,256], index: 4, kind: input, shape index: {}]   ;;  %s1113_s5 = inlined_call_operand.vmem [shape: f32[8,256], index: 5, kind: output, shape index: {}]  }
   0x1   :  { %s1018_s20 = smov 0  }
   0x2 LB: > { %s27_s21 = sadd.s32 1, %s977_s19  ;;  %p837_p0 = scmp.ge.s32.totalorder %s981_s20, 1  ;;  %s981_s20 = sphi %s1018_s20, %s15_s20   ;;  %s977_s19 = sphi %s1016_s19, %s1115_s19   ;;  %s973_s18 = sphi %s1014_s18, %s1114_s18  }
   0x3   : > { %p28_p1 = scmp.ge.s32.totalorder %s27_s21, 9  ;;  %p271_p2 = scmp.lt.s32.totalorder %s981_s20, 10 }
   0x5   : > { %s1117_s21 = smov (%p28_p1, %s27_s21), 0  ;;  %p272_p3 = pnand %p837_p0, %p271_p2 }
   0x6   : > { %s838_s22 = sshll.u32 (!%p272_p3), %s973_s18, 1  ;;  %s840_s23 = sshll.u32 (!%p272_p3), %s973_s18, 5 }
   0x7   : > { %275 = sbr.rel (%p272_p3) target bundleno = 321 (0x141), region = 40  ;;  %p337_p4 = scmp.lt.s32.totalorder (!%p272_p3), %s838_s22, 17 }
   0x8   : > { %p346_p5 = scmp.lt.s32.totalorder (!%p272_p3), %s840_s23, 287  ;;  %p843_p6 = scmp.ne.s32.totalorder (!%p272_p3), %s973_s18, 0 }
   0xe   : > { %s1119_s22 = smov (!%p337_p4, %s838_s22), 17  ;;  %s1121_s23 = smov (!%p346_p5, %s840_s23), 287 }
   0xf   : > { %s839_s24 = sshll.u32 %s1119_s22, 2  ;;  %s883_s28 = sshll.u32 %s1121_s23, 3  ;;  %v983_v0 = vmov (!%p843_p6), 0.0  }
  0x10   : > { %s1039_s27 = scalar_lea.vmem %s1108_s0, %s839_s24  ;;  %s1044_s6 = scalar_lea.vmem %s1109_s1, %s883_s28  ;;  %390 = vst [vmem:[#allocation2] sm:$0xff] (!%p843_p6), %v983_v0  ;;  %391 = vst [vmem:[#allocation2 + $0x8] sm:$0xff] (!%p843_p6), %v983_v0 }
  0x11   : > { %389 = sbr.rel (%p843_p6) target bundleno = 24 (0x18), region = 44 }
  0x18 PF: > { %v909_v1 = vld [vmem:[%s1044_s6 + $0x4] ss:$8 sps:$4 sm:$0xff]   ;;  %v911_v2 = vld [vmem:[%s1044_s6] ss:$8 sps:$4 sm:$0xff]   ;;  %v912_v3 = vld [vmem:[%s1044_s6 + $0x14] ss:$8 sps:$4 sm:$0xff]  }
  0x19   : > { %594 = vmatprep.subr.bf16.mxu0 %v909_v1  ;;  %v914_v4 = vld [vmem:[%s1044_s6 + $0x10] ss:$8 sps:$4 sm:$0xff]   ;;  %v915_v5 = vld [vmem:[%s1044_s6 + $0x24] ss:$8 sps:$4 sm:$0xff]   ;;  %v917_v6 = vld [vmem:[%s1044_s6 + $0x20] ss:$8 sps:$4 sm:$0xff]  }
  0x1a   : > { %595 = vmatpush1.bf16.msra.mxu0 %v911_v2  ;;  %v918_v7 = vld [vmem:[%s1044_s6 + $0x34] ss:$8 sps:$4 sm:$0xff]   ;;  %v920_v8 = vld [vmem:[%s1044_s6 + $0x30] ss:$8 sps:$4 sm:$0xff]   ;;  %v921_v9 = vld [vmem:[%s1044_s6 + $0x44] ss:$8 sps:$4 sm:$0xff]  }
  0x1b   : > { %596 = vmatprep.subr.bf16.mxu0 %v912_v3  ;;  %v923_v10 = vld [vmem:[%s1044_s6 + $0x40] ss:$8 sps:$4 sm:$0xff]   ;;  %v924_v11 = vld [vmem:[%s1044_s6 + $0x54] ss:$8 sps:$4 sm:$0xff]   ;;  %v926_v12 = vld [vmem:[%s1044_s6 + $0x50] ss:$8 sps:$4 sm:$0xff]  }
  0x1c   : > { %v927_v13 = vld [vmem:[%s1044_s6 + $0x64] ss:$8 sps:$4 sm:$0xff]   ;;  %v929_v16 = vld [vmem:[%s1044_s6 + $0x60] ss:$8 sps:$4 sm:$0xff]   ;;  %v930_v17 = vld [vmem:[%s1044_s6 + $0x74] ss:$8 sps:$4 sm:$0xff]  }
  0x1d   : > { %v394_v14 = vld [vmem:[%s1039_s27] sm:$0xff]  ;;  %v932_v18 = vld [vmem:[%s1044_s6 + $0x70] ss:$8 sps:$4 sm:$0xff]   ;;  %v936_v21 = vld [vmem:[%s1044_s6 + $0x94] ss:$8 sps:$4 sm:$0xff]   ;;  %p878_p7 = scmp.ne.s32.totalorder %s973_s18, 8 }
  0x1e   : > { %597 = vmatpush1.bf16.msra.mxu0 %v914_v4  ;;  %v845_v15 = vcombine.high %v394_v14, %v394_v14  ;;  %v933_v19 = vld [vmem:[%s1044_s6 + $0x84] ss:$8 sps:$4 sm:$0xff]   ;;  %v935_v20 = vld [vmem:[%s1044_s6 + $0x80] ss:$8 sps:$4 sm:$0xff]   ;;  %v938_v22 = vld [vmem:[%s1044_s6 + $0x90] ss:$8 sps:$4 sm:$0xff]   ;;  %v844_v35 = vcombine.low %v394_v14, %v394_v14  ;;  %v647_v44 = vlaneseq (!%p878_p7) }
  0x1f   : > { %598 = vmatprep.subr.bf16.mxu0 %v915_v5  ;;  %v939_v23 = vld [vmem:[%s1044_s6 + $0xa4] ss:$8 sps:$4 sm:$0xff]   ;;  %v941_v24 = vld [vmem:[%s1044_s6 + $0xa0] ss:$8 sps:$4 sm:$0xff]   ;;  %v942_v25 = vld [vmem:[%s1044_s6 + $0xb4] ss:$8 sps:$4 sm:$0xff]  }
  0x20   : > { %626 = vmatprep.mubr.bf16.mxu0 %v845_v15  ;;  %v944_v26 = vld [vmem:[%s1044_s6 + $0xb0] ss:$8 sps:$4 sm:$0xff]   ;;  %v945_v27 = vld [vmem:[%s1044_s6 + $0xc4] ss:$8 sps:$4 sm:$0xff]   ;;  %v947_v28 = vld [vmem:[%s1044_s6 + $0xc0] ss:$8 sps:$4 sm:$0xff]  }
  0x21   : > { %v948_v29 = vld [vmem:[%s1044_s6 + $0xd4] ss:$8 sps:$4 sm:$0xff]   ;;  %v950_v30 = vld [vmem:[%s1044_s6 + $0xd0] ss:$8 sps:$4 sm:$0xff]   ;;  %v951_v31 = vld [vmem:[%s1044_s6 + $0xe4] ss:$8 sps:$4 sm:$0xff]  }
  0x22   : > { %599 = vmatpush1.bf16.msra.mxu0 %v917_v6  ;;  %v953_v32 = vld [vmem:[%s1044_s6 + $0xe0] ss:$8 sps:$4 sm:$0xff]   ;;  %v954_v33 = vld [vmem:[%s1044_s6 + $0xf4] ss:$8 sps:$4 sm:$0xff]   ;;  %v956_v34 = vld [vmem:[%s1044_s6 + $0xf0] ss:$8 sps:$4 sm:$0xff]  }
  0x23   : > { %600 = vmatprep.subr.bf16.mxu0 %v918_v7  ;;  %v392_v36 = vld [vmem:[#allocation2] sm:$0xff]  ;;  %v393_v37 = vld [vmem:[#allocation2 + $0x8] sm:$0xff]  ;;  %v648_v45 = vshrl.u32 (!%p878_p7), %v647_v44, 7 }
  0x24   : > { %v645_v46 = vld [vmem:[%s1110_s2] sm:$0x3] (!%p878_p7)  ;;  %v674_v59 = vld [vmem:[%s1112_s4 + $0x8] sm:$0xff] (!%p878_p7) }
  0x25   : > { %v659_v47 = vld [vmem:[%s1111_s3] sm:$0x3] (!%p878_p7)  ;;  %v649_v48 = vsub.s32 (!%p878_p7), 0, %v648_v45  ;;  %v653_v49 = vsub.s32 (!%p878_p7), 1, %v648_v45 }
  0x26   : > { %601 = vmatpush1.bf16.msra.mxu0 %v920_v8  ;;  %v673_v58 = vld [vmem:[%s1112_s4] sm:$0xff] (!%p878_p7) }
  0x27   : > { %602 = vmatprep.subr.bf16.mxu0 %v921_v9  ;;  %v650_v52 = vrot.slane (!%p878_p7), %v645_v46, %v649_v48  ;;  %v664_v53 = vrot.slane (!%p878_p7), %v659_v47, %v649_v48  ;;  %v654_v54 = vrot.slane (!%p878_p7), %v645_v46, %v653_v49  ;;  %v668_v55 = vrot.slane (!%p878_p7), %v659_v47, %v653_v49 }
  0x2a   : > { %603 = vmatpush1.bf16.msra.mxu0 %v923_v10 }
  0x2b   : > { %604 = vmatprep.subr.bf16.mxu0 %v924_v11 }
  0x2e   : > { %605 = vmatpush1.bf16.msra.mxu0 %v926_v12 }
  0x2f   : > { %606 = vmatprep.subr.bf16.mxu0 %v927_v13 }
  0x32   : > { %607 = vmatpush1.bf16.msra.mxu0 %v929_v16 }
  0x33   : > { %608 = vmatprep.subr.bf16.mxu0 %v930_v17 }
  0x36   : > { %609 = vmatpush1.bf16.msra.mxu0 %v932_v18 }
  0x37   : > { %610 = vmatprep.subr.bf16.mxu0 %v933_v19 }
  0x3a   : > { %611 = vmatpush1.bf16.msra.mxu0 %v935_v20 }
  0x3b   : > { %612 = vmatprep.subr.bf16.mxu0 %v936_v21 }
  0x3e   : > { %613 = vmatpush1.bf16.msra.mxu0 %v938_v22 }
  0x3f   : > { %614 = vmatprep.subr.bf16.mxu0 %v939_v23 }
  0x42   : > { %615 = vmatpush1.bf16.msra.mxu0 %v941_v24 }
  0x43   : > { %616 = vmatprep.subr.bf16.mxu0 %v942_v25 }
  0x46   : > { %617 = vmatpush1.bf16.msra.mxu0 %v944_v26 }
  0x47   : > { %618 = vmatprep.subr.bf16.mxu0 %v945_v27 }
  0x4a   : > { %619 = vmatpush1.bf16.msra.mxu0 %v947_v28 }
  0x4b   : > { %620 = vmatprep.subr.bf16.mxu0 %v948_v29 }
  0x4e   : > { %621 = vmatpush1.bf16.msra.mxu0 %v950_v30 }
  0x4f   : > { %622 = vmatprep.subr.bf16.mxu0 %v951_v31 }
  0x52   : > { %623 = vmatpush1.bf16.msra.mxu0 %v953_v32 }
  0x53   : > { %624 = vmatprep.subr.bf16.mxu0 %v954_v33 }
  0x56   : > { %625 = vmatpush1.bf16.msra.mxu0 %v956_v34 }
  0x59   : > { %627 = vmatmul.mubr.bf16.vlgmr.msra.gmra.mrb[0].mxu0 %v844_v35 }
 0x12a   : > { %642 = sbr.rel (%p878_p7) target bundleno = 321 (0x141), region = 48 }
 0x12c   : > { %v628_v38 = vpop.f32.mrb[0].mxu0 }
 0x12d   : > { %v635_v39 = vadd.f32 %v628_v38, %v392_v36  ;;  %v630_v40 = vpop.f32.mrb[1].mxu0 }
 0x12e   : > { %v636_v41 = vadd.f32 %v630_v40, %v393_v37  ;;  %v632_v42 = vpop.f32.mrb[2].mxu0 }
 0x12f   : > { %637 = vst [vmem:[#allocation2] sm:$0xff] %v635_v39  ;;  %v633_v43 = vpop.f32.mrb[3].mxu0 }
 0x130   : > { %638 = vst [vmem:[#allocation2 + $0x8] sm:$0xff] %v636_v41 }
 0x136   : > { %v643_v50 = vld [vmem:[#allocation2] sm:$0xff] }
 0x137   : > { %v644_v51 = vld [vmem:[#allocation2 + $0x8] sm:$0xff]  ;;  %v657_v56 = vmul.f32 %v650_v52, %v643_v50 }
 0x138   : > { %v658_v57 = vmul.f32 %v654_v54, %v644_v51 }
 0x139   : > { %v671_v60 = vadd.f32 %v664_v53, %v657_v56 }
 0x13a   : > { %v672_v61 = vadd.f32 %v668_v55, %v658_v57 }
 0x13b   : > { %v675_v62 = vadd.f32 %v673_v58, %v671_v60 }
 0x13c   : > { %v676_v63 = vadd.f32 %v674_v59, %v672_v61 }
 0x13d   : > { %v677_v0 = vmax.f32 %v675_v62, 0.0 }
 0x13e   : > { %v678_v1 = vmax.f32 %v676_v63, 0.0 }
 0x13f   : > { %679 = vst [vmem:[%s1113_s5] sm:$0xff] %v677_v0 }
 0x140   : > { %680 = vst [vmem:[%s1113_s5 + $0x8] sm:$0xff] %v678_v1 }
 0x141 PF: > { %s15_s20 = sadd.s32 1, %s981_s20   ;;  %s1114_s18 = smov %s977_s19 }
 0x142   : > { %p12_p8 = scmp.ge.s32.totalorder %s15_s20, 11   ;;  %s1115_s19 = smov %s1117_s21 }
 0x144   :  { %14 = sbr.rel (!%p12_p8) target bundleno = 2 (0x2), region = 90 }

// kernel: resnet34_forward.59
= control target key start
LH: loop header
LB: loop body
LE: loop exit
PB: predicated region body
PF: predicated region fallthrough
CT: control target
= control target key end

     0   :  { %s920_s15 = smov 0   ;;  %s922_s16 = smov 0   ;;  %s1008_s0 = inlined_call_operand.vmem [shape: bf16[8,2304], index: 0, kind: input, shape index: {}]   ;;  %s1009_s1 = inlined_call_operand.vmem [shape: bf16[2304,256], index: 1, kind: input, shape index: {}]   ;;  %s1010_s2 = inlined_call_operand.vmem [shape: f32[1,256], index: 2, kind: input, shape index: {}]   ;;  %s1011_s3 = inlined_call_operand.vmem [shape: f32[1,256], index: 3, kind: input, shape index: {}]   ;;  %s1012_s4 = inlined_call_operand.vmem [shape: f32[8,256], index: 4, kind: output, shape index: {}]  }
   0x1   :  { %s924_s17 = smov 0  }
   0x2 LB: > { %s26_s18 = sadd.s32 1, %s888_s16  ;;  %p748_p0 = scmp.ge.s32.totalorder %s892_s17, 1  ;;  %s892_s17 = sphi %s924_s17, %s14_s17   ;;  %s888_s16 = sphi %s922_s16, %s1014_s16   ;;  %s884_s15 = sphi %s920_s15, %s1013_s15  }
   0x3   : > { %p27_p1 = scmp.ge.s32.totalorder %s26_s18, 9  ;;  %p229_p2 = scmp.lt.s32.totalorder %s892_s17, 10 }
   0x5   : > { %s1016_s18 = smov (%p27_p1, %s26_s18), 0  ;;  %p230_p3 = pnand %p748_p0, %p229_p2 }
   0x6   : > { %s749_s19 = sshll.u32 (!%p230_p3), %s884_s15, 1  ;;  %s751_s20 = sshll.u32 (!%p230_p3), %s884_s15, 5 }
   0x7   : > { %233 = sbr.rel (%p230_p3) target bundleno = 319 (0x13f), region = 36  ;;  %p284_p4 = scmp.lt.s32.totalorder (!%p230_p3), %s749_s19, 17 }
   0x8   : > { %p293_p5 = scmp.lt.s32.totalorder (!%p230_p3), %s751_s20, 287  ;;  %p754_p6 = scmp.ne.s32.totalorder (!%p230_p3), %s884_s15, 0 }
   0xe   : > { %s1018_s19 = smov (!%p284_p4, %s749_s19), 17  ;;  %s1020_s20 = smov (!%p293_p5, %s751_s20), 287 }
   0xf   : > { %s750_s21 = sshll.u32 %s1018_s19, 2  ;;  %s794_s25 = sshll.u32 %s1020_s20, 3  ;;  %v894_v0 = vmov (!%p754_p6), 0.0  }
  0x10   : > { %s945_s24 = scalar_lea.vmem %s1008_s0, %s750_s21  ;;  %s950_s28 = scalar_lea.vmem %s1009_s1, %s794_s25  ;;  %327 = vst [vmem:[#allocation2] sm:$0xff] (!%p754_p6), %v894_v0  ;;  %328 = vst [vmem:[#allocation2 + $0x8] sm:$0xff] (!%p754_p6), %v894_v0 }
  0x11   : > { %326 = sbr.rel (%p754_p6) target bundleno = 24 (0x18), region = 40 }
  0x18 PF: > { %v820_v1 = vld [vmem:[%s950_s28 + $0x4] ss:$8 sps:$4 sm:$0xff]   ;;  %v822_v2 = vld [vmem:[%s950_s28] ss:$8 sps:$4 sm:$0xff]   ;;  %v823_v3 = vld [vmem:[%s950_s28 + $0x14] ss:$8 sps:$4 sm:$0xff]  }
  0x19   : > { %531 = vmatprep.subr.bf16.mxu0 %v820_v1  ;;  %v825_v4 = vld [vmem:[%s950_s28 + $0x10] ss:$8 sps:$4 sm:$0xff]   ;;  %v826_v5 = vld [vmem:[%s950_s28 + $0x24] ss:$8 sps:$4 sm:$0xff]   ;;  %v828_v6 = vld [vmem:[%s950_s28 + $0x20] ss:$8 sps:$4 sm:$0xff]  }
  0x1a   : > { %532 = vmatpush1.bf16.msra.mxu0 %v822_v2  ;;  %v829_v7 = vld [vmem:[%s950_s28 + $0x34] ss:$8 sps:$4 sm:$0xff]   ;;  %v831_v8 = vld [vmem:[%s950_s28 + $0x30] ss:$8 sps:$4 sm:$0xff]   ;;  %v832_v9 = vld [vmem:[%s950_s28 + $0x44] ss:$8 sps:$4 sm:$0xff]  }
  0x1b   : > { %533 = vmatprep.subr.bf16.mxu0 %v823_v3  ;;  %v834_v10 = vld [vmem:[%s950_s28 + $0x40] ss:$8 sps:$4 sm:$0xff]   ;;  %v835_v11 = vld [vmem:[%s950_s28 + $0x54] ss:$8 sps:$4 sm:$0xff]   ;;  %v837_v12 = vld [vmem:[%s950_s28 + $0x50] ss:$8 sps:$4 sm:$0xff]  }
  0x1c   : > { %v838_v13 = vld [vmem:[%s950_s28 + $0x64] ss:$8 sps:$4 sm:$0xff]   ;;  %v840_v16 = vld [vmem:[%s950_s28 + $0x60] ss:$8 sps:$4 sm:$0xff]   ;;  %v841_v17 = vld [vmem:[%s950_s28 + $0x74] ss:$8 sps:$4 sm:$0xff]  }
  0x1d   : > { %v331_v14 = vld [vmem:[%s945_s24] sm:$0xff]  ;;  %v843_v18 = vld [vmem:[%s950_s28 + $0x70] ss:$8 sps:$4 sm:$0xff]   ;;  %v847_v21 = vld [vmem:[%s950_s28 + $0x94] ss:$8 sps:$4 sm:$0xff]   ;;  %p789_p7 = scmp.ne.s32.totalorder %s884_s15, 8 }
  0x1e   : > { %534 = vmatpush1.bf16.msra.mxu0 %v825_v4  ;;  %v756_v15 = vcombine.high %v331_v14, %v331_v14  ;;  %v844_v19 = vld [vmem:[%s950_s28 + $0x84] ss:$8 sps:$4 sm:$0xff]   ;;  %v846_v20 = vld [vmem:[%s950_s28 + $0x80] ss:$8 sps:$4 sm:$0xff]   ;;  %v849_v22 = vld [vmem:[%s950_s28 + $0x90] ss:$8 sps:$4 sm:$0xff]   ;;  %v755_v35 = vcombine.low %v331_v14, %v331_v14  ;;  %v584_v44 = vlaneseq (!%p789_p7) }
  0x1f   : > { %535 = vmatprep.subr.bf16.mxu0 %v826_v5  ;;  %v850_v23 = vld [vmem:[%s950_s28 + $0xa4] ss:$8 sps:$4 sm:$0xff]   ;;  %v852_v24 = vld [vmem:[%s950_s28 + $0xa0] ss:$8 sps:$4 sm:$0xff]   ;;  %v853_v25 = vld [vmem:[%s950_s28 + $0xb4] ss:$8 sps:$4 sm:$0xff]  }
  0x20   : > { %563 = vmatprep.mubr.bf16.mxu0 %v756_v15  ;;  %v855_v26 = vld [vmem:[%s950_s28 + $0xb0] ss:$8 sps:$4 sm:$0xff]   ;;  %v856_v27 = vld [vmem:[%s950_s28 + $0xc4] ss:$8 sps:$4 sm:$0xff]   ;;  %v858_v28 = vld [vmem:[%s950_s28 + $0xc0] ss:$8 sps:$4 sm:$0xff]  }
  0x21   : > { %v859_v29 = vld [vmem:[%s950_s28 + $0xd4] ss:$8 sps:$4 sm:$0xff]   ;;  %v861_v30 = vld [vmem:[%s950_s28 + $0xd0] ss:$8 sps:$4 sm:$0xff]   ;;  %v862_v31 = vld [vmem:[%s950_s28 + $0xe4] ss:$8 sps:$4 sm:$0xff]  }
  0x22   : > { %536 = vmatpush1.bf16.msra.mxu0 %v828_v6  ;;  %v864_v32 = vld [vmem:[%s950_s28 + $0xe0] ss:$8 sps:$4 sm:$0xff]   ;;  %v865_v33 = vld [vmem:[%s950_s28 + $0xf4] ss:$8 sps:$4 sm:$0xff]   ;;  %v867_v34 = vld [vmem:[%s950_s28 + $0xf0] ss:$8 sps:$4 sm:$0xff]  }
  0x23   : > { %537 = vmatprep.subr.bf16.mxu0 %v829_v7  ;;  %v329_v36 = vld [vmem:[#allocation2] sm:$0xff]  ;;  %v330_v37 = vld [vmem:[#allocation2 + $0x8] sm:$0xff]  ;;  %v585_v45 = vshrl.u32 (!%p789_p7), %v584_v44, 7 }
  0x24   : > { %v582_v46 = vld [vmem:[%s1010_s2] sm:$0x3] (!%p789_p7) }
  0x25   : > { %v596_v47 = vld [vmem:[%s1011_s3] sm:$0x3] (!%p789_p7)  ;;  %v586_v48 = vsub.s32 (!%p789_p7), 0, %v585_v45  ;;  %v590_v49 = vsub.s32 (!%p789_p7), 1, %v585_v45 }
  0x26   : > { %538 = vmatpush1.bf16.msra.mxu0 %v831_v8 }
  0x27   : > { %539 = vmatprep.subr.bf16.mxu0 %v832_v9  ;;  %v587_v52 = vrot.slane (!%p789_p7), %v582_v46, %v586_v48  ;;  %v601_v53 = vrot.slane (!%p789_p7), %v596_v47, %v586_v48  ;;  %v591_v54 = vrot.slane (!%p789_p7), %v582_v46, %v590_v49  ;;  %v605_v55 = vrot.slane (!%p789_p7), %v596_v47, %v590_v49 }
  0x2a   : > { %540 = vmatpush1.bf16.msra.mxu0 %v834_v10 }
  0x2b   : > { %541 = vmatprep.subr.bf16.mxu0 %v835_v11 }
  0x2e   : > { %542 = vmatpush1.bf16.msra.mxu0 %v837_v12 }
  0x2f   : > { %543 = vmatprep.subr.bf16.mxu0 %v838_v13 }
  0x32   : > { %544 = vmatpush1.bf16.msra.mxu0 %v840_v16 }
  0x33   : > { %545 = vmatprep.subr.bf16.mxu0 %v841_v17 }
  0x36   : > { %546 = vmatpush1.bf16.msra.mxu0 %v843_v18 }
  0x37   : > { %547 = vmatprep.subr.bf16.mxu0 %v844_v19 }
  0x3a   : > { %548 = vmatpush1.bf16.msra.mxu0 %v846_v20 }
  0x3b   : > { %549 = vmatprep.subr.bf16.mxu0 %v847_v21 }
  0x3e   : > { %550 = vmatpush1.bf16.msra.mxu0 %v849_v22 }
  0x3f   : > { %551 = vmatprep.subr.bf16.mxu0 %v850_v23 }
  0x42   : > { %552 = vmatpush1.bf16.msra.mxu0 %v852_v24 }
  0x43   : > { %553 = vmatprep.subr.bf16.mxu0 %v853_v25 }
  0x46   : > { %554 = vmatpush1.bf16.msra.mxu0 %v855_v26 }
  0x47   : > { %555 = vmatprep.subr.bf16.mxu0 %v856_v27 }
  0x4a   : > { %556 = vmatpush1.bf16.msra.mxu0 %v858_v28 }
  0x4b   : > { %557 = vmatprep.subr.bf16.mxu0 %v859_v29 }
  0x4e   : > { %558 = vmatpush1.bf16.msra.mxu0 %v861_v30 }
  0x4f   : > { %559 = vmatprep.subr.bf16.mxu0 %v862_v31 }
  0x52   : > { %560 = vmatpush1.bf16.msra.mxu0 %v864_v32 }
  0x53   : > { %561 = vmatprep.subr.bf16.mxu0 %v865_v33 }
  0x56   : > { %562 = vmatpush1.bf16.msra.mxu0 %v867_v34 }
  0x59   : > { %564 = vmatmul.mubr.bf16.vlgmr.msra.gmra.mrb[0].mxu0 %v755_v35 }
 0x12a   : > { %579 = sbr.rel (%p789_p7) target bundleno = 319 (0x13f), region = 44 }
 0x12c   : > { %v565_v38 = vpop.f32.mrb[0].mxu0 }
 0x12d   : > { %v572_v39 = vadd.f32 %v565_v38, %v329_v36  ;;  %v567_v40 = vpop.f32.mrb[1].mxu0 }
 0x12e   : > { %v573_v41 = vadd.f32 %v567_v40, %v330_v37  ;;  %v569_v42 = vpop.f32.mrb[2].mxu0 }
 0x12f   : > { %574 = vst [vmem:[#allocation2] sm:$0xff] %v572_v39  ;;  %v570_v43 = vpop.f32.mrb[3].mxu0 }
 0x130   : > { %575 = vst [vmem:[#allocation2 + $0x8] sm:$0xff] %v573_v41 }
 0x136   : > { %v580_v50 = vld [vmem:[#allocation2] sm:$0xff] }
 0x137   : > { %v581_v51 = vld [vmem:[#allocation2 + $0x8] sm:$0xff]  ;;  %v594_v56 = vmul.f32 %v587_v52, %v580_v50 }
 0x138   : > { %v595_v57 = vmul.f32 %v591_v54, %v581_v51 }
 0x139   : > { %v608_v58 = vadd.f32 %v601_v53, %v594_v56 }
 0x13a   : > { %v609_v59 = vadd.f32 %v605_v55, %v595_v57 }
 0x13b   : > { %v610_v60 = vmax.f32 %v608_v58, 0.0 }
 0x13c   : > { %v611_v61 = vmax.f32 %v609_v59, 0.0 }
 0x13d   : > { %612 = vst [vmem:[%s1012_s4] sm:$0xff] %v610_v60 }
 0x13e   : > { %613 = vst [vmem:[%s1012_s4 + $0x8] sm:$0xff] %v611_v61 }
 0x13f PF: > { %s14_s17 = sadd.s32 1, %s892_s17   ;;  %s1013_s15 = smov %s888_s16 }
 0x140   : > { %p11_p8 = scmp.ge.s32.totalorder %s14_s17, 11   ;;  %s1014_s16 = smov %s1016_s18 }
 0x142   :  { %13 = sbr.rel (!%p11_p8) target bundleno = 2 (0x2), region = 83 }

// kernel: resnet34_forward.69
= control target key start
LH: loop header
LB: loop body
LE: loop exit
PB: predicated region body
PF: predicated region fallthrough
CT: control target
= control target key end

     0   :  { %s1136_s15 = smov 0   ;;  %s1138_s16 = smov 0   ;;  %s1360_s0 = inlined_call_operand.vmem [shape: bf16[8,2304], index: 0, kind: input, shape index: {}]   ;;  %s1361_s1 = inlined_call_operand.vmem [shape: bf16[2304,512], index: 1, kind: input, shape index: {}]   ;;  %s1362_s2 = inlined_call_operand.vmem [shape: f32[1,512], index: 2, kind: input, shape index: {}]   ;;  %s1363_s3 = inlined_call_operand.vmem [shape: f32[1,512], index: 3, kind: input, shape index: {}]   ;;  %s1364_s4 = inlined_call_operand.vmem [shape: f32[8,512], index: 4, kind: output, shape index: {}]  }
   0x1   :  { %s1140_s17 = smov 0   ;;  %s1142_s18 = smov 0  }
   0x2   :  { %s1144_s19 = smov 0   ;;  %s1146_s20 = smov 0  }
   0x3   :  { %s1148_s21 = smov 0  }
   0x4 LB: > { %s26_s22 = sadd.s32 1, %s1100_s19  ;;  %s29_s23 = sadd.s32 1, %s1104_s20  ;;  %s1108_s21 = sphi %s1148_s21, %s14_s21   ;;  %s1104_s20 = sphi %s1146_s20, %s1370_s20   ;;  %s1100_s19 = sphi %s1144_s19, %s1369_s19   ;;  %s1096_s18 = sphi %s1142_s18, %s1368_s18   ;;  %s1092_s17 = sphi %s1140_s17, %s1367_s17   ;;  %s1088_s16 = sphi %s1138_s16, %s1366_s16   ;;  %s1084_s15 = sphi %s1136_s15, %s1365_s15  }
   0x5   : > { %p27_p0 = scmp.ge.s32.totalorder %s26_s22, 9  ;;  %p77_p1 = scmp.ne.s32.totalorder %s1088_s16, %s1084_s15 }
   0x6   : > { %p78_p2 = scmp.eq.s32.totalorder %s1108_s21, 0  ;;  %s70_s27 = sadd.s32 1, %s1088_s16 }
   0x7   : > { %s1372_s22 = smov (%p27_p0, %s26_s22), 0  ;;  %s1374_s23 = smov (!%p27_p0, %s29_s23), %s1104_s20 }
   0x8   : > { %p79_p3 = por %p78_p2, %p77_p1  ;;  %p31_p4 = scmp.ge.s32.totalorder %s1374_s23, 2 }
   0x9   : > { %s65_s24 = ssub.s32 %s1100_s19, %s1372_s22  ;;  %p894_p6 = scmp.ge.s32.totalorder %s1108_s21, 18 }
   0xa   : > { %s1376_s23 = smov (%p31_p4, %s1374_s23), 0 }
   0xb   : > { %s66_s25 = ssub.s32 %s1104_s20, %s1376_s23  ;;  %183 = sbr.rel (%p894_p6) target bundleno = 41 (0x29), region = 16 }
   0xc   : > { %s67_s26 = sor.u32 %s66_s25, %s65_s24 }
   0xd   : > { %p68_p5 = scmp.eq.s32.totalorder %s67_s26, 0 }
   0xf   : > { %s1187_s28 = scalar_select %p68_p5, %s1088_s16, %s70_s27  }
  0x12   : > { %199 = sbr.rel (!%p79_p3) target bundleno = 41 (0x29), region = 24  ;;  %s201_s29 = sand.u32 (%p79_p3), 1, %s1088_s16  }
  0x13   : > { %s897_s30 = sshll.u32 (%p79_p3), %s1104_s20, 1  ;;  %s895_s5 = sshll.u32 (%p79_p3), %s201_s29, 8 }
  0x14   : > { %s946_s6 = sshll.u32 (%p79_p3), %s1100_s19, 7  ;;  %s1201_s12 = scalar_lea.vmem (%p79_p3), [#allocation3], %s895_s5 }
  0x15   : > { %s207_s7 = sadd.s32 (%p79_p3), %s946_s6, %s897_s30 }
  0x16   : > { %s899_s8 = sshll.u32 (%p79_p3), %s207_s7, 2 }
  0x17   : > { %s1196_s11 = scalar_lea.vmem (%p79_p3), %s1361_s1, %s899_s8 }
  0x18   : > { %v299_v0 = vld [vmem:[%s1196_s11] sm:$0xff] (%p79_p3)  ;;  %v301_v1 = vld [vmem:[%s1196_s11 + $0x10] sm:$0xff] (%p79_p3) }
  0x19   : > { %v303_v2 = vld [vmem:[%s1196_s11 + $0x20] sm:$0xff]  ;;  %300 = vst [vmem:[%s1201_s12] sm:$0xff] %v299_v0  ;;  %302 = vst [vmem:[%s1201_s12 + $0x8] sm:$0xff] %v301_v1  ;;  %v305_v3 = vld [vmem:[%s1196_s11 + $0x30] sm:$0xff] }
  0x1a   : > { %304 = vst [vmem:[%s1201_s12 + $0x10] sm:$0xff] %v303_v2  ;;  %v307_v4 = vld [vmem:[%s1196_s11 + $0x40] sm:$0xff]  ;;  %v309_v5 = vld [vmem:[%s1196_s11 + $0x50] sm:$0xff]  ;;  %306 = vst [vmem:[%s1201_s12 + $0x18] sm:$0xff] %v305_v3 }
  0x1b   : > { %308 = vst [vmem:[%s1201_s12 + $0x20] sm:$0xff] %v307_v4  ;;  %310 = vst [vmem:[%s1201_s12 + $0x28] sm:$0xff] %v309_v5  ;;  %v311_v6 = vld [vmem:[%s1196_s11 + $0x60] sm:$0xff]  ;;  %v313_v7 = vld [vmem:[%s1196_s11 + $0x70] sm:$0xff] }
  0x1c   : > { %v315_v8 = vld [vmem:[%s1196_s11 + $0x80] sm:$0xff]  ;;  %312 = vst [vmem:[%s1201_s12 + $0x30] sm:$0xff] %v311_v6  ;;  %314 = vst [vmem:[%s1201_s12 + $0x38] sm:$0xff] %v313_v7  ;;  %v317_v9 = vld [vmem:[%s1196_s11 + $0x90] sm:$0xff] }
  0x1d   : > { %316 = vst [vmem:[%s1201_s12 + $0x40] sm:$0xff] %v315_v8  ;;  %v319_v10 = vld [vmem:[%s1196_s11 + $0xa0] sm:$0xff]  ;;  %v321_v11 = vld [vmem:[%s1196_s11 + $0xb0] sm:$0xff]  ;;  %318 = vst [vmem:[%s1201_s12 + $0x48] sm:$0xff] %v317_v9 }
  0x1e   : > { %320 = vst [vmem:[%s1201_s12 + $0x50] sm:$0xff] %v319_v10  ;;  %322 = vst [vmem:[%s1201_s12 + $0x58] sm:$0xff] %v321_v11  ;;  %v323_v12 = vld [vmem:[%s1196_s11 + $0xc0] sm:$0xff]  ;;  %v325_v13 = vld [vmem:[%s1196_s11 + $0xd0] sm:$0xff] }
  0x1f   : > { %v327_v14 = vld [vmem:[%s1196_s11 + $0xe0] sm:$0xff]  ;;  %324 = vst [vmem:[%s1201_s12 + $0x60] sm:$0xff] %v323_v12  ;;  %326 = vst [vmem:[%s1201_s12 + $0x68] sm:$0xff] %v325_v13  ;;  %v329_v15 = vld [vmem:[%s1196_s11 + $0xf0] sm:$0xff] }
  0x20   : > { %328 = vst [vmem:[%s1201_s12 + $0x70] sm:$0xff] %v327_v14  ;;  %v331_v16 = vld [vmem:[%s1196_s11 + $0x100] sm:$0xff]  ;;  %v333_v17 = vld [vmem:[%s1196_s11 + $0x110] sm:$0xff]  ;;  %330 = vst [vmem:[%s1201_s12 + $0x78] sm:$0xff] %v329_v15 }
  0x21   : > { %332 = vst [vmem:[%s1201_s12 + $0x80] sm:$0xff] %v331_v16  ;;  %334 = vst [vmem:[%s1201_s12 + $0x88] sm:$0xff] %v333_v17  ;;  %v335_v18 = vld [vmem:[%s1196_s11 + $0x120] sm:$0xff]  ;;  %v337_v19 = vld [vmem:[%s1196_s11 + $0x130] sm:$0xff] }
  0x22   : > { %v339_v20 = vld [vmem:[%s1196_s11 + $0x140] sm:$0xff]  ;;  %336 = vst [vmem:[%s1201_s12 + $0x90] sm:$0xff] %v335_v18  ;;  %338 = vst [vmem:[%s1201_s12 + $0x98] sm:$0xff] %v337_v19  ;;  %v341_v21 = vld [vmem:[%s1196_s11 + $0x150] sm:$0xff] }
  0x23   : > { %340 = vst [vmem:[%s1201_s12 + $0xa0] sm:$0xff] %v339_v20  ;;  %v343_v22 = vld [vmem:[%s1196_s11 + $0x160] sm:$0xff]  ;;  %v345_v23 = vld [vmem:[%s1196_s11 + $0x170] sm:$0xff]  ;;  %342 = vst [vmem:[%s1201_s12 + $0xa8] sm:$0xff] %v341_v21 }
  0x24   : > { %344 = vst [vmem:[%s1201_s12 + $0xb0] sm:$0xff] %v343_v22  ;;  %346 = vst [vmem:[%s1201_s12 + $0xb8] sm:$0xff] %v345_v23  ;;  %v347_v24 = vld [vmem:[%s1196_s11 + $0x180] sm:$0xff]  ;;  %v349_v25 = vld [vmem:[%s1196_s11 + $0x190] sm:$0xff] }
  0x25   : > { %v351_v26 = vld [vmem:[%s1196_s11 + $0x1a0] sm:$0xff]  ;;  %348 = vst [vmem:[%s1201_s12 + $0xc0] sm:$0xff] %v347_v24  ;;  %350 = vst [vmem:[%s1201_s12 + $0xc8] sm:$0xff] %v349_v25  ;;  %v353_v27 = vld [vmem:[%s1196_s11 + $0x1b0] sm:$0xff] }
  0x26   : > { %352 = vst [vmem:[%s1201_s12 + $0xd0] sm:$0xff] %v351_v26  ;;  %v355_v28 = vld [vmem:[%s1196_s11 + $0x1c0] sm:$0xff]  ;;  %v357_v29 = vld [vmem:[%s1196_s11 + $0x1d0] sm:$0xff]  ;;  %354 = vst [vmem:[%s1201_s12 + $0xd8] sm:$0xff] %v353_v27 }
  0x27   : > { %356 = vst [vmem:[%s1201_s12 + $0xe0] sm:$0xff] %v355_v28  ;;  %358 = vst [vmem:[%s1201_s12 + $0xe8] sm:$0xff] %v357_v29  ;;  %v359_v30 = vld [vmem:[%s1196_s11 + $0x1e0] sm:$0xff]  ;;  %v361_v31 = vld [vmem:[%s1196_s11 + $0x1f0] sm:$0xff] }
  0x28   : > { %360 = vst [vmem:[%s1201_s12 + $0xf0] sm:$0xff] %v359_v30  ;;  %362 = vst [vmem:[%s1201_s12 + $0xf8] sm:$0xff] %v361_v31 }
  0x29 PF: > { %p900_p7 = scmp.ge.s32.totalorder %s1108_s21, 1  ;;  %p383_p8 = scmp.lt.s32.totalorder %s1108_s21, 19 }
  0x2b   : > { %p384_p9 = pnand %p900_p7, %p383_p8 }
  0x2c   : > { %s390_s13 = sand.u32 (!%p384_p9), 1, %s1084_s15   ;;  %s902_s14 = sshll.u32 (!%p384_p9), %s1092_s17, 1 }
  0x2d   : > { %387 = sbr.rel (%p384_p9) target bundleno = 357 (0x165), region = 70  ;;  %s901_s24 = sshll.u32 (!%p384_p9), %s390_s13, 8 }
  0x2e   : > { %p439_p10 = scmp.lt.s32.totalorder (!%p384_p9), %s902_s14, 17  ;;  %s904_s25 = sshll.u32 (!%p384_p9), %s1096_s18, 1 }
  0x2f   : > { %p449_p11 = scmp.lt.s32.totalorder (!%p384_p9), %s904_s25, 3  ;;  %s1290_s13 = scalar_lea.vmem (!%p384_p9), [#allocation3], %s901_s24 }
  0x30   : > { %p908_p12 = scmp.ne.s32.totalorder (!%p384_p9), %s1092_s17, 0 }
  0x34   : > { %s1378_s14 = smov (!%p439_p10, %s902_s14), 17  ;;  %s1380_s25 = smov (!%p449_p11, %s904_s25), 3 }
  0x35   : > { %s903_s26 = sshll.u32 %s1378_s14, 2  ;;  %s451_s15 = scalar_lea.vmem %s1362_s2, %s1380_s25  ;;  %v1110_v32 = vmov (!%p908_p12), 0.0  }
  0x36   : > { %s1272_s30 = scalar_lea.vmem %s1360_s0, %s903_s26  ;;  %s456_s18 = scalar_lea.vmem %s1363_s3, %s1380_s25  ;;  %472 = vst [vmem:[#allocation2] sm:$0xff] (!%p908_p12), %v1110_v32  ;;  %473 = vst [vmem:[#allocation2 + $0x8] sm:$0xff] (!%p908_p12), %v1110_v32 }
  0x37   : > { %s907_s9 = sshll.u32 %s1380_s25, 3  ;;  %471 = sbr.rel (%p908_p12) target bundleno = 62 (0x3e), region = 78 }
  0x38   : > { %s1288_s12 = scalar_lea.vmem %s1364_s4, %s907_s9 }
  0x3e PF: > { %v1004_v33 = vld [vmem:[%s1290_s13 + $0x4] ss:$8 sps:$4 sm:$0xff]   ;;  %v1006_v34 = vld [vmem:[%s1290_s13] ss:$8 sps:$4 sm:$0xff]   ;;  %v1007_v35 = vld [vmem:[%s1290_s13 + $0x14] ss:$8 sps:$4 sm:$0xff]  }
  0x3f   : > { %676 = vmatprep.subr.bf16.mxu0 %v1004_v33  ;;  %v1009_v36 = vld [vmem:[%s1290_s13 + $0x10] ss:$8 sps:$4 sm:$0xff]   ;;  %v1010_v37 = vld [vmem:[%s1290_s13 + $0x24] ss:$8 sps:$4 sm:$0xff]   ;;  %v1012_v38 = vld [vmem:[%s1290_s13 + $0x20] ss:$8 sps:$4 sm:$0xff]  }
  0x40   : > { %677 = vmatpush1.bf16.msra.mxu0 %v1006_v34  ;;  %v1013_v39 = vld [vmem:[%s1290_s13 + $0x34] ss:$8 sps:$4 sm:$0xff]   ;;  %v1015_v40 = vld [vmem:[%s1290_s13 + $0x30] ss:$8 sps:$4 sm:$0xff]   ;;  %v1016_v41 = vld [vmem:[%s1290_s13 + $0x44] ss:$8 sps:$4 sm:$0xff]  }
  0x41   : > { %678 = vmatprep.subr.bf16.mxu0 %v1007_v35  ;;  %v1018_v42 = vld [vmem:[%s1290_s13 + $0x40] ss:$8 sps:$4 sm:$0xff]   ;;  %v1019_v43 = vld [vmem:[%s1290_s13 + $0x54] ss:$8 sps:$4 sm:$0xff]   ;;  %v1021_v44 = vld [vmem:[%s1290_s13 + $0x50] ss:$8 sps:$4 sm:$0xff]  }
  0x42   : > { %v1022_v45 = vld [vmem:[%s1290_s13 + $0x64] ss:$8 sps:$4 sm:$0xff]   ;;  %v476_v46 = vld [vmem:[%s1272_s30] sm:$0xff]  ;;  %v1024_v48 = vld [vmem:[%s1290_s13 + $0x60] ss:$8 sps:$4 sm:$0xff]   ;;  %p943_p13 = scmp.ne.s32.totalorder %s1092_s17, 8 }
  0x43   : > { %v910_v47 = vcombine.high %v476_v46, %v476_v46  ;;  %v1025_v49 = vld [vmem:[%s1290_s13 + $0x74] ss:$8 sps:$4 sm:$0xff]   ;;  %v1027_v50 = vld [vmem:[%s1290_s13 + $0x70] ss:$8 sps:$4 sm:$0xff]   ;;  %v1028_v51 = vld [vmem:[%s1290_s13 + $0x84] ss:$8 sps:$4 sm:$0xff]   ;;  %v909_v3 = vcombine.low %v476_v46, %v476_v46  ;;  %v729_v12 = vlaneseq (!%p943_p13) }
  0x44   : > { %679 = vmatpush1.bf16.msra.mxu0 %v1009_v36  ;;  %v1030_v52 = vld [vmem:[%s1290_s13 + $0x80] ss:$8 sps:$4 sm:$0xff]   ;;  %v1031_v53 = vld [vmem:[%s1290_s13 + $0x94] ss:$8 sps:$4 sm:$0xff]   ;;  %v1033_v54 = vld [vmem:[%s1290_s13 + $0x90] ss:$8 sps:$4 sm:$0xff]  }
  0x45   : > { %680 = vmatprep.subr.bf16.mxu0 %v1010_v37  ;;  %708 = vmatprep.mubr.bf16.mxu0 %v910_v47  ;;  %v1034_v55 = vld [vmem:[%s1290_s13 + $0xa4] ss:$8 sps:$4 sm:$0xff]   ;;  %v1036_v56 = vld [vmem:[%s1290_s13 + $0xa0] ss:$8 sps:$4 sm:$0xff]   ;;  %v1037_v57 = vld [vmem:[%s1290_s13 + $0xb4] ss:$8 sps:$4 sm:$0xff]  }
  0x46   : > { %v1039_v58 = vld [vmem:[%s1290_s13 + $0xb0] ss:$8 sps:$4 sm:$0xff]   ;;  %v1040_v59 = vld [vmem:[%s1290_s13 + $0xc4] ss:$8 sps:$4 sm:$0xff]   ;;  %v1042_v60 = vld [vmem:[%s1290_s13 + $0xc0] ss:$8 sps:$4 sm:$0xff]  }
  0x47   : > { %v1043_v61 = vld [vmem:[%s1290_s13 + $0xd4] ss:$8 sps:$4 sm:$0xff]   ;;  %v1045_v62 = vld [vmem:[%s1290_s13 + $0xd0] ss:$8 sps:$4 sm:$0xff]   ;;  %v1046_v63 = vld [vmem:[%s1290_s13 + $0xe4] ss:$8 sps:$4 sm:$0xff]  }
  0x48   : > { %681 = vmatpush1.bf16.msra.mxu0 %v1012_v38  ;;  %v1048_v0 = vld [vmem:[%s1290_s13 + $0xe0] ss:$8 sps:$4 sm:$0xff]   ;;  %v1049_v1 = vld [vmem:[%s1290_s13 + $0xf4] ss:$8 sps:$4 sm:$0xff]   ;;  %v1051_v2 = vld [vmem:[%s1290_s13 + $0xf0] ss:$8 sps:$4 sm:$0xff]  }
  0x49   : > { %682 = vmatprep.subr.bf16.mxu0 %v1013_v39  ;;  %v474_v4 = vld [vmem:[#allocation2] sm:$0xff]  ;;  %v475_v5 = vld [vmem:[#allocation2 + $0x8] sm:$0xff]  ;;  %v730_v13 = vshrl.u32 (!%p943_p13), %v729_v12, 7 }
  0x4a   : > { %v727_v14 = vld [vmem:[%s451_s15] sm:$0x3] (!%p943_p13) }
  0x4b   : > { %v741_v15 = vld [vmem:[%s456_s18] sm:$0x3] (!%p943_p13)  ;;  %v731_v16 = vsub.s32 (!%p943_p13), 0, %v730_v13  ;;  %v735_v17 = vsub.s32 (!%p943_p13), 1, %v730_v13 }
  0x4c   : > { %683 = vmatpush1.bf16.msra.mxu0 %v1015_v40 }
  0x4d   : > { %684 = vmatprep.subr.bf16.mxu0 %v1016_v41  ;;  %v732_v20 = vrot.slane (!%p943_p13), %v727_v14, %v731_v16  ;;  %v746_v21 = vrot.slane (!%p943_p13), %v741_v15, %v731_v16  ;;  %v736_v22 = vrot.slane (!%p943_p13), %v727_v14, %v735_v17  ;;  %v750_v23 = vrot.slane (!%p943_p13), %v741_v15, %v735_v17 }
  0x50   : > { %685 = vmatpush1.bf16.msra.mxu0 %v1018_v42 }
  0x51   : > { %686 = vmatprep.subr.bf16.mxu0 %v1019_v43 }
  0x54   : > { %687 = vmatpush1.bf16.msra.mxu0 %v1021_v44 }
  0x55   : > { %688 = vmatprep.subr.bf16.mxu0 %v1022_v45 }
  0x58   : > { %689 = vmatpush1.bf16.msra.mxu0 %v1024_v48 }
  0x59   : > { %690 = vmatprep.subr.bf16.mxu0 %v1025_v49 }
  0x5c   : > { %691 = vmatpush1.bf16.msra.mxu0 %v1027_v50 }
  0x5d   : > { %692 = vmatprep.subr.bf16.mxu0 %v1028_v51 }
  0x60   : > { %693 = vmatpush1.bf16.msra.mxu0 %v1030_v52 }
  0x61   : > { %694 = vmatprep.subr.bf16.mxu0 %v1031_v53 }
  0x64   : > { %695 = vmatpush1.bf16.msra.mxu0 %v1033_v54 }
  0x65   : > { %696 = vmatprep.subr.bf16.mxu0 %v1034_v55 }
  0x68   : > { %697 = vmatpush1.bf16.msra.mxu0 %v1036_v56 }
  0x69   : > { %698 = vmatprep.subr.bf16.mxu0 %v1037_v57 }
  0x6c   : > { %699 = vmatpush1.bf16.msra.mxu0 %v1039_v58 }
  0x6d   : > { %700 = vmatprep.subr.bf16.mxu0 %v1040_v59 }
  0x70   : > { %701 = vmatpush1.bf16.msra.mxu0 %v1042_v60 }
  0x71   : > { %702 = vmatprep.subr.bf16.mxu0 %v1043_v61 }
  0x74   : > { %703 = vmatpush1.bf16.msra.mxu0 %v1045_v62 }
  0x75   : > { %704 = vmatprep.subr.bf16.mxu0 %v1046_v63 }
  0x78   : > { %705 = vmatpush1.bf16.msra.mxu0 %v1048_v0 }
  0x79   : > { %706 = vmatprep.subr.bf16.mxu0 %v1049_v1 }
  0x7c   : > { %707 = vmatpush1.bf16.msra.mxu0 %v1051_v2 }
  0x7f   : > { %709 = vmatmul.mubr.bf16.vlgmr.msra.gmra.mrb[0].mxu0 %v909_v3 }
 0x150   : > { %724 = sbr.rel (%p943_p13) target bundleno = 357 (0x165), region = 82 }
 0x152   : > { %v710_v6 = vpop.f32.mrb[0].mxu0 }
 0x153   : > { %v717_v7 = vadd.f32 %v710_v6, %v474_v4  ;;  %v712_v8 = vpop.f32.mrb[1].mxu0 }
 0x154   : > { %v718_v9 = vadd.f32 %v712_v8, %v475_v5  ;;  %v714_v10 = vpop.f32.mrb[2].mxu0 }
 0x155   : > { %719 = vst [vmem:[#allocation2] sm:$0xff] %v717_v7  ;;  %v715_v11 = vpop.f32.mrb[3].mxu0 }
 0x156   : > { %720 = vst [vmem:[#allocation2 + $0x8] sm:$0xff] %v718_v9 }
 0x15c   : > { %v725_v18 = vld [vmem:[#allocation2] sm:$0xff] }
 0x15d   : > { %v726_v19 = vld [vmem:[#allocation2 + $0x8] sm:$0xff]  ;;  %v739_v24 = vmul.f32 %v732_v20, %v725_v18 }
 0x15e   : > { %v740_v25 = vmul.f32 %v736_v22, %v726_v19 }
 0x15f   : > { %v753_v26 = vadd.f32 %v746_v21, %v739_v24 }
 0x160   : > { %v754_v27 = vadd.f32 %v750_v23, %v740_v25 }
 0x161   : > { %v755_v28 = vmax.f32 %v753_v26, 0.0 }
 0x162   : > { %v756_v29 = vmax.f32 %v754_v27, 0.0 }
 0x163   : > { %757 = vst [vmem:[%s1288_s12] sm:$0xff] %v755_v28 }
 0x164   : > { %758 = vst [vmem:[%s1288_s12 + $0x8] sm:$0xff] %v756_v29 }
 0x165 PF: > { %s14_s21 = sadd.s32 1, %s1108_s21   ;;  %s1365_s15 = smov %s1088_s16 }
 0x166   : > { %p11_p0 = scmp.ge.s32.totalorder %s14_s21, 20   ;;  %s1366_s16 = smov %s1187_s28 }
 0x167   : > { %s1367_s17 = smov %s1100_s19  ;;  %s1368_s18 = smov %s1104_s20 }
 0x168   : > { %s1369_s19 = smov %s1372_s22  ;;  %s1370_s20 = smov %s1376_s23 }
 0x169   :  { %13 = sbr.rel (!%p11_p0) target bundleno = 4 (0x4), region = 126 }

// kernel: resnet34_forward.70
= control target key start
LH: loop header
LB: loop body
LE: loop exit
PB: predicated region body
PF: predicated region fallthrough
CT: control target
= control target key end

     0   :  { %s1094_s15 = smov 0   ;;  %s1096_s16 = smov 0   ;;  %s1276_s0 = inlined_call_operand.vmem [shape: bf16[8,256], index: 0, kind: input, shape index: {}]   ;;  %s1277_s1 = inlined_call_operand.vmem [shape: bf16[256,512], index: 1, kind: input, shape index: {}]   ;;  %s1278_s2 = inlined_call_operand.vmem [shape: f32[1,512], index: 2, kind: input, shape index: {}]   ;;  %s1279_s3 = inlined_call_operand.vmem [shape: f32[1,512], index: 3, kind: input, shape index: {}]   ;;  %s1280_s4 = inlined_call_operand.vmem [shape: f32[8,512], index: 4, kind: output, shape index: {}]  }
   0x1   :  { %s1098_s17 = smov 0   ;;  %s1100_s18 = smov 0  }
   0x2   :  { %s1102_s19 = smov 0  }
   0x3 LB: > { %s29_s20 = sadd.s32 1, %s1063_s18  ;;  %p77_p1 = scmp.ne.s32.totalorder %s1055_s16, %s1051_s15  ;;  %s1067_s19 = sphi %s1102_s19, %s14_s19   ;;  %s1063_s18 = sphi %s1100_s18, %s1284_s18   ;;  %s1059_s17 = sphi %s1098_s17, %s1283_s17   ;;  %s1055_s16 = sphi %s1096_s16, %s1282_s16   ;;  %s1051_s15 = sphi %s1094_s15, %s1281_s15  }
   0x4   : > { %p31_p0 = scmp.ge.s32.totalorder %s29_s20, 2  ;;  %p78_p2 = scmp.eq.s32.totalorder %s1067_s19, 0 }
   0x5   : > { %s70_s22 = sadd.s32 1, %s1055_s16  ;;  %p892_p5 = scmp.ge.s32.totalorder %s1067_s19, 2 }
   0x6   : > { %s1286_s20 = smov (%p31_p0, %s29_s20), 0  ;;  %p79_p3 = por %p78_p2, %p77_p1 }
   0x7   : > { %s66_s21 = ssub.s32 %s1063_s18, %s1286_s20  ;;  %196 = sbr.rel (%p892_p5) target bundleno = 34 (0x22), region = 20 }
   0x8   : > { %p68_p4 = scmp.eq.s32.totalorder %s66_s21, 0 }
   0xa   : > { %s1129_s23 = scalar_select %p68_p4, %s1055_s16, %s70_s22  }
   0xe   : > { %199 = sbr.rel (!%p79_p3) target bundleno = 34 (0x22), region = 24  ;;  %s201_s24 = sand.u32 (%p79_p3), 1, %s1055_s16  }
   0xf   : > { %s938_s25 = sshll.u32 (%p79_p3), %s1063_s18, 3  ;;  %s893_s26 = sshll.u32 (%p79_p3), %s201_s24, 8 }
  0x10   : > { %s1137_s29 = scalar_lea.vmem (%p79_p3), %s1277_s1, %s938_s25  ;;  %s1142_s30 = scalar_lea.vmem (%p79_p3), [#allocation3], %s893_s26 }
  0x11   : > { %v299_v0 = vld [vmem:[%s1137_s29] sm:$0xff] (%p79_p3)  ;;  %v301_v1 = vld [vmem:[%s1137_s29 + $0x10] sm:$0xff] (%p79_p3) }
  0x12   : > { %v303_v2 = vld [vmem:[%s1137_s29 + $0x20] sm:$0xff] (%p79_p3)  ;;  %300 = vst [vmem:[%s1142_s30] sm:$0xff] (%p79_p3), %v299_v0  ;;  %302 = vst [vmem:[%s1142_s30 + $0x8] sm:$0xff] (%p79_p3), %v301_v1  ;;  %v305_v3 = vld [vmem:[%s1137_s29 + $0x30] sm:$0xff] (%p79_p3) }
  0x13   : > { %304 = vst [vmem:[%s1142_s30 + $0x10] sm:$0xff] (%p79_p3), %v303_v2  ;;  %v307_v4 = vld [vmem:[%s1137_s29 + $0x40] sm:$0xff] (%p79_p3)  ;;  %v309_v5 = vld [vmem:[%s1137_s29 + $0x50] sm:$0xff] (%p79_p3)  ;;  %306 = vst [vmem:[%s1142_s30 + $0x18] sm:$0xff] (%p79_p3), %v305_v3 }
  0x14   : > { %308 = vst [vmem:[%s1142_s30 + $0x20] sm:$0xff] (%p79_p3), %v307_v4  ;;  %310 = vst [vmem:[%s1142_s30 + $0x28] sm:$0xff] (%p79_p3), %v309_v5  ;;  %v311_v6 = vld [vmem:[%s1137_s29 + $0x60] sm:$0xff] (%p79_p3)  ;;  %v313_v7 = vld [vmem:[%s1137_s29 + $0x70] sm:$0xff] (%p79_p3) }
  0x15   : > { %v315_v8 = vld [vmem:[%s1137_s29 + $0x80] sm:$0xff]  ;;  %312 = vst [vmem:[%s1142_s30 + $0x30] sm:$0xff] %v311_v6  ;;  %314 = vst [vmem:[%s1142_s30 + $0x38] sm:$0xff] %v313_v7  ;;  %v317_v9 = vld [vmem:[%s1137_s29 + $0x90] sm:$0xff] }
  0x16   : > { %316 = vst [vmem:[%s1142_s30 + $0x40] sm:$0xff] %v315_v8  ;;  %v319_v10 = vld [vmem:[%s1137_s29 + $0xa0] sm:$0xff]  ;;  %v321_v11 = vld [vmem:[%s1137_s29 + $0xb0] sm:$0xff]  ;;  %318 = vst [vmem:[%s1142_s30 + $0x48] sm:$0xff] %v317_v9 }
  0x17   : > { %320 = vst [vmem:[%s1142_s30 + $0x50] sm:$0xff] %v319_v10  ;;  %322 = vst [vmem:[%s1142_s30 + $0x58] sm:$0xff] %v321_v11  ;;  %v323_v12 = vld [vmem:[%s1137_s29 + $0xc0] sm:$0xff]  ;;  %v325_v13 = vld [vmem:[%s1137_s29 + $0xd0] sm:$0xff] }
  0x18   : > { %v327_v14 = vld [vmem:[%s1137_s29 + $0xe0] sm:$0xff]  ;;  %324 = vst [vmem:[%s1142_s30 + $0x60] sm:$0xff] %v323_v12  ;;  %326 = vst [vmem:[%s1142_s30 + $0x68] sm:$0xff] %v325_v13  ;;  %v329_v15 = vld [vmem:[%s1137_s29 + $0xf0] sm:$0xff] }
  0x19   : > { %328 = vst [vmem:[%s1142_s30 + $0x70] sm:$0xff] %v327_v14  ;;  %v331_v16 = vld [vmem:[%s1137_s29 + $0x100] sm:$0xff]  ;;  %v333_v17 = vld [vmem:[%s1137_s29 + $0x110] sm:$0xff]  ;;  %330 = vst [vmem:[%s1142_s30 + $0x78] sm:$0xff] %v329_v15 }
  0x1a   : > { %332 = vst [vmem:[%s1142_s30 + $0x80] sm:$0xff] %v331_v16  ;;  %334 = vst [vmem:[%s1142_s30 + $0x88] sm:$0xff] %v333_v17  ;;  %v335_v18 = vld [vmem:[%s1137_s29 + $0x120] sm:$0xff]  ;;  %v337_v19 = vld [vmem:[%s1137_s29 + $0x130] sm:$0xff] }
  0x1b   : > { %v339_v20 = vld [vmem:[%s1137_s29 + $0x140] sm:$0xff]  ;;  %336 = vst [vmem:[%s1142_s30 + $0x90] sm:$0xff] %v335_v18  ;;  %338 = vst [vmem:[%s1142_s30 + $0x98] sm:$0xff] %v337_v19  ;;  %v341_v21 = vld [vmem:[%s1137_s29 + $0x150] sm:$0xff] }
  0x1c   : > { %340 = vst [vmem:[%s1142_s30 + $0xa0] sm:$0xff] %v339_v20  ;;  %v343_v22 = vld [vmem:[%s1137_s29 + $0x160] sm:$0xff]  ;;  %v345_v23 = vld [vmem:[%s1137_s29 + $0x170] sm:$0xff]  ;;  %342 = vst [vmem:[%s1142_s30 + $0xa8] sm:$0xff] %v341_v21 }
  0x1d   : > { %344 = vst [vmem:[%s1142_s30 + $0xb0] sm:$0xff] %v343_v22  ;;  %346 = vst [vmem:[%s1142_s30 + $0xb8] sm:$0xff] %v345_v23  ;;  %v347_v24 = vld [vmem:[%s1137_s29 + $0x180] sm:$0xff]  ;;  %v349_v25 = vld [vmem:[%s1137_s29 + $0x190] sm:$0xff] }
  0x1e   : > { %v351_v26 = vld [vmem:[%s1137_s29 + $0x1a0] sm:$0xff]  ;;  %348 = vst [vmem:[%s1142_s30 + $0xc0] sm:$0xff] %v347_v24  ;;  %350 = vst [vmem:[%s1142_s30 + $0xc8] sm:$0xff] %v349_v25  ;;  %v353_v27 = vld [vmem:[%s1137_s29 + $0x1b0] sm:$0xff] }
  0x1f   : > { %352 = vst [vmem:[%s1142_s30 + $0xd0] sm:$0xff] %v351_v26  ;;  %v355_v28 = vld [vmem:[%s1137_s29 + $0x1c0] sm:$0xff]  ;;  %v357_v29 = vld [vmem:[%s1137_s29 + $0x1d0] sm:$0xff]  ;;  %354 = vst [vmem:[%s1142_s30 + $0xd8] sm:$0xff] %v353_v27 }
  0x20   : > { %356 = vst [vmem:[%s1142_s30 + $0xe0] sm:$0xff] %v355_v28  ;;  %358 = vst [vmem:[%s1142_s30 + $0xe8] sm:$0xff] %v357_v29  ;;  %v359_v30 = vld [vmem:[%s1137_s29 + $0x1e0] sm:$0xff]  ;;  %v361_v31 = vld [vmem:[%s1137_s29 + $0x1f0] sm:$0xff] }
  0x21   : > { %360 = vst [vmem:[%s1142_s30 + $0xf0] sm:$0xff] %v359_v30  ;;  %362 = vst [vmem:[%s1142_s30 + $0xf8] sm:$0xff] %v361_v31 }
  0x22 PF: > { %p896_p6 = scmp.ge.s32.totalorder %s1067_s19, 1  ;;  %p383_p7 = scmp.lt.s32.totalorder %s1067_s19, 3 }
  0x24   : > { %p384_p8 = pnand %p896_p6, %p383_p7 }
  0x25   : > { %s390_s5 = sand.u32 (!%p384_p8), 1, %s1051_s15   ;;  %v1211_v32 = vld [vmem:[%s1276_s0] sm:$0xff] (!%p384_p8)  ;;  %s898_s10 = sshll.u32 (!%p384_p8), %s1059_s17, 1  ;;  %v728_v3 = vlaneseq (!%p384_p8) }
  0x26   : > { %387 = sbr.rel (%p384_p8) target bundleno = 323 (0x143), region = 70  ;;  %s897_s8 = sshll.u32 (!%p384_p8), %s390_s5, 8  ;;  %v903_v33 = vcombine.high (!%p384_p8), %v1211_v32, %v1211_v32  ;;  %v902_v2 = vcombine.low (!%p384_p8), %v1211_v32, %v1211_v32 }
  0x27   : > { %s1215_s9 = scalar_lea.vmem (!%p384_p8), [#allocation3], %s897_s8  ;;  %p449_p9 = scmp.lt.s32.totalorder (!%p384_p8), %s898_s10, 3  ;;  %v729_v4 = vshrl.u32 (!%p384_p8), %v728_v3, 7 }
  0x28   : > { %v979_v34 = vld [vmem:[%s1215_s9 + $0x4] ss:$8 sps:$4 sm:$0xff] (!%p384_p8)   ;;  %708 = vmatprep.mubr.bf16.mxu0 (!%p384_p8), %v903_v33  ;;  %v981_v35 = vld [vmem:[%s1215_s9] ss:$8 sps:$4 sm:$0xff] (!%p384_p8)   ;;  %v982_v36 = vld [vmem:[%s1215_s9 + $0x14] ss:$8 sps:$4 sm:$0xff] (!%p384_p8)  }
  0x29   : > { %676 = vmatprep.subr.bf16.mxu0 (!%p384_p8), %v979_v34  ;;  %v984_v37 = vld [vmem:[%s1215_s9 + $0x10] ss:$8 sps:$4 sm:$0xff] (!%p384_p8)   ;;  %v985_v38 = vld [vmem:[%s1215_s9 + $0x24] ss:$8 sps:$4 sm:$0xff] (!%p384_p8)   ;;  %v987_v39 = vld [vmem:[%s1215_s9 + $0x20] ss:$8 sps:$4 sm:$0xff] (!%p384_p8)  }
  0x2a   : > { %677 = vmatpush1.bf16.msra.mxu0 (!%p384_p8), %v981_v35  ;;  %v988_v40 = vld [vmem:[%s1215_s9 + $0x34] ss:$8 sps:$4 sm:$0xff] (!%p384_p8)   ;;  %v990_v41 = vld [vmem:[%s1215_s9 + $0x30] ss:$8 sps:$4 sm:$0xff] (!%p384_p8)   ;;  %v991_v42 = vld [vmem:[%s1215_s9 + $0x44] ss:$8 sps:$4 sm:$0xff] (!%p384_p8)  }
  0x2b   : > { %678 = vmatprep.subr.bf16.mxu0 (!%p384_p8), %v982_v36  ;;  %v993_v43 = vld [vmem:[%s1215_s9 + $0x40] ss:$8 sps:$4 sm:$0xff] (!%p384_p8)   ;;  %v994_v44 = vld [vmem:[%s1215_s9 + $0x54] ss:$8 sps:$4 sm:$0xff] (!%p384_p8)   ;;  %v996_v45 = vld [vmem:[%s1215_s9 + $0x50] ss:$8 sps:$4 sm:$0xff] (!%p384_p8)  }
  0x2c   : > { %v997_v46 = vld [vmem:[%s1215_s9 + $0x64] ss:$8 sps:$4 sm:$0xff] (!%p384_p8)   ;;  %v999_v47 = vld [vmem:[%s1215_s9 + $0x60] ss:$8 sps:$4 sm:$0xff] (!%p384_p8)   ;;  %v1000_v48 = vld [vmem:[%s1215_s9 + $0x74] ss:$8 sps:$4 sm:$0xff] (!%p384_p8)  }
  0x2d   : > { %v1002_v49 = vld [vmem:[%s1215_s9 + $0x70] ss:$8 sps:$4 sm:$0xff]   ;;  %v1003_v50 = vld [vmem:[%s1215_s9 + $0x84] ss:$8 sps:$4 sm:$0xff]   ;;  %v1005_v51 = vld [vmem:[%s1215_s9 + $0x80] ss:$8 sps:$4 sm:$0xff]  }
  0x2e   : > { %679 = vmatpush1.bf16.msra.mxu0 %v984_v37  ;;  %v1006_v52 = vld [vmem:[%s1215_s9 + $0x94] ss:$8 sps:$4 sm:$0xff]   ;;  %v1008_v53 = vld [vmem:[%s1215_s9 + $0x90] ss:$8 sps:$4 sm:$0xff]   ;;  %v1009_v54 = vld [vmem:[%s1215_s9 + $0xa4] ss:$8 sps:$4 sm:$0xff]  }
  0x2f   : > { %680 = vmatprep.subr.bf16.mxu0 %v985_v38  ;;  %v1011_v55 = vld [vmem:[%s1215_s9 + $0xa0] ss:$8 sps:$4 sm:$0xff]   ;;  %v1012_v56 = vld [vmem:[%s1215_s9 + $0xb4] ss:$8 sps:$4 sm:$0xff]   ;;  %v1014_v57 = vld [vmem:[%s1215_s9 + $0xb0] ss:$8 sps:$4 sm:$0xff]  }
  0x30   : > { %v1015_v58 = vld [vmem:[%s1215_s9 + $0xc4] ss:$8 sps:$4 sm:$0xff]   ;;  %v1017_v59 = vld [vmem:[%s1215_s9 + $0xc0] ss:$8 sps:$4 sm:$0xff]   ;;  %v1018_v60 = vld [vmem:[%s1215_s9 + $0xd4] ss:$8 sps:$4 sm:$0xff]  }
  0x31   : > { %v1020_v61 = vld [vmem:[%s1215_s9 + $0xd0] ss:$8 sps:$4 sm:$0xff]   ;;  %v1021_v62 = vld [vmem:[%s1215_s9 + $0xe4] ss:$8 sps:$4 sm:$0xff]   ;;  %v1023_v63 = vld [vmem:[%s1215_s9 + $0xe0] ss:$8 sps:$4 sm:$0xff]  }
  0x32   : > { %681 = vmatpush1.bf16.msra.mxu0 %v987_v39  ;;  %v1024_v0 = vld [vmem:[%s1215_s9 + $0xf4] ss:$8 sps:$4 sm:$0xff]   ;;  %v1026_v1 = vld [vmem:[%s1215_s9 + $0xf0] ss:$8 sps:$4 sm:$0xff]   ;;  %s1288_s10 = smov (!%p449_p9, %s898_s10), 3  ;;  %v730_v5 = vsub.s32 0, %v729_v4 }
  0x33   : > { %682 = vmatprep.subr.bf16.mxu0 %v988_v40  ;;  %s451_s13 = scalar_lea.vmem %s1278_s2, %s1288_s10  ;;  %s456_s21 = scalar_lea.vmem %s1279_s3, %s1288_s10  ;;  %v734_v7 = vsub.s32 1, %v729_v4 }
  0x34   : > { %v726_v6 = vld [vmem:[%s451_s13] sm:$0x3]  ;;  %s901_s22 = sshll.u32 %s1288_s10, 3 }
  0x35   : > { %v740_v8 = vld [vmem:[%s456_s21] sm:$0x3]  ;;  %v731_v9 = vrot.slane %v726_v6, %v730_v5  ;;  %v735_v10 = vrot.slane %v726_v6, %v734_v7  ;;  %s466_s25 = scalar_lea.vmem %s1280_s4, %s901_s22 }
  0x36   : > { %683 = vmatpush1.bf16.msra.mxu0 %v990_v41  ;;  %v745_v11 = vrot.slane %v740_v8, %v730_v5  ;;  %v749_v13 = vrot.slane %v740_v8, %v734_v7 }
  0x37   : > { %684 = vmatprep.subr.bf16.mxu0 %v991_v42 }
  0x3a   : > { %685 = vmatpush1.bf16.msra.mxu0 %v993_v43 }
  0x3b   : > { %686 = vmatprep.subr.bf16.mxu0 %v994_v44 }
  0x3e   : > { %687 = vmatpush1.bf16.msra.mxu0 %v996_v45 }
  0x3f   : > { %688 = vmatprep.subr.bf16.mxu0 %v997_v46 }
  0x42   : > { %689 = vmatpush1.bf16.msra.mxu0 %v999_v47 }
  0x43   : > { %690 = vmatprep.subr.bf16.mxu0 %v1000_v48 }
  0x46   : > { %691 = vmatpush1.bf16.msra.mxu0 %v1002_v49 }
  0x47   : > { %692 = vmatprep.subr.bf16.mxu0 %v1003_v50 }
  0x4a   : > { %693 = vmatpush1.bf16.msra.mxu0 %v1005_v51 }
  0x4b   : > { %694 = vmatprep.subr.bf16.mxu0 %v1006_v52 }
  0x4e   : > { %695 = vmatpush1.bf16.msra.mxu0 %v1008_v53 }
  0x4f   : > { %696 = vmatprep.subr.bf16.mxu0 %v1009_v54 }
  0x52   : > { %697 = vmatpush1.bf16.msra.mxu0 %v1011_v55 }
  0x53   : > { %698 = vmatprep.subr.bf16.mxu0 %v1012_v56 }
  0x56   : > { %699 = vmatpush1.bf16.msra.mxu0 %v1014_v57 }
  0x57   : > { %700 = vmatprep.subr.bf16.mxu0 %v1015_v58 }
  0x5a   : > { %701 = vmatpush1.bf16.msra.mxu0 %v1017_v59 }
  0x5b   : > { %702 = vmatprep.subr.bf16.mxu0 %v1018_v60 }
  0x5e   : > { %703 = vmatpush1.bf16.msra.mxu0 %v1020_v61 }
  0x5f   : > { %704 = vmatprep.subr.bf16.mxu0 %v1021_v62 }
  0x62   : > { %705 = vmatpush1.bf16.msra.mxu0 %v1023_v63 }
  0x63   : > { %706 = vmatprep.subr.bf16.mxu0 %v1024_v0 }
  0x66   : > { %707 = vmatpush1.bf16.msra.mxu0 %v1026_v1 }
  0x69   : > { %709 = vmatmul.mubr.bf16.vlgmr.msra.gmra.mrb[0].mxu0 %v902_v2 }
 0x13c   : > { %v710_v12 = vpop.f32.mrb[0].mxu0 }
 0x13d   : > { %v738_v14 = vmul.f32 %v731_v9, %v710_v12  ;;  %v712_v15 = vpop.f32.mrb[1].mxu0 }
 0x13e   : > { %v739_v16 = vmul.f32 %v735_v10, %v712_v15  ;;  %v714_v17 = vpop.f32.mrb[2].mxu0 }
 0x13f   : > { %v752_v18 = vadd.f32 %v745_v11, %v738_v14  ;;  %v715_v19 = vpop.f32.mrb[3].mxu0 }
 0x140   : > { %v753_v20 = vadd.f32 %v749_v13, %v739_v16 }
 0x141   : > { %754 = vst [vmem:[%s466_s25] sm:$0xff] %v752_v18 }
 0x142   : > { %755 = vst [vmem:[%s466_s25 + $0x8] sm:$0xff] %v753_v20 }
 0x143 PF: > { %s14_s19 = sadd.s32 1, %s1067_s19   ;;  %s1281_s15 = smov %s1055_s16 }
 0x144   : > { %p11_p10 = scmp.ge.s32.totalorder %s14_s19, 4   ;;  %s1282_s16 = smov %s1129_s23 }
 0x145   : > { %s1283_s17 = smov %s1063_s18  ;;  %s1284_s18 = smov %s1286_s20 }
 0x146   :  { %13 = sbr.rel (!%p11_p10) target bundleno = 3 (0x3), region = 126 }

// kernel: resnet34_forward.71
= control target key start
LH: loop header
LB: loop body
LE: loop exit
PB: predicated region body
PF: predicated region fallthrough
CT: control target
= control target key end

     0   :  { %s1228_s18 = smov 0   ;;  %s1230_s19 = smov 0   ;;  %s1459_s0 = inlined_call_operand.vmem [shape: bf16[8,4608], index: 0, kind: input, shape index: {}]   ;;  %s1460_s1 = inlined_call_operand.vmem [shape: bf16[4608,512], index: 1, kind: input, shape index: {}]   ;;  %s1461_s2 = inlined_call_operand.vmem [shape: f32[1,512], index: 2, kind: input, shape index: {}]   ;;  %s1462_s3 = inlined_call_operand.vmem [shape: f32[1,512], index: 3, kind: input, shape index: {}]   ;;  %s1463_s4 = inlined_call_operand.vmem [shape: f32[8,512], index: 4, kind: input, shape index: {}]   ;;  %s1464_s5 = inlined_call_operand.vmem [shape: f32[8,512], index: 5, kind: output, shape index: {}]  }
   0x1   :  { %s1232_s20 = smov 0   ;;  %s1234_s21 = smov 0  }
   0x2   :  { %s1236_s22 = smov 0   ;;  %s1238_s23 = smov 0  }
   0x3   :  { %s1240_s24 = smov 0  }
   0x4 LB: > { %s27_s25 = sadd.s32 1, %s1187_s22  ;;  %s30_s26 = sadd.s32 1, %s1191_s23  ;;  %s1195_s24 = sphi %s1240_s24, %s15_s24   ;;  %s1191_s23 = sphi %s1238_s23, %s1470_s23   ;;  %s1187_s22 = sphi %s1236_s22, %s1469_s22   ;;  %s1183_s21 = sphi %s1234_s21, %s1468_s21   ;;  %s1179_s20 = sphi %s1232_s20, %s1467_s20   ;;  %s1175_s19 = sphi %s1230_s19, %s1466_s19   ;;  %s1171_s18 = sphi %s1228_s18, %s1465_s18  }
   0x5   : > { %p28_p0 = scmp.ge.s32.totalorder %s27_s25, 18  ;;  %p78_p1 = scmp.ne.s32.totalorder %s1175_s19, %s1171_s18 }
   0x6   : > { %p79_p2 = scmp.eq.s32.totalorder %s1195_s24, 0  ;;  %s71_s30 = sadd.s32 1, %s1175_s19 }
   0x7   : > { %s1472_s25 = smov (%p28_p0, %s27_s25), 0  ;;  %s1474_s26 = smov (!%p28_p0, %s30_s26), %s1191_s23 }
   0x8   : > { %p80_p3 = por %p79_p2, %p78_p1  ;;  %p32_p4 = scmp.ge.s32.totalorder %s1474_s26, 2 }
   0x9   : > { %s66_s27 = ssub.s32 %s1187_s22, %s1472_s25  ;;  %p979_p6 = scmp.ge.s32.totalorder %s1195_s24, 36 }
   0xa   : > { %s1476_s26 = smov (%p32_p4, %s1474_s26), 0 }
   0xb   : > { %s67_s28 = ssub.s32 %s1191_s23, %s1476_s26  ;;  %212 = sbr.rel (%p979_p6) target bundleno = 41 (0x29), region = 16 }
   0xc   : > { %s68_s29 = sor.u32 %s67_s28, %s66_s27 }
   0xd   : > { %p69_p5 = scmp.eq.s32.totalorder %s68_s29, 0 }
   0xf   : > { %s1279_s6 = scalar_select %p69_p5, %s1175_s19, %s71_s30  }
  0x12   : > { %228 = sbr.rel (!%p80_p3) target bundleno = 41 (0x29), region = 24  ;;  %s230_s7 = sand.u32 (%p80_p3), 1, %s1175_s19  }
  0x13   : > { %s982_s8 = sshll.u32 (%p80_p3), %s1191_s23, 1  ;;  %s980_s9 = sshll.u32 (%p80_p3), %s230_s7, 8 }
  0x14   : > { %s1033_s10 = sshll.u32 (%p80_p3), %s1187_s22, 7  ;;  %s1293_s16 = scalar_lea.vmem (%p80_p3), [#allocation3], %s980_s9 }
  0x15   : > { %s236_s11 = sadd.s32 (%p80_p3), %s1033_s10, %s982_s8 }
  0x16   : > { %s984_s12 = sshll.u32 (%p80_p3), %s236_s11, 2 }
  0x17   : > { %s1288_s15 = scalar_lea.vmem (%p80_p3), %s1460_s1, %s984_s12 }
  0x18   : > { %v328_v0 = vld [vmem:[%s1288_s15] sm:$0xff] (%p80_p3)  ;;  %v330_v1 = vld [vmem:[%s1288_s15 + $0x10] sm:$0xff] (%p80_p3) }
  0x19   : > { %v332_v2 = vld [vmem:[%s1288_s15 + $0x20] sm:$0xff]  ;;  %329 = vst [vmem:[%s1293_s16] sm:$0xff] %v328_v0  ;;  %331 = vst [vmem:[%s1293_s16 + $0x8] sm:$0xff] %v330_v1  ;;  %v334_v3 = vld [vmem:[%s1288_s15 + $0x30] sm:$0xff] }
  0x1a   : > { %333 = vst [vmem:[%s1293_s16 + $0x10] sm:$0xff] %v332_v2  ;;  %v336_v4 = vld [vmem:[%s1288_s15 + $0x40] sm:$0xff]  ;;  %v338_v5 = vld [vmem:[%s1288_s15 + $0x50] sm:$0xff]  ;;  %335 = vst [vmem:[%s1293_s16 + $0x18] sm:$0xff] %v334_v3 }
  0x1b   : > { %337 = vst [vmem:[%s1293_s16 + $0x20] sm:$0xff] %v336_v4  ;;  %339 = vst [vmem:[%s1293_s16 + $0x28] sm:$0xff] %v338_v5  ;;  %v340_v6 = vld [vmem:[%s1288_s15 + $0x60] sm:$0xff]  ;;  %v342_v7 = vld [vmem:[%s1288_s15 + $0x70] sm:$0xff] }
  0x1c   : > { %v344_v8 = vld [vmem:[%s1288_s15 + $0x80] sm:$0xff]  ;;  %341 = vst [vmem:[%s1293_s16 + $0x30] sm:$0xff] %v340_v6  ;;  %343 = vst [vmem:[%s1293_s16 + $0x38] sm:$0xff] %v342_v7  ;;  %v346_v9 = vld [vmem:[%s1288_s15 + $0x90] sm:$0xff] }
  0x1d   : > { %345 = vst [vmem:[%s1293_s16 + $0x40] sm:$0xff] %v344_v8  ;;  %v348_v10 = vld [vmem:[%s1288_s15 + $0xa0] sm:$0xff]  ;;  %v350_v11 = vld [vmem:[%s1288_s15 + $0xb0] sm:$0xff]  ;;  %347 = vst [vmem:[%s1293_s16 + $0x48] sm:$0xff] %v346_v9 }
  0x1e   : > { %349 = vst [vmem:[%s1293_s16 + $0x50] sm:$0xff] %v348_v10  ;;  %351 = vst [vmem:[%s1293_s16 + $0x58] sm:$0xff] %v350_v11  ;;  %v352_v12 = vld [vmem:[%s1288_s15 + $0xc0] sm:$0xff]  ;;  %v354_v13 = vld [vmem:[%s1288_s15 + $0xd0] sm:$0xff] }
  0x1f   : > { %v356_v14 = vld [vmem:[%s1288_s15 + $0xe0] sm:$0xff]  ;;  %353 = vst [vmem:[%s1293_s16 + $0x60] sm:$0xff] %v352_v12  ;;  %355 = vst [vmem:[%s1293_s16 + $0x68] sm:$0xff] %v354_v13  ;;  %v358_v15 = vld [vmem:[%s1288_s15 + $0xf0] sm:$0xff] }
  0x20   : > { %357 = vst [vmem:[%s1293_s16 + $0x70] sm:$0xff] %v356_v14  ;;  %v360_v16 = vld [vmem:[%s1288_s15 + $0x100] sm:$0xff]  ;;  %v362_v17 = vld [vmem:[%s1288_s15 + $0x110] sm:$0xff]  ;;  %359 = vst [vmem:[%s1293_s16 + $0x78] sm:$0xff] %v358_v15 }
  0x21   : > { %361 = vst [vmem:[%s1293_s16 + $0x80] sm:$0xff] %v360_v16  ;;  %363 = vst [vmem:[%s1293_s16 + $0x88] sm:$0xff] %v362_v17  ;;  %v364_v18 = vld [vmem:[%s1288_s15 + $0x120] sm:$0xff]  ;;  %v366_v19 = vld [vmem:[%s1288_s15 + $0x130] sm:$0xff] }
  0x22   : > { %v368_v20 = vld [vmem:[%s1288_s15 + $0x140] sm:$0xff]  ;;  %365 = vst [vmem:[%s1293_s16 + $0x90] sm:$0xff] %v364_v18  ;;  %367 = vst [vmem:[%s1293_s16 + $0x98] sm:$0xff] %v366_v19  ;;  %v370_v21 = vld [vmem:[%s1288_s15 + $0x150] sm:$0xff] }
  0x23   : > { %369 = vst [vmem:[%s1293_s16 + $0xa0] sm:$0xff] %v368_v20  ;;  %v372_v22 = vld [vmem:[%s1288_s15 + $0x160] sm:$0xff]  ;;  %v374_v23 = vld [vmem:[%s1288_s15 + $0x170] sm:$0xff]  ;;  %371 = vst [vmem:[%s1293_s16 + $0xa8] sm:$0xff] %v370_v21 }
  0x24   : > { %373 = vst [vmem:[%s1293_s16 + $0xb0] sm:$0xff] %v372_v22  ;;  %375 = vst [vmem:[%s1293_s16 + $0xb8] sm:$0xff] %v374_v23  ;;  %v376_v24 = vld [vmem:[%s1288_s15 + $0x180] sm:$0xff]  ;;  %v378_v25 = vld [vmem:[%s1288_s15 + $0x190] sm:$0xff] }
  0x25   : > { %v380_v26 = vld [vmem:[%s1288_s15 + $0x1a0] sm:$0xff]  ;;  %377 = vst [vmem:[%s1293_s16 + $0xc0] sm:$0xff] %v376_v24  ;;  %379 = vst [vmem:[%s1293_s16 + $0xc8] sm:$0xff] %v378_v25  ;;  %v382_v27 = vld [vmem:[%s1288_s15 + $0x1b0] sm:$0xff] }
  0x26   : > { %381 = vst [vmem:[%s1293_s16 + $0xd0] sm:$0xff] %v380_v26  ;;  %v384_v28 = vld [vmem:[%s1288_s15 + $0x1c0] sm:$0xff]  ;;  %v386_v29 = vld [vmem:[%s1288_s15 + $0x1d0] sm:$0xff]  ;;  %383 = vst [vmem:[%s1293_s16 + $0xd8] sm:$0xff] %v382_v27 }
  0x27   : > { %385 = vst [vmem:[%s1293_s16 + $0xe0] sm:$0xff] %v384_v28  ;;  %387 = vst [vmem:[%s1293_s16 + $0xe8] sm:$0xff] %v386_v29  ;;  %v388_v30 = vld [vmem:[%s1288_s15 + $0x1e0] sm:$0xff]  ;;  %v390_v31 = vld [vmem:[%s1288_s15 + $0x1f0] sm:$0xff] }
  0x28   : > { %389 = vst [vmem:[%s1293_s16 + $0xf0] sm:$0xff] %v388_v30  ;;  %391 = vst [vmem:[%s1293_s16 + $0xf8] sm:$0xff] %v390_v31 }
  0x29 PF: > { %p985_p7 = scmp.ge.s32.totalorder %s1195_s24, 1  ;;  %p425_p8 = scmp.lt.s32.totalorder %s1195_s24, 37 }
  0x2b   : > { %p426_p9 = pnand %p985_p7, %p425_p8 }
  0x2c   : > { %s432_s17 = sand.u32 (!%p426_p9), 1, %s1171_s18   ;;  %s987_s27 = sshll.u32 (!%p426_p9), %s1179_s20, 1 }
  0x2d   : > { %429 = sbr.rel (%p426_p9) target bundleno = 359 (0x167), region = 74  ;;  %s986_s28 = sshll.u32 (!%p426_p9), %s432_s17, 8 }
  0x2e   : > { %p492_p10 = scmp.lt.s32.totalorder (!%p426_p9), %s987_s27, 35  ;;  %s989_s29 = sshll.u32 (!%p426_p9), %s1183_s21, 1 }
  0x2f   : > { %p502_p11 = scmp.lt.s32.totalorder (!%p426_p9), %s989_s29, 3  ;;  %s1387_s8 = scalar_lea.vmem (!%p426_p9), [#allocation3], %s986_s28 }
  0x30   : > { %p995_p12 = scmp.ne.s32.totalorder (!%p426_p9), %s1179_s20, 0 }
  0x34   : > { %s1478_s27 = smov (!%p492_p10, %s987_s27), 35  ;;  %s1480_s29 = smov (!%p502_p11, %s989_s29), 3 }
  0x35   : > { %s988_s30 = sshll.u32 %s1478_s27, 2  ;;  %s504_s18 = scalar_lea.vmem %s1461_s2, %s1480_s29  ;;  %v1197_v32 = vmov (!%p995_p12), 0.0  }
  0x36   : > { %s1364_s9 = scalar_lea.vmem %s1459_s0, %s988_s30  ;;  %s509_s21 = scalar_lea.vmem %s1462_s3, %s1480_s29  ;;  %535 = vst [vmem:[#allocation2] sm:$0xff] (!%p995_p12), %v1197_v32  ;;  %536 = vst [vmem:[#allocation2 + $0x8] sm:$0xff] (!%p995_p12), %v1197_v32 }
  0x37   : > { %s992_s14 = sshll.u32 %s1480_s29, 3  ;;  %534 = sbr.rel (%p995_p12) target bundleno = 62 (0x3e), region = 82 }
  0x38   : > { %s1380_s17 = scalar_lea.vmem %s1463_s4, %s992_s14  ;;  %s1385_s7 = scalar_lea.vmem %s1464_s5, %s992_s14 }
  0x3e PF: > { %v1091_v33 = vld [vmem:[%s1387_s8 + $0x4] ss:$8 sps:$4 sm:$0xff]   ;;  %v1093_v34 = vld [vmem:[%s1387_s8] ss:$8 sps:$4 sm:$0xff]   ;;  %v1094_v35 = vld [vmem:[%s1387_s8 + $0x14] ss:$8 sps:$4 sm:$0xff]  }
  0x3f   : > { %739 = vmatprep.subr.bf16.mxu0 %v1091_v33  ;;  %v1096_v36 = vld [vmem:[%s1387_s8 + $0x10] ss:$8 sps:$4 sm:$0xff]   ;;  %v1097_v37 = vld [vmem:[%s1387_s8 + $0x24] ss:$8 sps:$4 sm:$0xff]   ;;  %v1099_v38 = vld [vmem:[%s1387_s8 + $0x20] ss:$8 sps:$4 sm:$0xff]  }
  0x40   : > { %740 = vmatpush1.bf16.msra.mxu0 %v1093_v34  ;;  %v1100_v39 = vld [vmem:[%s1387_s8 + $0x34] ss:$8 sps:$4 sm:$0xff]   ;;  %v1102_v40 = vld [vmem:[%s1387_s8 + $0x30] ss:$8 sps:$4 sm:$0xff]   ;;  %v1103_v41 = vld [vmem:[%s1387_s8 + $0x44] ss:$8 sps:$4 sm:$0xff]  }
  0x41   : > { %741 = vmatprep.subr.bf16.mxu0 %v1094_v35  ;;  %v1105_v42 = vld [vmem:[%s1387_s8 + $0x40] ss:$8 sps:$4 sm:$0xff]   ;;  %v1106_v43 = vld [vmem:[%s1387_s8 + $0x54] ss:$8 sps:$4 sm:$0xff]   ;;  %v1108_v44 = vld [vmem:[%s1387_s8 + $0x50] ss:$8 sps:$4 sm:$0xff]  }
  0x42   : > { %v1109_v45 = vld [vmem:[%s1387_s8 + $0x64] ss:$8 sps:$4 sm:$0xff]   ;;  %v539_v46 = vld [vmem:[%s1364_s9] sm:$0xff]  ;;  %v1111_v48 = vld [vmem:[%s1387_s8 + $0x60] ss:$8 sps:$4 sm:$0xff]   ;;  %p1030_p13 = scmp.ne.s32.totalorder %s1179_s20, 17 }
  0x43   : > { %v997_v47 = vcombine.high %v539_v46, %v539_v46  ;;  %v1112_v49 = vld [vmem:[%s1387_s8 + $0x74] ss:$8 sps:$4 sm:$0xff]   ;;  %v1114_v50 = vld [vmem:[%s1387_s8 + $0x70] ss:$8 sps:$4 sm:$0xff]   ;;  %v1115_v51 = vld [vmem:[%s1387_s8 + $0x84] ss:$8 sps:$4 sm:$0xff]   ;;  %v996_v3 = vcombine.low %v539_v46, %v539_v46  ;;  %v792_v12 = vlaneseq (!%p1030_p13) }
  0x44   : > { %742 = vmatpush1.bf16.msra.mxu0 %v1096_v36  ;;  %v1117_v52 = vld [vmem:[%s1387_s8 + $0x80] ss:$8 sps:$4 sm:$0xff]   ;;  %v1118_v53 = vld [vmem:[%s1387_s8 + $0x94] ss:$8 sps:$4 sm:$0xff]   ;;  %v1120_v54 = vld [vmem:[%s1387_s8 + $0x90] ss:$8 sps:$4 sm:$0xff]  }
  0x45   : > { %743 = vmatprep.subr.bf16.mxu0 %v1097_v37  ;;  %771 = vmatprep.mubr.bf16.mxu0 %v997_v47  ;;  %v1121_v55 = vld [vmem:[%s1387_s8 + $0xa4] ss:$8 sps:$4 sm:$0xff]   ;;  %v1123_v56 = vld [vmem:[%s1387_s8 + $0xa0] ss:$8 sps:$4 sm:$0xff]   ;;  %v1124_v57 = vld [vmem:[%s1387_s8 + $0xb4] ss:$8 sps:$4 sm:$0xff]  }
  0x46   : > { %v1126_v58 = vld [vmem:[%s1387_s8 + $0xb0] ss:$8 sps:$4 sm:$0xff]   ;;  %v1127_v59 = vld [vmem:[%s1387_s8 + $0xc4] ss:$8 sps:$4 sm:$0xff]   ;;  %v1129_v60 = vld [vmem:[%s1387_s8 + $0xc0] ss:$8 sps:$4 sm:$0xff]  }
  0x47   : > { %v1130_v61 = vld [vmem:[%s1387_s8 + $0xd4] ss:$8 sps:$4 sm:$0xff]   ;;  %v1132_v62 = vld [vmem:[%s1387_s8 + $0xd0] ss:$8 sps:$4 sm:$0xff]   ;;  %v1133_v63 = vld [vmem:[%s1387_s8 + $0xe4] ss:$8 sps:$4 sm:$0xff]  }
  0x48   : > { %744 = vmatpush1.bf16.msra.mxu0 %v1099_v38  ;;  %v1135_v0 = vld [vmem:[%s1387_s8 + $0xe0] ss:$8 sps:$4 sm:$0xff]   ;;  %v1136_v1 = vld [vmem:[%s1387_s8 + $0xf4] ss:$8 sps:$4 sm:$0xff]   ;;  %v1138_v2 = vld [vmem:[%s1387_s8 + $0xf0] ss:$8 sps:$4 sm:$0xff]  }
  0x49   : > { %745 = vmatprep.subr.bf16.mxu0 %v1100_v39  ;;  %v537_v4 = vld [vmem:[#allocation2] sm:$0xff]  ;;  %v538_v5 = vld [vmem:[#allocation2 + $0x8] sm:$0xff]  ;;  %v793_v13 = vshrl.u32 (!%p1030_p13), %v792_v12, 7 }
  0x4a   : > { %v790_v14 = vld [vmem:[%s504_s18] sm:$0x3] (!%p1030_p13)  ;;  %v819_v27 = vld [vmem:[%s1380_s17 + $0x8] sm:$0xff] (!%p1030_p13) }
  0x4b   : > { %v804_v15 = vld [vmem:[%s509_s21] sm:$0x3] (!%p1030_p13)  ;;  %v794_v16 = vsub.s32 (!%p1030_p13), 0, %v793_v13  ;;  %v798_v17 = vsub.s32 (!%p1030_p13), 1, %v793_v13 }
  0x4c   : > { %746 = vmatpush1.bf16.msra.mxu0 %v1102_v40  ;;  %v818_v26 = vld [vmem:[%s1380_s17] sm:$0xff] (!%p1030_p13) }
  0x4d   : > { %747 = vmatprep.subr.bf16.mxu0 %v1103_v41  ;;  %v795_v20 = vrot.slane (!%p1030_p13), %v790_v14, %v794_v16  ;;  %v809_v21 = vrot.slane (!%p1030_p13), %v804_v15, %v794_v16  ;;  %v799_v22 = vrot.slane (!%p1030_p13), %v790_v14, %v798_v17  ;;  %v813_v23 = vrot.slane (!%p1030_p13), %v804_v15, %v798_v17 }
  0x50   : > { %748 = vmatpush1.bf16.msra.mxu0 %v1105_v42 }
  0x51   : > { %749 = vmatprep.subr.bf16.mxu0 %v1106_v43 }
  0x54   : > { %750 = vmatpush1.bf16.msra.mxu0 %v1108_v44 }
  0x55   : > { %751 = vmatprep.subr.bf16.mxu0 %v1109_v45 }
  0x58   : > { %752 = vmatpush1.bf16.msra.mxu0 %v1111_v48 }
  0x59   : > { %753 = vmatprep.subr.bf16.mxu0 %v1112_v49 }
  0x5c   : > { %754 = vmatpush1.bf16.msra.mxu0 %v1114_v50 }
  0x5d   : > { %755 = vmatprep.subr.bf16.mxu0 %v1115_v51 }
  0x60   : > { %756 = vmatpush1.bf16.msra.mxu0 %v1117_v52 }
  0x61   : > { %757 = vmatprep.subr.bf16.mxu0 %v1118_v53 }
  0x64   : > { %758 = vmatpush1.bf16.msra.mxu0 %v1120_v54 }
  0x65   : > { %759 = vmatprep.subr.bf16.mxu0 %v1121_v55 }
  0x68   : > { %760 = vmatpush1.bf16.msra.mxu0 %v1123_v56 }
  0x69   : > { %761 = vmatprep.subr.bf16.mxu0 %v1124_v57 }
  0x6c   : > { %762 = vmatpush1.bf16.msra.mxu0 %v1126_v58 }
  0x6d   : > { %763 = vmatprep.subr.bf16.mxu0 %v1127_v59 }
  0x70   : > { %764 = vmatpush1.bf16.msra.mxu0 %v1129_v60 }
  0x71   : > { %765 = vmatprep.subr.bf16.mxu0 %v1130_v61 }
  0x74   : > { %766 = vmatpush1.bf16.msra.mxu0 %v1132_v62 }
  0x75   : > { %767 = vmatprep.subr.bf16.mxu0 %v1133_v63 }
  0x78   : > { %768 = vmatpush1.bf16.msra.mxu0 %v1135_v0 }
  0x79   : > { %769 = vmatprep.subr.bf16.mxu0 %v1136_v1 }
  0x7c   : > { %770 = vmatpush1.bf16.msra.mxu0 %v1138_v2 }
  0x7f   : > { %772 = vmatmul.mubr.bf16.vlgmr.msra.gmra.mrb[0].mxu0 %v996_v3 }
 0x150   : > { %787 = sbr.rel (%p1030_p13) target bundleno = 359 (0x167), region = 86 }
 0x152   : > { %v773_v6 = vpop.f32.mrb[0].mxu0 }
 0x153   : > { %v780_v7 = vadd.f32 %v773_v6, %v537_v4  ;;  %v775_v8 = vpop.f32.mrb[1].mxu0 }
 0x154   : > { %v781_v9 = vadd.f32 %v775_v8, %v538_v5  ;;  %v777_v10 = vpop.f32.mrb[2].mxu0 }
 0x155   : > { %782 = vst [vmem:[#allocation2] sm:$0xff] %v780_v7  ;;  %v778_v11 = vpop.f32.mrb[3].mxu0 }
 0x156   : > { %783 = vst [vmem:[#allocation2 + $0x8] sm:$0xff] %v781_v9 }
 0x15c   : > { %v788_v18 = vld [vmem:[#allocation2] sm:$0xff] }
 0x15d   : > { %v789_v19 = vld [vmem:[#allocation2 + $0x8] sm:$0xff]  ;;  %v802_v24 = vmul.f32 %v795_v20, %v788_v18 }
 0x15e   : > { %v803_v25 = vmul.f32 %v799_v22, %v789_v19 }
 0x15f   : > { %v816_v28 = vadd.f32 %v809_v21, %v802_v24 }
 0x160   : > { %v817_v29 = vadd.f32 %v813_v23, %v803_v25 }
 0x161   : > { %v820_v30 = vadd.f32 %v818_v26, %v816_v28 }
 0x162   : > { %v821_v31 = vadd.f32 %v819_v27, %v817_v29 }
 0x163   : > { %v822_v32 = vmax.f32 %v820_v30, 0.0 }
 0x164   : > { %v823_v33 = vmax.f32 %v821_v31, 0.0 }
 0x165   : > { %824 = vst [vmem:[%s1385_s7] sm:$0xff] %v822_v32 }
 0x166   : > { %825 = vst [vmem:[%s1385_s7 + $0x8] sm:$0xff] %v823_v33 }
 0x167 PF: > { %s15_s24 = sadd.s32 1, %s1195_s24   ;;  %s1465_s18 = smov %s1175_s19 }
 0x168   : > { %p12_p0 = scmp.ge.s32.totalorder %s15_s24, 38   ;;  %s1466_s19 = smov %s1279_s6 }
 0x169   : > { %s1467_s20 = smov %s1187_s22  ;;  %s1468_s21 = smov %s1191_s23 }
 0x16a   : > { %s1469_s22 = smov %s1472_s25  ;;  %s1470_s23 = smov %s1476_s26 }
 0x16b   :  { %14 = sbr.rel (!%p12_p0) target bundleno = 4 (0x4), region = 133 }

// kernel: resnet34_forward.72
= control target key start
LH: loop header
LB: loop body
LE: loop exit
PB: predicated region body
PF: predicated region fallthrough
CT: control target
= control target key end

     0   :  { %s1136_s15 = smov 0   ;;  %s1138_s16 = smov 0   ;;  %s1360_s0 = inlined_call_operand.vmem [shape: bf16[8,4608], index: 0, kind: input, shape index: {}]   ;;  %s1361_s1 = inlined_call_operand.vmem [shape: bf16[4608,512], index: 1, kind: input, shape index: {}]   ;;  %s1362_s2 = inlined_call_operand.vmem [shape: f32[1,512], index: 2, kind: input, shape index: {}]   ;;  %s1363_s3 = inlined_call_operand.vmem [shape: f32[1,512], index: 3, kind: input, shape index: {}]   ;;  %s1364_s4 = inlined_call_operand.vmem [shape: f32[8,512], index: 4, kind: output, shape index: {}]  }
   0x1   :  { %s1140_s17 = smov 0   ;;  %s1142_s18 = smov 0  }
   0x2   :  { %s1144_s19 = smov 0   ;;  %s1146_s20 = smov 0  }
   0x3   :  { %s1148_s21 = smov 0  }
   0x4 LB: > { %s26_s22 = sadd.s32 1, %s1100_s19  ;;  %s29_s23 = sadd.s32 1, %s1104_s20  ;;  %s1108_s21 = sphi %s1148_s21, %s14_s21   ;;  %s1104_s20 = sphi %s1146_s20, %s1370_s20   ;;  %s1100_s19 = sphi %s1144_s19, %s1369_s19   ;;  %s1096_s18 = sphi %s1142_s18, %s1368_s18   ;;  %s1092_s17 = sphi %s1140_s17, %s1367_s17   ;;  %s1088_s16 = sphi %s1138_s16, %s1366_s16   ;;  %s1084_s15 = sphi %s1136_s15, %s1365_s15  }
   0x5   : > { %p27_p0 = scmp.ge.s32.totalorder %s26_s22, 18  ;;  %p77_p1 = scmp.ne.s32.totalorder %s1088_s16, %s1084_s15 }
   0x6   : > { %p78_p2 = scmp.eq.s32.totalorder %s1108_s21, 0  ;;  %s70_s27 = sadd.s32 1, %s1088_s16 }
   0x7   : > { %s1372_s22 = smov (%p27_p0, %s26_s22), 0  ;;  %s1374_s23 = smov (!%p27_p0, %s29_s23), %s1104_s20 }
   0x8   : > { %p79_p3 = por %p78_p2, %p77_p1  ;;  %p31_p4 = scmp.ge.s32.totalorder %s1374_s23, 2 }
   0x9   : > { %s65_s24 = ssub.s32 %s1100_s19, %s1372_s22  ;;  %p894_p6 = scmp.ge.s32.totalorder %s1108_s21, 36 }
   0xa   : > { %s1376_s23 = smov (%p31_p4, %s1374_s23), 0 }
   0xb   : > { %s66_s25 = ssub.s32 %s1104_s20, %s1376_s23  ;;  %183 = sbr.rel (%p894_p6) target bundleno = 41 (0x29), region = 16 }
   0xc   : > { %s67_s26 = sor.u32 %s66_s25, %s65_s24 }
   0xd   : > { %p68_p5 = scmp.eq.s32.totalorder %s67_s26, 0 }
   0xf   : > { %s1187_s28 = scalar_select %p68_p5, %s1088_s16, %s70_s27  }
  0x12   : > { %199 = sbr.rel (!%p79_p3) target bundleno = 41 (0x29), region = 24  ;;  %s201_s29 = sand.u32 (%p79_p3), 1, %s1088_s16  }
  0x13   : > { %s897_s30 = sshll.u32 (%p79_p3), %s1104_s20, 1  ;;  %s895_s5 = sshll.u32 (%p79_p3), %s201_s29, 8 }
  0x14   : > { %s946_s6 = sshll.u32 (%p79_p3), %s1100_s19, 7  ;;  %s1201_s12 = scalar_lea.vmem (%p79_p3), [#allocation3], %s895_s5 }
  0x15   : > { %s207_s7 = sadd.s32 (%p79_p3), %s946_s6, %s897_s30 }
  0x16   : > { %s899_s8 = sshll.u32 (%p79_p3), %s207_s7, 2 }
  0x17   : > { %s1196_s11 = scalar_lea.vmem (%p79_p3), %s1361_s1, %s899_s8 }
  0x18   : > { %v299_v0 = vld [vmem:[%s1196_s11] sm:$0xff] (%p79_p3)  ;;  %v301_v1 = vld [vmem:[%s1196_s11 + $0x10] sm:$0xff] (%p79_p3) }
  0x19   : > { %v303_v2 = vld [vmem:[%s1196_s11 + $0x20] sm:$0xff]  ;;  %300 = vst [vmem:[%s1201_s12] sm:$0xff] %v299_v0  ;;  %302 = vst [vmem:[%s1201_s12 + $0x8] sm:$0xff] %v301_v1  ;;  %v305_v3 = vld [vmem:[%s1196_s11 + $0x30] sm:$0xff] }
  0x1a   : > { %304 = vst [vmem:[%s1201_s12 + $0x10] sm:$0xff] %v303_v2  ;;  %v307_v4 = vld [vmem:[%s1196_s11 + $0x40] sm:$0xff]  ;;  %v309_v5 = vld [vmem:[%s1196_s11 + $0x50] sm:$0xff]  ;;  %306 = vst [vmem:[%s1201_s12 + $0x18] sm:$0xff] %v305_v3 }
  0x1b   : > { %308 = vst [vmem:[%s1201_s12 + $0x20] sm:$0xff] %v307_v4  ;;  %310 = vst [vmem:[%s1201_s12 + $0x28] sm:$0xff] %v309_v5  ;;  %v311_v6 = vld [vmem:[%s1196_s11 + $0x60] sm:$0xff]  ;;  %v313_v7 = vld [vmem:[%s1196_s11 + $0x70] sm:$0xff] }
  0x1c   : > { %v315_v8 = vld [vmem:[%s1196_s11 + $0x80] sm:$0xff]  ;;  %312 = vst [vmem:[%s1201_s12 + $0x30] sm:$0xff] %v311_v6  ;;  %314 = vst [vmem:[%s1201_s12 + $0x38] sm:$0xff] %v313_v7  ;;  %v317_v9 = vld [vmem:[%s1196_s11 + $0x90] sm:$0xff] }
  0x1d   : > { %316 = vst [vmem:[%s1201_s12 + $0x40] sm:$0xff] %v315_v8  ;;  %v319_v10 = vld [vmem:[%s1196_s11 + $0xa0] sm:$0xff]  ;;  %v321_v11 = vld [vmem:[%s1196_s11 + $0xb0] sm:$0xff]  ;;  %318 = vst [vmem:[%s1201_s12 + $0x48] sm:$0xff] %v317_v9 }
  0x1e   : > { %320 = vst [vmem:[%s1201_s12 + $0x50] sm:$0xff] %v319_v10  ;;  %322 = vst [vmem:[%s1201_s12 + $0x58] sm:$0xff] %v321_v11  ;;  %v323_v12 = vld [vmem:[%s1196_s11 + $0xc0] sm:$0xff]  ;;  %v325_v13 = vld [vmem:[%s1196_s11 + $0xd0] sm:$0xff] }
  0x1f   : > { %v327_v14 = vld [vmem:[%s1196_s11 + $0xe0] sm:$0xff]  ;;  %324 = vst [vmem:[%s1201_s12 + $0x60] sm:$0xff] %v323_v12  ;;  %326 = vst [vmem:[%s1201_s12 + $0x68] sm:$0xff] %v325_v13  ;;  %v329_v15 = vld [vmem:[%s1196_s11 + $0xf0] sm:$0xff] }
  0x20   : > { %328 = vst [vmem:[%s1201_s12 + $0x70] sm:$0xff] %v327_v14  ;;  %v331_v16 = vld [vmem:[%s1196_s11 + $0x100] sm:$0xff]  ;;  %v333_v17 = vld [vmem:[%s1196_s11 + $0x110] sm:$0xff]  ;;  %330 = vst [vmem:[%s1201_s12 + $0x78] sm:$0xff] %v329_v15 }
  0x21   : > { %332 = vst [vmem:[%s1201_s12 + $0x80] sm:$0xff] %v331_v16  ;;  %334 = vst [vmem:[%s1201_s12 + $0x88] sm:$0xff] %v333_v17  ;;  %v335_v18 = vld [vmem:[%s1196_s11 + $0x120] sm:$0xff]  ;;  %v337_v19 = vld [vmem:[%s1196_s11 + $0x130] sm:$0xff] }
  0x22   : > { %v339_v20 = vld [vmem:[%s1196_s11 + $0x140] sm:$0xff]  ;;  %336 = vst [vmem:[%s1201_s12 + $0x90] sm:$0xff] %v335_v18  ;;  %338 = vst [vmem:[%s1201_s12 + $0x98] sm:$0xff] %v337_v19  ;;  %v341_v21 = vld [vmem:[%s1196_s11 + $0x150] sm:$0xff] }
  0x23   : > { %340 = vst [vmem:[%s1201_s12 + $0xa0] sm:$0xff] %v339_v20  ;;  %v343_v22 = vld [vmem:[%s1196_s11 + $0x160] sm:$0xff]  ;;  %v345_v23 = vld [vmem:[%s1196_s11 + $0x170] sm:$0xff]  ;;  %342 = vst [vmem:[%s1201_s12 + $0xa8] sm:$0xff] %v341_v21 }
  0x24   : > { %344 = vst [vmem:[%s1201_s12 + $0xb0] sm:$0xff] %v343_v22  ;;  %346 = vst [vmem:[%s1201_s12 + $0xb8] sm:$0xff] %v345_v23  ;;  %v347_v24 = vld [vmem:[%s1196_s11 + $0x180] sm:$0xff]  ;;  %v349_v25 = vld [vmem:[%s1196_s11 + $0x190] sm:$0xff] }
  0x25   : > { %v351_v26 = vld [vmem:[%s1196_s11 + $0x1a0] sm:$0xff]  ;;  %348 = vst [vmem:[%s1201_s12 + $0xc0] sm:$0xff] %v347_v24  ;;  %350 = vst [vmem:[%s1201_s12 + $0xc8] sm:$0xff] %v349_v25  ;;  %v353_v27 = vld [vmem:[%s1196_s11 + $0x1b0] sm:$0xff] }
  0x26   : > { %352 = vst [vmem:[%s1201_s12 + $0xd0] sm:$0xff] %v351_v26  ;;  %v355_v28 = vld [vmem:[%s1196_s11 + $0x1c0] sm:$0xff]  ;;  %v357_v29 = vld [vmem:[%s1196_s11 + $0x1d0] sm:$0xff]  ;;  %354 = vst [vmem:[%s1201_s12 + $0xd8] sm:$0xff] %v353_v27 }
  0x27   : > { %356 = vst [vmem:[%s1201_s12 + $0xe0] sm:$0xff] %v355_v28  ;;  %358 = vst [vmem:[%s1201_s12 + $0xe8] sm:$0xff] %v357_v29  ;;  %v359_v30 = vld [vmem:[%s1196_s11 + $0x1e0] sm:$0xff]  ;;  %v361_v31 = vld [vmem:[%s1196_s11 + $0x1f0] sm:$0xff] }
  0x28   : > { %360 = vst [vmem:[%s1201_s12 + $0xf0] sm:$0xff] %v359_v30  ;;  %362 = vst [vmem:[%s1201_s12 + $0xf8] sm:$0xff] %v361_v31 }
  0x29 PF: > { %p900_p7 = scmp.ge.s32.totalorder %s1108_s21, 1  ;;  %p383_p8 = scmp.lt.s32.totalorder %s1108_s21, 37 }
  0x2b   : > { %p384_p9 = pnand %p900_p7, %p383_p8 }
  0x2c   : > { %s390_s13 = sand.u32 (!%p384_p9), 1, %s1084_s15   ;;  %s902_s14 = sshll.u32 (!%p384_p9), %s1092_s17, 1 }
  0x2d   : > { %387 = sbr.rel (%p384_p9) target bundleno = 357 (0x165), region = 70  ;;  %s901_s24 = sshll.u32 (!%p384_p9), %s390_s13, 8 }
  0x2e   : > { %p439_p10 = scmp.lt.s32.totalorder (!%p384_p9), %s902_s14, 35  ;;  %s904_s25 = sshll.u32 (!%p384_p9), %s1096_s18, 1 }
  0x2f   : > { %p449_p11 = scmp.lt.s32.totalorder (!%p384_p9), %s904_s25, 3  ;;  %s1290_s13 = scalar_lea.vmem (!%p384_p9), [#allocation3], %s901_s24 }
  0x30   : > { %p908_p12 = scmp.ne.s32.totalorder (!%p384_p9), %s1092_s17, 0 }
  0x34   : > { %s1378_s14 = smov (!%p439_p10, %s902_s14), 35  ;;  %s1380_s25 = smov (!%p449_p11, %s904_s25), 3 }
  0x35   : > { %s903_s26 = sshll.u32 %s1378_s14, 2  ;;  %s451_s15 = scalar_lea.vmem %s1362_s2, %s1380_s25  ;;  %v1110_v32 = vmov (!%p908_p12), 0.0  }
  0x36   : > { %s1272_s30 = scalar_lea.vmem %s1360_s0, %s903_s26  ;;  %s456_s18 = scalar_lea.vmem %s1363_s3, %s1380_s25  ;;  %472 = vst [vmem:[#allocation2] sm:$0xff] (!%p908_p12), %v1110_v32  ;;  %473 = vst [vmem:[#allocation2 + $0x8] sm:$0xff] (!%p908_p12), %v1110_v32 }
  0x37   : > { %s907_s9 = sshll.u32 %s1380_s25, 3  ;;  %471 = sbr.rel (%p908_p12) target bundleno = 62 (0x3e), region = 78 }
  0x38   : > { %s1288_s12 = scalar_lea.vmem %s1364_s4, %s907_s9 }
  0x3e PF: > { %v1004_v33 = vld [vmem:[%s1290_s13 + $0x4] ss:$8 sps:$4 sm:$0xff]   ;;  %v1006_v34 = vld [vmem:[%s1290_s13] ss:$8 sps:$4 sm:$0xff]   ;;  %v1007_v35 = vld [vmem:[%s1290_s13 + $0x14] ss:$8 sps:$4 sm:$0xff]  }
  0x3f   : > { %676 = vmatprep.subr.bf16.mxu0 %v1004_v33  ;;  %v1009_v36 = vld [vmem:[%s1290_s13 + $0x10] ss:$8 sps:$4 sm:$0xff]   ;;  %v1010_v37 = vld [vmem:[%s1290_s13 + $0x24] ss:$8 sps:$4 sm:$0xff]   ;;  %v1012_v38 = vld [vmem:[%s1290_s13 + $0x20] ss:$8 sps:$4 sm:$0xff]  }
  0x40   : > { %677 = vmatpush1.bf16.msra.mxu0 %v1006_v34  ;;  %v1013_v39 = vld [vmem:[%s1290_s13 + $0x34] ss:$8 sps:$4 sm:$0xff]   ;;  %v1015_v40 = vld [vmem:[%s1290_s13 + $0x30] ss:$8 sps:$4 sm:$0xff]   ;;  %v1016_v41 = vld [vmem:[%s1290_s13 + $0x44] ss:$8 sps:$4 sm:$0xff]  }
  0x41   : > { %678 = vmatprep.subr.bf16.mxu0 %v1007_v35  ;;  %v1018_v42 = vld [vmem:[%s1290_s13 + $0x40] ss:$8 sps:$4 sm:$0xff]   ;;  %v1019_v43 = vld [vmem:[%s1290_s13 + $0x54] ss:$8 sps:$4 sm:$0xff]   ;;  %v1021_v44 = vld [vmem:[%s1290_s13 + $0x50] ss:$8 sps:$4 sm:$0xff]  }
  0x42   : > { %v1022_v45 = vld [vmem:[%s1290_s13 + $0x64] ss:$8 sps:$4 sm:$0xff]   ;;  %v476_v46 = vld [vmem:[%s1272_s30] sm:$0xff]  ;;  %v1024_v48 = vld [vmem:[%s1290_s13 + $0x60] ss:$8 sps:$4 sm:$0xff]   ;;  %p943_p13 = scmp.ne.s32.totalorder %s1092_s17, 17 }
  0x43   : > { %v910_v47 = vcombine.high %v476_v46, %v476_v46  ;;  %v1025_v49 = vld [vmem:[%s1290_s13 + $0x74] ss:$8 sps:$4 sm:$0xff]   ;;  %v1027_v50 = vld [vmem:[%s1290_s13 + $0x70] ss:$8 sps:$4 sm:$0xff]   ;;  %v1028_v51 = vld [vmem:[%s1290_s13 + $0x84] ss:$8 sps:$4 sm:$0xff]   ;;  %v909_v3 = vcombine.low %v476_v46, %v476_v46  ;;  %v729_v12 = vlaneseq (!%p943_p13) }
  0x44   : > { %679 = vmatpush1.bf16.msra.mxu0 %v1009_v36  ;;  %v1030_v52 = vld [vmem:[%s1290_s13 + $0x80] ss:$8 sps:$4 sm:$0xff]   ;;  %v1031_v53 = vld [vmem:[%s1290_s13 + $0x94] ss:$8 sps:$4 sm:$0xff]   ;;  %v1033_v54 = vld [vmem:[%s1290_s13 + $0x90] ss:$8 sps:$4 sm:$0xff]  }
  0x45   : > { %680 = vmatprep.subr.bf16.mxu0 %v1010_v37  ;;  %708 = vmatprep.mubr.bf16.mxu0 %v910_v47  ;;  %v1034_v55 = vld [vmem:[%s1290_s13 + $0xa4] ss:$8 sps:$4 sm:$0xff]   ;;  %v1036_v56 = vld [vmem:[%s1290_s13 + $0xa0] ss:$8 sps:$4 sm:$0xff]   ;;  %v1037_v57 = vld [vmem:[%s1290_s13 + $0xb4] ss:$8 sps:$4 sm:$0xff]  }
  0x46   : > { %v1039_v58 = vld [vmem:[%s1290_s13 + $0xb0] ss:$8 sps:$4 sm:$0xff]   ;;  %v1040_v59 = vld [vmem:[%s1290_s13 + $0xc4] ss:$8 sps:$4 sm:$0xff]   ;;  %v1042_v60 = vld [vmem:[%s1290_s13 + $0xc0] ss:$8 sps:$4 sm:$0xff]  }
  0x47   : > { %v1043_v61 = vld [vmem:[%s1290_s13 + $0xd4] ss:$8 sps:$4 sm:$0xff]   ;;  %v1045_v62 = vld [vmem:[%s1290_s13 + $0xd0] ss:$8 sps:$4 sm:$0xff]   ;;  %v1046_v63 = vld [vmem:[%s1290_s13 + $0xe4] ss:$8 sps:$4 sm:$0xff]  }
  0x48   : > { %681 = vmatpush1.bf16.msra.mxu0 %v1012_v38  ;;  %v1048_v0 = vld [vmem:[%s1290_s13 + $0xe0] ss:$8 sps:$4 sm:$0xff]   ;;  %v1049_v1 = vld [vmem:[%s1290_s13 + $0xf4] ss:$8 sps:$4 sm:$0xff]   ;;  %v1051_v2 = vld [vmem:[%s1290_s13 + $0xf0] ss:$8 sps:$4 sm:$0xff]  }
  0x49   : > { %682 = vmatprep.subr.bf16.mxu0 %v1013_v39  ;;  %v474_v4 = vld [vmem:[#allocation2] sm:$0xff]  ;;  %v475_v5 = vld [vmem:[#allocation2 + $0x8] sm:$0xff]  ;;  %v730_v13 = vshrl.u32 (!%p943_p13), %v729_v12, 7 }
  0x4a   : > { %v727_v14 = vld [vmem:[%s451_s15] sm:$0x3] (!%p943_p13) }
  0x4b   : > { %v741_v15 = vld [vmem:[%s456_s18] sm:$0x3] (!%p943_p13)  ;;  %v731_v16 = vsub.s32 (!%p943_p13), 0, %v730_v13  ;;  %v735_v17 = vsub.s32 (!%p943_p13), 1, %v730_v13 }
  0x4c   : > { %683 = vmatpush1.bf16.msra.mxu0 %v1015_v40 }
  0x4d   : > { %684 = vmatprep.subr.bf16.mxu0 %v1016_v41  ;;  %v732_v20 = vrot.slane (!%p943_p13), %v727_v14, %v731_v16  ;;  %v746_v21 = vrot.slane (!%p943_p13), %v741_v15, %v731_v16  ;;  %v736_v22 = vrot.slane (!%p943_p13), %v727_v14, %v735_v17  ;;  %v750_v23 = vrot.slane (!%p943_p13), %v741_v15, %v735_v17 }
  0x50   : > { %685 = vmatpush1.bf16.msra.mxu0 %v1018_v42 }
  0x51   : > { %686 = vmatprep.subr.bf16.mxu0 %v1019_v43 }
  0x54   : > { %687 = vmatpush1.bf16.msra.mxu0 %v1021_v44 }
  0x55   : > { %688 = vmatprep.subr.bf16.mxu0 %v1022_v45 }
  0x58   : > { %689 = vmatpush1.bf16.msra.mxu0 %v1024_v48 }
  0x59   : > { %690 = vmatprep.subr.bf16.mxu0 %v1025_v49 }
  0x5c   : > { %691 = vmatpush1.bf16.msra.mxu0 %v1027_v50 }
  0x5d   : > { %692 = vmatprep.subr.bf16.mxu0 %v1028_v51 }
  0x60   : > { %693 = vmatpush1.bf16.msra.mxu0 %v1030_v52 }
  0x61   : > { %694 = vmatprep.subr.bf16.mxu0 %v1031_v53 }
  0x64   : > { %695 = vmatpush1.bf16.msra.mxu0 %v1033_v54 }
  0x65   : > { %696 = vmatprep.subr.bf16.mxu0 %v1034_v55 }
  0x68   : > { %697 = vmatpush1.bf16.msra.mxu0 %v1036_v56 }
  0x69   : > { %698 = vmatprep.subr.bf16.mxu0 %v1037_v57 }
  0x6c   : > { %699 = vmatpush1.bf16.msra.mxu0 %v1039_v58 }
  0x6d   : > { %700 = vmatprep.subr.bf16.mxu0 %v1040_v59 }
  0x70   : > { %701 = vmatpush1.bf16.msra.mxu0 %v1042_v60 }
  0x71   : > { %702 = vmatprep.subr.bf16.mxu0 %v1043_v61 }
  0x74   : > { %703 = vmatpush1.bf16.msra.mxu0 %v1045_v62 }
  0x75   : > { %704 = vmatprep.subr.bf16.mxu0 %v1046_v63 }
  0x78   : > { %705 = vmatpush1.bf16.msra.mxu0 %v1048_v0 }
  0x79   : > { %706 = vmatprep.subr.bf16.mxu0 %v1049_v1 }
  0x7c   : > { %707 = vmatpush1.bf16.msra.mxu0 %v1051_v2 }
  0x7f   : > { %709 = vmatmul.mubr.bf16.vlgmr.msra.gmra.mrb[0].mxu0 %v909_v3 }
 0x150   : > { %724 = sbr.rel (%p943_p13) target bundleno = 357 (0x165), region = 82 }
 0x152   : > { %v710_v6 = vpop.f32.mrb[0].mxu0 }
 0x153   : > { %v717_v7 = vadd.f32 %v710_v6, %v474_v4  ;;  %v712_v8 = vpop.f32.mrb[1].mxu0 }
 0x154   : > { %v718_v9 = vadd.f32 %v712_v8, %v475_v5  ;;  %v714_v10 = vpop.f32.mrb[2].mxu0 }
 0x155   : > { %719 = vst [vmem:[#allocation2] sm:$0xff] %v717_v7  ;;  %v715_v11 = vpop.f32.mrb[3].mxu0 }
 0x156   : > { %720 = vst [vmem:[#allocation2 + $0x8] sm:$0xff] %v718_v9 }
 0x15c   : > { %v725_v18 = vld [vmem:[#allocation2] sm:$0xff] }
 0x15d   : > { %v726_v19 = vld [vmem:[#allocation2 + $0x8] sm:$0xff]  ;;  %v739_v24 = vmul.f32 %v732_v20, %v725_v18 }
 0x15e   : > { %v740_v25 = vmul.f32 %v736_v22, %v726_v19 }
 0x15f   : > { %v753_v26 = vadd.f32 %v746_v21, %v739_v24 }
 0x160   : > { %v754_v27 = vadd.f32 %v750_v23, %v740_v25 }
 0x161   : > { %v755_v28 = vmax.f32 %v753_v26, 0.0 }
 0x162   : > { %v756_v29 = vmax.f32 %v754_v27, 0.0 }
 0x163   : > { %757 = vst [vmem:[%s1288_s12] sm:$0xff] %v755_v28 }
 0x164   : > { %758 = vst [vmem:[%s1288_s12 + $0x8] sm:$0xff] %v756_v29 }
 0x165 PF: > { %s14_s21 = sadd.s32 1, %s1108_s21   ;;  %s1365_s15 = smov %s1088_s16 }
 0x166   : > { %p11_p0 = scmp.ge.s32.totalorder %s14_s21, 38   ;;  %s1366_s16 = smov %s1187_s28 }
 0x167   : > { %s1367_s17 = smov %s1100_s19  ;;  %s1368_s18 = smov %s1104_s20 }
 0x168   : > { %s1369_s19 = smov %s1372_s22  ;;  %s1370_s20 = smov %s1376_s23 }
 0x169   :  { %13 = sbr.rel (!%p11_p0) target bundleno = 4 (0x4), region = 126 }

// kernel: resnet34_forward.76
= control target key start
LH: loop header
LB: loop body
LE: loop exit
PB: predicated region body
PF: predicated region fallthrough
CT: control target
= control target key end

     0   :  { %s46_s0 = inlined_call_operand.vmem [shape: f32[2,1,512], index: 0, kind: input, shape index: {}]   ;;  %s47_s1 = inlined_call_operand.vmem [shape: f32[2,512], index: 1, kind: output, shape index: {}]  }
   0x1   :  { %v29_v0 = vld [vmem:[%s46_s0] sm:$0xff]  }
   0x2   :  { %28 = vst.sshfl [vmem:[%s47_s1] sm:$0xff pattern:$0x75316420] %v29_v0 }

// kernel: resnet34_forward.77
= control target key start
LH: loop header
LB: loop body
LE: loop exit
PB: predicated region body
PF: predicated region fallthrough
CT: control target
= control target key end

     0   :  { %s918_s15 = smov 0   ;;  %s920_s16 = smov 0   ;;  %s1006_s0 = inlined_call_operand.vmem [shape: bf16[8,512], index: 0, kind: input, shape index: {}]   ;;  %s1007_s1 = inlined_call_operand.vmem [shape: bf16[512,256], index: 1, kind: input, shape index: {}]   ;;  %s1008_s2 = inlined_call_operand.vmem [shape: f32[1,256], index: 2, kind: input, shape index: {}]   ;;  %s1009_s3 = inlined_call_operand.vmem [shape: f32[1,256], index: 3, kind: input, shape index: {}]   ;;  %s1010_s4 = inlined_call_operand.vmem [shape: f32[8,256], index: 4, kind: output, shape index: {}]  }
   0x1   :  { %s922_s17 = smov 0  }
   0x2 LB: > { %s26_s18 = sadd.s32 1, %s886_s16  ;;  %p746_p0 = scmp.ge.s32.totalorder %s890_s17, 1  ;;  %s890_s17 = sphi %s922_s17, %s14_s17   ;;  %s886_s16 = sphi %s920_s16, %s1012_s16   ;;  %s882_s15 = sphi %s918_s15, %s1011_s15  }
   0x3   : > { %p27_p1 = scmp.ge.s32.totalorder %s26_s18, 2  ;;  %p229_p2 = scmp.lt.s32.totalorder %s890_s17, 3 }
   0x5   : > { %s1014_s18 = smov (%p27_p1, %s26_s18), 0  ;;  %p230_p3 = pnand %p746_p0, %p229_p2 }
   0x6   : > { %s747_s19 = sshll.u32 (!%p230_p3), %s882_s15, 1  ;;  %s749_s20 = sshll.u32 (!%p230_p3), %s882_s15, 5 }
   0x7   : > { %233 = sbr.rel (%p230_p3) target bundleno = 317 (0x13d), region = 36  ;;  %p284_p4 = scmp.lt.s32.totalorder (!%p230_p3), %s747_s19, 3 }
   0x8   : > { %p293_p5 = scmp.lt.s32.totalorder (!%p230_p3), %s749_s20, 63  ;;  %p752_p6 = scmp.ne.s32.totalorder (!%p230_p3), %s882_s15, 0 }
   0xe   : > { %s1016_s19 = smov (!%p284_p4, %s747_s19), 3  ;;  %s1018_s20 = smov (!%p293_p5, %s749_s20), 63 }
   0xf   : > { %s748_s21 = sshll.u32 %s1016_s19, 2  ;;  %s792_s25 = sshll.u32 %s1018_s20, 3  ;;  %v892_v0 = vmov (!%p752_p6), 0.0  }
  0x10   : > { %s943_s24 = scalar_lea.vmem %s1006_s0, %s748_s21  ;;  %s948_s28 = scalar_lea.vmem %s1007_s1, %s792_s25  ;;  %327 = vst [vmem:[#allocation2] sm:$0xff] (!%p752_p6), %v892_v0  ;;  %328 = vst [vmem:[#allocation2 + $0x8] sm:$0xff] (!%p752_p6), %v892_v0 }
  0x11   : > { %326 = sbr.rel (%p752_p6) target bundleno = 24 (0x18), region = 40 }
  0x18 PF: > { %v818_v1 = vld [vmem:[%s948_s28 + $0x4] ss:$8 sps:$4 sm:$0xff]   ;;  %v820_v2 = vld [vmem:[%s948_s28] ss:$8 sps:$4 sm:$0xff]   ;;  %v821_v3 = vld [vmem:[%s948_s28 + $0x14] ss:$8 sps:$4 sm:$0xff]  }
  0x19   : > { %531 = vmatprep.subr.bf16.mxu0 %v818_v1  ;;  %v823_v4 = vld [vmem:[%s948_s28 + $0x10] ss:$8 sps:$4 sm:$0xff]   ;;  %v824_v5 = vld [vmem:[%s948_s28 + $0x24] ss:$8 sps:$4 sm:$0xff]   ;;  %v826_v6 = vld [vmem:[%s948_s28 + $0x20] ss:$8 sps:$4 sm:$0xff]  }
  0x1a   : > { %532 = vmatpush1.bf16.msra.mxu0 %v820_v2  ;;  %v827_v7 = vld [vmem:[%s948_s28 + $0x34] ss:$8 sps:$4 sm:$0xff]   ;;  %v829_v8 = vld [vmem:[%s948_s28 + $0x30] ss:$8 sps:$4 sm:$0xff]   ;;  %v830_v9 = vld [vmem:[%s948_s28 + $0x44] ss:$8 sps:$4 sm:$0xff]  }
  0x1b   : > { %533 = vmatprep.subr.bf16.mxu0 %v821_v3  ;;  %v832_v10 = vld [vmem:[%s948_s28 + $0x40] ss:$8 sps:$4 sm:$0xff]   ;;  %v833_v11 = vld [vmem:[%s948_s28 + $0x54] ss:$8 sps:$4 sm:$0xff]   ;;  %v835_v12 = vld [vmem:[%s948_s28 + $0x50] ss:$8 sps:$4 sm:$0xff]  }
  0x1c   : > { %v836_v13 = vld [vmem:[%s948_s28 + $0x64] ss:$8 sps:$4 sm:$0xff]   ;;  %v838_v16 = vld [vmem:[%s948_s28 + $0x60] ss:$8 sps:$4 sm:$0xff]   ;;  %v839_v17 = vld [vmem:[%s948_s28 + $0x74] ss:$8 sps:$4 sm:$0xff]  }
  0x1d   : > { %v331_v14 = vld [vmem:[%s943_s24] sm:$0xff]  ;;  %v841_v18 = vld [vmem:[%s948_s28 + $0x70] ss:$8 sps:$4 sm:$0xff]   ;;  %v845_v21 = vld [vmem:[%s948_s28 + $0x94] ss:$8 sps:$4 sm:$0xff]   ;;  %p787_p7 = scmp.ne.s32.totalorder %s882_s15, 1 }
  0x1e   : > { %534 = vmatpush1.bf16.msra.mxu0 %v823_v4  ;;  %v754_v15 = vcombine.high %v331_v14, %v331_v14  ;;  %v842_v19 = vld [vmem:[%s948_s28 + $0x84] ss:$8 sps:$4 sm:$0xff]   ;;  %v844_v20 = vld [vmem:[%s948_s28 + $0x80] ss:$8 sps:$4 sm:$0xff]   ;;  %v847_v22 = vld [vmem:[%s948_s28 + $0x90] ss:$8 sps:$4 sm:$0xff]   ;;  %v753_v35 = vcombine.low %v331_v14, %v331_v14  ;;  %v584_v44 = vlaneseq (!%p787_p7) }
  0x1f   : > { %535 = vmatprep.subr.bf16.mxu0 %v824_v5  ;;  %v848_v23 = vld [vmem:[%s948_s28 + $0xa4] ss:$8 sps:$4 sm:$0xff]   ;;  %v850_v24 = vld [vmem:[%s948_s28 + $0xa0] ss:$8 sps:$4 sm:$0xff]   ;;  %v851_v25 = vld [vmem:[%s948_s28 + $0xb4] ss:$8 sps:$4 sm:$0xff]  }
  0x20   : > { %563 = vmatprep.mubr.bf16.mxu0 %v754_v15  ;;  %v853_v26 = vld [vmem:[%s948_s28 + $0xb0] ss:$8 sps:$4 sm:$0xff]   ;;  %v854_v27 = vld [vmem:[%s948_s28 + $0xc4] ss:$8 sps:$4 sm:$0xff]   ;;  %v856_v28 = vld [vmem:[%s948_s28 + $0xc0] ss:$8 sps:$4 sm:$0xff]  }
  0x21   : > { %v857_v29 = vld [vmem:[%s948_s28 + $0xd4] ss:$8 sps:$4 sm:$0xff]   ;;  %v859_v30 = vld [vmem:[%s948_s28 + $0xd0] ss:$8 sps:$4 sm:$0xff]   ;;  %v860_v31 = vld [vmem:[%s948_s28 + $0xe4] ss:$8 sps:$4 sm:$0xff]  }
  0x22   : > { %536 = vmatpush1.bf16.msra.mxu0 %v826_v6  ;;  %v862_v32 = vld [vmem:[%s948_s28 + $0xe0] ss:$8 sps:$4 sm:$0xff]   ;;  %v863_v33 = vld [vmem:[%s948_s28 + $0xf4] ss:$8 sps:$4 sm:$0xff]   ;;  %v865_v34 = vld [vmem:[%s948_s28 + $0xf0] ss:$8 sps:$4 sm:$0xff]  }
  0x23   : > { %537 = vmatprep.subr.bf16.mxu0 %v827_v7  ;;  %v329_v36 = vld [vmem:[#allocation2] sm:$0xff]  ;;  %v330_v37 = vld [vmem:[#allocation2 + $0x8] sm:$0xff]  ;;  %v585_v45 = vshrl.u32 (!%p787_p7), %v584_v44, 7 }
  0x24   : > { %v582_v46 = vld [vmem:[%s1008_s2] sm:$0x3] (!%p787_p7) }
  0x25   : > { %v596_v47 = vld [vmem:[%s1009_s3] sm:$0x3] (!%p787_p7)  ;;  %v586_v48 = vsub.s32 (!%p787_p7), 0, %v585_v45  ;;  %v590_v49 = vsub.s32 (!%p787_p7), 1, %v585_v45 }
  0x26   : > { %538 = vmatpush1.bf16.msra.mxu0 %v829_v8 }
  0x27   : > { %539 = vmatprep.subr.bf16.mxu0 %v830_v9  ;;  %v587_v52 = vrot.slane (!%p787_p7), %v582_v46, %v586_v48  ;;  %v601_v53 = vrot.slane (!%p787_p7), %v596_v47, %v586_v48  ;;  %v591_v54 = vrot.slane (!%p787_p7), %v582_v46, %v590_v49  ;;  %v605_v55 = vrot.slane (!%p787_p7), %v596_v47, %v590_v49 }
  0x2a   : > { %540 = vmatpush1.bf16.msra.mxu0 %v832_v10 }
  0x2b   : > { %541 = vmatprep.subr.bf16.mxu0 %v833_v11 }
  0x2e   : > { %542 = vmatpush1.bf16.msra.mxu0 %v835_v12 }
  0x2f   : > { %543 = vmatprep.subr.bf16.mxu0 %v836_v13 }
  0x32   : > { %544 = vmatpush1.bf16.msra.mxu0 %v838_v16 }
  0x33   : > { %545 = vmatprep.subr.bf16.mxu0 %v839_v17 }
  0x36   : > { %546 = vmatpush1.bf16.msra.mxu0 %v841_v18 }
  0x37   : > { %547 = vmatprep.subr.bf16.mxu0 %v842_v19 }
  0x3a   : > { %548 = vmatpush1.bf16.msra.mxu0 %v844_v20 }
  0x3b   : > { %549 = vmatprep.subr.bf16.mxu0 %v845_v21 }
  0x3e   : > { %550 = vmatpush1.bf16.msra.mxu0 %v847_v22 }
  0x3f   : > { %551 = vmatprep.subr.bf16.mxu0 %v848_v23 }
  0x42   : > { %552 = vmatpush1.bf16.msra.mxu0 %v850_v24 }
  0x43   : > { %553 = vmatprep.subr.bf16.mxu0 %v851_v25 }
  0x46   : > { %554 = vmatpush1.bf16.msra.mxu0 %v853_v26 }
  0x47   : > { %555 = vmatprep.subr.bf16.mxu0 %v854_v27 }
  0x4a   : > { %556 = vmatpush1.bf16.msra.mxu0 %v856_v28 }
  0x4b   : > { %557 = vmatprep.subr.bf16.mxu0 %v857_v29 }
  0x4e   : > { %558 = vmatpush1.bf16.msra.mxu0 %v859_v30 }
  0x4f   : > { %559 = vmatprep.subr.bf16.mxu0 %v860_v31 }
  0x52   : > { %560 = vmatpush1.bf16.msra.mxu0 %v862_v32 }
  0x53   : > { %561 = vmatprep.subr.bf16.mxu0 %v863_v33 }
  0x56   : > { %562 = vmatpush1.bf16.msra.mxu0 %v865_v34 }
  0x59   : > { %564 = vmatmul.mubr.bf16.vlgmr.msra.gmra.mrb[0].mxu0 %v753_v35 }
 0x12a   : > { %579 = sbr.rel (%p787_p7) target bundleno = 317 (0x13d), region = 44 }
 0x12c   : > { %v565_v38 = vpop.f32.mrb[0].mxu0 }
 0x12d   : > { %v572_v39 = vadd.f32 %v565_v38, %v329_v36  ;;  %v567_v40 = vpop.f32.mrb[1].mxu0 }
 0x12e   : > { %v573_v41 = vadd.f32 %v567_v40, %v330_v37  ;;  %v569_v42 = vpop.f32.mrb[2].mxu0 }
 0x12f   : > { %574 = vst [vmem:[#allocation2] sm:$0xff] %v572_v39  ;;  %v570_v43 = vpop.f32.mrb[3].mxu0 }
 0x130   : > { %575 = vst [vmem:[#allocation2 + $0x8] sm:$0xff] %v573_v41 }
 0x136   : > { %v580_v50 = vld [vmem:[#allocation2] sm:$0xff] }
 0x137   : > { %v581_v51 = vld [vmem:[#allocation2 + $0x8] sm:$0xff]  ;;  %v594_v56 = vmul.f32 %v587_v52, %v580_v50 }
 0x138   : > { %v595_v57 = vmul.f32 %v591_v54, %v581_v51 }
 0x139   : > { %v608_v58 = vadd.f32 %v601_v53, %v594_v56 }
 0x13a   : > { %v609_v59 = vadd.f32 %v605_v55, %v595_v57 }
 0x13b   : > { %610 = vst [vmem:[%s1010_s4] sm:$0xff] %v608_v58 }
 0x13c   : > { %611 = vst [vmem:[%s1010_s4 + $0x8] sm:$0xff] %v609_v59 }
 0x13d PF: > { %s14_s17 = sadd.s32 1, %s890_s17   ;;  %s1011_s15 = smov %s886_s16 }
 0x13e   : > { %p11_p8 = scmp.ge.s32.totalorder %s14_s17, 4   ;;  %s1012_s16 = smov %s1014_s18 }
 0x140   :  { %13 = sbr.rel (!%p11_p8) target bundleno = 2 (0x2), region = 83 }

</bundles_post_ra>
